<compile_context>
chip_gen: v7x
topology: tpu7x:2x2x1
jax: 0.10.0
libtpu: 0.0.40
codegen_flags: <defaults>
</compile_context>

<pallas_src>
import math

import jax
import jax.numpy as jnp
from jax import lax
from jax.experimental import pallas as pl
from jax.experimental.pallas import tpu as pltpu

_EPS = 1e-5          # torch.nn.LayerNorm default eps
_NEG_SLOPE = 0.2     # LeakyReLU negative slope


def _vmem_limit_bytes():
    # Never request more than 3/4 of physical VMEM (v7x has 64 MiB per TC).
    try:
        cap = pltpu.get_tpu_info().vmem_capacity_bytes
        return min(int(cap) * 3 // 4, 96 * 1024 * 1024)
    except Exception:
        return 32 * 1024 * 1024


_VMEM_LIMIT = _vmem_limit_bytes()


def _batch_dim_semantics():
    # On v7x (2 TensorCores/chip) only core-level semantics shard the grid
    # across cores; on single-TC chips (v5e/v6e) "parallel" is the safe no-op.
    try:
        kind = jax.devices()[0].device_kind.lower()
    except Exception:
        kind = ""
    if "v7" in kind:
        return (pltpu.CORE_PARALLEL,)
    return ("parallel",)


# ----------------------------- fused Pallas kernel -----------------------------

def _tgram_kernel(xu_ref, w0_ref, gam_ref, bet_ref, wenc_ref, o_ref,
                  kcat_ref, trs_ref):
    # xu_ref:   (1, T-1, hop)      raw (unpadded) audio frames, f32
    # w0_ref:   (2*hop, C)         conv_extrctor weight (tap, c_out), bf16
    # gam_ref:  (num_layer, T, 1)  LayerNorm weight per layer (per time step), f32
    # bet_ref:  (num_layer, T, 1)  LayerNorm bias  per layer, f32
    # wenc_ref: (num_layer, 3C, C) encoder conv weights, taps stacked along K, bf16
    # o_ref:    (1, C, T)          output activation in torch layout, f32
    # kcat_ref: (T+1, 3C)          VMEM scratch: lane-concatenated conv taps, f32
    # trs_ref:  (T_pad, C)         VMEM scratch: extractor combine + output transpose, f32
    hop = xu_ref.shape[2]
    c = o_ref.shape[1]
    t = o_ref.shape[2]
    t_pad = trs_ref.shape[0]
    num_layer = wenc_ref.shape[0]
    f32 = jnp.float32
    zrow = jnp.zeros((1, c), f32)

    # ---- conv_extrctor: Conv1d(1, C, 2*hop, stride=hop, pad=hop), bias-free ----
    # With A = frames @ W[:hop], B = frames @ W[hop:] (both (T-1, C)):
    #   h[0] = B[0],  h[i] = A[i-1] + B[i],  h[T-1] = A[T-2]
    xu_bf = xu_ref[0].astype(jnp.bfloat16)                               # (T-1, hop)
    a = jnp.dot(xu_bf, w0_ref[0:hop, :], preferred_element_type=f32)     # (T-1, C)
    b = jnp.dot(xu_bf, w0_ref[hop:2 * hop, :], preferred_element_type=f32)
    trs_ref[0:1, :] = zrow
    trs_ref[1:t, :] = a
    h = trs_ref[0:t, :]                                                  # [0 ; A]
    trs_ref[0:t - 1, :] = b
    trs_ref[t - 1:t, :] = zrow
    h = h + trs_ref[0:t, :]                                              # + [B ; 0]

    # Zero the two halo cells of the tap-concat buffer.  Invariant: the
    # per-layer stores below never write row 0 of the tap-0 lane block nor
    # row T-1 of the tap-2 lane block, so these stay zero for all layers.
    # (Zeroed every grid step -> correct even when the batch axis is sharded
    #  across TensorCores and each core has its own scratch.)
    kcat_ref[0:1, 0:c] = zrow
    kcat_ref[t - 1:t, 2 * c:3 * c] = zrow

    for l in range(num_layer):                   # static unroll (num_layer = 3)
        # LayerNorm over time (torch LayerNorm(T) on an (N, C, T) tensor),
        # two-pass biased variance, f32.
        mean = jnp.mean(h, axis=0, keepdims=True)                        # (1, C)
        cent = h - mean
        var = jnp.mean(cent * cent, axis=0, keepdims=True)
        hn = cent * lax.rsqrt(var + _EPS)
        hn = hn * gam_ref[l] + bet_ref[l]        # (T,1) affine broadcast over lanes
        # LeakyReLU(0.2) as a single max per vreg
        hn = jnp.maximum(hn, _NEG_SLOPE * hn)

        # Conv1d(C, C, 3, stride=1, padding=1): lane-concatenate the three
        # time-shifted taps and contract them in ONE K=3C MXU dot.
        kcat_ref[0:t, c:2 * c] = hn                       # tap 1: hn[t]
        kcat_ref[1:t + 1, 0:c] = hn                       # tap 0: hn[t-1] (row 0 halo)
        kcat_ref[0:t - 1, 2 * c:3 * c] = kcat_ref[1:t, c:2 * c]   # tap 2: hn[t+1]
        h = jnp.dot(kcat_ref[0:t, :].astype(jnp.bfloat16), wenc_ref[l],
                    preferred_element_type=f32)                          # (T, C)

    # ---- write back in torch (C, T) layout via an aligned in-kernel transpose ----
    trs_ref[0:t, :] = h
    if t_pad > t:
        trs_ref[t:t_pad, :] = jnp.zeros((t_pad - t, c), f32)
    o_ref[0] = jnp.transpose(trs_ref[...])[:, 0:t]                       # (C, T)


# ----------------------------- host-side wrapper -----------------------------

def tgram_forward(params, x):
    """TgramNet forward.  x: (N, 1, L) with L % hop == 0.  Returns (N, C, T)."""
    w_ext = params["w_ext"]                                  # (C, 1, win) torch layout
    c, _, win = w_ext.shape
    hop = win // 2
    n, _, length = x.shape
    assert win == 2 * hop and length % hop == 0, "framing needs win=2*hop, L % hop == 0"
    t = length // hop + 1                                    # conv_extrctor output frames
    num_layer = len(params["enc"])
    t_pad = ((t + 7) // 8) * 8                               # sublane-aligned staging rows

    # Host-side glue is now a pure reshape (no pad, no copy of the audio) plus
    # the one-time weight layout changes, which also carry the bf16 casts.
    xu = x.reshape(n, t - 1, hop).astype(jnp.float32)                      # (N, T-1, hop)
    w0 = jnp.transpose(w_ext.reshape(c, win), (1, 0)).astype(jnp.bfloat16)  # (2*hop, C)
    gam = jnp.stack([e["gamma"] for e in params["enc"]]).reshape(num_layer, t, 1)
    bet = jnp.stack([e["beta"] for e in params["enc"]]).reshape(num_layer, t, 1)
    # (c_out, c_in, k) -> (k, c_in, c_out) -> taps stacked along K: (3*C, C)
    wenc = jnp.stack([jnp.transpose(e["w"], (2, 1, 0)).reshape(3 * c, c)
                      for e in params["enc"]]).astype(jnp.bfloat16)        # (L, 3C, C)

    y = pl.pallas_call(
        _tgram_kernel,
        out_shape=jax.ShapeDtypeStruct((n, c, t), jnp.float32),
        grid_spec=pltpu.PrefetchScalarGridSpec(
            num_scalar_prefetch=0,
            grid=(n,),
            in_specs=[
                pl.BlockSpec((1, t - 1, hop), lambda i: (i, 0, 0)),
                pl.BlockSpec((2 * hop, c), lambda i: (0, 0)),
                pl.BlockSpec((num_layer, t, 1), lambda i: (0, 0, 0)),
                pl.BlockSpec((num_layer, t, 1), lambda i: (0, 0, 0)),
                pl.BlockSpec((num_layer, 3 * c, c), lambda i: (0, 0, 0)),
            ],
            out_specs=pl.BlockSpec((1, c, t), lambda i: (i, 0, 0)),
            scratch_shapes=[
                pltpu.VMEM((t + 1, 3 * c), jnp.float32),   # lane-concat conv taps
                pltpu.VMEM((t_pad, c), jnp.float32),       # extractor combine / transpose staging
            ],
        ),
        compiler_params=pltpu.CompilerParams(
            dimension_semantics=_batch_dim_semantics(),
            vmem_limit_bytes=_VMEM_LIMIT,
        ),
    )(xu, w0, gam, bet, wenc)

    return y                                                  # (N, C, T), torch layout


# ----------------------------- pure-JAX reference -----------------------------

def tgram_forward_ref(params, x):
    """Pure-jnp (no Pallas) reference mirroring the torch forward (f32)."""
    w_ext = params["w_ext"]
    c, _, win = w_ext.shape
    hop = win // 2
    n, _, length = x.shape
    t = length // hop + 1
    hi = jax.lax.Precision.HIGHEST
    xp = jnp.pad(x.reshape(n, length).astype(jnp.float32), ((0, 0), (hop, hop)))
    idx = jnp.arange(t)[:, None] * hop + jnp.arange(win)[None, :]
    frames = xp[:, idx]                                                    # (N, T, win)
    h = jnp.einsum("ntk,ck->nct", frames, w_ext.reshape(c, win), precision=hi)
    for e in params["enc"]:
        mean = jnp.mean(h, axis=-1, keepdims=True)
        var = jnp.mean((h - mean) ** 2, axis=-1, keepdims=True)
        hn = (h - mean) * lax.rsqrt(var + _EPS) * e["gamma"] + e["beta"]
        hn = jnp.where(hn >= 0.0, hn, _NEG_SLOPE * hn)
        hp = jnp.pad(hn, ((0, 0), (0, 0), (1, 1)))
        h = sum(jnp.einsum("nct,oc->not", hp[:, :, k:k + t], e["w"][:, :, k],
                           precision=hi) for k in range(3))
    return h


# ----------------------------- parameter init -----------------------------

def init_params(key, num_layer=3, mel_bins=128, win_len=1024, t_out=313):
    keys = jax.random.split(key, 2 * num_layer + 1)
    # torch Conv1d default init: kaiming_uniform(a=sqrt(5)) == U(+-1/sqrt(fan_in))
    b0 = 1.0 / math.sqrt(1 * win_len)
    params = {
        "w_ext": jax.random.uniform(keys[0], (mel_bins, 1, win_len), jnp.float32,
                                    -b0, b0),
        "enc": [],
    }
    be = 1.0 / math.sqrt(mel_bins * 3)
    for i in range(num_layer):
        # gamma/beta lightly randomized (instead of torch's ones/zeros default)
        # purely so the per-time affine path is exercised by the reference check.
        params["enc"].append({
            "w": jax.random.uniform(keys[2 * i + 1], (mel_bins, mel_bins, 3),
                                    jnp.float32, -be, be),
            "gamma": 1.0 + 0.1 * jax.random.normal(keys[2 * i + 2], (t_out,),
                                                   jnp.float32),
            "beta": 0.1 * jax.random.normal(jax.random.fold_in(keys[2 * i + 2], 7),
                                            (t_out,), jnp.float32),
        })
    return params


if __name__ == "__main__":
    num_layer, mel_bins, win_len, hop_len = 3, 128, 1024, 512     # module defaults
    t_out = 313                               # pinned by the hard-coded LayerNorm(313)
    batch = 2
    length = (t_out - 1) * hop_len            # 159744 samples -> exactly 313 frames

    key = jax.random.PRNGKey(0)
    pkey, xkey = jax.random.split(key)
    params = init_params(pkey, num_layer, mel_bins, win_len, t_out)
    x = jax.random.normal(xkey, (batch, 1, length), jnp.float32)

    fwd = jax.jit(tgram_forward)
    out = fwd(params, x)
    jax.block_until_ready(out)

    assert out.shape == (batch, mel_bins, t_out), out.shape
    assert bool(jnp.all(jnp.isfinite(out)))

    # correctness vs. pure-JAX f32 reference (tolerance covers bf16 MXU operands
    # with f32 accumulation)
    ref = jax.jit(tgram_forward_ref)(params, x)
    jax.block_until_ready(ref)
    max_abs = float(jnp.max(jnp.abs(ref)))
    max_err = float(jnp.max(jnp.abs(out - ref)))
    assert max_err <= 5e-2 * max(1.0, max_abs), (max_err, max_abs)

    print("KERNEL_OK")
</pallas_src>

<mosaic_0001>
module attributes {stable_mosaic.version = 11 : i64} {
  func.func @_tgram_kernel(%arg0: i32, %arg1: memref<1x312x512xf32, #tpu.memory_space<vmem>>, %arg2: memref<1024x128xbf16, #tpu.memory_space<vmem>>, %arg3: memref<3x313x1xf32, #tpu.memory_space<vmem>>, %arg4: memref<3x313x1xf32, #tpu.memory_space<vmem>>, %arg5: memref<3x384x128xbf16, #tpu.memory_space<vmem>>, %arg6: memref<1x128x313xf32, #tpu.memory_space<vmem>>, %arg7: memref<314x384xf32, #tpu.memory_space<vmem>>, %arg8: memref<320x128xf32, #tpu.memory_space<vmem>>) attributes {dimension_semantics = [#tpu.dimension_semantics<parallel>], iteration_bounds = array<i64: 2>, scalar_prefetch = 0 : i64, scratch_operands = 2 : i64, tpu.core_type = #tpu.core_type<tc>, window_params = [{transform_indices = @transform_0, window_bounds = array<i64: 1, 312, 512>}, {pipeline_mode = #tpu.pipeline_mode<synchronous>, transform_indices = @transform_1, window_bounds = array<i64: 1024, 128>}, {pipeline_mode = #tpu.pipeline_mode<synchronous>, transform_indices = @transform_2, window_bounds = array<i64: 3, 313, 1>}, {pipeline_mode = #tpu.pipeline_mode<synchronous>, transform_indices = @transform_3, window_bounds = array<i64: 3, 313, 1>}, {pipeline_mode = #tpu.pipeline_mode<synchronous>, transform_indices = @transform_4, window_bounds = array<i64: 3, 384, 128>}, {transform_indices = @transform_5, window_bounds = array<i64: 1, 128, 313>}]} {
    %cst = arith.constant 0.000000e+00 : f32
    %0 = vector.broadcast %cst : f32 to vector<1x128xf32>
    %c0 = arith.constant 0 : index
    %c0_0 = arith.constant 0 : index
    %c0_1 = arith.constant 0 : index
    %1 = vector.load %arg1[%c0, %c0_0, %c0_1] : memref<1x312x512xf32, #tpu.memory_space<vmem>>, vector<1x312x512xf32>
    %2 = vector.shape_cast %1 : vector<1x312x512xf32> to vector<312x512xf32>
    %3 = arith.truncf %2 : vector<312x512xf32> to vector<312x512xbf16>
    %c0_2 = arith.constant 0 : index
    %c0_3 = arith.constant 0 : index
    %4 = vector.load %arg2[%c0_2, %c0_3] : memref<1024x128xbf16, #tpu.memory_space<vmem>>, vector<512x128xbf16>
    %cst_4 = arith.constant dense<0.000000e+00> : vector<312x128xf32>
    %5 = tpu.matmul %3, %4, %cst_4 {dimension_numbers = #tpu.dot_dimension_numbers<[1], [0], [0], [1], [0, 0, 1, 1], [], []>} : vector<312x512xbf16>, vector<512x128xbf16>, vector<312x128xf32> -> vector<312x128xf32>
    %c512 = arith.constant 512 : index
    %c0_5 = arith.constant 0 : index
    %6 = vector.load %arg2[%c512, %c0_5] : memref<1024x128xbf16, #tpu.memory_space<vmem>>, vector<512x128xbf16>
    %cst_6 = arith.constant dense<0.000000e+00> : vector<312x128xf32>
    %7 = tpu.matmul %3, %6, %cst_6 {dimension_numbers = #tpu.dot_dimension_numbers<[1], [0], [0], [1], [0, 0, 1, 1], [], []>} : vector<312x512xbf16>, vector<512x128xbf16>, vector<312x128xf32> -> vector<312x128xf32>
    %c0_7 = arith.constant 0 : index
    %c0_8 = arith.constant 0 : index
    %8 = vector.load %arg8[%c0_7, %c0_8] : memref<320x128xf32, #tpu.memory_space<vmem>>, vector<1x128xf32>
    tpu.vector_store %arg8[%c0_7, %c0_8], %0 {strides = array<i32>} : memref<320x128xf32, #tpu.memory_space<vmem>>, vector<1x128xf32>,
    %c1 = arith.constant 1 : index
    %c0_9 = arith.constant 0 : index
    %9 = vector.load %arg8[%c1, %c0_9] : memref<320x128xf32, #tpu.memory_space<vmem>>, vector<312x128xf32>
    tpu.vector_store %arg8[%c1, %c0_9], %5 {strides = array<i32>} : memref<320x128xf32, #tpu.memory_space<vmem>>, vector<312x128xf32>,
    %c0_10 = arith.constant 0 : index
    %c0_11 = arith.constant 0 : index
    %10 = vector.load %arg8[%c0_10, %c0_11] : memref<320x128xf32, #tpu.memory_space<vmem>>, vector<313x128xf32>
    %c0_12 = arith.constant 0 : index
    %c0_13 = arith.constant 0 : index
    %11 = vector.load %arg8[%c0_12, %c0_13] : memref<320x128xf32, #tpu.memory_space<vmem>>, vector<312x128xf32>
    tpu.vector_store %arg8[%c0_12, %c0_13], %7 {strides = array<i32>} : memref<320x128xf32, #tpu.memory_space<vmem>>, vector<312x128xf32>,
    %c312 = arith.constant 312 : index
    %c0_14 = arith.constant 0 : index
    %12 = vector.load %arg8[%c312, %c0_14] : memref<320x128xf32, #tpu.memory_space<vmem>>, vector<1x128xf32>
    tpu.vector_store %arg8[%c312, %c0_14], %0 {strides = array<i32>} : memref<320x128xf32, #tpu.memory_space<vmem>>, vector<1x128xf32>,
    %c0_15 = arith.constant 0 : index
    %c0_16 = arith.constant 0 : index
    %13 = vector.load %arg8[%c0_15, %c0_16] : memref<320x128xf32, #tpu.memory_space<vmem>>, vector<313x128xf32>
    %14 = arith.addf %10, %13 : vector<313x128xf32>
    %c0_17 = arith.constant 0 : index
    %c0_18 = arith.constant 0 : index
    %15 = vector.load %arg7[%c0_17, %c0_18] : memref<314x384xf32, #tpu.memory_space<vmem>>, vector<1x128xf32>
    tpu.vector_store %arg7[%c0_17, %c0_18], %0 {strides = array<i32>} : memref<314x384xf32, #tpu.memory_space<vmem>>, vector<1x128xf32>,
    %c312_19 = arith.constant 312 : index
    %c256 = arith.constant 256 : index
    %16 = vector.load %arg7[%c312_19, %c256] : memref<314x384xf32, #tpu.memory_space<vmem>>, vector<1x128xf32>
    tpu.vector_store %arg7[%c312_19, %c256], %0 {strides = array<i32>} : memref<314x384xf32, #tpu.memory_space<vmem>>, vector<1x128xf32>,
    %cst_20 = arith.constant dense<0.000000e+00> : vector<128xf32>
    %17 = vector.multi_reduction <add>, %14, %cst_20 [0] : vector<313x128xf32> to vector<128xf32>
    %18 = vector.shape_cast %17 : vector<128xf32> to vector<1x128xf32>
    %cst_21 = arith.constant 3.130000e+02 : f32
    %19 = vector.broadcast %cst_21 : f32 to vector<1x128xf32>
    %20 = arith.divf %18, %19 : vector<1x128xf32>
    %21 = vector.broadcast %20 : vector<1x128xf32> to vector<313x128xf32>
    %22 = arith.subf %14, %21 : vector<313x128xf32>
    %23 = arith.mulf %22, %22 : vector<313x128xf32>
    %cst_22 = arith.constant dense<0.000000e+00> : vector<128xf32>
    %24 = vector.multi_reduction <add>, %23, %cst_22 [0] : vector<313x128xf32> to vector<128xf32>
    %25 = vector.shape_cast %24 : vector<128xf32> to vector<1x128xf32>
    %cst_23 = arith.constant 3.130000e+02 : f32
    %26 = vector.broadcast %cst_23 : f32 to vector<1x128xf32>
    %27 = arith.divf %25, %26 : vector<1x128xf32>
    %cst_24 = arith.constant 9.99999974E-6 : f32
    %28 = vector.broadcast %cst_24 : f32 to vector<1x128xf32>
    %29 = arith.addf %27, %28 : vector<1x128xf32>
    %30 = math.rsqrt %29 : vector<1x128xf32>
    %31 = vector.broadcast %30 : vector<1x128xf32> to vector<313x128xf32>
    %32 = arith.mulf %22, %31 : vector<313x128xf32>
    %c0_25 = arith.constant 0 : index
    %c0_26 = arith.constant 0 : index
    %c0_27 = arith.constant 0 : index
    %33 = vector.load %arg3[%c0_25, %c0_26, %c0_27] : memref<3x313x1xf32, #tpu.memory_space<vmem>>, vector<1x313x1xf32>
    %34 = vector.shape_cast %33 : vector<1x313x1xf32> to vector<313x1xf32>
    %35 = vector.broadcast %34 : vector<313x1xf32> to vector<313x128xf32>
    %36 = arith.mulf %32, %35 : vector<313x128xf32>
    %c0_28 = arith.constant 0 : index
    %c0_29 = arith.constant 0 : index
    %c0_30 = arith.constant 0 : index
    %37 = vector.load %arg4[%c0_28, %c0_29, %c0_30] : memref<3x313x1xf32, #tpu.memory_space<vmem>>, vector<1x313x1xf32>
    %38 = vector.shape_cast %37 : vector<1x313x1xf32> to vector<313x1xf32>
    %39 = vector.broadcast %38 : vector<313x1xf32> to vector<313x128xf32>
    %40 = arith.addf %36, %39 : vector<313x128xf32>
    %cst_31 = arith.constant 2.000000e-01 : f32
    %41 = vector.broadcast %cst_31 : f32 to vector<313x128xf32>
    %42 = arith.mulf %41, %40 : vector<313x128xf32>
    %43 = arith.maximumf %40, %42 : vector<313x128xf32>
    %c0_32 = arith.constant 0 : index
    %c128 = arith.constant 128 : index
    %44 = vector.load %arg7[%c0_32, %c128] : memref<314x384xf32, #tpu.memory_space<vmem>>, vector<313x128xf32>
    tpu.vector_store %arg7[%c0_32, %c128], %43 {strides = array<i32>} : memref<314x384xf32, #tpu.memory_space<vmem>>, vector<313x128xf32>,
    %c1_33 = arith.constant 1 : index
    %c0_34 = arith.constant 0 : index
    %45 = vector.load %arg7[%c1_33, %c0_34] : memref<314x384xf32, #tpu.memory_space<vmem>>, vector<313x128xf32>
    tpu.vector_store %arg7[%c1_33, %c0_34], %43 {strides = array<i32>} : memref<314x384xf32, #tpu.memory_space<vmem>>, vector<313x128xf32>,
    %c1_35 = arith.constant 1 : index
    %c128_36 = arith.constant 128 : index
    %46 = vector.load %arg7[%c1_35, %c128_36] : memref<314x384xf32, #tpu.memory_space<vmem>>, vector<312x128xf32>
    %c0_37 = arith.constant 0 : index
    %c256_38 = arith.constant 256 : index
    %47 = vector.load %arg7[%c0_37, %c256_38] : memref<314x384xf32, #tpu.memory_space<vmem>>, vector<312x128xf32>
    tpu.vector_store %arg7[%c0_37, %c256_38], %46 {strides = array<i32>} : memref<314x384xf32, #tpu.memory_space<vmem>>, vector<312x128xf32>,
    %c0_39 = arith.constant 0 : index
    %c0_40 = arith.constant 0 : index
    %48 = vector.load %arg7[%c0_39, %c0_40] : memref<314x384xf32, #tpu.memory_space<vmem>>, vector<313x384xf32>
    %49 = arith.truncf %48 : vector<313x384xf32> to vector<313x384xbf16>
    %c0_41 = arith.constant 0 : index
    %c0_42 = arith.constant 0 : index
    %c0_43 = arith.constant 0 : index
    %50 = vector.load %arg5[%c0_41, %c0_42, %c0_43] : memref<3x384x128xbf16, #tpu.memory_space<vmem>>, vector<1x384x128xbf16>
    %51 = vector.shape_cast %50 : vector<1x384x128xbf16> to vector<384x128xbf16>
    %cst_44 = arith.constant dense<0.000000e+00> : vector<313x128xf32>
    %52 = tpu.matmul %49, %51, %cst_44 {dimension_numbers = #tpu.dot_dimension_numbers<[1], [0], [0], [1], [0, 0, 1, 1], [], []>} : vector<313x384xbf16>, vector<384x128xbf16>, vector<313x128xf32> -> vector<313x128xf32>
    %cst_45 = arith.constant dense<0.000000e+00> : vector<128xf32>
    %53 = vector.multi_reduction <add>, %52, %cst_45 [0] : vector<313x128xf32> to vector<128xf32>
    %54 = vector.shape_cast %53 : vector<128xf32> to vector<1x128xf32>
    %cst_46 = arith.constant 3.130000e+02 : f32
    %55 = vector.broadcast %cst_46 : f32 to vector<1x128xf32>
    %56 = arith.divf %54, %55 : vector<1x128xf32>
    %57 = vector.broadcast %56 : vector<1x128xf32> to vector<313x128xf32>
    %58 = arith.subf %52, %57 : vector<313x128xf32>
    %59 = arith.mulf %58, %58 : vector<313x128xf32>
    %cst_47 = arith.constant dense<0.000000e+00> : vector<128xf32>
    %60 = vector.multi_reduction <add>, %59, %cst_47 [0] : vector<313x128xf32> to vector<128xf32>
    %61 = vector.shape_cast %60 : vector<128xf32> to vector<1x128xf32>
    %cst_48 = arith.constant 3.130000e+02 : f32
    %62 = vector.broadcast %cst_48 : f32 to vector<1x128xf32>
    %63 = arith.divf %61, %62 : vector<1x128xf32>
    %cst_49 = arith.constant 9.99999974E-6 : f32
    %64 = vector.broadcast %cst_49 : f32 to vector<1x128xf32>
    %65 = arith.addf %63, %64 : vector<1x128xf32>
    %66 = math.rsqrt %65 : vector<1x128xf32>
    %67 = vector.broadcast %66 : vector<1x128xf32> to vector<313x128xf32>
    %68 = arith.mulf %58, %67 : vector<313x128xf32>
    %c1_50 = arith.constant 1 : index
    %c0_51 = arith.constant 0 : index
    %c0_52 = arith.constant 0 : index
    %69 = vector.load %arg3[%c1_50, %c0_51, %c0_52] : memref<3x313x1xf32, #tpu.memory_space<vmem>>, vector<1x313x1xf32>
    %70 = vector.shape_cast %69 : vector<1x313x1xf32> to vector<313x1xf32>
    %71 = vector.broadcast %70 : vector<313x1xf32> to vector<313x128xf32>
    %72 = arith.mulf %68, %71 : vector<313x128xf32>
    %c1_53 = arith.constant 1 : index
    %c0_54 = arith.constant 0 : index
    %c0_55 = arith.constant 0 : index
    %73 = vector.load %arg4[%c1_53, %c0_54, %c0_55] : memref<3x313x1xf32, #tpu.memory_space<vmem>>, vector<1x313x1xf32>
    %74 = vector.shape_cast %73 : vector<1x313x1xf32> to vector<313x1xf32>
    %75 = vector.broadcast %74 : vector<313x1xf32> to vector<313x128xf32>
    %76 = arith.addf %72, %75 : vector<313x128xf32>
    %cst_56 = arith.constant 2.000000e-01 : f32
    %77 = vector.broadcast %cst_56 : f32 to vector<313x128xf32>
    %78 = arith.mulf %77, %76 : vector<313x128xf32>
    %79 = arith.maximumf %76, %78 : vector<313x128xf32>
    %c0_57 = arith.constant 0 : index
    %c128_58 = arith.constant 128 : index
    %80 = vector.load %arg7[%c0_57, %c128_58] : memref<314x384xf32, #tpu.memory_space<vmem>>, vector<313x128xf32>
    tpu.vector_store %arg7[%c0_57, %c128_58], %79 {strides = array<i32>} : memref<314x384xf32, #tpu.memory_space<vmem>>, vector<313x128xf32>,
    %c1_59 = arith.constant 1 : index
    %c0_60 = arith.constant 0 : index
    %81 = vector.load %arg7[%c1_59, %c0_60] : memref<314x384xf32, #tpu.memory_space<vmem>>, vector<313x128xf32>
    tpu.vector_store %arg7[%c1_59, %c0_60], %79 {strides = array<i32>} : memref<314x384xf32, #tpu.memory_space<vmem>>, vector<313x128xf32>,
    %c1_61 = arith.constant 1 : index
    %c128_62 = arith.constant 128 : index
    %82 = vector.load %arg7[%c1_61, %c128_62] : memref<314x384xf32, #tpu.memory_space<vmem>>, vector<312x128xf32>
    %c0_63 = arith.constant 0 : index
    %c256_64 = arith.constant 256 : index
    %83 = vector.load %arg7[%c0_63, %c256_64] : memref<314x384xf32, #tpu.memory_space<vmem>>, vector<312x128xf32>
    tpu.vector_store %arg7[%c0_63, %c256_64], %82 {strides = array<i32>} : memref<314x384xf32, #tpu.memory_space<vmem>>, vector<312x128xf32>,
    %c0_65 = arith.constant 0 : index
    %c0_66 = arith.constant 0 : index
    %84 = vector.load %arg7[%c0_65, %c0_66] : memref<314x384xf32, #tpu.memory_space<vmem>>, vector<313x384xf32>
    %85 = arith.truncf %84 : vector<313x384xf32> to vector<313x384xbf16>
    %c1_67 = arith.constant 1 : index
    %c0_68 = arith.constant 0 : index
    %c0_69 = arith.constant 0 : index
    %86 = vector.load %arg5[%c1_67, %c0_68, %c0_69] : memref<3x384x128xbf16, #tpu.memory_space<vmem>>, vector<1x384x128xbf16>
    %87 = vector.shape_cast %86 : vector<1x384x128xbf16> to vector<384x128xbf16>
    %cst_70 = arith.constant dense<0.000000e+00> : vector<313x128xf32>
    %88 = tpu.matmul %85, %87, %cst_70 {dimension_numbers = #tpu.dot_dimension_numbers<[1], [0], [0], [1], [0, 0, 1, 1], [], []>} : vector<313x384xbf16>, vector<384x128xbf16>, vector<313x128xf32> -> vector<313x128xf32>
    %cst_71 = arith.constant dense<0.000000e+00> : vector<128xf32>
    %89 = vector.multi_reduction <add>, %88, %cst_71 [0] : vector<313x128xf32> to vector<128xf32>
    %90 = vector.shape_cast %89 : vector<128xf32> to vector<1x128xf32>
    %cst_72 = arith.constant 3.130000e+02 : f32
    %91 = vector.broadcast %cst_72 : f32 to vector<1x128xf32>
    %92 = arith.divf %90, %91 : vector<1x128xf32>
    %93 = vector.broadcast %92 : vector<1x128xf32> to vector<313x128xf32>
    %94 = arith.subf %88, %93 : vector<313x128xf32>
    %95 = arith.mulf %94, %94 : vector<313x128xf32>
    %cst_73 = arith.constant dense<0.000000e+00> : vector<128xf32>
    %96 = vector.multi_reduction <add>, %95, %cst_73 [0] : vector<313x128xf32> to vector<128xf32>
    %97 = vector.shape_cast %96 : vector<128xf32> to vector<1x128xf32>
    %cst_74 = arith.constant 3.130000e+02 : f32
    %98 = vector.broadcast %cst_74 : f32 to vector<1x128xf32>
    %99 = arith.divf %97, %98 : vector<1x128xf32>
    %cst_75 = arith.constant 9.99999974E-6 : f32
    %100 = vector.broadcast %cst_75 : f32 to vector<1x128xf32>
    %101 = arith.addf %99, %100 : vector<1x128xf32>
    %102 = math.rsqrt %101 : vector<1x128xf32>
    %103 = vector.broadcast %102 : vector<1x128xf32> to vector<313x128xf32>
    %104 = arith.mulf %94, %103 : vector<313x128xf32>
    %c2 = arith.constant 2 : index
    %c0_76 = arith.constant 0 : index
    %c0_77 = arith.constant 0 : index
    %105 = vector.load %arg3[%c2, %c0_76, %c0_77] : memref<3x313x1xf32, #tpu.memory_space<vmem>>, vector<1x313x1xf32>
    %106 = vector.shape_cast %105 : vector<1x313x1xf32> to vector<313x1xf32>
    %107 = vector.broadcast %106 : vector<313x1xf32> to vector<313x128xf32>
    %108 = arith.mulf %104, %107 : vector<313x128xf32>
    %c2_78 = arith.constant 2 : index
    %c0_79 = arith.constant 0 : index
    %c0_80 = arith.constant 0 : index
    %109 = vector.load %arg4[%c2_78, %c0_79, %c0_80] : memref<3x313x1xf32, #tpu.memory_space<vmem>>, vector<1x313x1xf32>
    %110 = vector.shape_cast %109 : vector<1x313x1xf32> to vector<313x1xf32>
    %111 = vector.broadcast %110 : vector<313x1xf32> to vector<313x128xf32>
    %112 = arith.addf %108, %111 : vector<313x128xf32>
    %cst_81 = arith.constant 2.000000e-01 : f32
    %113 = vector.broadcast %cst_81 : f32 to vector<313x128xf32>
    %114 = arith.mulf %113, %112 : vector<313x128xf32>
    %115 = arith.maximumf %112, %114 : vector<313x128xf32>
    %c0_82 = arith.constant 0 : index
    %c128_83 = arith.constant 128 : index
    %116 = vector.load %arg7[%c0_82, %c128_83] : memref<314x384xf32, #tpu.memory_space<vmem>>, vector<313x128xf32>
    tpu.vector_store %arg7[%c0_82, %c128_83], %115 {strides = array<i32>} : memref<314x384xf32, #tpu.memory_space<vmem>>, vector<313x128xf32>,
    %c1_84 = arith.constant 1 : index
    %c0_85 = arith.constant 0 : index
    %117 = vector.load %arg7[%c1_84, %c0_85] : memref<314x384xf32, #tpu.memory_space<vmem>>, vector<313x128xf32>
    tpu.vector_store %arg7[%c1_84, %c0_85], %115 {strides = array<i32>} : memref<314x384xf32, #tpu.memory_space<vmem>>, vector<313x128xf32>,
    %c1_86 = arith.constant 1 : index
    %c128_87 = arith.constant 128 : index
    %118 = vector.load %arg7[%c1_86, %c128_87] : memref<314x384xf32, #tpu.memory_space<vmem>>, vector<312x128xf32>
    %c0_88 = arith.constant 0 : index
    %c256_89 = arith.constant 256 : index
    %119 = vector.load %arg7[%c0_88, %c256_89] : memref<314x384xf32, #tpu.memory_space<vmem>>, vector<312x128xf32>
    tpu.vector_store %arg7[%c0_88, %c256_89], %118 {strides = array<i32>} : memref<314x384xf32, #tpu.memory_space<vmem>>, vector<312x128xf32>,
    %c0_90 = arith.constant 0 : index
    %c0_91 = arith.constant 0 : index
    %120 = vector.load %arg7[%c0_90, %c0_91] : memref<314x384xf32, #tpu.memory_space<vmem>>, vector<313x384xf32>
    %121 = arith.truncf %120 : vector<313x384xf32> to vector<313x384xbf16>
    %c2_92 = arith.constant 2 : index
    %c0_93 = arith.constant 0 : index
    %c0_94 = arith.constant 0 : index
    %122 = vector.load %arg5[%c2_92, %c0_93, %c0_94] : memref<3x384x128xbf16, #tpu.memory_space<vmem>>, vector<1x384x128xbf16>
    %123 = vector.shape_cast %122 : vector<1x384x128xbf16> to vector<384x128xbf16>
    %cst_95 = arith.constant dense<0.000000e+00> : vector<313x128xf32>
    %124 = tpu.matmul %121, %123, %cst_95 {dimension_numbers = #tpu.dot_dimension_numbers<[1], [0], [0], [1], [0, 0, 1, 1], [], []>} : vector<313x384xbf16>, vector<384x128xbf16>, vector<313x128xf32> -> vector<313x128xf32>
    %c0_96 = arith.constant 0 : index
    %c0_97 = arith.constant 0 : index
    %125 = vector.load %arg8[%c0_96, %c0_97] : memref<320x128xf32, #tpu.memory_space<vmem>>, vector<313x128xf32>
    tpu.vector_store %arg8[%c0_96, %c0_97], %124 {strides = array<i32>} : memref<320x128xf32, #tpu.memory_space<vmem>>, vector<313x128xf32>,
    %cst_98 = arith.constant 0.000000e+00 : f32
    %126 = vector.broadcast %cst_98 : f32 to vector<7x128xf32>
    %c313 = arith.constant 313 : index
    %c0_99 = arith.constant 0 : index
    %127 = vector.load %arg8[%c313, %c0_99] : memref<320x128xf32, #tpu.memory_space<vmem>>, vector<7x128xf32>
    tpu.vector_store %arg8[%c313, %c0_99], %126 {strides = array<i32>} : memref<320x128xf32, #tpu.memory_space<vmem>>, vector<7x128xf32>,
    %c0_100 = arith.constant 0 : index
    %c0_101 = arith.constant 0 : index
    %128 = vector.load %arg8[%c0_100, %c0_101] : memref<320x128xf32, #tpu.memory_space<vmem>>, vector<320x128xf32>
    %129 = tpu.transpose %128, [1, 0] : vector<320x128xf32> -> vector<128x320xf32>
    %130 = vector.extract_strided_slice %129 {offsets = [0, 0], sizes = [128, 313], strides = [1, 1]} : vector<128x320xf32> to vector<128x313xf32>
    %c0_102 = arith.constant 0 : index
    %c0_103 = arith.constant 0 : index
    %c0_104 = arith.constant 0 : index
    %131 = vector.load %arg6[%c0_102, %c0_103, %c0_104] : memref<1x128x313xf32, #tpu.memory_space<vmem>>, vector<1x128x313xf32>
    %132 = vector.shape_cast %131 : vector<1x128x313xf32> to vector<128x313xf32>
    %133 = vector.shape_cast %130 : vector<128x313xf32> to vector<1x128x313xf32>
    tpu.vector_store %arg6[%c0_102, %c0_103, %c0_104], %133 {strides = array<i32>} : memref<1x128x313xf32, #tpu.memory_space<vmem>>, vector<1x128x313xf32>,
    return
  }
  func.func @transform_0(%arg0: i32) -> (i32, i32, i32) {
    %c0_i32 = arith.constant 0 : i32
    %c0_i32_0 = arith.constant 0 : i32
    %c0_i32_1 = arith.constant 0 : i32
    return %arg0, %c0_i32, %c0_i32_0 : i32, i32, i32
  }
  func.func @transform_1(%arg0: i32) -> (i32, i32) {
    %c0_i32 = arith.constant 0 : i32
    %c0_i32_0 = arith.constant 0 : i32
    %c0_i32_1 = arith.constant 0 : i32
    return %c0_i32, %c0_i32_0 : i32, i32
  }
  func.func @transform_2(%arg0: i32) -> (i32, i32, i32) {
    %c0_i32 = arith.constant 0 : i32
    %c0_i32_0 = arith.constant 0 : i32
    %c0_i32_1 = arith.constant 0 : i32
    %c0_i32_2 = arith.constant 0 : i32
    return %c0_i32, %c0_i32_0, %c0_i32_1 : i32, i32, i32
  }
  func.func @transform_3(%arg0: i32) -> (i32, i32, i32) {
    %c0_i32 = arith.constant 0 : i32
    %c0_i32_0 = arith.constant 0 : i32
    %c0_i32_1 = arith.constant 0 : i32
    %c0_i32_2 = arith.constant 0 : i32
    return %c0_i32, %c0_i32_0, %c0_i32_1 : i32, i32, i32
  }
  func.func @transform_4(%arg0: i32) -> (i32, i32, i32) {
    %c0_i32 = arith.constant 0 : i32
    %c0_i32_0 = arith.constant 0 : i32
    %c0_i32_1 = arith.constant 0 : i32
    %c0_i32_2 = arith.constant 0 : i32
    return %c0_i32, %c0_i32_0, %c0_i32_1 : i32, i32, i32
  }
  func.func @transform_5(%arg0: i32) -> (i32, i32, i32) {
    %c0_i32 = arith.constant 0 : i32
    %c0_i32_0 = arith.constant 0 : i32
    %c0_i32_1 = arith.constant 0 : i32
    return %arg0, %c0_i32, %c0_i32_0 : i32, i32, i32
  }
}

</mosaic_0001>

<bundles_post_ra>
// kernel: tgram_forward.1
= control target key start
LH: loop header
LB: loop body
LE: loop exit
PB: predicated region body
PF: predicated region fallthrough
CT: control target
= control target key end

     0   :  { %s9465_s18 = smov 0   ;;  %s14880_s0 = inlined_call_operand.vmem [shape: f32[2,312,512], index: 0, kind: input, shape index: {}]   ;;  %s14881_s1 = inlined_call_operand.vmem [shape: bf16[1024,128], index: 1, kind: input, shape index: {}]   ;;  %s14882_s2 = inlined_call_operand.vmem [shape: f32[3,313,1], index: 2, kind: input, shape index: {}]   ;;  %s14883_s3 = inlined_call_operand.vmem [shape: f32[3,313,1], index: 3, kind: input, shape index: {}]   ;;  %s14884_s4 = inlined_call_operand.vmem [shape: bf16[3,384,128], index: 4, kind: input, shape index: {}]   ;;  %s14885_s5 = inlined_call_operand.vmem [shape: f32[2,128,313], index: 5, kind: output, shape index: {}]  }
   0x1 LB: > { %s8504_s19 = sadd.s32 4294967295, %s9431_s18   ;;  %p8508_p0 = scmp.ge.s32.totalorder %s9431_s18, 1  ;;  %s9431_s18 = sphi %s9465_s18, %s15_s18  }
   0x2   : > { %p187_p1 = scmp.lt.s32.totalorder %s9431_s18, 3 }
   0x4   : > { %p188_p2 = pnand %p8508_p0, %p187_p1 }
   0x6   : > { %191 = sbr.rel (%p188_p2) target bundleno = 2474 (0x9aa), region = 40 }
   0xd   : > { %v9283_v0 = vld [vmem:[%s14881_s1] sm:$0xff]   ;;  %v14886_v1 = vmov 0   ;;  %v9285_v3 = vld [vmem:[%s14881_s1 + $0x8] sm:$0xff]   ;;  %v9287_v5 = vld [vmem:[%s14881_s1 + $0x10] sm:$0xff]   ;;  %p215_p3 = scmp.lt.s32.totalorder %s8504_s19, 1  ;;  %vm1982_vm0 = vcmask 1040384  }
   0xe   : > { %718 = vmatprep.subr.bf16.mxu0 %v14886_v1  ;;  %1358 = vmatprep.subr.bf16.mxu1 %v14886_v1  ;;  %v9284_v2 = vld [vmem:[%s14881_s1 + $0x100] sm:$0xff]   ;;  %v9286_v4 = vld [vmem:[%s14881_s1 + $0x108] sm:$0xff]   ;;  %v9288_v6 = vld [vmem:[%s14881_s1 + $0x110] sm:$0xff]   ;;  %vm3121_vm1 = vcmask 1046528   ;;  %vm8402_vm2 = vcmask 465920  }
   0xf   : > { %719 = vmatpush1.bf16.msra.mxu0 %v9283_v0  ;;  %9282 = vset.pattern.permute.xlu1 %v14886_v1  ;;  %v9289_v7 = vld [vmem:[%s14881_s1 + $0x18] sm:$0xff]   ;;  %v9291_v9 = vld [vmem:[%s14881_s1 + $0x20] sm:$0xff]   ;;  %v9293_v11 = vld [vmem:[%s14881_s1 + $0x28] sm:$0xff]   ;;  %s15607_s19 = smov (!%p215_p3, %s8504_s19), 1 }
  0x10   : > { %1359 = vmatpush1.bf16.msra.mxu1 %v9284_v2  ;;  %720 = vmatprep.subr.bf16.mxu0 %v14886_v1  ;;  %v9290_v8 = vld [vmem:[%s14881_s1 + $0x118] sm:$0xff]   ;;  %v9292_v10 = vld [vmem:[%s14881_s1 + $0x120] sm:$0xff]   ;;  %v9294_v12 = vld [vmem:[%s14881_s1 + $0x128] sm:$0xff]   ;;  %s9269_s25 = smul.u32 1248, %s15607_s19 }
  0x11   : > { %1360 = vmatprep.subr.bf16.mxu1 %v14886_v1  ;;  %9281 = vset.pattern.permute.xlu0 %v14886_v1  ;;  %v9295_v13 = vld [vmem:[%s14881_s1 + $0x30] sm:$0xff]   ;;  %v9297_v15 = vld [vmem:[%s14881_s1 + $0x38] sm:$0xff]   ;;  %v9299_v17 = vld [vmem:[%s14881_s1 + $0x40] sm:$0xff]   ;;  %s9270_s11 = smul.u32 384, %s15607_s19 }
  0x12   : > { %v9296_v14 = vld [vmem:[%s14881_s1 + $0x130] sm:$0xff]   ;;  %v9298_v16 = vld [vmem:[%s14881_s1 + $0x138] sm:$0xff]   ;;  %s9549_s7 = scalar_lea.vmem %s14880_s0, %s9269_s25  ;;  %v9300_v18 = vld [vmem:[%s14881_s1 + $0x140] sm:$0xff]  }
  0x13   : > { %721 = vmatpush1.bf16.msra.mxu0 %v9285_v3  ;;  %v227_v19 = vld [vmem:[%s9549_s7 + $0x8] sm:$0xff]  ;;  %v2442_v24 = vld [vmem:[%s14883_s3] sm:$0xff]  ;;  %v9303_v26 = vld [vmem:[%s14881_s1 + $0x50] sm:$0xff]   ;;  %s14805_s14 = scalar_lea.vmem %s14885_s5, %s9270_s11 }
  0x14   : > { %1361 = vmatpush1.bf16.msra.mxu1 %v9286_v4  ;;  %722 = vmatprep.subr.bf16.mxu0 %v14886_v1  ;;  %v231_v20 = vld [vmem:[%s9549_s7 + $0x28] sm:$0xff]  ;;  %v2162_v25 = vld [vmem:[%s14882_s2] sm:$0xff]  ;;  %v9304_v28 = vld [vmem:[%s14881_s1 + $0x150] sm:$0xff]  }
  0x15   : > { %1362 = vmatprep.subr.bf16.mxu1 %v14886_v1  ;;  %v383_v21 = vpack.c.bf16 %v231_v20, %v227_v19  ;;  %v9301_v22 = vld [vmem:[%s14881_s1 + $0x48] sm:$0xff]   ;;  %2484 = vperm.xlu1 %9282, %v2442_v24   ;;  %v9305_v30 = vld [vmem:[%s14881_s1 + $0x58] sm:$0xff]   ;;  %v2164_v33 = vld [vmem:[%s14882_s2 + $0x10] sm:$0xff] }
  0x16   : > { %v9302_v23 = vld [vmem:[%s14881_s1 + $0x148] sm:$0xff]   ;;  %2204 = vperm.xlu0 %9281, %v2162_v25   ;;  %v2165_v31 = vld [vmem:[%s14882_s2 + $0x18] sm:$0xff]  ;;  %v9307_v34 = vld [vmem:[%s14881_s1 + $0x60] sm:$0xff]  }
  0x17   : > { %723 = vmatpush1.bf16.msra.mxu0 %v9287_v5  ;;  %750 = vmatprep.mubr.bf16.mxu0 %v383_v21  ;;  %v2443_v27 = vld [vmem:[%s14883_s3 + $0x8] sm:$0xff]  ;;  %v9306_v32 = vld [vmem:[%s14881_s1 + $0x158] sm:$0xff]   ;;  %v9308_v36 = vld [vmem:[%s14881_s1 + $0x160] sm:$0xff]  }
  0x18   : > { %1363 = vmatpush1.bf16.msra.mxu1 %v9288_v6  ;;  %724 = vmatprep.subr.bf16.mxu0 %v14886_v1  ;;  %v2163_v29 = vld [vmem:[%s14882_s2 + $0x8] sm:$0xff]  ;;  %v2445_v35 = vld [vmem:[%s14883_s3 + $0x18] sm:$0xff]  ;;  %v2444_v37 = vld [vmem:[%s14883_s3 + $0x10] sm:$0xff] }
  0x19   : > { %1364 = vmatprep.subr.bf16.mxu1 %v14886_v1  ;;  %1390 = vmatprep.mubr.bf16.mxu1 %v383_v21  ;;  %v9309_v38 = vld [vmem:[%s14881_s1 + $0x68] sm:$0xff]   ;;  %v2192_v40 = vld [vmem:[%s14882_s2 + $0xf0] sm:$0xff]  ;;  %v2166_v43 = vld [vmem:[%s14882_s2 + $0x20] sm:$0xff] }
  0x1a   : > { %2489 = vperm.xlu1 %9282, %v2443_v27   ;;  %2209 = vperm.xlu0 %9281, %v2163_v29   ;;  %v9310_v39 = vld [vmem:[%s14881_s1 + $0x168] sm:$0xff]   ;;  %v9311_v42 = vld [vmem:[%s14881_s1 + $0x70] sm:$0xff]   ;;  %v2193_v45 = vld [vmem:[%s14882_s2 + $0xf8] sm:$0xff] }
  0x1b   : > { %725 = vmatpush1.bf16.msra.mxu0 %v9289_v7  ;;  %v2191_v41 = vld [vmem:[%s14882_s2 + $0xe8] sm:$0xff]  ;;  %v9312_v44 = vld [vmem:[%s14881_s1 + $0x170] sm:$0xff]   ;;  %v9313_v46 = vld [vmem:[%s14881_s1 + $0x78] sm:$0xff]  }
  0x1c   : > { %1365 = vmatpush1.bf16.msra.mxu1 %v9290_v8  ;;  %726 = vmatprep.subr.bf16.mxu0 %v14886_v1  ;;  %v226_v47 = vld [vmem:[%s9549_s7] sm:$0xff]  ;;  %v2471_v49 = vld [vmem:[%s14883_s3 + $0xe8] sm:$0xff]  ;;  %v9314_v50 = vld [vmem:[%s14881_s1 + $0x178] sm:$0xff]  }
  0x1d   : > { %1366 = vmatprep.subr.bf16.mxu1 %v14886_v1  ;;  %v230_v48 = vld [vmem:[%s9549_s7 + $0x20] sm:$0xff]  ;;  %v2167_v51 = vld [vmem:[%s14882_s2 + $0x28] sm:$0xff]  ;;  %v2473_v56 = vld [vmem:[%s14883_s3 + $0xf8] sm:$0xff] }
  0x1e   : > { %2219 = vperm.xlu1 %9282, %v2165_v31   ;;  %2214 = vperm.xlu0 %9281, %v2164_v33   ;;  %v235_v52 = vld [vmem:[%s9549_s7 + $0x48] sm:$0xff]  ;;  %v382_v54 = vpack.c.bf16 %v230_v48, %v226_v47  ;;  %v9315_v55 = vld [vmem:[%s14881_s1 + $0x80] sm:$0xff]   ;;  %v2472_v0 = vld [vmem:[%s14883_s3 + $0xf0] sm:$0xff] }
  0x1f   : > { %727 = vmatpush1.bf16.msra.mxu0 %v9291_v9  ;;  %v239_v53 = vld [vmem:[%s9549_s7 + $0x68] sm:$0xff]  ;;  %v9316_v58 = vld [vmem:[%s14881_s1 + $0x180] sm:$0xff]   ;;  %v9319_v6 = vld [vmem:[%s14881_s1 + $0x90] sm:$0xff]  }
  0x20   : > { %1367 = vmatpush1.bf16.msra.mxu1 %v9292_v10  ;;  %728 = vmatprep.subr.bf16.mxu0 %v14886_v1  ;;  %v387_v57 = vpack.c.bf16 %v239_v53, %v235_v52  ;;  %v234_v59 = vld [vmem:[%s9549_s7 + $0x40] sm:$0xff]  ;;  %v9317_v61 = vld [vmem:[%s14881_s1 + $0x88] sm:$0xff]   ;;  %v9320_v7 = vld [vmem:[%s14881_s1 + $0x190] sm:$0xff]  }
  0x21   : > { %1368 = vmatprep.subr.bf16.mxu1 %v14886_v1  ;;  %v238_v60 = vld [vmem:[%s9549_s7 + $0x60] sm:$0xff]  ;;  %v243_v62 = vld [vmem:[%s9549_s7 + $0x88] sm:$0xff]  ;;  %v2168_v25 = vld [vmem:[%s14882_s2 + $0x30] sm:$0xff] }
  0x22   : > { %2499 = vperm.xlu1 %9282, %v2445_v35   ;;  %2494 = vperm.xlu0 %9281, %v2444_v37   ;;  %v247_v63 = vld [vmem:[%s9549_s7 + $0xa8] sm:$0xff]  ;;  %v386_v4 = vpack.c.bf16 %v238_v60, %v234_v59  ;;  %v242_v8 = vld [vmem:[%s9549_s7 + $0x80] sm:$0xff]  ;;  %v9327_v33 = vld [vmem:[%s14881_s1 + $0xb0] sm:$0xff]  }
  0x23   : > { %729 = vmatpush1.bf16.msra.mxu0 %v9293_v11  ;;  %v2447_v2 = vld [vmem:[%s14883_s3 + $0x28] sm:$0xff]  ;;  %v391_v5 = vpack.c.bf16 %v247_v63, %v243_v62  ;;  %v246_v9 = vld [vmem:[%s9549_s7 + $0xa0] sm:$0xff]  ;;  %v9330_v47 = vld [vmem:[%s14881_s1 + $0x1b8] sm:$0xff]  }
  0x24   : > { %1369 = vmatpush1.bf16.msra.mxu1 %v9294_v12  ;;  %730 = vmatprep.subr.bf16.mxu0 %v14886_v1  ;;  %v9318_v3 = vld [vmem:[%s14881_s1 + $0x188] sm:$0xff]   ;;  %v9321_v12 = vld [vmem:[%s14881_s1 + $0x98] sm:$0xff]   ;;  %v9323_v19 = vld [vmem:[%s14881_s1 + $0xa0] sm:$0xff]  }
  0x25   : > { %1370 = vmatprep.subr.bf16.mxu1 %v14886_v1  ;;  %v251_v10 = vld [vmem:[%s9549_s7 + $0xc8] sm:$0xff]  ;;  %v250_v20 = vld [vmem:[%s9549_s7 + $0xc0] sm:$0xff] }
  0x26   : > { %2354 = vperm.xlu1 %9282, %v2192_v40   ;;  %2349 = vperm.xlu0 %9281, %v2191_v41   ;;  %v255_v11 = vld [vmem:[%s9549_s7 + $0xe8] sm:$0xff]  ;;  %v9324_v21 = vld [vmem:[%s14881_s1 + $0x1a0] sm:$0xff]   ;;  %v9328_v40 = vld [vmem:[%s14881_s1 + $0x1b0] sm:$0xff]  }
  0x27   : > { %731 = vmatpush1.bf16.msra.mxu0 %v9295_v13  ;;  %v2446_v13 = vld [vmem:[%s14883_s3 + $0x20] sm:$0xff]  ;;  %v259_v24 = vld [vmem:[%s9549_s7 + $0x108] sm:$0xff]  ;;  %v9329_v41 = vld [vmem:[%s14881_s1 + $0xb8] sm:$0xff]  }
  0x28   : > { %1371 = vmatpush1.bf16.msra.mxu1 %v9296_v14  ;;  %732 = vmatprep.subr.bf16.mxu0 %v14886_v1  ;;  %v2195_v14 = vld [vmem:[%s14882_s2 + $0x108] sm:$0xff]  ;;  %v2474_v31 = vld [vmem:[%s14883_s3 + $0x100] sm:$0xff] }
  0x29   : > { %1372 = vmatprep.subr.bf16.mxu1 %v14886_v1  ;;  %v9325_v27 = vld [vmem:[%s14881_s1 + $0xa8] sm:$0xff]   ;;  %v262_v35 = vld [vmem:[%s9549_s7 + $0x120] sm:$0xff] }
  0x2a   : > { %2224 = vperm.xlu1 %9282, %v2166_v43   ;;  %2359 = vperm.xlu0 %9281, %v2193_v45   ;;  %v2475_v29 = vld [vmem:[%s14883_s3 + $0x108] sm:$0xff]  ;;  %v2197_v43 = vld [vmem:[%s14882_s2 + $0x118] sm:$0xff]  ;;  %v2196_v45 = vld [vmem:[%s14882_s2 + $0x110] sm:$0xff] }
  0x2b   : > { %733 = vmatpush1.bf16.msra.mxu0 %v9297_v15  ;;  %v9322_v15 = vld [vmem:[%s14881_s1 + $0x198] sm:$0xff]   ;;  %v267_v37 = vld [vmem:[%s9549_s7 + $0x148] sm:$0xff]  ;;  %v270_v48 = vld [vmem:[%s9549_s7 + $0x160] sm:$0xff] }
  0x2c   : > { %1373 = vmatpush1.bf16.msra.mxu1 %v9298_v16  ;;  %734 = vmatprep.subr.bf16.mxu0 %v14886_v1  ;;  %v390_v16 = vpack.c.bf16 %v246_v9, %v242_v8  ;;  %v9331_v52 = vld [vmem:[%s14881_s1 + $0xc0] sm:$0xff]   ;;  %v279_v53 = vld [vmem:[%s9549_s7 + $0x1a8] sm:$0xff]  ;;  %v9336_v9 = vld [vmem:[%s14881_s1 + $0x1d0] sm:$0xff]  }
  0x2d   : > { %1374 = vmatprep.subr.bf16.mxu1 %v14886_v1  ;;  %v9333_v59 = vld [vmem:[%s14881_s1 + $0xc8] sm:$0xff]   ;;  %v274_v60 = vld [vmem:[%s9549_s7 + $0x180] sm:$0xff] }
  0x2e   : > { %2629 = vperm.xlu1 %9282, %v2471_v49   ;;  %2229 = vperm.xlu0 %9281, %v2167_v51   ;;  %v2171_v49 = vld [vmem:[%s14882_s2 + $0x48] sm:$0xff]  ;;  %v2170_v51 = vld [vmem:[%s14882_s2 + $0x40] sm:$0xff] }
  0x2f   : > { %735 = vmatpush1.bf16.msra.mxu0 %v9299_v17  ;;  %v395_v17 = vpack.c.bf16 %v255_v11, %v251_v10  ;;  %v2451_v62 = vld [vmem:[%s14883_s3 + $0x48] sm:$0xff]  ;;  %v2198_v8 = vld [vmem:[%s14882_s2 + $0x120] sm:$0xff]  ;;  %v9337_v10 = vld [vmem:[%s14881_s1 + $0xd8] sm:$0xff]  }
  0x30   : > { %1375 = vmatpush1.bf16.msra.mxu1 %v9300_v18  ;;  %736 = vmatprep.subr.bf16.mxu0 %v14886_v1  ;;  %v2194_v18 = vld [vmem:[%s14882_s2 + $0x100] sm:$0xff]  ;;  %v9334_v63 = vld [vmem:[%s14881_s1 + $0x1c8] sm:$0xff]  }
  0x31   : > { %1376 = vmatprep.subr.bf16.mxu1 %v14886_v1  ;;  %v282_v11 = vld [vmem:[%s9549_s7 + $0x1c0] sm:$0xff] }
  0x32   : > { %2639 = vperm.xlu1 %9282, %v2473_v56   ;;  %2634 = vperm.xlu0 %9281, %v2472_v0   ;;  %v2477_v56 = vld [vmem:[%s14883_s3 + $0x118] sm:$0xff]  ;;  %v283_v0 = vld [vmem:[%s9549_s7 + $0x1c8] sm:$0xff] }
  0x33   : > { %737 = vmatpush1.bf16.msra.mxu0 %v9301_v22  ;;  %v2169_v22 = vld [vmem:[%s14882_s2 + $0x38] sm:$0xff] }
  0x34   : > { %1377 = vmatpush1.bf16.msra.mxu1 %v9302_v23  ;;  %738 = vmatprep.subr.bf16.mxu0 %v14886_v1  ;;  %v254_v23 = vld [vmem:[%s9549_s7 + $0xe0] sm:$0xff] }
  0x35   : > { %1378 = vmatprep.subr.bf16.mxu1 %v14886_v1 }
  0x36   : > { %2509 = vperm.xlu1 %9282, %v2447_v2   ;;  %2504 = vperm.xlu0 %9281, %v2446_v13   ;;  %v2450_v2 = vld [vmem:[%s14883_s3 + $0x40] sm:$0xff]  ;;  %v2173_v13 = vld [vmem:[%s14882_s2 + $0x58] sm:$0xff] }
  0x37   : > { %739 = vmatpush1.bf16.msra.mxu0 %v9303_v26  ;;  %v263_v26 = vld [vmem:[%s9549_s7 + $0x128] sm:$0xff] }
  0x38   : > { %1379 = vmatpush1.bf16.msra.mxu1 %v9304_v28  ;;  %740 = vmatprep.subr.bf16.mxu0 %v14886_v1  ;;  %v394_v28 = vpack.c.bf16 %v254_v23, %v250_v20  ;;  %v2479_v20 = vld [vmem:[%s14883_s3 + $0x128] sm:$0xff]  ;;  %v9340_v23 = vld [vmem:[%s14881_s1 + $0x1e0] sm:$0xff]  }
  0x39   : > { %1380 = vmatprep.subr.bf16.mxu1 %v14886_v1 }
  0x3a   : > { %2369 = vperm.xlu1 %9282, %v2195_v14   ;;  %2364 = vperm.xlu0 %9281, %v2194_v18   ;;  %v2172_v14 = vld [vmem:[%s14882_s2 + $0x50] sm:$0xff]  ;;  %v9339_v18 = vld [vmem:[%s14881_s1 + $0xe0] sm:$0xff]  }
  0x3b   : > { %741 = vmatpush1.bf16.msra.mxu0 %v9305_v30  ;;  %v399_v30 = vpack.c.bf16 %v263_v26, %v259_v24  ;;  %v290_v24 = vld [vmem:[%s9549_s7 + $0x200] sm:$0xff] }
  0x3c   : > { %1381 = vmatpush1.bf16.msra.mxu1 %v9306_v32  ;;  %742 = vmatprep.subr.bf16.mxu0 %v14886_v1  ;;  %v9326_v32 = vld [vmem:[%s14881_s1 + $0x1a8] sm:$0xff]   ;;  %v294_v26 = vld [vmem:[%s9549_s7 + $0x220] sm:$0xff] }
  0x3d   : > { %1382 = vmatprep.subr.bf16.mxu1 %v14886_v1 }
  0x3e   : > { %2239 = vperm.xlu1 %9282, %v2169_v22   ;;  %2234 = vperm.xlu0 %9281, %v2168_v25   ;;  %v2478_v22 = vld [vmem:[%s14883_s3 + $0x120] sm:$0xff]  ;;  %v2453_v25 = vld [vmem:[%s14883_s3 + $0x58] sm:$0xff] }
  0x3f   : > { %743 = vmatpush1.bf16.msra.mxu0 %v9307_v34  ;;  %v258_v34 = vld [vmem:[%s9549_s7 + $0x100] sm:$0xff] }
  0x40   : > { %1383 = vmatpush1.bf16.msra.mxu1 %v9308_v36  ;;  %744 = vmatprep.subr.bf16.mxu0 %v14886_v1  ;;  %v2449_v36 = vld [vmem:[%s14883_s3 + $0x38] sm:$0xff] }
  0x41   : > { %1384 = vmatprep.subr.bf16.mxu1 %v14886_v1 }
  0x42   : > { %2649 = vperm.xlu1 %9282, %v2475_v29   ;;  %2644 = vperm.xlu0 %9281, %v2474_v31   ;;  %v299_v29 = vld [vmem:[%s9549_s7 + $0x248] sm:$0xff] }
  0x43   : > { %745 = vmatpush1.bf16.msra.mxu0 %v9309_v38  ;;  %v2448_v38 = vld [vmem:[%s14883_s3 + $0x30] sm:$0xff]  ;;  %v9342_v31 = vld [vmem:[%s14881_s1 + $0x1e8] sm:$0xff]  }
  0x44   : > { %1385 = vmatpush1.bf16.msra.mxu1 %v9310_v39  ;;  %746 = vmatprep.subr.bf16.mxu0 %v14886_v1  ;;  %v271_v39 = vld [vmem:[%s9549_s7 + $0x168] sm:$0xff] }
  0x45   : > { %1386 = vmatprep.subr.bf16.mxu1 %v14886_v1 }
  0x46   : > { %2519 = vperm.xlu1 %9282, %v2449_v36   ;;  %2514 = vperm.xlu0 %9281, %v2448_v38   ;;  %v9343_v36 = vld [vmem:[%s14881_s1 + $0xf0] sm:$0xff]  }
  0x47   : > { %747 = vmatpush1.bf16.msra.mxu0 %v9311_v42  ;;  %v398_v42 = vpack.c.bf16 %v262_v35, %v258_v34  ;;  %v2200_v35 = vld [vmem:[%s14882_s2 + $0x130] sm:$0xff] }
  0x48   : > { %1387 = vmatpush1.bf16.msra.mxu1 %v9312_v44  ;;  %748 = vmatprep.subr.bf16.mxu0 %v14886_v1  ;;  %v403_v44 = vpack.c.bf16 %v271_v39, %v267_v37  ;;  %v2175_v37 = vld [vmem:[%s14882_s2 + $0x68] sm:$0xff]  ;;  %v9344_v38 = vld [vmem:[%s14881_s1 + $0x1f0] sm:$0xff]   ;;  %v298_v39 = vld [vmem:[%s9549_s7 + $0x240] sm:$0xff] }
  0x49   : > { %1388 = vmatprep.subr.bf16.mxu1 %v14886_v1 }
  0x4a   : > { %2379 = vperm.xlu1 %9282, %v2197_v43   ;;  %2374 = vperm.xlu0 %9281, %v2196_v45   ;;  %v311_v43 = vld [vmem:[%s9549_s7 + $0x2a8] sm:$0xff]  ;;  %v2481_v45 = vld [vmem:[%s14883_s3 + $0x138] sm:$0x1] }
  0x4b   : > { %749 = vmatpush1.bf16.msra.mxu0 %v9313_v46  ;;  %v266_v46 = vld [vmem:[%s9549_s7 + $0x140] sm:$0xff] }
  0x4c   : > { %1389 = vmatpush1.bf16.msra.mxu1 %v9314_v50  ;;  %910 = vmatprep.subr.bf16.mxu0 %v14886_v1  ;;  %v275_v50 = vld [vmem:[%s9549_s7 + $0x188] sm:$0xff] }
  0x4d   : > { %1550 = vmatprep.subr.bf16.mxu1 %v14886_v1 }
  0x4e   : > { %751 = vmatmul.mubr.bf16.vlgmr.msra.gmra.mrb[0].mxu0 %v382_v54  ;;  %2249 = vperm.xlu1 %9282, %v2171_v49  }
  0x4f   : > { %1391 = vmatmul.mubr.bf16.vlgmr.msra.gmra.mrb[0].mxu1 %v382_v54  ;;  %911 = vmatpush1.bf16.msra.mxu0 %v9315_v55  ;;  %v9332_v54 = vld [vmem:[%s14881_s1 + $0x1c0] sm:$0xff]   ;;  %v402_v55 = vpack.c.bf16 %v270_v48, %v266_v46  ;;  %v2480_v46 = vld [vmem:[%s14883_s3 + $0x130] sm:$0xff]  ;;  %v9346_v48 = vld [vmem:[%s14881_s1 + $0x1f8] sm:$0xff]  }
  0x50   : > { %758 = vmatprep.mubr.bf16.mxu0 %v387_v57  ;;  %1398 = vmatprep.mubr.bf16.mxu1 %v387_v57  ;;  %v407_v57 = vpack.c.bf16 %v279_v53, %v275_v50  ;;  %v2455_v50 = vld [vmem:[%s14883_s3 + $0x68] sm:$0xff]  ;;  %v2454_v53 = vld [vmem:[%s14883_s3 + $0x60] sm:$0xff] }
  0x51   : > { %1551 = vmatpush1.bf16.msra.mxu1 %v9316_v58  ;;  %912 = vmatprep.subr.bf16.mxu0 %v14886_v1  ;;  %v2476_v58 = vld [vmem:[%s14883_s3 + $0x110] sm:$0xff] }
  0x52   : > { %1552 = vmatprep.subr.bf16.mxu1 %v14886_v1  ;;  %2244 = vperm.xlu0 %9281, %v2170_v51   ;;  %v306_v51 = vld [vmem:[%s9549_s7 + $0x280] sm:$0xff] }
  0x53   : > { %913 = vmatpush1.bf16.msra.mxu0 %v9317_v61  ;;  %v278_v61 = vld [vmem:[%s9549_s7 + $0x1a0] sm:$0xff]  ;;  %2659 = vperm.xlu1 %9282, %v2477_v56   ;;  %v2177_v56 = vld [vmem:[%s14882_s2 + $0x78] sm:$0xff] }
  0x54   : > { %914 = vmatprep.subr.bf16.mxu0 %v14886_v1 }
  0x55   : > { %1553 = vmatpush1.bf16.msra.mxu1 %v9318_v3  ;;  %v287_v3 = vld [vmem:[%s9549_s7 + $0x1e8] sm:$0xff] }
  0x56   : > { %759 = vmatmul.mubr.bf16.gmra.mrb[4].mxu0 %v386_v4  ;;  %1554 = vmatprep.subr.bf16.mxu1 %v14886_v1 }
  0x57   : > { %1399 = vmatmul.mubr.bf16.gmra.mrb[4].mxu1 %v386_v4  ;;  %766 = vmatprep.mubr.bf16.mxu0 %v391_v5  ;;  %v9335_v4 = vld [vmem:[%s14881_s1 + $0xd0] sm:$0xff]  }
  0x58   : > { %1406 = vmatprep.mubr.bf16.mxu1 %v391_v5  ;;  %915 = vmatpush1.bf16.msra.mxu0 %v9319_v6  ;;  %v406_v5 = vpack.c.bf16 %v278_v61, %v274_v60  ;;  %v2199_v6 = vld [vmem:[%s14882_s2 + $0x128] sm:$0xff]  ;;  %v2457_v60 = vld [vmem:[%s14883_s3 + $0x78] sm:$0xff]  ;;  %v314_v61 = vld [vmem:[%s9549_s7 + $0x2c0] sm:$0xff] }
  0x59   : > { %1555 = vmatpush1.bf16.msra.mxu1 %v9320_v7  ;;  %916 = vmatprep.subr.bf16.mxu0 %v14886_v1  ;;  %v411_v7 = vpack.c.bf16 %v287_v3, %v283_v0  ;;  %v323_v0 = vld [vmem:[%s9549_s7 + $0x308] sm:$0xff] }
  0x5a   : > { %1556 = vmatprep.subr.bf16.mxu1 %v14886_v1  ;;  %2654 = vperm.xlu0 %9281, %v2476_v58  }
  0x5b   : > { %2529 = vperm.xlu1 %9282, %v2451_v62   ;;  %v318_v62 = vld [vmem:[%s9549_s7 + $0x2e0] sm:$0xff] }
  0x5c   : > { %917 = vmatpush1.bf16.msra.mxu0 %v9321_v12  ;;  %v286_v12 = vld [vmem:[%s9549_s7 + $0x1e0] sm:$0xff]  ;;  %v426_v3 = vpack.c.bf16 %v318_v62, %v314_v61  ;;  %v2187_v61 = vld [vmem:[%s14882_s2 + $0xc8] sm:$0xff] }
  0x5d   : > { %1557 = vmatpush1.bf16.msra.mxu1 %v9322_v15  ;;  %918 = vmatprep.subr.bf16.mxu0 %v14886_v1  ;;  %v291_v15 = vld [vmem:[%s9549_s7 + $0x208] sm:$0xff] }
  0x5e   : > { %767 = vmatmul.mubr.bf16.gmra.mrb[8].mxu0 %v390_v16  ;;  %1558 = vmatprep.subr.bf16.mxu1 %v14886_v1 }
  0x5f   : > { %1407 = vmatmul.mubr.bf16.gmra.mrb[8].mxu1 %v390_v16  ;;  %774 = vmatprep.mubr.bf16.mxu0 %v395_v17  ;;  %v295_v16 = vld [vmem:[%s9549_s7 + $0x228] sm:$0xff] }
  0x60   : > { %1414 = vmatprep.mubr.bf16.mxu1 %v395_v17  ;;  %919 = vmatpush1.bf16.msra.mxu0 %v9323_v19  ;;  %v9338_v17 = vld [vmem:[%s14881_s1 + $0x1d8] sm:$0xff]   ;;  %v410_v19 = vpack.c.bf16 %v286_v12, %v282_v11  ;;  %v331_v11 = vld [vmem:[%s9549_s7 + $0x348] sm:$0xff] }
  0x61   : > { %1559 = vmatpush1.bf16.msra.mxu1 %v9324_v21  ;;  %920 = vmatprep.subr.bf16.mxu0 %v14886_v1  ;;  %v415_v21 = vpack.c.bf16 %v295_v16, %v291_v15  ;;  %v335_v12 = vld [vmem:[%s9549_s7 + $0x368] sm:$0xff]  ;;  %v2180_v15 = vld [vmem:[%s14882_s2 + $0x90] sm:$0xff] }
  0x62   : > { %1560 = vmatprep.subr.bf16.mxu1 %v14886_v1  ;;  %2524 = vperm.xlu0 %9281, %v2450_v2   ;;  %v327_v2 = vld [vmem:[%s9549_s7 + $0x328] sm:$0xff]  ;;  %v435_v16 = vpack.c.bf16 %v335_v12, %v331_v11  ;;  %v366_v11 = vld [vmem:[%s9549_s7 + $0x460] sm:$0xff] }
  0x63   : > { %2389 = vperm.xlu1 %9282, %v2199_v6   ;;  %v431_v6 = vpack.c.bf16 %v327_v2, %v323_v0  ;;  %v367_v0 = vld [vmem:[%s9549_s7 + $0x468] sm:$0xff] }
  0x64   : > { %921 = vmatpush1.bf16.msra.mxu0 %v9325_v27  ;;  %v2452_v27 = vld [vmem:[%s14883_s3 + $0x50] sm:$0xff]  ;;  %v2467_v12 = vld [vmem:[%s14883_s3 + $0xc8] sm:$0xff] }
  0x65   : > { %922 = vmatprep.subr.bf16.mxu0 %v14886_v1  ;;  %1561 = vmatpush1.bf16.msra.mxu1 %v9326_v32  ;;  %v414_v32 = vpack.c.bf16 %v294_v26, %v290_v24  ;;  %v2182_v26 = vld [vmem:[%s14882_s2 + $0xa0] sm:$0xff] }
  0x66   : > { %775 = vmatmul.mubr.bf16.gmra.mrb[12].mxu0 %v394_v28  ;;  %1562 = vmatprep.subr.bf16.mxu1 %v14886_v1 }
  0x67   : > { %1415 = vmatmul.mubr.bf16.gmra.mrb[12].mxu1 %v394_v28  ;;  %782 = vmatprep.mubr.bf16.mxu0 %v399_v30  ;;  %v9341_v28 = vld [vmem:[%s14881_s1 + $0xe8] sm:$0xff]  }
  0x68   : > { %1422 = vmatprep.mubr.bf16.mxu1 %v399_v30  ;;  %923 = vmatpush1.bf16.msra.mxu0 %v9327_v33  ;;  %v303_v30 = vld [vmem:[%s9549_s7 + $0x268] sm:$0xff]  ;;  %v2201_v33 = vld [vmem:[%s14882_s2 + $0x138] sm:$0x1] }
  0x69   : > { %924 = vmatprep.subr.bf16.mxu0 %v14886_v1  ;;  %1563 = vmatpush1.bf16.msra.mxu1 %v9328_v40  ;;  %v419_v34 = vpack.c.bf16 %v303_v30, %v299_v29  ;;  %v302_v40 = vld [vmem:[%s9549_s7 + $0x260] sm:$0xff]  ;;  %v2463_v29 = vld [vmem:[%s14883_s3 + $0xa8] sm:$0xff] }
  0x6a   : > { %1564 = vmatprep.subr.bf16.mxu1 %v14886_v1  ;;  %2384 = vperm.xlu0 %9281, %v2198_v8   ;;  %v322_v8 = vld [vmem:[%s9549_s7 + $0x300] sm:$0xff] }
  0x6b   : > { %2259 = vperm.xlu1 %9282, %v2173_v13  }
  0x6c   : > { %925 = vmatpush1.bf16.msra.mxu0 %v9329_v41  ;;  %v2174_v41 = vld [vmem:[%s14882_s2 + $0x60] sm:$0xff] }
  0x6d   : > { %1565 = vmatpush1.bf16.msra.mxu1 %v9330_v47  ;;  %926 = vmatprep.subr.bf16.mxu0 %v14886_v1  ;;  %v418_v47 = vpack.c.bf16 %v302_v40, %v298_v39  ;;  %v2185_v39 = vld [vmem:[%s14882_s2 + $0xb8] sm:$0xff]  ;;  %v2184_v40 = vld [vmem:[%s14882_s2 + $0xb0] sm:$0xff] }
  0x6e   : > { %783 = vmatmul.mubr.bf16.gmra.mrb[16].mxu0 %v398_v42  ;;  %1566 = vmatprep.subr.bf16.mxu1 %v14886_v1 }
  0x6f   : > { %1423 = vmatmul.mubr.bf16.gmra.mrb[16].mxu1 %v398_v42  ;;  %790 = vmatprep.mubr.bf16.mxu0 %v403_v44  ;;  %v307_v42 = vld [vmem:[%s9549_s7 + $0x288] sm:$0xff] }
  0x70   : > { %1430 = vmatprep.mubr.bf16.mxu1 %v403_v44  ;;  %927 = vmatpush1.bf16.msra.mxu0 %v9331_v52  ;;  %v9345_v44 = vld [vmem:[%s14881_s1 + $0xf8] sm:$0xff]   ;;  %v423_v49 = vpack.c.bf16 %v311_v43, %v307_v42  ;;  %v310_v52 = vld [vmem:[%s9549_s7 + $0x2a0] sm:$0xff]  ;;  %v2464_v43 = vld [vmem:[%s14883_s3 + $0xb0] sm:$0xff] }
  0x71   : > { %928 = vmatprep.subr.bf16.mxu0 %v14886_v1  ;;  %1567 = vmatpush1.bf16.msra.mxu1 %v9332_v54  ;;  %v315_v54 = vld [vmem:[%s9549_s7 + $0x2c8] sm:$0xff]  ;;  %v422_v58 = vpack.c.bf16 %v310_v52, %v306_v51 }
  0x72   : > { %1568 = vmatprep.subr.bf16.mxu1 %v14886_v1  ;;  %2254 = vperm.xlu0 %9281, %v2172_v14   ;;  %v2181_v14 = vld [vmem:[%s14882_s2 + $0x98] sm:$0xff] }
  0x73   : > { %2669 = vperm.xlu1 %9282, %v2479_v20   ;;  %v2460_v20 = vld [vmem:[%s14883_s3 + $0x90] sm:$0xff] }
  0x74   : > { %929 = vmatpush1.bf16.msra.mxu0 %v9333_v59 }
  0x75   : > { %1569 = vmatpush1.bf16.msra.mxu1 %v9334_v63  ;;  %930 = vmatprep.subr.bf16.mxu0 %v14886_v1  ;;  %v2456_v63 = vld [vmem:[%s14883_s3 + $0x70] sm:$0xff] }
  0x76   : > { %791 = vmatmul.mubr.bf16.gmra.mrb[20].mxu0 %v402_v55  ;;  %1570 = vmatprep.subr.bf16.mxu1 %v14886_v1 }
  0x77   : > { %1431 = vmatmul.mubr.bf16.gmra.mrb[20].mxu1 %v402_v55  ;;  %798 = vmatprep.mubr.bf16.mxu0 %v407_v57  ;;  %v319_v55 = vld [vmem:[%s9549_s7 + $0x2e8] sm:$0xff] }
  0x78   : > { %1438 = vmatprep.mubr.bf16.mxu1 %v407_v57  ;;  %931 = vmatpush1.bf16.msra.mxu0 %v9335_v4  ;;  %v2176_v57 = vld [vmem:[%s14882_s2 + $0x70] sm:$0xff]  ;;  %v427_v59 = vpack.c.bf16 %v319_v55, %v315_v54  ;;  %v2179_v4 = vld [vmem:[%s14882_s2 + $0x88] sm:$0xff]  ;;  %v2465_v54 = vld [vmem:[%s14883_s3 + $0xb8] sm:$0xff] }
  0x79   : > { %932 = vmatprep.subr.bf16.mxu0 %v14886_v1  ;;  %1571 = vmatpush1.bf16.msra.mxu1 %v9336_v9  ;;  %v326_v9 = vld [vmem:[%s9549_s7 + $0x320] sm:$0xff] }
  0x7a   : > { %1572 = vmatprep.subr.bf16.mxu1 %v14886_v1  ;;  %2664 = vperm.xlu0 %9281, %v2478_v22   ;;  %v430_v13 = vpack.c.bf16 %v326_v9, %v322_v8  ;;  %v343_v22 = vld [vmem:[%s9549_s7 + $0x3a8] sm:$0xff] }
  0x7b   : > { %2539 = vperm.xlu1 %9282, %v2453_v25   ;;  %v2183_v25 = vld [vmem:[%s14882_s2 + $0xa8] sm:$0xff] }
  0x7c   : > { %933 = vmatpush1.bf16.msra.mxu0 %v9337_v10  ;;  %v2458_v10 = vld [vmem:[%s14883_s3 + $0x80] sm:$0xff] }
  0x7d   : > { %934 = vmatprep.subr.bf16.mxu0 %v14886_v1  ;;  %1573 = vmatpush1.bf16.msra.mxu1 %v9338_v17  ;;  %v2461_v17 = vld [vmem:[%s14883_s3 + $0x98] sm:$0xff] }
  0x7e   : > { %799 = vmatmul.mubr.bf16.gmra.mrb[24].mxu0 %v406_v5  ;;  %1574 = vmatprep.subr.bf16.mxu1 %v14886_v1 }
  0x7f   : > { %1439 = vmatmul.mubr.bf16.gmra.mrb[24].mxu1 %v406_v5  ;;  %806 = vmatprep.mubr.bf16.mxu0 %v411_v7  ;;  %v2178_v5 = vld [vmem:[%s14882_s2 + $0x80] sm:$0xff] }
  0x80   : > { %1446 = vmatprep.mubr.bf16.mxu1 %v411_v7  ;;  %935 = vmatpush1.bf16.msra.mxu0 %v9339_v18  ;;  %v2459_v7 = vld [vmem:[%s14883_s3 + $0x88] sm:$0xff]  ;;  %v330_v18 = vld [vmem:[%s9549_s7 + $0x340] sm:$0xff] }
  0x81   : > { %1575 = vmatpush1.bf16.msra.mxu1 %v9340_v23  ;;  %2534 = vperm.xlu0 %9281, %v2452_v27  }
  0x82   : > { %936 = vmatprep.subr.bf16.mxu0 %v14886_v1  ;;  %1576 = vmatprep.subr.bf16.mxu1 %v14886_v1 }
  0x83   : > { %2399 = vperm.xlu1 %9282, %v2201_v33   ;;  %v342_v33 = vld [vmem:[%s9549_s7 + $0x3a0] sm:$0xff] }
  0x84   : > { %937 = vmatpush1.bf16.msra.mxu0 %v9341_v28 }
  0x85   : > { %938 = vmatprep.subr.bf16.mxu0 %v14886_v1  ;;  %1577 = vmatpush1.bf16.msra.mxu1 %v9342_v31 }
  0x86   : > { %807 = vmatmul.mubr.bf16.gmra.mrb[28].mxu0 %v410_v19  ;;  %2394 = vperm.xlu0 %9281, %v2200_v35   ;;  %v347_v35 = vld [vmem:[%s9549_s7 + $0x3c8] sm:$0xff] }
  0x87   : > { %1447 = vmatmul.mubr.bf16.gmra.mrb[28].mxu1 %v410_v19  ;;  %814 = vmatprep.mubr.bf16.mxu0 %v415_v21  ;;  %v334_v19 = vld [vmem:[%s9549_s7 + $0x360] sm:$0xff] }
  0x88   : > { %1454 = vmatprep.mubr.bf16.mxu1 %v415_v21  ;;  %939 = vmatpush1.bf16.msra.mxu0 %v9343_v36  ;;  %v339_v21 = vld [vmem:[%s9549_s7 + $0x388] sm:$0xff]  ;;  %v434_v24 = vpack.c.bf16 %v334_v19, %v330_v18 }
  0x89   : > { %2269 = vperm.xlu1 %9282, %v2175_v37   ;;  %1578 = vmatprep.subr.bf16.mxu1 %v14886_v1  ;;  %v439_v28 = vpack.c.bf16 %v343_v22, %v339_v21  ;;  %v351_v36 = vld [vmem:[%s9549_s7 + $0x3e8] sm:$0xff]  ;;  %v370_v22 = vld [vmem:[%s9549_s7 + $0x480] sm:$0xff] }
  0x8a   : > { %2264 = vperm.xlu0 %9281, %v2174_v41   ;;  %1579 = vmatpush1.bf16.msra.mxu1 %v9344_v38  ;;  %v443_v42 = vpack.c.bf16 %v351_v36, %v347_v35  ;;  %v8600_v21 = vld [vmem:[%s14882_s2 + $0x148] sm:$0xff]  ;;  %v8639_v35 = vld [vmem:[%s14883_s3 + $0x140] sm:$0xff] }
  0x8b   : > { %940 = vmatprep.subr.bf16.mxu0 %v14886_v1  ;;  %1580 = vmatprep.subr.bf16.mxu1 %v14886_v1 }
  0x8c   : > { %941 = vmatpush1.bf16.msra.mxu0 %v9345_v44 }
  0x8d   : > { %2679 = vperm.xlu1 %9282, %v2481_v45   ;;  %3651 = vmatprep.subr.bf16.mxu0 %v14886_v1 }
  0x8e   : > { %815 = vmatmul.mubr.bf16.gmra.mrb[32].mxu0 %v414_v32  ;;  %2674 = vperm.xlu0 %9281, %v2480_v46   ;;  %v346_v46 = vld [vmem:[%s9549_s7 + $0x3c0] sm:$0xff] }
  0x8f   : > { %1455 = vmatmul.mubr.bf16.gmra.mrb[32].mxu1 %v414_v32  ;;  %822 = vmatprep.mubr.bf16.mxu0 %v419_v34  ;;  %v338_v32 = vld [vmem:[%s9549_s7 + $0x380] sm:$0xff] }
  0x90   : > { %1462 = vmatprep.mubr.bf16.mxu1 %v419_v34  ;;  %1581 = vmatpush1.bf16.msra.mxu1 %v9346_v48  ;;  %v2462_v34 = vld [vmem:[%s14883_s3 + $0xa0] sm:$0xff]  ;;  %v438_v38 = vpack.c.bf16 %v342_v33, %v338_v32  ;;  %v8640_v33 = vld [vmem:[%s14883_s3 + $0x148] sm:$0xff] }
  0x91   : > { %2549 = vperm.xlu1 %9282, %v2455_v50   ;;  %9157 = vmatprep.subr.bf16.mxu1 %v14886_v1  ;;  %v2186_v48 = vld [vmem:[%s14882_s2 + $0xc0] sm:$0xff]  ;;  %v359_v50 = vld [vmem:[%s9549_s7 + $0x428] sm:$0xff] }
  0x92   : > { %2544 = vperm.xlu0 %9281, %v2454_v53   ;;  %v2466_v53 = vld [vmem:[%s14883_s3 + $0xc0] sm:$0xff] }
  0x94   : > { %v9989_v23 = vpop.permute.xlu1 %2484 }
  0x95   : > { %2279 = vperm.xlu1 %9282, %v2177_v56   ;;  %14978 = vst [vmem:[#allocation4_spill] sm:$0xff] %v9989_v23  ;;  %v9997_v27 = vpop.permute.xlu0 %2204 }
  0x96   : > { %823 = vmatmul.mubr.bf16.gmra.mrb[36].mxu0 %v418_v47  ;;  %2274 = vperm.xlu0 %9281, %v2176_v57   ;;  %14979 = vst [vmem:[#allocation5_spill] sm:$0xff] %v9997_v27  ;;  %v2188_v57 = vld [vmem:[%s14882_s2 + $0xd0] sm:$0xff] }
  0x97   : > { %1463 = vmatmul.mubr.bf16.gmra.mrb[36].mxu1 %v418_v47  ;;  %830 = vmatprep.mubr.bf16.mxu0 %v423_v49  ;;  %v350_v47 = vld [vmem:[%s9549_s7 + $0x3e0] sm:$0xff] }
  0x98   : > { %1470 = vmatprep.mubr.bf16.mxu1 %v423_v49  ;;  %v355_v49 = vld [vmem:[%s9549_s7 + $0x408] sm:$0xff]  ;;  %v442_v52 = vpack.c.bf16 %v350_v47, %v346_v46 }
  0x99   : > { %2559 = vperm.xlu1 %9282, %v2457_v60   ;;  %v10002_v30 = vpop.permute.xlu1 %2489  ;;  %v10004_v31 = vpop.permute.xlu0 %2209  ;;  %v447_v56 = vpack.c.bf16 %v359_v50, %v355_v49  ;;  %v358_v60 = vld [vmem:[%s9549_s7 + $0x420] sm:$0xff]  ;;  %v8642_v49 = vld [vmem:[%s14883_s3 + $0x158] sm:$0xff] }
  0x9a   : > { %2554 = vperm.xlu0 %9281, %v2456_v63   ;;  %14980 = vst [vmem:[#allocation6_spill] sm:$0xff] %v10002_v30  ;;  %14981 = vst [vmem:[#allocation7_spill] sm:$0xff] %v10004_v31  ;;  %v363_v63 = vld [vmem:[%s9549_s7 + $0x448] sm:$0xff] }
  0x9d   : > { %2289 = vperm.xlu1 %9282, %v2179_v4   ;;  %v10013_v37 = vpop.permute.xlu1 %2219  ;;  %v10021_v41 = vpop.permute.xlu0 %2214  ;;  %v2190_v4 = vld [vmem:[%s14882_s2 + $0xe0] sm:$0xff] }
  0x9e   : > { %831 = vmatmul.mubr.bf16.gmra.mrb[40].mxu0 %v422_v58  ;;  %2284 = vperm.xlu0 %9281, %v2178_v5   ;;  %14982 = vst [vmem:[#allocation8_spill] sm:$0xff] %v10013_v37  ;;  %14983 = vst [vmem:[#allocation9_spill] sm:$0xff] %v10021_v41  ;;  %v2189_v5 = vld [vmem:[%s14882_s2 + $0xd8] sm:$0xff] }
  0x9f   : > { %1471 = vmatmul.mubr.bf16.gmra.mrb[40].mxu1 %v422_v58  ;;  %838 = vmatprep.mubr.bf16.mxu0 %v427_v59 }
  0xa0   : > { %1478 = vmatprep.mubr.bf16.mxu1 %v427_v59  ;;  %v354_v59 = vld [vmem:[%s9549_s7 + $0x400] sm:$0xff] }
  0xa1   : > { %2569 = vperm.xlu1 %9282, %v2459_v7   ;;  %v10026_v44 = vpop.permute.xlu1 %2499  ;;  %v10028_v45 = vpop.permute.xlu0 %2494  ;;  %v2468_v7 = vld [vmem:[%s14883_s3 + $0xd0] sm:$0xff] }
  0xa2   : > { %2564 = vperm.xlu0 %9281, %v2458_v10   ;;  %14984 = vst [vmem:[#allocation10_spill] sm:$0xff] %v10026_v44  ;;  %14985 = vst [vmem:[#allocation11_spill] sm:$0xff] %v10028_v45  ;;  %v362_v10 = vld [vmem:[%s9549_s7 + $0x440] sm:$0xff]  ;;  %v317_v44 = vld [vmem:[%s9549_s7 + $0x2d8] sm:$0xff] }
  0xa5   : > { %2299 = vperm.xlu1 %9282, %v2181_v14   ;;  %v10037_v51 = vpop.permute.xlu1 %2354  ;;  %v10045_v55 = vpop.permute.xlu0 %2349  ;;  %v375_v14 = vld [vmem:[%s9549_s7 + $0x4a8] sm:$0xff] }
  0xa6   : > { %839 = vmatmul.mubr.bf16.gmra.mrb[44].mxu0 %v426_v3  ;;  %2294 = vperm.xlu0 %9281, %v2180_v15   ;;  %14986 = vst [vmem:[#allocation12_spill] sm:$0xff] %v10037_v51  ;;  %14987 = vst [vmem:[#allocation13_spill] sm:$0xff] %v10045_v55  ;;  %v450_v15 = vpack.c.bf16 %v366_v11, %v362_v10 }
  0xa7   : > { %1479 = vmatmul.mubr.bf16.gmra.mrb[44].mxu1 %v426_v3  ;;  %846 = vmatprep.mubr.bf16.mxu0 %v431_v6  ;;  %v446_v3 = vpack.c.bf16 %v358_v60, %v354_v59  ;;  %v232_v59 = vld [vmem:[%s9549_s7 + $0x30] sm:$0xff]  ;;  %v8603_v60 = vld [vmem:[%s14882_s2 + $0x160] sm:$0xff] }
  0xa8   : > { %1486 = vmatprep.mubr.bf16.mxu1 %v431_v6  ;;  %v451_v6 = vpack.c.bf16 %v367_v0, %v363_v63  ;;  %v241_v63 = vld [vmem:[%s9549_s7 + $0x78] sm:$0xff] }
  0xa9   : > { %2579 = vperm.xlu1 %9282, %v2461_v17   ;;  %v10050_v58 = vpop.permute.xlu1 %2224  ;;  %v10057_v62 = vpop.permute.xlu0 %2359  ;;  %v2469_v17 = vld [vmem:[%s14883_s3 + $0xd8] sm:$0xff] }
  0xaa   : > { %2574 = vperm.xlu0 %9281, %v2460_v20   ;;  %14988 = vst [vmem:[#allocation14_spill] sm:$0xff] %v10050_v58  ;;  %14989 = vst [vmem:[#allocation15_spill] sm:$0xff] %v10057_v62 }
  0xad   : > { %2309 = vperm.xlu1 %9282, %v2183_v25   ;;  %v10061_v2 = vpop.permute.xlu1 %2629  ;;  %v10072_v8 = vpop.permute.xlu0 %2229  ;;  %v8599_v25 = vld [vmem:[%s14882_s2 + $0x140] sm:$0xff] }
  0xae   : > { %847 = vmatmul.mubr.bf16.gmra.mrb[48].mxu0 %v430_v13  ;;  %2304 = vperm.xlu0 %9281, %v2182_v26   ;;  %14990 = vst [vmem:[#allocation16_spill] sm:$0xff] %v10061_v2  ;;  %14991 = vst [vmem:[#allocation17_spill] sm:$0xff] %v10072_v8  ;;  %v379_v26 = vld [vmem:[%s9549_s7 + $0x4c8] sm:$0xff] }
  0xaf   : > { %1487 = vmatmul.mubr.bf16.gmra.mrb[48].mxu1 %v430_v13  ;;  %854 = vmatprep.mubr.bf16.mxu0 %v435_v16  ;;  %v371_v13 = vld [vmem:[%s9549_s7 + $0x488] sm:$0xff] }
  0xb0   : > { %1494 = vmatprep.mubr.bf16.mxu1 %v435_v16  ;;  %v2470_v16 = vld [vmem:[%s14883_s3 + $0xe0] sm:$0xff]  ;;  %v455_v18 = vpack.c.bf16 %v375_v14, %v371_v13  ;;  %v236_v13 = vld [vmem:[%s9549_s7 + $0x50] sm:$0xff] }
  0xb1   : > { %2589 = vperm.xlu1 %9282, %v2463_v29   ;;  %v10074_v9 = vpop.permute.xlu1 %2639  ;;  %v10089_v19 = vpop.permute.xlu0 %2634  ;;  %v240_v14 = vld [vmem:[%s9549_s7 + $0x70] sm:$0xff] }
  0xb2   : > { %2584 = vperm.xlu0 %9281, %v2462_v34   ;;  %14992 = vst [vmem:[#allocation18_spill] sm:$0xff] %v10074_v9  ;;  %14993 = vst [vmem:[#allocation19_spill] sm:$0xff] %v10089_v19  ;;  %v459_v34 = vpack.c.bf16 %v379_v26, %v379_v26  ;;  %v8645_v26 = vld [vmem:[%s14883_s3 + $0x170] sm:$0xff] }
  0xb5   : > { %2319 = vperm.xlu1 %9282, %v2185_v39   ;;  %v10091_v20 = vpop.permute.xlu1 %2509  ;;  %v378_v39 = vld [vmem:[%s9549_s7 + $0x4c0] sm:$0xff] }
  0xb6   : > { %855 = vmatmul.mubr.bf16.gmra.mrb[52].mxu0 %v434_v24  ;;  %2314 = vperm.xlu0 %9281, %v2184_v40   ;;  %14994 = vst [vmem:[#allocation20_spill] sm:$0xff] %v10091_v20  ;;  %v8601_v40 = vld [vmem:[%s14882_s2 + $0x150] sm:$0xff] }
  0xb7   : > { %1495 = vmatmul.mubr.bf16.gmra.mrb[52].mxu1 %v434_v24  ;;  %862 = vmatprep.mubr.bf16.mxu0 %v439_v28  ;;  %v374_v24 = vld [vmem:[%s9549_s7 + $0x4a0] sm:$0xff] }
  0xb8   : > { %1502 = vmatprep.mubr.bf16.mxu1 %v439_v28  ;;  %v10102_v28 = vpop.permute.xlu0 %2504  ;;  %v454_v29 = vpack.c.bf16 %v374_v24, %v370_v22  ;;  %v388_v22 = vpack.c.bf16 %v240_v14, %v236_v13  ;;  %v8646_v24 = vld [vmem:[%s14883_s3 + $0x178] sm:$0xff] }
  0xb9   : > { %2594 = vperm.xlu1 %9282, %v2464_v43   ;;  %14995 = vst [vmem:[#allocation21_spill] sm:$0xff] %v10102_v28  ;;  %v10104_v32 = vpop.permute.xlu1 %2369  ;;  %v233_v43 = vld [vmem:[%s9549_s7 + $0x38] sm:$0xff] }
  0xba   : > { %2324 = vperm.xlu0 %9281, %v2186_v48   ;;  %14996 = vst [vmem:[#allocation22_spill] sm:$0xff] %v10104_v32  ;;  %v458_v48 = vpack.c.bf16 %v378_v39, %v378_v39  ;;  %v8607_v39 = vld [vmem:[%s14882_s2 + $0x180] sm:$0xff]  ;;  %v8650_v14 = vld [vmem:[%s14883_s3 + $0x198] sm:$0xff] }
  0xbc   : > { %v10112_v36 = vpop.permute.xlu0 %2364 }
  0xbd   : > { %2604 = vperm.xlu1 %9282, %v2466_v53   ;;  %14997 = vst [vmem:[#allocation23_spill] sm:$0xff] %v10112_v36  ;;  %v10123_v46 = vpop.permute.xlu1 %2239 }
  0xbe   : > { %863 = vmatmul.mubr.bf16.gmra.mrb[56].mxu0 %v438_v38  ;;  %2599 = vperm.xlu0 %9281, %v2465_v54   ;;  %14998 = vst [vmem:[#allocation24_spill] sm:$0xff] %v10123_v46 }
  0xbf   : > { %1503 = vmatmul.mubr.bf16.gmra.mrb[56].mxu1 %v438_v38  ;;  %870 = vmatprep.mubr.bf16.mxu0 %v443_v42  ;;  %v8602_v38 = vld [vmem:[%s14882_s2 + $0x158] sm:$0xff] }
  0xc0   : > { %1510 = vmatprep.mubr.bf16.mxu1 %v443_v42  ;;  %v229_v42 = vld [vmem:[%s9549_s7 + $0x18] sm:$0xff]  ;;  %v10125_v47 = vpop.permute.xlu0 %2234 }
  0xc1   : > { %2334 = vperm.xlu1 %9282, %v2188_v57   ;;  %14999 = vst [vmem:[#allocation25_spill] sm:$0xff] %v10125_v47  ;;  %v385_v50 = vpack.c.bf16 %v233_v43, %v229_v42  ;;  %v10133_v53 = vpop.permute.xlu1 %2649  ;;  %v228_v57 = vld [vmem:[%s9549_s7 + $0x10] sm:$0xff]  ;;  %v257_v42 = vld [vmem:[%s9549_s7 + $0xf8] sm:$0xff] }
  0xc2   : > { %2329 = vperm.xlu0 %9281, %v2187_v61   ;;  %15000 = vst [vmem:[#allocation26_spill] sm:$0xff] %v10133_v53  ;;  %v237_v61 = vld [vmem:[%s9549_s7 + $0x58] sm:$0xff] }
  0xc3   : > { %v309_v47 = vld [vmem:[%s9549_s7 + $0x298] sm:$0xff] }
  0xc4   : > { %v10135_v54 = vpop.permute.xlu0 %2644 }
  0xc5   : > { %2344 = vperm.xlu1 %9282, %v2190_v4   ;;  %15001 = vst [vmem:[#allocation27_spill] sm:$0xff] %v10135_v54  ;;  %v10147_v0 = vpop.permute.xlu1 %2519  ;;  %v384_v4 = vpack.c.bf16 %v232_v59, %v228_v57  ;;  %v325_v54 = vld [vmem:[%s9549_s7 + $0x318] sm:$0xff] }
  0xc6   : > { %871 = vmatmul.mubr.bf16.gmra.mrb[60].mxu0 %v442_v52  ;;  %2339 = vperm.xlu0 %9281, %v2189_v5   ;;  %15002 = vst [vmem:[#allocation28_spill] sm:$0xff] %v10147_v0  ;;  %v8644_v5 = vld [vmem:[%s14883_s3 + $0x168] sm:$0xff] }
  0xc7   : > { %1511 = vmatmul.mubr.bf16.gmra.mrb[60].mxu1 %v442_v52  ;;  %878 = vmatprep.mubr.bf16.mxu0 %v447_v56  ;;  %v8641_v52 = vld [vmem:[%s14883_s3 + $0x150] sm:$0xff] }
  0xc8   : > { %1518 = vmatprep.mubr.bf16.mxu1 %v447_v56  ;;  %v8604_v56 = vld [vmem:[%s14882_s2 + $0x168] sm:$0xff] }
  0xc9   : > { %2614 = vperm.xlu1 %9282, %v2468_v7   ;;  %v8643_v7 = vld [vmem:[%s14883_s3 + $0x160] sm:$0xff]  ;;  %v10157_v10 = vpop.permute.xlu1 %2379 }
  0xca   : > { %2609 = vperm.xlu0 %9281, %v2467_v12   ;;  %15004 = vst [vmem:[#allocation30_spill] sm:$0xff] %v10157_v10  ;;  %v8606_v12 = vld [vmem:[%s14882_s2 + $0x178] sm:$0xff] }
  0xcd   : > { %2624 = vperm.xlu1 %9282, %v2470_v16   ;;  %v245_v16 = vld [vmem:[%s9549_s7 + $0x98] sm:$0xff] }
  0xce   : > { %879 = vmatmul.mubr.bf16.gmra.mrb[64].mxu0 %v446_v3  ;;  %2619 = vperm.xlu0 %9281, %v2469_v17   ;;  %v249_v17 = vld [vmem:[%s9549_s7 + $0xb8] sm:$0xff] }
  0xcf   : > { %1519 = vmatmul.mubr.bf16.gmra.mrb[64].mxu1 %v446_v3  ;;  %886 = vmatprep.mubr.bf16.mxu0 %v451_v6  ;;  %v10149_v3 = vpop.permute.xlu0 %2514 }
  0xd0   : > { %1526 = vmatprep.mubr.bf16.mxu1 %v451_v6  ;;  %15003 = vst [vmem:[#allocation29_spill] sm:$0xff] %v10149_v3  ;;  %v389_v6 = vpack.c.bf16 %v241_v63, %v237_v61  ;;  %v252_v61 = vld [vmem:[%s9549_s7 + $0xd0] sm:$0xff] }
  0xd1   : > { %4301 = vperm.xlu1 %9282, %v8600_v21   ;;  %v256_v63 = vld [vmem:[%s9549_s7 + $0xf0] sm:$0xff] }
  0xd2   : > { %4296 = vperm.xlu0 %9281, %v8599_v25   ;;  %v393_v25 = vpack.c.bf16 %v249_v17, %v245_v16  ;;  %v396_v13 = vpack.c.bf16 %v256_v63, %v252_v61  ;;  %v8649_v16 = vld [vmem:[%s14883_s3 + $0x190] sm:$0xff]  ;;  %v8614_v61 = vld [vmem:[%s14882_s2 + $0x1b8] sm:$0xff] }
  0xd3   : > { %v10159_v11 = vpop.permute.xlu0 %2374  ;;  %v268_v63 = vld [vmem:[%s9549_s7 + $0x150] sm:$0xff] }
  0xd4   : > { %15005 = vst [vmem:[#allocation31_spill] sm:$0xff] %v10159_v11 }
  0xd5   : > { %4582 = vperm.xlu1 %9282, %v8640_v33  }
  0xd6   : > { %887 = vmatmul.mubr.bf16.gmra.mrb[68].mxu0 %v450_v15  ;;  %4577 = vperm.xlu0 %9281, %v8639_v35   ;;  %v244_v35 = vld [vmem:[%s9549_s7 + $0x90] sm:$0xff] }
  0xd7   : > { %1527 = vmatmul.mubr.bf16.gmra.mrb[68].mxu1 %v450_v15  ;;  %894 = vmatprep.mubr.bf16.mxu0 %v455_v18  ;;  %v8605_v15 = vld [vmem:[%s14882_s2 + $0x170] sm:$0xff]  ;;  %v10173_v21 = vpop.permute.xlu0 %2244 }
  0xd8   : > { %1534 = vmatprep.mubr.bf16.mxu1 %v455_v18  ;;  %v10171_v18 = vpop.permute.xlu1 %2249  ;;  %15007 = vst [vmem:[#allocation33_spill] sm:$0xff] %v10173_v21 }
  0xd9   : > { %4311 = vperm.xlu1 %9282, %v8602_v38   ;;  %15006 = vst [vmem:[#allocation32_spill] sm:$0xff] %v10171_v18  ;;  %v248_v38 = vld [vmem:[%s9549_s7 + $0xb0] sm:$0xff] }
  0xda   : > { %4306 = vperm.xlu0 %9281, %v8601_v40   ;;  %v253_v40 = vld [vmem:[%s9549_s7 + $0xd8] sm:$0xff] }
  0xdb   : > { %v10183_v33 = vpop.permute.xlu0 %2654 }
  0xdc   : > { %15009 = vst [vmem:[#allocation35_spill] sm:$0xff] %v10183_v33 }
  0xdd   : > { %4592 = vperm.xlu1 %9282, %v8642_v49   ;;  %v392_v49 = vpack.c.bf16 %v248_v38, %v244_v35  ;;  %v269_v35 = vld [vmem:[%s9549_s7 + $0x158] sm:$0xff] }
  0xde   : > { %895 = vmatmul.mubr.bf16.gmra.mrb[72].mxu0 %v454_v29  ;;  %4587 = vperm.xlu0 %9281, %v8641_v52   ;;  %v397_v52 = vpack.c.bf16 %v257_v42, %v253_v40  ;;  %v273_v38 = vld [vmem:[%s9549_s7 + $0x178] sm:$0xff] }
  0xdf   : > { %1535 = vmatmul.mubr.bf16.gmra.mrb[72].mxu1 %v454_v29  ;;  %902 = vmatprep.mubr.bf16.mxu0 %v459_v34  ;;  %v10181_v29 = vpop.permute.xlu1 %2659 }
  0xe0   : > { %1542 = vmatprep.mubr.bf16.mxu1 %v459_v34  ;;  %15008 = vst [vmem:[#allocation34_spill] sm:$0xff] %v10181_v29  ;;  %v8608_v34 = vld [vmem:[%s14882_s2 + $0x188] sm:$0xff] }
  0xe1   : > { %4321 = vperm.xlu1 %9282, %v8604_v56   ;;  %v8647_v56 = vld [vmem:[%s14883_s3 + $0x180] sm:$0xff] }
  0xe2   : > { %4316 = vperm.xlu0 %9281, %v8603_v60   ;;  %v8610_v60 = vld [vmem:[%s14882_s2 + $0x198] sm:$0xff] }
  0xe3   : > { %v10195_v43 = vpop.permute.xlu1 %2529 }
  0xe4   : > { %15010 = vst [vmem:[#allocation36_spill] sm:$0xff] %v10195_v43 }
  0xe5   : > { %4602 = vperm.xlu1 %9282, %v8644_v5   ;;  %v261_v5 = vld [vmem:[%s9549_s7 + $0x118] sm:$0xff] }
  0xe6   : > { %903 = vmatmul.mubr.bf16.gmra.mrb[76].mxu0 %v458_v48  ;;  %4597 = vperm.xlu0 %9281, %v8643_v7  }
  0xe7   : > { %1543 = vmatmul.mubr.bf16.gmra.mrb[76].mxu1 %v458_v48  ;;  %942 = vmatprep.mubr.bf16.mxu0 %v385_v50  ;;  %v10197_v48 = vpop.permute.xlu0 %2524  ;;  %v10205_v57 = vpop.permute.xlu1 %2389 }
  0xe8   : > { %1582 = vmatprep.mubr.bf16.mxu1 %v385_v50  ;;  %15011 = vst [vmem:[#allocation37_spill] sm:$0xff] %v10197_v48  ;;  %v8648_v50 = vld [vmem:[%s14883_s3 + $0x188] sm:$0xff]  ;;  %v301_v48 = vld [vmem:[%s9549_s7 + $0x258] sm:$0xff] }
  0xe9   : > { %4331 = vperm.xlu1 %9282, %v8606_v12  }
  0xea   : > { %4326 = vperm.xlu0 %9281, %v8605_v15  }
  0xeb   : > { %v10207_v59 = vpop.permute.xlu0 %2384  ;;  %v10219_v7 = vpop.permute.xlu1 %2259 }
  0xec   : > { %15012 = vst [vmem:[#allocation38_spill] sm:$0xff] %v10207_v59  ;;  %15013 = vst [vmem:[#allocation39_spill] sm:$0xff] %v10219_v7 }
  0xed   : > { %4612 = vperm.xlu1 %9282, %v8646_v24   ;;  %v8612_v24 = vld [vmem:[%s14882_s2 + $0x1a8] sm:$0xff] }
  0xee   : > { %943 = vmatmul.mubr.bf16.vlgmr.msra.gmra.mrb[0].mxu0 %v384_v4  ;;  %4607 = vperm.xlu0 %9281, %v8645_v26   ;;  %v264_v26 = vld [vmem:[%s9549_s7 + $0x130] sm:$0xff] }
  0xef   : > { %1583 = vmatmul.mubr.bf16.vlgmr.msra.gmra.mrb[80].mxu1 %v384_v4  ;;  %950 = vmatprep.mubr.bf16.mxu0 %v389_v6  ;;  %v8609_v4 = vld [vmem:[%s14882_s2 + $0x190] sm:$0xff] }
  0xf0   : > { %1590 = vmatprep.mubr.bf16.mxu1 %v389_v6  ;;  %v265_v6 = vld [vmem:[%s9549_s7 + $0x138] sm:$0xff] }
  0xf1   : > { %4341 = vperm.xlu1 %9282, %v8608_v34   ;;  %v10221_v12 = vpop.permute.xlu0 %2254  ;;  %v401_v15 = vpack.c.bf16 %v265_v6, %v261_v5  ;;  %v8611_v34 = vld [vmem:[%s14882_s2 + $0x1a0] sm:$0xff]  ;;  %v8613_v5 = vld [vmem:[%s14882_s2 + $0x1b0] sm:$0xff]  ;;  %v277_v6 = vld [vmem:[%s9549_s7 + $0x198] sm:$0xff] }
  0xf2   : > { %4336 = vperm.xlu0 %9281, %v8607_v39   ;;  %15014 = vst [vmem:[#allocation40_spill] sm:$0xff] %v10221_v12  ;;  %v10229_v17 = vpop.permute.xlu1 %2669 }
  0xf5   : > { %4622 = vperm.xlu1 %9282, %v8648_v50   ;;  %v405_v50 = vpack.c.bf16 %v273_v38, %v269_v35  ;;  %v8616_v38 = vld [vmem:[%s14882_s2 + $0x1c8] sm:$0xff] }
  0xf6   : > { %951 = vmatmul.mubr.bf16.gmra.mrb[4].mxu0 %v388_v22  ;;  %4617 = vperm.xlu0 %9281, %v8647_v56  }
  0xf7   : > { %1591 = vmatmul.mubr.bf16.gmra.mrb[84].mxu1 %v388_v22  ;;  %958 = vmatprep.mubr.bf16.mxu0 %v393_v25 }
  0xf8   : > { %1598 = vmatprep.mubr.bf16.mxu1 %v393_v25  ;;  %v260_v25 = vld [vmem:[%s9549_s7 + $0x110] sm:$0xff] }
  0xf9   : > { %4351 = vperm.xlu1 %9282, %v8610_v60   ;;  %v10231_v22 = vpop.permute.xlu0 %2664  ;;  %v400_v42 = vpack.c.bf16 %v264_v26, %v260_v25  ;;  %v8653_v26 = vld [vmem:[%s14883_s3 + $0x1b0] sm:$0xff] }
  0xfa   : > { %4346 = vperm.xlu0 %9281, %v8609_v4   ;;  %15015 = vst [vmem:[#allocation41_spill] sm:$0xff] %v10231_v22  ;;  %v10243_v39 = vpop.permute.xlu1 %2539  ;;  %v272_v4 = vld [vmem:[%s9549_s7 + $0x170] sm:$0xff] }
  0xfb   : > { %15016 = vst [vmem:[#allocation42_spill] sm:$0xff] %v10243_v39 }
  0xfd   : > { %4632 = vperm.xlu1 %9282, %v8650_v14  }
  0xfe   : > { %959 = vmatmul.mubr.bf16.gmra.mrb[8].mxu0 %v392_v49  ;;  %4627 = vperm.xlu0 %9281, %v8649_v16   ;;  %v404_v16 = vpack.c.bf16 %v272_v4, %v268_v63 }
  0xff   : > { %1599 = vmatmul.mubr.bf16.gmra.mrb[88].mxu1 %v392_v49  ;;  %966 = vmatprep.mubr.bf16.mxu0 %v397_v52  ;;  %v8652_v49 = vld [vmem:[%s14883_s3 + $0x1a8] sm:$0xff] }
 0x100   : > { %1606 = vmatprep.mubr.bf16.mxu1 %v397_v52  ;;  %v10245_v40 = vpop.permute.xlu0 %2534  ;;  %v8651_v52 = vld [vmem:[%s14883_s3 + $0x1a0] sm:$0xff] }
 0x101   : > { %15017 = vst [vmem:[#allocation43_spill] sm:$0xff] %v10245_v40  ;;  %4361 = vperm.xlu1 %9282, %v8612_v24   ;;  %v8654_v24 = vld [vmem:[%s14883_s3 + $0x1b8] sm:$0xff] }
 0x102   : > { %4356 = vperm.xlu0 %9281, %v8611_v34   ;;  %v10253_v56 = vpop.permute.xlu1 %2399 }
 0x105   : > { %v10255_v60 = vpop.permute.xlu0 %2394  ;;  %4642 = vperm.xlu1 %9282, %v8652_v49   ;;  %v280_v49 = vld [vmem:[%s9549_s7 + $0x1b0] sm:$0xff] }
 0x106   : > { %967 = vmatmul.mubr.bf16.gmra.mrb[12].mxu0 %v396_v13  ;;  %4637 = vperm.xlu0 %9281, %v8651_v52   ;;  %v285_v52 = vld [vmem:[%s9549_s7 + $0x1d8] sm:$0xff] }
 0x107   : > { %1607 = vmatmul.mubr.bf16.gmra.mrb[92].mxu1 %v396_v13  ;;  %974 = vmatprep.mubr.bf16.mxu0 %v401_v15  ;;  %v281_v13 = vld [vmem:[%s9549_s7 + $0x1b8] sm:$0xff] }
 0x108   : > { %1614 = vmatprep.mubr.bf16.mxu1 %v401_v15  ;;  %v10267_v14 = vpop.permute.xlu1 %2269  ;;  %v409_v25 = vpack.c.bf16 %v281_v13, %v277_v6  ;;  %v8656_v6 = vld [vmem:[%s14883_s3 + $0x1c8] sm:$0xff] }
 0x109   : > { %15018 = vst [vmem:[#allocation44_spill] sm:$0xff] %v10267_v14  ;;  %v10269_v15 = vpop.permute.xlu0 %2264  ;;  %4371 = vperm.xlu1 %9282, %v8614_v61   ;;  %v289_v61 = vld [vmem:[%s9549_s7 + $0x1f8] sm:$0xff] }
 0x10a   : > { %15019 = vst [vmem:[#allocation45_spill] sm:$0xff] %v10269_v15  ;;  %4366 = vperm.xlu0 %9281, %v8613_v5   ;;  %v413_v13 = vpack.c.bf16 %v289_v61, %v285_v52  ;;  %v297_v52 = vld [vmem:[%s9549_s7 + $0x238] sm:$0xff] }
 0x10c   : > { %v10277_v34 = vpop.permute.xlu1 %2679 }
 0x10d   : > { %15020 = vst [vmem:[#allocation46_spill] sm:$0xff] %v10277_v34  ;;  %v10279_v35 = vpop.permute.xlu0 %2674  ;;  %4652 = vperm.xlu1 %9282, %v8654_v24  }
 0x10e   : > { %975 = vmatmul.mubr.bf16.gmra.mrb[16].mxu0 %v400_v42  ;;  %4647 = vperm.xlu0 %9281, %v8653_v26   ;;  %v8618_v26 = vld [vmem:[%s14882_s2 + $0x1d8] sm:$0xff] }
 0x10f   : > { %1615 = vmatmul.mubr.bf16.gmra.mrb[96].mxu1 %v400_v42  ;;  %982 = vmatprep.mubr.bf16.mxu0 %v405_v50  ;;  %v276_v42 = vld [vmem:[%s9549_s7 + $0x190] sm:$0xff] }
 0x110   : > { %1622 = vmatprep.mubr.bf16.mxu1 %v405_v50  ;;  %v8615_v50 = vld [vmem:[%s14882_s2 + $0x1c0] sm:$0xff]  ;;  %v10291_v63 = vpop.permute.xlu1 %2549  ;;  %v408_v5 = vpack.c.bf16 %v280_v49, %v276_v42  ;;  %v288_v42 = vld [vmem:[%s9549_s7 + $0x1f0] sm:$0xff] }
 0x111   : > { %15021 = vst [vmem:[#allocation47_spill] sm:$0xff] %v10291_v63  ;;  %v10293_v4 = vpop.permute.xlu0 %2544  ;;  %4381 = vperm.xlu1 %9282, %v8616_v38   ;;  %v284_v38 = vld [vmem:[%s9549_s7 + $0x1d0] sm:$0xff] }
 0x112   : > { %15022 = vst [vmem:[#allocation48_spill] sm:$0xff] %v10293_v4  ;;  %4376 = vperm.xlu0 %9281, %v8615_v50   ;;  %v8617_v49 = vld [vmem:[%s14882_s2 + $0x1d0] sm:$0xff]  ;;  %v293_v50 = vld [vmem:[%s9549_s7 + $0x218] sm:$0xff]  ;;  %v412_v1 = vpack.c.bf16 %v288_v42, %v284_v38 }
 0x113   : > { %v417_v12 = vpack.c.bf16 %v297_v52, %v293_v50  ;;  %v296_v50 = vld [vmem:[%s9549_s7 + $0x230] sm:$0xff]  ;;  %v8619_v52 = vld [vmem:[%s14882_s2 + $0x1e0] sm:$0xff] }
 0x114   : > { %v10301_v24 = vpop.permute.xlu1 %2279 }
 0x115   : > { %15023 = vst [vmem:[#allocation49_spill] sm:$0xff] %v10301_v24  ;;  %4662 = vperm.xlu1 %9282, %v8656_v6  }
 0x116   : > { %983 = vmatmul.mubr.bf16.gmra.mrb[20].mxu0 %v404_v16 }
 0x117   : > { %1623 = vmatmul.mubr.bf16.gmra.mrb[100].mxu1 %v404_v16  ;;  %990 = vmatprep.mubr.bf16.mxu0 %v409_v25  ;;  %v8655_v16 = vld [vmem:[%s14883_s3 + $0x1c0] sm:$0xff] }
 0x118   : > { %1630 = vmatprep.mubr.bf16.mxu1 %v409_v25  ;;  %v10303_v25 = vpop.permute.xlu0 %2274  ;;  %4657 = vperm.xlu0 %9281, %v8655_v16   ;;  %v10315_v61 = vpop.permute.xlu1 %2559 }
 0x119   : > { %15024 = vst [vmem:[#allocation50_spill] sm:$0xff] %v10303_v25  ;;  %15025 = vst [vmem:[#allocation51_spill] sm:$0xff] %v10315_v61  ;;  %4391 = vperm.xlu1 %9282, %v8618_v26  }
 0x11c   : > { %v10317_v6 = vpop.permute.xlu0 %2554  ;;  %4386 = vperm.xlu0 %9281, %v8617_v49   ;;  %v10329_v26 = vpop.permute.xlu1 %2289  ;;  %v292_v49 = vld [vmem:[%s9549_s7 + $0x210] sm:$0xff] }
 0x11d   : > { %15026 = vst [vmem:[#allocation52_spill] sm:$0xff] %v10317_v6  ;;  %15027 = vst [vmem:[#allocation53_spill] sm:$0xff] %v10329_v26  ;;  %v416_v21 = vpack.c.bf16 %v296_v50, %v292_v49 }
 0x11e   : > { %991 = vmatmul.mubr.bf16.gmra.mrb[24].mxu0 %v408_v5 }
 0x11f   : > { %1631 = vmatmul.mubr.bf16.gmra.mrb[104].mxu1 %v408_v5  ;;  %998 = vmatprep.mubr.bf16.mxu0 %v413_v13  ;;  %v8658_v5 = vld [vmem:[%s14883_s3 + $0x1d8] sm:$0xff] }
 0x120   : > { %1638 = vmatprep.mubr.bf16.mxu1 %v413_v13  ;;  %v8657_v13 = vld [vmem:[%s14883_s3 + $0x1d0] sm:$0xff]  ;;  %v10331_v42 = vpop.permute.xlu0 %2284  ;;  %4672 = vperm.xlu1 %9282, %v8658_v5   ;;  %v10343_v18 = vpop.permute.xlu1 %2569 }
 0x121   : > { %15028 = vst [vmem:[#allocation54_spill] sm:$0xff] %v10331_v42  ;;  %4667 = vperm.xlu0 %9281, %v8657_v13   ;;  %15029 = vst [vmem:[#allocation55_spill] sm:$0xff] %v10343_v18 }
 0x122   : > { %v10319_v16 = vpop.f32.mrb[0].mxu1 }
 0x123   : > { %v1394_v40 = vpop.f32.mrb[1].mxu1 }
 0x124   : > { %v10327_v43 = vpop.f32.mrb[2].mxu1  ;;  %v8620_v40 = vld [vmem:[%s14882_s2 + $0x1e8] sm:$0xff]  ;;  %v10345_v5 = vpop.permute.xlu0 %2564 }
 0x125   : > { %v1397_v38 = vpop.f32.mrb[3].mxu1  ;;  %15030 = vst [vmem:[#allocation56_spill] sm:$0xff] %v10345_v5  ;;  %4401 = vperm.xlu1 %9282, %v8620_v40   ;;  %4396 = vperm.xlu0 %9281, %v8619_v52   ;;  %v10357_v40 = vpop.permute.xlu1 %2299  ;;  %v304_v52 = vld [vmem:[%s9549_s7 + $0x270] sm:$0xff]  ;;  %v341_v5 = vld [vmem:[%s9549_s7 + $0x398] sm:$0xff] }
 0x126   : > { %999 = vmatmul.mubr.bf16.gmra.mrb[28].mxu0 %v412_v1  ;;  %v305_v38 = vld [vmem:[%s9549_s7 + $0x278] sm:$0xff]  ;;  %15031 = vst [vmem:[#allocation57_spill] sm:$0xff] %v10357_v40 }
 0x127   : > { %1639 = vmatmul.mubr.bf16.gmra.mrb[108].mxu1 %v412_v1  ;;  %1006 = vmatprep.mubr.bf16.mxu0 %v417_v12  ;;  %v8660_v1 = vld [vmem:[%s14883_s3 + $0x1e8] sm:$0xff]  ;;  %v421_v3 = vpack.c.bf16 %v305_v38, %v301_v48  ;;  %v300_v48 = vld [vmem:[%s9549_s7 + $0x250] sm:$0xff] }
 0x128   : > { %1646 = vmatprep.mubr.bf16.mxu1 %v417_v12  ;;  %v8659_v12 = vld [vmem:[%s14883_s3 + $0x1e0] sm:$0xff]  ;;  %v10359_v50 = vpop.permute.xlu0 %2294  ;;  %v8621_v38 = vld [vmem:[%s14882_s2 + $0x1f0] sm:$0xff]  ;;  %v420_v28 = vpack.c.bf16 %v304_v52, %v300_v48 }
 0x129   : > { %15032 = vst [vmem:[#allocation58_spill] sm:$0xff] %v10359_v50  ;;  %4682 = vperm.xlu1 %9282, %v8660_v1   ;;  %4677 = vperm.xlu0 %9281, %v8659_v12   ;;  %v10371_v20 = vpop.permute.xlu1 %2579 }
 0x12a   : > { %v10347_v13 = vpop.f32.mrb[4].mxu1  ;;  %15033 = vst [vmem:[#allocation59_spill] sm:$0xff] %v10371_v20 }
 0x12b   : > { %v1402_v0 = vpop.f32.mrb[5].mxu1 }
 0x12c   : > { %v10355_v46 = vpop.f32.mrb[6].mxu1  ;;  %v8622_v0 = vld [vmem:[%s14882_s2 + $0x1f8] sm:$0xff]  ;;  %v10373_v1 = vpop.permute.xlu0 %2574 }
 0x12d   : > { %v1405_v49 = vpop.f32.mrb[7].mxu1  ;;  %15034 = vst [vmem:[#allocation60_spill] sm:$0xff] %v10373_v1  ;;  %4411 = vperm.xlu1 %9282, %v8622_v0   ;;  %4406 = vperm.xlu0 %9281, %v8621_v38   ;;  %v10385_v0 = vpop.permute.xlu1 %2309  ;;  %v312_v38 = vld [vmem:[%s9549_s7 + $0x2b0] sm:$0xff] }
 0x12e   : > { %1007 = vmatmul.mubr.bf16.gmra.mrb[32].mxu0 %v416_v21  ;;  %v313_v49 = vld [vmem:[%s9549_s7 + $0x2b8] sm:$0xff]  ;;  %15035 = vst [vmem:[#allocation61_spill] sm:$0xff] %v10385_v0 }
 0x12f   : > { %1647 = vmatmul.mubr.bf16.gmra.mrb[112].mxu1 %v416_v21  ;;  %1014 = vmatprep.mubr.bf16.mxu0 %v421_v3  ;;  %v8662_v21 = vld [vmem:[%s14883_s3 + $0x1f8] sm:$0xff]  ;;  %v425_v58 = vpack.c.bf16 %v313_v49, %v309_v47  ;;  %v308_v47 = vld [vmem:[%s9549_s7 + $0x290] sm:$0xff]  ;;  %v8623_v49 = vld [vmem:[%s14882_s2 + $0x200] sm:$0xff] }
 0x130   : > { %1654 = vmatprep.mubr.bf16.mxu1 %v421_v3  ;;  %v8661_v3 = vld [vmem:[%s14883_s3 + $0x1f0] sm:$0xff]  ;;  %v10387_v52 = vpop.permute.xlu0 %2304  ;;  %v424_v22 = vpack.c.bf16 %v312_v38, %v308_v47 }
 0x131   : > { %15036 = vst [vmem:[#allocation62_spill] sm:$0xff] %v10387_v52  ;;  %4692 = vperm.xlu1 %9282, %v8662_v21   ;;  %4687 = vperm.xlu0 %9281, %v8661_v3   ;;  %v10399_v45 = vpop.permute.xlu1 %2589 }
 0x132   : > { %v10375_v12 = vpop.f32.mrb[8].mxu1  ;;  %15037 = vst [vmem:[#allocation63_spill] sm:$0xff] %v10399_v45 }
 0x133   : > { %v1410_v8 = vpop.f32.mrb[9].mxu1 }
 0x134   : > { %v10383_v39 = vpop.f32.mrb[10].mxu1  ;;  %v8624_v8 = vld [vmem:[%s14882_s2 + $0x208] sm:$0xff]  ;;  %v10401_v21 = vpop.permute.xlu0 %2584 }
 0x135   : > { %v1413_v48 = vpop.f32.mrb[11].mxu1  ;;  %15038 = vst [vmem:[#allocation64_spill] sm:$0xff] %v10401_v21  ;;  %4421 = vperm.xlu1 %9282, %v8624_v8   ;;  %4416 = vperm.xlu0 %9281, %v8623_v49   ;;  %v10413_v8 = vpop.permute.xlu1 %2319  ;;  %v320_v49 = vld [vmem:[%s9549_s7 + $0x2f0] sm:$0xff]  ;;  %v14888_v21 = vmov 0.0  }
 0x136   : > { %1015 = vmatmul.mubr.bf16.gmra.mrb[36].mxu0 %v420_v28  ;;  %v321_v48 = vld [vmem:[%s9549_s7 + $0x2f8] sm:$0xff]  ;;  %15039 = vst [vmem:[#allocation65_spill] sm:$0xff] %v10413_v8  ;;  %1742 = vst [vmem:[#allocation3] sm:$0x1] %v14888_v21 }
 0x137   : > { %1655 = vmatmul.mubr.bf16.gmra.mrb[116].mxu1 %v420_v28  ;;  %1022 = vmatprep.mubr.bf16.mxu0 %v425_v58  ;;  %v8664_v28 = vld [vmem:[%s14883_s3 + $0x208] sm:$0xff]  ;;  %v429_v33 = vpack.c.bf16 %v321_v48, %v317_v44  ;;  %v8626_v44 = vld [vmem:[%s14882_s2 + $0x218] sm:$0xff]  ;;  %v8625_v48 = vld [vmem:[%s14882_s2 + $0x210] sm:$0xff]  ;;  %1942 = vst [vmem:[#allocation2] sm:$0x1] %v14888_v21 }
 0x138   : > { %1662 = vmatprep.mubr.bf16.mxu1 %v425_v58  ;;  %v8663_v58 = vld [vmem:[%s14883_s3 + $0x200] sm:$0xff]  ;;  %v10415_v38 = vpop.permute.xlu0 %2314  ;;  %1943 = vst [vmem:[#allocation2 + $0x3b8] sm:$0x1] %v14888_v21  ;;  %8263 = vst [vmem:[#allocation3 + $0x139] sm:$0x7f] %v14888_v21 }
 0x139   : > { %15040 = vst [vmem:[#allocation66_spill] sm:$0xff] %v10415_v38  ;;  %4702 = vperm.xlu1 %9282, %v8664_v28   ;;  %4697 = vperm.xlu0 %9281, %v8663_v58   ;;  %v10427_v9 = vpop.permute.xlu1 %2594  ;;  %v8627_v21 = vld [vmem:[%s14882_s2 + $0x220] sm:$0xff] }
 0x13a   : > { %v10403_v3 = vpop.f32.mrb[12].mxu1  ;;  %15041 = vst [vmem:[#allocation67_spill] sm:$0xff] %v10427_v9 }
 0x13b   : > { %v1418_v29 = vpop.f32.mrb[13].mxu1 }
 0x13c   : > { %v10411_v53 = vpop.f32.mrb[14].mxu1  ;;  %v316_v29 = vld [vmem:[%s9549_s7 + $0x2d0] sm:$0xff]  ;;  %v10429_v28 = vpop.permute.xlu0 %2324 }
 0x13d   : > { %v1421_v47 = vpop.f32.mrb[15].mxu1  ;;  %15042 = vst [vmem:[#allocation68_spill] sm:$0xff] %v10429_v28  ;;  %4431 = vperm.xlu1 %9282, %v8626_v44   ;;  %v428_v19 = vpack.c.bf16 %v320_v49, %v316_v29  ;;  %4426 = vperm.xlu0 %9281, %v8625_v48   ;;  %v8628_v49 = vld [vmem:[%s14882_s2 + $0x228] sm:$0xff]  ;;  %v324_v48 = vld [vmem:[%s9549_s7 + $0x310] sm:$0xff] }
 0x13e   : > { %1023 = vmatmul.mubr.bf16.gmra.mrb[40].mxu0 %v424_v22  ;;  %v329_v47 = vld [vmem:[%s9549_s7 + $0x338] sm:$0xff] }
 0x13f   : > { %1663 = vmatmul.mubr.bf16.gmra.mrb[120].mxu1 %v424_v22  ;;  %1030 = vmatprep.mubr.bf16.mxu0 %v429_v33  ;;  %v8666_v22 = vld [vmem:[%s14883_s3 + $0x218] sm:$0xff]  ;;  %v433_v45 = vpack.c.bf16 %v329_v47, %v325_v54  ;;  %v328_v47 = vld [vmem:[%s9549_s7 + $0x330] sm:$0xff] }
 0x140   : > { %1670 = vmatprep.mubr.bf16.mxu1 %v429_v33  ;;  %v8665_v33 = vld [vmem:[%s14883_s3 + $0x210] sm:$0xff]  ;;  %v10447_v29 = vpop.permute.xlu0 %2599 }
 0x141   : > { %15044 = vst [vmem:[#allocation70_spill] sm:$0xff] %v10447_v29  ;;  %4712 = vperm.xlu1 %9282, %v8666_v22   ;;  %4707 = vperm.xlu0 %9281, %v8665_v33   ;;  %v432_v29 = vpack.c.bf16 %v328_v47, %v324_v48 }
 0x142   : > { %v10431_v58 = vpop.f32.mrb[16].mxu1 }
 0x143   : > { %v1426_v2 = vpop.f32.mrb[17].mxu1 }
 0x144   : > { %v10443_v44 = vpop.f32.mrb[18].mxu1  ;;  %v10445_v2 = vpop.permute.xlu1 %2604 }
 0x145   : > { %15043 = vst [vmem:[#allocation69_spill] sm:$0xff] %v10445_v2  ;;  %v1429_v54 = vpop.f32.mrb[19].mxu1  ;;  %v333_v2 = vld [vmem:[%s9549_s7 + $0x358] sm:$0xff]  ;;  %v10461_v22 = vpop.permute.xlu0 %2329  ;;  %4441 = vperm.xlu1 %9282, %v8628_v49   ;;  %4436 = vperm.xlu0 %9281, %v8627_v21   ;;  %v332_v21 = vld [vmem:[%s9549_s7 + $0x350] sm:$0xff] }
 0x146   : > { %1031 = vmatmul.mubr.bf16.gmra.mrb[44].mxu0 %v428_v19  ;;  %v337_v54 = vld [vmem:[%s9549_s7 + $0x378] sm:$0xff]  ;;  %15046 = vst [vmem:[#allocation72_spill] sm:$0xff] %v10461_v22 }
 0x147   : > { %1671 = vmatmul.mubr.bf16.gmra.mrb[124].mxu1 %v428_v19  ;;  %1038 = vmatprep.mubr.bf16.mxu0 %v433_v45  ;;  %v8668_v19 = vld [vmem:[%s14883_s3 + $0x228] sm:$0xff]  ;;  %v437_v1 = vpack.c.bf16 %v337_v54, %v333_v2  ;;  %v336_v2 = vld [vmem:[%s9549_s7 + $0x370] sm:$0xff] }
 0x148   : > { %1678 = vmatprep.mubr.bf16.mxu1 %v433_v45  ;;  %v10459_v9 = vpop.permute.xlu1 %2334  ;;  %v8667_v45 = vld [vmem:[%s14883_s3 + $0x220] sm:$0xff]  ;;  %v8629_v54 = vld [vmem:[%s14882_s2 + $0x230] sm:$0xff]  ;;  %v436_v6 = vpack.c.bf16 %v336_v2, %v332_v21 }
 0x149   : > { %15045 = vst [vmem:[#allocation71_spill] sm:$0xff] %v10459_v9  ;;  %v10475_v47 = vpop.permute.xlu0 %2339  ;;  %4722 = vperm.xlu1 %9282, %v8668_v19   ;;  %4717 = vperm.xlu0 %9281, %v8667_v45  }
 0x14a   : > { %v10463_v33 = vpop.f32.mrb[20].mxu1  ;;  %15048 = vst [vmem:[#allocation74_spill] sm:$0xff] %v10475_v47 }
 0x14b   : > { %v1434_v20 = vpop.f32.mrb[21].mxu1 }
 0x14c   : > { %v10471_v18 = vpop.f32.mrb[22].mxu1  ;;  %v10473_v49 = vpop.permute.xlu1 %2344  ;;  %v8630_v20 = vld [vmem:[%s14882_s2 + $0x238] sm:$0xff] }
 0x14d   : > { %15047 = vst [vmem:[#allocation73_spill] sm:$0xff] %v10473_v49  ;;  %v1437_v48 = vpop.f32.mrb[23].mxu1  ;;  %v10489_v19 = vpop.permute.xlu0 %2609  ;;  %4451 = vperm.xlu1 %9282, %v8630_v20   ;;  %4446 = vperm.xlu0 %9281, %v8629_v54   ;;  %v344_v54 = vld [vmem:[%s9549_s7 + $0x3b0] sm:$0xff] }
 0x14e   : > { %1039 = vmatmul.mubr.bf16.gmra.mrb[48].mxu0 %v432_v29  ;;  %v345_v48 = vld [vmem:[%s9549_s7 + $0x3b8] sm:$0xff]  ;;  %15050 = vst [vmem:[#allocation76_spill] sm:$0xff] %v10489_v19 }
 0x14f   : > { %1679 = vmatmul.mubr.bf16.gmra.mrb[128].mxu1 %v432_v29  ;;  %1046 = vmatprep.mubr.bf16.mxu0 %v437_v1  ;;  %v8670_v29 = vld [vmem:[%s14883_s3 + $0x238] sm:$0xff]  ;;  %v441_v4 = vpack.c.bf16 %v345_v48, %v341_v5  ;;  %v340_v5 = vld [vmem:[%s9549_s7 + $0x390] sm:$0xff]  ;;  %v8631_v48 = vld [vmem:[%s14882_s2 + $0x240] sm:$0xff] }
 0x150   : > { %1686 = vmatprep.mubr.bf16.mxu1 %v437_v1  ;;  %v10487_v61 = vpop.permute.xlu1 %2614  ;;  %v8669_v1 = vld [vmem:[%s14883_s3 + $0x230] sm:$0xff] }
 0x151   : > { %15049 = vst [vmem:[#allocation75_spill] sm:$0xff] %v10487_v61  ;;  %v10503_v2 = vpop.permute.xlu0 %2619  ;;  %4732 = vperm.xlu1 %9282, %v8670_v29   ;;  %4727 = vperm.xlu0 %9281, %v8669_v1  }
 0x152   : > { %v10491_v45 = vpop.f32.mrb[24].mxu1  ;;  %15052 = vst [vmem:[#allocation78_spill] sm:$0xff] %v10503_v2  ;;  %v440_v2 = vpack.c.bf16 %v344_v54, %v340_v5 }
 0x153   : > { %v1442_v63 = vpop.f32.mrb[25].mxu1 }
 0x154   : > { %v10499_v61 = vpop.f32.mrb[26].mxu1  ;;  %v10501_v20 = vpop.permute.xlu1 %2624  ;;  %v8671_v63 = vld [vmem:[%s14883_s3 + $0x240] sm:$0xff] }
 0x155   : > { %15051 = vst [vmem:[#allocation77_spill] sm:$0xff] %v10501_v20  ;;  %v1445_v21 = vpop.f32.mrb[27].mxu1  ;;  %v349_v20 = vld [vmem:[%s9549_s7 + $0x3d8] sm:$0xff]  ;;  %v10517_v29 = vpop.permute.xlu0 %4296  ;;  %4737 = vperm.xlu1 %9282, %v8671_v63   ;;  %4456 = vperm.xlu0 %9281, %v8631_v48   ;;  %v352_v48 = vld [vmem:[%s9549_s7 + $0x3f0] sm:$0xff] }
 0x156   : > { %1047 = vmatmul.mubr.bf16.gmra.mrb[52].mxu0 %v436_v6  ;;  %v353_v21 = vld [vmem:[%s9549_s7 + $0x3f8] sm:$0xff]  ;;  %15054 = vst [vmem:[#allocation80_spill] sm:$0xff] %v10517_v29 }
 0x157   : > { %1687 = vmatmul.mubr.bf16.gmra.mrb[132].mxu1 %v436_v6  ;;  %1054 = vmatprep.mubr.bf16.mxu0 %v441_v4  ;;  %v8672_v6 = vld [vmem:[%s14883_s3 + $0x248] sm:$0xff]  ;;  %v445_v59 = vpack.c.bf16 %v353_v21, %v349_v20  ;;  %v348_v20 = vld [vmem:[%s9549_s7 + $0x3d0] sm:$0xff] }
 0x158   : > { %1694 = vmatprep.mubr.bf16.mxu1 %v441_v4  ;;  %v10515_v19 = vpop.permute.xlu1 %4301  ;;  %v8632_v4 = vld [vmem:[%s14882_s2 + $0x248] sm:$0xff]  ;;  %v8633_v21 = vld [vmem:[%s14882_s2 + $0x250] sm:$0xff] }
 0x159   : > { %15053 = vst [vmem:[#allocation79_spill] sm:$0xff] %v10515_v19  ;;  %v10531_v54 = vpop.permute.xlu0 %4577  ;;  %4742 = vperm.xlu1 %9282, %v8672_v6   ;;  %4461 = vperm.xlu0 %9281, %v8632_v4  }
 0x15a   : > { %v10519_v1 = vpop.f32.mrb[28].mxu1  ;;  %15056 = vst [vmem:[#allocation82_spill] sm:$0xff] %v10531_v54  ;;  %v444_v54 = vpack.c.bf16 %v352_v48, %v348_v20 }
 0x15b   : > { %v1450_v30 = vpop.f32.mrb[29].mxu1 }
 0x15c   : > { %v10527_v19 = vpop.f32.mrb[30].mxu1  ;;  %v10529_v63 = vpop.permute.xlu1 %4582  ;;  %v8634_v30 = vld [vmem:[%s14882_s2 + $0x258] sm:$0xff] }
 0x15d   : > { %15055 = vst [vmem:[#allocation81_spill] sm:$0xff] %v10529_v63  ;;  %v1453_v5 = vpop.f32.mrb[31].mxu1  ;;  %v357_v63 = vld [vmem:[%s9549_s7 + $0x418] sm:$0xff]  ;;  %v10545_v6 = vpop.permute.xlu0 %4306  ;;  %4471 = vperm.xlu1 %9282, %v8634_v30   ;;  %4466 = vperm.xlu0 %9281, %v8633_v21   ;;  %v360_v21 = vld [vmem:[%s9549_s7 + $0x430] sm:$0xff] }
 0x15e   : > { %1055 = vmatmul.mubr.bf16.gmra.mrb[56].mxu0 %v440_v2  ;;  %v361_v5 = vld [vmem:[%s9549_s7 + $0x438] sm:$0xff]  ;;  %15058 = vst [vmem:[#allocation84_spill] sm:$0xff] %v10545_v6 }
 0x15f   : > { %1695 = vmatmul.mubr.bf16.gmra.mrb[136].mxu1 %v440_v2  ;;  %1062 = vmatprep.mubr.bf16.mxu0 %v445_v59  ;;  %v8673_v2 = vld [vmem:[%s14883_s3 + $0x250] sm:$0xff]  ;;  %v449_v11 = vpack.c.bf16 %v361_v5, %v357_v63  ;;  %v8674_v5 = vld [vmem:[%s14883_s3 + $0x258] sm:$0xff] }
 0x160   : > { %1702 = vmatprep.mubr.bf16.mxu1 %v445_v59  ;;  %v10543_v29 = vpop.permute.xlu1 %4311  ;;  %v8635_v59 = vld [vmem:[%s14882_s2 + $0x260] sm:$0xff]  ;;  %v356_v63 = vld [vmem:[%s9549_s7 + $0x410] sm:$0xff] }
 0x161   : > { %15057 = vst [vmem:[#allocation83_spill] sm:$0xff] %v10543_v29  ;;  %v10559_v48 = vpop.permute.xlu0 %4587  ;;  %4747 = vperm.xlu1 %9282, %v8673_v2   ;;  %4476 = vperm.xlu0 %9281, %v8635_v59  }
 0x162   : > { %v10547_v4 = vpop.f32.mrb[32].mxu1  ;;  %15060 = vst [vmem:[#allocation86_spill] sm:$0xff] %v10559_v48  ;;  %v448_v48 = vpack.c.bf16 %v360_v21, %v356_v63 }
 0x163   : > { %v1458_v10 = vpop.f32.mrb[33].mxu1 }
 0x164   : > { %v10555_v29 = vpop.f32.mrb[34].mxu1  ;;  %v10557_v30 = vpop.permute.xlu1 %4592  ;;  %v8675_v10 = vld [vmem:[%s14883_s3 + $0x260] sm:$0xff] }
 0x165   : > { %15059 = vst [vmem:[#allocation85_spill] sm:$0xff] %v10557_v30  ;;  %v1461_v20 = vpop.f32.mrb[35].mxu1  ;;  %v365_v30 = vld [vmem:[%s9549_s7 + $0x458] sm:$0xff]  ;;  %v10573_v2 = vpop.permute.xlu0 %4316  ;;  %4757 = vperm.xlu1 %9282, %v8675_v10   ;;  %4752 = vperm.xlu0 %9281, %v8674_v5   ;;  %v368_v5 = vld [vmem:[%s9549_s7 + $0x470] sm:$0xff] }
 0x166   : > { %1063 = vmatmul.mubr.bf16.gmra.mrb[60].mxu0 %v444_v54  ;;  %v369_v20 = vld [vmem:[%s9549_s7 + $0x478] sm:$0xff]  ;;  %15062 = vst [vmem:[#allocation88_spill] sm:$0xff] %v10573_v2 }
 0x167   : > { %1703 = vmatmul.mubr.bf16.gmra.mrb[140].mxu1 %v444_v54  ;;  %1070 = vmatprep.mubr.bf16.mxu0 %v449_v11  ;;  %v8637_v54 = vld [vmem:[%s14882_s2 + $0x270] sm:$0xff]  ;;  %v453_v36 = vpack.c.bf16 %v369_v20, %v365_v30  ;;  %v8638_v20 = vld [vmem:[%s14882_s2 + $0x278] sm:$0x1] }
 0x168   : > { %1710 = vmatprep.mubr.bf16.mxu1 %v449_v11  ;;  %v10571_v6 = vpop.permute.xlu1 %4321  ;;  %v8636_v11 = vld [vmem:[%s14882_s2 + $0x268] sm:$0xff]  ;;  %v364_v30 = vld [vmem:[%s9549_s7 + $0x450] sm:$0xff] }
 0x169   : > { %15061 = vst [vmem:[#allocation87_spill] sm:$0xff] %v10571_v6  ;;  %v10587_v21 = vpop.permute.xlu0 %4597  ;;  %4486 = vperm.xlu1 %9282, %v8637_v54   ;;  %4481 = vperm.xlu0 %9281, %v8636_v11   ;;  %v452_v54 = vpack.c.bf16 %v368_v5, %v364_v30  ;;  %v8752_v5 = vld [vmem:[%s14882_s2 + $0x288] sm:$0xff] }
 0x16a   : > { %v10575_v59 = vpop.f32.mrb[36].mxu1  ;;  %15064 = vst [vmem:[#allocation90_spill] sm:$0xff] %v10587_v21 }
 0x16b   : > { %v1466_v32 = vpop.f32.mrb[37].mxu1 }
 0x16c   : > { %v10583_v6 = vpop.f32.mrb[38].mxu1  ;;  %v10585_v10 = vpop.permute.xlu1 %4602  ;;  %v8676_v32 = vld [vmem:[%s14883_s3 + $0x268] sm:$0xff] }
 0x16d   : > { %15063 = vst [vmem:[#allocation89_spill] sm:$0xff] %v10585_v10  ;;  %v1469_v63 = vpop.f32.mrb[39].mxu1  ;;  %v373_v10 = vld [vmem:[%s9549_s7 + $0x498] sm:$0xff]  ;;  %4762 = vperm.xlu1 %9282, %v8676_v32   ;;  %4491 = vperm.xlu0 %9281, %v8638_v20   ;;  %v10606_v51 = vpop.permute.xlu0 %4326  ;;  %v8751_v20 = vld [vmem:[%s14882_s2 + $0x280] sm:$0xff] }
 0x16e   : > { %1071 = vmatmul.mubr.bf16.gmra.mrb[64].mxu0 %v448_v48  ;;  %v377_v63 = vld [vmem:[%s9549_s7 + $0x4b8] sm:$0xff]  ;;  %15066 = vst [vmem:[#allocation92_spill] sm:$0xff] %v10606_v51 }
 0x16f   : > { %1711 = vmatmul.mubr.bf16.gmra.mrb[144].mxu1 %v448_v48  ;;  %1078 = vmatprep.mubr.bf16.mxu0 %v453_v36  ;;  %v8678_v48 = vld [vmem:[%s14883_s3 + $0x278] sm:$0x1]  ;;  %v457_v62 = vpack.c.bf16 %v377_v63, %v373_v10  ;;  %v376_v10 = vld [vmem:[%s9549_s7 + $0x4b0] sm:$0xff] }
 0x170   : > { %1718 = vmatprep.mubr.bf16.mxu1 %v453_v36  ;;  %v10601_v11 = vpop.permute.xlu1 %4331  ;;  %v8677_v36 = vld [vmem:[%s14883_s3 + $0x270] sm:$0xff]  ;;  %v381_v63 = vld [vmem:[%s9549_s7 + $0x4d8] sm:$0xff] }
 0x171   : > { %15065 = vst [vmem:[#allocation91_spill] sm:$0xff] %v10601_v11  ;;  %4772 = vperm.xlu1 %9282, %v8678_v48   ;;  %4767 = vperm.xlu0 %9281, %v8677_v36   ;;  %v461_v55 = vpack.c.bf16 %v381_v63, %v381_v63 }
 0x172   : > { %v10599_v21 = vpop.f32.mrb[40].mxu1 }
 0x173   : > { %v1474_v2 = vpop.f32.mrb[41].mxu1 }
 0x174   : > { %v10611_v32 = vpop.f32.mrb[42].mxu1  ;;  %v372_v2 = vld [vmem:[%s9549_s7 + $0x490] sm:$0xff]  ;;  %v10622_v11 = vpop.permute.xlu1 %4612 }
 0x175   : > { %v1477_v30 = vpop.f32.mrb[43].mxu1  ;;  %15067 = vst [vmem:[#allocation93_spill] sm:$0xff] %v10622_v11  ;;  %6394 = vperm.xlu1 %9282, %v8752_v5   ;;  %v456_v36 = vpack.c.bf16 %v376_v10, %v372_v2  ;;  %6389 = vperm.xlu0 %9281, %v8751_v20   ;;  %v8754_v2 = vld [vmem:[%s14882_s2 + $0x298] sm:$0xff]  ;;  %v8753_v20 = vld [vmem:[%s14882_s2 + $0x290] sm:$0xff] }
 0x176   : > { %1079 = vmatmul.mubr.bf16.gmra.mrb[68].mxu0 %v452_v54  ;;  %v10624_v30 = vpop.permute.xlu0 %4607 }
 0x177   : > { %1719 = vmatmul.mubr.bf16.gmra.mrb[148].mxu1 %v452_v54  ;;  %1086 = vmatprep.mubr.bf16.mxu0 %v457_v62  ;;  %15068 = vst [vmem:[#allocation94_spill] sm:$0xff] %v10624_v30  ;;  %v8792_v54 = vld [vmem:[%s14883_s3 + $0x288] sm:$0xff] }
 0x178   : > { %1726 = vmatprep.mubr.bf16.mxu1 %v457_v62  ;;  %v8791_v62 = vld [vmem:[%s14883_s3 + $0x280] sm:$0xff]  ;;  %v10636_v5 = vpop.permute.xlu1 %4341 }
 0x179   : > { %6675 = vperm.xlu1 %9282, %v8792_v54   ;;  %15069 = vst [vmem:[#allocation95_spill] sm:$0xff] %v10636_v5  ;;  %6670 = vperm.xlu0 %9281, %v8791_v62   ;;  %v8794_v54 = vld [vmem:[%s14883_s3 + $0x298] sm:$0xff] }
 0x17a   : > { %v10626_v48 = vpop.f32.mrb[44].mxu1  ;;  %v10642_v10 = vpop.permute.xlu0 %4336 }
 0x17b   : > { %v1482_v51 = vpop.f32.mrb[45].mxu1  ;;  %15070 = vst [vmem:[#allocation96_spill] sm:$0xff] %v10642_v10 }
 0x17c   : > { %v10634_v49 = vpop.f32.mrb[46].mxu1  ;;  %v380_v51 = vld [vmem:[%s9549_s7 + $0x4d0] sm:$0xff]  ;;  %v10657_v5 = vpop.permute.xlu1 %4622 }
 0x17d   : > { %v1485_v11 = vpop.f32.mrb[47].mxu1  ;;  %6404 = vperm.xlu1 %9282, %v8754_v2   ;;  %v460_v63 = vpack.c.bf16 %v380_v51, %v380_v51  ;;  %6399 = vperm.xlu0 %9281, %v8753_v20   ;;  %15071 = vst [vmem:[#allocation97_spill] sm:$0xff] %v10657_v5  ;;  %v8756_v2 = vld [vmem:[%s14882_s2 + $0x2a8] sm:$0xff]  ;;  %v8755_v51 = vld [vmem:[%s14882_s2 + $0x2a0] sm:$0xff] }
 0x17e   : > { %1087 = vmatmul.mubr.bf16.gmra.mrb[72].mxu0 %v456_v36 }
 0x17f   : > { %1727 = vmatmul.mubr.bf16.gmra.mrb[152].mxu1 %v456_v36  ;;  %1094 = vmatprep.mubr.bf16.mxu0 %v461_v55  ;;  %v8793_v36 = vld [vmem:[%s14883_s3 + $0x290] sm:$0xff] }
 0x180   : > { %1734 = vmatprep.mubr.bf16.mxu1 %v461_v55  ;;  %v10659_v55 = vpop.permute.xlu0 %4617 }
 0x181   : > { %15072 = vst [vmem:[#allocation98_spill] sm:$0xff] %v10659_v55  ;;  %6685 = vperm.xlu1 %9282, %v8794_v54   ;;  %6680 = vperm.xlu0 %9281, %v8793_v36  }
 0x182   : > { %v10647_v11 = vpop.f32.mrb[48].mxu1 }
 0x183   : > { %v1490_v62 = vpop.f32.mrb[49].mxu1 }
 0x184   : > { %v10655_v30 = vpop.f32.mrb[50].mxu1  ;;  %v10669_v62 = vpop.permute.xlu1 %4351 }
 0x185   : > { %v1493_v10 = vpop.f32.mrb[51].mxu1  ;;  %6414 = vperm.xlu1 %9282, %v8756_v2   ;;  %15073 = vst [vmem:[#allocation99_spill] sm:$0xff] %v10669_v62  ;;  %6409 = vperm.xlu0 %9281, %v8755_v51   ;;  %v10674_v36 = vpop.permute.xlu0 %4346  ;;  %v8758_v2 = vld [vmem:[%s14882_s2 + $0x2b8] sm:$0xff]  ;;  %v8757_v51 = vld [vmem:[%s14882_s2 + $0x2b0] sm:$0xff] }
 0x186   : > { %1095 = vmatmul.mubr.bf16.gmra.mrb[76].mxu0 %v460_v63  ;;  %v8796_v10 = vld [vmem:[%s14883_s3 + $0x2a8] sm:$0xff]  ;;  %15074 = vst [vmem:[#allocation100_spill] sm:$0xff] %v10674_v36 }
 0x187   : > { %1735 = vmatmul.mubr.bf16.gmra.mrb[156].mxu1 %v460_v63  ;;  %v8795_v63 = vld [vmem:[%s14883_s3 + $0x2a0] sm:$0xff] }
 0x189   : > { %6695 = vperm.xlu1 %9282, %v8796_v10   ;;  %6690 = vperm.xlu0 %9281, %v8795_v63   ;;  %v10689_v62 = vpop.permute.xlu0 %4627  ;;  %v8797_v63 = vld [vmem:[%s14883_s3 + $0x2b0] sm:$0xff] }
 0x18a   : > { %v10667_v20 = vpop.f32.mrb[52].mxu1  ;;  %15076 = vst [vmem:[#allocation102_spill] sm:$0xff] %v10689_v62 }
 0x18b   : > { %v1498_v54 = vpop.f32.mrb[53].mxu1 }
 0x18c   : > { %v10679_v5 = vpop.f32.mrb[54].mxu1  ;;  %v10687_v54 = vpop.permute.xlu1 %4632 }
 0x18d   : > { %v1501_v55 = vpop.f32.mrb[55].mxu1  ;;  %15075 = vst [vmem:[#allocation101_spill] sm:$0xff] %v10687_v54  ;;  %6424 = vperm.xlu1 %9282, %v8758_v2   ;;  %6419 = vperm.xlu0 %9281, %v8757_v51   ;;  %v8760_v2 = vld [vmem:[%s14882_s2 + $0x2c8] sm:$0xff]  ;;  %v10706_v51 = vpop.permute.xlu0 %4356 }
 0x18e   : > { %v8798_v55 = vld [vmem:[%s14883_s3 + $0x2b8] sm:$0xff]  ;;  %15078 = vst [vmem:[#allocation104_spill] sm:$0xff] %v10706_v51 }
 0x190   : > { %v10701_v54 = vpop.permute.xlu1 %4361 }
 0x191   : > { %6705 = vperm.xlu1 %9282, %v8798_v55   ;;  %15077 = vst [vmem:[#allocation103_spill] sm:$0xff] %v10701_v54  ;;  %6700 = vperm.xlu0 %9281, %v8797_v63   ;;  %v8799_v63 = vld [vmem:[%s14883_s3 + $0x2c0] sm:$0xff]  ;;  %v10723_v22 = vpop.permute.xlu0 %4637 }
 0x192   : > { %v10691_v36 = vpop.f32.mrb[56].mxu1  ;;  %15080 = vst [vmem:[#allocation106_spill] sm:$0xff] %v10723_v22 }
 0x193   : > { %v1506_v10 = vpop.f32.mrb[57].mxu1 }
 0x194   : > { %v10699_v23 = vpop.f32.mrb[58].mxu1  ;;  %v8759_v10 = vld [vmem:[%s14882_s2 + $0x2c0] sm:$0xff]  ;;  %v10721_v51 = vpop.permute.xlu1 %4642 }
 0x195   : > { %v1509_v47 = vpop.f32.mrb[59].mxu1  ;;  %6434 = vperm.xlu1 %9282, %v8760_v2   ;;  %6429 = vperm.xlu0 %9281, %v8759_v10   ;;  %15079 = vst [vmem:[#allocation105_spill] sm:$0xff] %v10721_v51  ;;  %v8762_v2 = vld [vmem:[%s14882_s2 + $0x2d8] sm:$0xff]  ;;  %v8761_v10 = vld [vmem:[%s14882_s2 + $0x2d0] sm:$0xff] }
 0x196   : > { %v8800_v47 = vld [vmem:[%s14883_s3 + $0x2c8] sm:$0xff]  ;;  %v8801_v51 = vld [vmem:[%s14883_s3 + $0x2d0] sm:$0xff] }
 0x198   : > { %v10733_v28 = vpop.permute.xlu1 %4371 }
 0x199   : > { %6715 = vperm.xlu1 %9282, %v8800_v47   ;;  %6710 = vperm.xlu0 %9281, %v8799_v63   ;;  %15081 = vst [vmem:[#allocation107_spill] sm:$0xff] %v10733_v28  ;;  %v10738_v63 = vpop.permute.xlu0 %4366 }
 0x19a   : > { %v10711_v62 = vpop.f32.mrb[60].mxu1  ;;  %15082 = vst [vmem:[#allocation108_spill] sm:$0xff] %v10738_v63 }
 0x19b   : > { %v1514_v55 = vpop.f32.mrb[61].mxu1 }
 0x19c   : > { %v10719_v54 = vpop.f32.mrb[62].mxu1 }
 0x19d   : > { %v1517_v9 = vpop.f32.mrb[63].mxu1  ;;  %6444 = vperm.xlu1 %9282, %v8762_v2   ;;  %6439 = vperm.xlu0 %9281, %v8761_v10   ;;  %v8764_v2 = vld [vmem:[%s14882_s2 + $0x2e8] sm:$0xff]  ;;  %v8763_v10 = vld [vmem:[%s14882_s2 + $0x2e0] sm:$0xff]  ;;  %v10753_v28 = vpop.permute.xlu0 %4647 }
 0x19e   : > { %v8802_v9 = vld [vmem:[%s14883_s3 + $0x2d8] sm:$0xff]  ;;  %15084 = vst [vmem:[#allocation110_spill] sm:$0xff] %v10753_v28 }
 0x1a1   : > { %6725 = vperm.xlu1 %9282, %v8802_v9   ;;  %6720 = vperm.xlu0 %9281, %v8801_v51   ;;  %v8803_v9 = vld [vmem:[%s14883_s3 + $0x2e0] sm:$0xff] }
 0x1a2   : > { %v10731_v55 = vpop.f32.mrb[64].mxu1 }
 0x1a3   : > { %v1522_v47 = vpop.f32.mrb[65].mxu1 }
 0x1a4   : > { %v10743_v22 = vpop.f32.mrb[66].mxu1  ;;  %v10751_v47 = vpop.permute.xlu1 %4652 }
 0x1a5   : > { %v1525_v8 = vpop.f32.mrb[67].mxu1  ;;  %15083 = vst [vmem:[#allocation109_spill] sm:$0xff] %v10751_v47  ;;  %6454 = vperm.xlu1 %9282, %v8764_v2   ;;  %6449 = vperm.xlu0 %9281, %v8763_v10   ;;  %v8766_v2 = vld [vmem:[%s14882_s2 + $0x2f8] sm:$0xff]  ;;  %v10770_v10 = vpop.permute.xlu0 %4376 }
 0x1a6   : > { %v8804_v8 = vld [vmem:[%s14883_s3 + $0x2e8] sm:$0xff]  ;;  %15086 = vst [vmem:[#allocation112_spill] sm:$0xff] %v10770_v10 }
 0x1a8   : > { %v10765_v47 = vpop.permute.xlu1 %4381 }
 0x1a9   : > { %6735 = vperm.xlu1 %9282, %v8804_v8   ;;  %15085 = vst [vmem:[#allocation111_spill] sm:$0xff] %v10765_v47  ;;  %6730 = vperm.xlu0 %9281, %v8803_v9   ;;  %v8805_v9 = vld [vmem:[%s14883_s3 + $0x2f0] sm:$0xff]  ;;  %v10787_v40 = vpop.permute.xlu0 %4657 }
 0x1aa   : > { %v10755_v63 = vpop.f32.mrb[68].mxu1  ;;  %15088 = vst [vmem:[#allocation114_spill] sm:$0xff] %v10787_v40 }
 0x1ab   : > { %v1530_v51 = vpop.f32.mrb[69].mxu1 }
 0x1ac   : > { %v10763_v38 = vpop.f32.mrb[70].mxu1  ;;  %v8765_v51 = vld [vmem:[%s14882_s2 + $0x2f0] sm:$0xff]  ;;  %v10785_v10 = vpop.permute.xlu1 %4662 }
 0x1ad   : > { %v1533_v0 = vpop.f32.mrb[71].mxu1  ;;  %6464 = vperm.xlu1 %9282, %v8766_v2   ;;  %6459 = vperm.xlu0 %9281, %v8765_v51   ;;  %15087 = vst [vmem:[#allocation113_spill] sm:$0xff] %v10785_v10  ;;  %v8768_v2 = vld [vmem:[%s14882_s2 + $0x308] sm:$0xff]  ;;  %v8767_v51 = vld [vmem:[%s14882_s2 + $0x300] sm:$0xff] }
 0x1ae   : > { %v8806_v0 = vld [vmem:[%s14883_s3 + $0x2f8] sm:$0xff]  ;;  %v8807_v10 = vld [vmem:[%s14883_s3 + $0x300] sm:$0xff] }
 0x1b0   : > { %v10797_v50 = vpop.permute.xlu1 %4391 }
 0x1b1   : > { %6745 = vperm.xlu1 %9282, %v8806_v0   ;;  %6740 = vperm.xlu0 %9281, %v8805_v9   ;;  %15089 = vst [vmem:[#allocation115_spill] sm:$0xff] %v10797_v50  ;;  %v10802_v0 = vpop.permute.xlu0 %4386 }
 0x1b2   : > { %v10775_v28 = vpop.f32.mrb[72].mxu1  ;;  %15090 = vst [vmem:[#allocation116_spill] sm:$0xff] %v10802_v0 }
 0x1b3   : > { %v1538_v8 = vpop.f32.mrb[73].mxu1 }
 0x1b4   : > { %v10783_v47 = vpop.f32.mrb[74].mxu1  ;;  %v10813_v50 = vpop.permute.xlu1 %4672 }
 0x1b5   : > { %v1541_v52 = vpop.f32.mrb[75].mxu1  ;;  %6474 = vperm.xlu1 %9282, %v8768_v2   ;;  %6469 = vperm.xlu0 %9281, %v8767_v51   ;;  %v8770_v2 = vld [vmem:[%s14882_s2 + $0x318] sm:$0xff]  ;;  %v8769_v51 = vld [vmem:[%s14882_s2 + $0x310] sm:$0xff]  ;;  %15091 = vst [vmem:[#allocation117_spill] sm:$0xff] %v10813_v50 }
 0x1b6   : > { %v8808_v52 = vld [vmem:[%s14883_s3 + $0x308] sm:$0xff]  ;;  %v8809_v50 = vld [vmem:[%s14883_s3 + $0x310] sm:$0xff] }
 0x1b9   : > { %6755 = vperm.xlu1 %9282, %v8808_v52   ;;  %6750 = vperm.xlu0 %9281, %v8807_v10  }
 0x1ba   : > { %v10795_v8 = vpop.f32.mrb[76].mxu1 }
 0x1bb   : > { %v1546_v9 = vpop.f32.mrb[77].mxu1 }
 0x1bc   : > { %v1547_v40 = vpop.f32.mrb[78].mxu1  ;;  %v10815_v9 = vpop.permute.xlu0 %4667 }
 0x1bd   : > { %v1548_v26 = vpop.f32.mrb[79].mxu1  ;;  %15092 = vst [vmem:[#allocation118_spill] sm:$0xff] %v10815_v9  ;;  %6484 = vperm.xlu1 %9282, %v8770_v2   ;;  %6479 = vperm.xlu0 %9281, %v8769_v51  }
 0x1be   : > { %v8810_v26 = vld [vmem:[%s14883_s3 + $0x318] sm:$0xff] }
 0x1c1   : > { %v944_v0 = vpop.f32.mrb[0].mxu0  ;;  %6765 = vperm.xlu1 %9282, %v8810_v26   ;;  %6760 = vperm.xlu0 %9281, %v8809_v50   ;;  %v8812_v50 = vld [vmem:[%s14883_s3 + $0x328] sm:$0xff] }
 0x1c2   : > { %1743 = vst [vmem:[#allocation3 + $0x1] sm:$0xff] %v944_v0  ;;  %v1584_v42 = vpop.f32.mrb[80].mxu1  ;;  %v946_v40 = vpop.f32.mrb[1].mxu0 }
 0x1c3   : > { %v10821_v10 = vadd.f32 %v1584_v42, %v10319_v16  ;;  %v1586_v52 = vpop.f32.mrb[81].mxu1  ;;  %v947_v24 = vpop.f32.mrb[2].mxu0  ;;  %v8772_v16 = vld [vmem:[%s14882_s2 + $0x328] sm:$0xff]  ;;  %v8771_v42 = vld [vmem:[%s14882_s2 + $0x320] sm:$0xff] }
 0x1c4   : > { %1744 = vst [vmem:[#allocation3 + $0x9] sm:$0xff] %v947_v24  ;;  %v1587_v9 = vpop.f32.mrb[82].mxu1  ;;  %v949_v2 = vpop.f32.mrb[3].mxu0 }
 0x1c5   : > { %v10827_v0 = vadd.f32 %v1587_v9, %v10327_v43  ;;  %v1589_v51 = vpop.f32.mrb[83].mxu1  ;;  %v10835_v40 = vpop.permute.xlu1 %4401  ;;  %6494 = vperm.xlu1 %9282, %v8772_v16   ;;  %6489 = vperm.xlu0 %9281, %v8771_v42  }
 0x1c6   : > { %15093 = vst [vmem:[#allocation119_spill] sm:$0xff] %v10835_v40  ;;  %v10837_v52 = vpop.permute.xlu0 %4396  ;;  %v8811_v40 = vld [vmem:[%s14883_s3 + $0x320] sm:$0xff] }
 0x1c7   : > { %15094 = vst [vmem:[#allocation120_spill] sm:$0xff] %v10837_v52 }
 0x1c9   : > { %v952_v24 = vpop.f32.mrb[4].mxu0  ;;  %6775 = vperm.xlu1 %9282, %v8812_v50   ;;  %6770 = vperm.xlu0 %9281, %v8811_v40   ;;  %v8814_v40 = vld [vmem:[%s14883_s3 + $0x338] sm:$0xff] }
 0x1ca   : > { %1745 = vst [vmem:[#allocation3 + $0x11] sm:$0xff] %v952_v24  ;;  %v1592_v43 = vpop.f32.mrb[84].mxu1  ;;  %v954_v9 = vpop.f32.mrb[5].mxu0 }
 0x1cb   : > { %v10843_v26 = vadd.f32 %v1592_v43, %v10347_v13  ;;  %v1594_v2 = vpop.f32.mrb[85].mxu1  ;;  %v955_v51 = vpop.f32.mrb[6].mxu0  ;;  %v8774_v13 = vld [vmem:[%s14882_s2 + $0x338] sm:$0xff]  ;;  %v8773_v43 = vld [vmem:[%s14882_s2 + $0x330] sm:$0xff] }
 0x1cc   : > { %1746 = vst [vmem:[#allocation3 + $0x19] sm:$0xff] %v955_v51  ;;  %v1595_v52 = vpop.f32.mrb[86].mxu1  ;;  %v957_v16 = vpop.f32.mrb[7].mxu0 }
 0x1cd   : > { %v10849_v24 = vadd.f32 %v1595_v52, %v10355_v46  ;;  %v1597_v42 = vpop.f32.mrb[87].mxu1  ;;  %v10857_v9 = vpop.permute.xlu1 %4682  ;;  %6504 = vperm.xlu1 %9282, %v8774_v13   ;;  %6499 = vperm.xlu0 %9281, %v8773_v43  }
 0x1ce   : > { %15095 = vst [vmem:[#allocation121_spill] sm:$0xff] %v10857_v9  ;;  %v10859_v2 = vpop.permute.xlu0 %4677  ;;  %v8813_v9 = vld [vmem:[%s14883_s3 + $0x330] sm:$0xff] }
 0x1cf   : > { %15096 = vst [vmem:[#allocation122_spill] sm:$0xff] %v10859_v2 }
 0x1d1   : > { %v960_v51 = vpop.f32.mrb[8].mxu0  ;;  %6785 = vperm.xlu1 %9282, %v8814_v40   ;;  %6780 = vperm.xlu0 %9281, %v8813_v9   ;;  %v8816_v9 = vld [vmem:[%s14883_s3 + $0x348] sm:$0xff] }
 0x1d2   : > { %1747 = vst [vmem:[#allocation3 + $0x21] sm:$0xff] %v960_v51  ;;  %v1600_v46 = vpop.f32.mrb[88].mxu1  ;;  %v962_v52 = vpop.f32.mrb[9].mxu0 }
 0x1d3   : > { %v10865_v50 = vadd.f32 %v1600_v46, %v10375_v12  ;;  %v1602_v16 = vpop.f32.mrb[89].mxu1  ;;  %v963_v42 = vpop.f32.mrb[10].mxu0  ;;  %v8776_v12 = vld [vmem:[%s14882_s2 + $0x348] sm:$0xff]  ;;  %v8775_v46 = vld [vmem:[%s14882_s2 + $0x340] sm:$0xff] }
 0x1d4   : > { %1748 = vst [vmem:[#allocation3 + $0x29] sm:$0xff] %v963_v42  ;;  %v1603_v2 = vpop.f32.mrb[90].mxu1  ;;  %v965_v13 = vpop.f32.mrb[11].mxu0 }
 0x1d5   : > { %v10871_v51 = vadd.f32 %v1603_v2, %v10383_v39  ;;  %v1605_v43 = vpop.f32.mrb[91].mxu1  ;;  %v10879_v52 = vpop.permute.xlu1 %4411  ;;  %6514 = vperm.xlu1 %9282, %v8776_v12   ;;  %6509 = vperm.xlu0 %9281, %v8775_v46  }
 0x1d6   : > { %15097 = vst [vmem:[#allocation123_spill] sm:$0xff] %v10879_v52  ;;  %v10881_v16 = vpop.permute.xlu0 %4406  ;;  %v8815_v52 = vld [vmem:[%s14883_s3 + $0x340] sm:$0xff] }
 0x1d7   : > { %15098 = vst [vmem:[#allocation124_spill] sm:$0xff] %v10881_v16 }
 0x1d9   : > { %v968_v42 = vpop.f32.mrb[12].mxu0  ;;  %6795 = vperm.xlu1 %9282, %v8816_v9   ;;  %6790 = vperm.xlu0 %9281, %v8815_v52   ;;  %v8818_v52 = vld [vmem:[%s14883_s3 + $0x358] sm:$0xff] }
 0x1da   : > { %1749 = vst [vmem:[#allocation3 + $0x31] sm:$0xff] %v968_v42  ;;  %v1608_v39 = vpop.f32.mrb[92].mxu1  ;;  %v970_v2 = vpop.f32.mrb[13].mxu0 }
 0x1db   : > { %v10887_v40 = vadd.f32 %v1608_v39, %v10403_v3  ;;  %v1610_v13 = vpop.f32.mrb[93].mxu1  ;;  %v971_v43 = vpop.f32.mrb[14].mxu0  ;;  %v8778_v3 = vld [vmem:[%s14882_s2 + $0x358] sm:$0xff]  ;;  %v8777_v39 = vld [vmem:[%s14882_s2 + $0x350] sm:$0xff] }
 0x1dc   : > { %1750 = vst [vmem:[#allocation3 + $0x39] sm:$0xff] %v971_v43  ;;  %v1611_v16 = vpop.f32.mrb[94].mxu1  ;;  %v973_v12 = vpop.f32.mrb[15].mxu0 }
 0x1dd   : > { %v10893_v42 = vadd.f32 %v1611_v16, %v10411_v53  ;;  %v1613_v46 = vpop.f32.mrb[95].mxu1  ;;  %v10901_v2 = vpop.permute.xlu1 %4692  ;;  %6524 = vperm.xlu1 %9282, %v8778_v3   ;;  %6519 = vperm.xlu0 %9281, %v8777_v39  }
 0x1de   : > { %15099 = vst [vmem:[#allocation125_spill] sm:$0xff] %v10901_v2  ;;  %v10903_v13 = vpop.permute.xlu0 %4687  ;;  %v8817_v2 = vld [vmem:[%s14883_s3 + $0x350] sm:$0xff] }
 0x1df   : > { %15100 = vst [vmem:[#allocation126_spill] sm:$0xff] %v10903_v13 }
 0x1e1   : > { %v976_v43 = vpop.f32.mrb[16].mxu0  ;;  %6805 = vperm.xlu1 %9282, %v8818_v52   ;;  %6800 = vperm.xlu0 %9281, %v8817_v2  }
 0x1e2   : > { %1751 = vst [vmem:[#allocation3 + $0x41] sm:$0xff] %v976_v43  ;;  %v1616_v53 = vpop.f32.mrb[96].mxu1  ;;  %v978_v16 = vpop.f32.mrb[17].mxu0 }
 0x1e3   : > { %v10909_v9 = vadd.f32 %v1616_v53, %v10431_v58  ;;  %v1618_v12 = vpop.f32.mrb[97].mxu1  ;;  %v979_v46 = vpop.f32.mrb[18].mxu0  ;;  %v8780_v58 = vld [vmem:[%s14882_s2 + $0x368] sm:$0xff]  ;;  %v8779_v16 = vld [vmem:[%s14882_s2 + $0x360] sm:$0xff] }
 0x1e4   : > { %1752 = vst [vmem:[#allocation3 + $0x49] sm:$0xff] %v979_v46  ;;  %v1619_v13 = vpop.f32.mrb[98].mxu1  ;;  %v981_v3 = vpop.f32.mrb[19].mxu0  ;;  %v1783_v53 = vld [vmem:[#allocation3 + $0x8] sm:$0xff]  ;;  %v1784_v46 = vld [vmem:[#allocation3 + $0x10] sm:$0xff] }
 0x1e5   : > { %v10915_v43 = vadd.f32 %v1619_v13, %v10443_v44  ;;  %v1621_v39 = vpop.f32.mrb[99].mxu1  ;;  %v10923_v12 = vpop.permute.xlu1 %4421  ;;  %6534 = vperm.xlu1 %9282, %v8780_v58   ;;  %v1782_v44 = vld [vmem:[#allocation3] sm:$0xff]  ;;  %v10928_v13 = vadd.f32 %v1783_v53, %v10827_v0  ;;  %6529 = vperm.xlu0 %9281, %v8779_v16   ;;  %v10940_v0 = vadd.f32 %v1784_v46, %v10843_v26 }
 0x1e6   : > { %15101 = vst [vmem:[#allocation127_spill] sm:$0xff] %v10923_v12  ;;  %v10925_v25 = vpop.permute.xlu0 %4416  ;;  %v8820_v39 = vld [vmem:[%s14883_s3 + $0x368] sm:$0xff]  ;;  %v8819_v58 = vld [vmem:[%s14883_s3 + $0x360] sm:$0xff]  ;;  %v10943_v16 = vadd.f32 %v1782_v44, %v10821_v10  ;;  %v8781_v10 = vld [vmem:[%s14882_s2 + $0x370] sm:$0xff] }
 0x1e7   : > { %15102 = vst [vmem:[#allocation128_spill] sm:$0xff] %v10925_v25 }
 0x1e8   : > { %v1944_v26 = vadd.f32 %v10928_v13, %v10943_v16 }
 0x1e9   : > { %v984_v3 = vpop.f32.mrb[20].mxu0  ;;  %6815 = vperm.xlu1 %9282, %v8820_v39   ;;  %6810 = vperm.xlu0 %9281, %v8819_v58  }
 0x1ea   : > { %1753 = vst [vmem:[#allocation3 + $0x51] sm:$0xff] %v984_v3  ;;  %v1624_v2 = vpop.f32.mrb[100].mxu1  ;;  %v986_v52 = vpop.f32.mrb[21].mxu0  ;;  %v1945_v44 = vadd.f32 %v1944_v26, %v10940_v0 }
 0x1eb   : > { %v10934_v14 = vadd.f32 %v1624_v2, %v10463_v33  ;;  %v1626_v12 = vpop.f32.mrb[101].mxu1  ;;  %v987_v15 = vpop.f32.mrb[22].mxu0  ;;  %v1785_v52 = vld [vmem:[#allocation3 + $0x18] sm:$0xff] }
 0x1ec   : > { %1754 = vst [vmem:[#allocation3 + $0x59] sm:$0xff] %v987_v15  ;;  %v1627_v53 = vpop.f32.mrb[102].mxu1  ;;  %v989_v3 = vpop.f32.mrb[23].mxu0  ;;  %v8782_v12 = vld [vmem:[%s14882_s2 + $0x378] sm:$0xff]  ;;  %v1786_v15 = vld [vmem:[#allocation3 + $0x20] sm:$0xff]  ;;  %v10957_v46 = vadd.f32 %v1785_v52, %v10849_v24  ;;  %v1787_v52 = vld [vmem:[#allocation3 + $0x28] sm:$0xff] }
 0x1ed   : > { %v10946_v25 = vadd.f32 %v1627_v53, %v10471_v18  ;;  %v1629_v33 = vpop.f32.mrb[103].mxu1  ;;  %v10959_v18 = vpop.permute.xlu1 %4702  ;;  %6544 = vperm.xlu1 %9282, %v8782_v12   ;;  %v10965_v58 = vadd.f32 %v1786_v15, %v10865_v50  ;;  %6539 = vperm.xlu0 %9281, %v8781_v10   ;;  %v8822_v24 = vld [vmem:[%s14883_s3 + $0x378] sm:$0xff]  ;;  %v8821_v12 = vld [vmem:[%s14883_s3 + $0x370] sm:$0xff] }
 0x1ee   : > { %15103 = vst [vmem:[#allocation129_spill] sm:$0xff] %v10959_v18  ;;  %v10962_v2 = vpop.permute.xlu0 %4697  ;;  %v1788_v10 = vld [vmem:[#allocation3 + $0x30] sm:$0xff] }
 0x1ef   : > { %15104 = vst [vmem:[#allocation130_spill] sm:$0xff] %v10962_v2 }
 0x1f1   : > { %v992_v39 = vpop.f32.mrb[24].mxu0  ;;  %6825 = vperm.xlu1 %9282, %v8822_v24   ;;  %6820 = vperm.xlu0 %9281, %v8821_v12  }
 0x1f2   : > { %1755 = vst [vmem:[#allocation3 + $0x61] sm:$0xff] %v992_v39  ;;  %v1632_v53 = vpop.f32.mrb[104].mxu1  ;;  %v994_v3 = vpop.f32.mrb[25].mxu0  ;;  %v1946_v39 = vadd.f32 %v1945_v44, %v10957_v46  ;;  %v8783_v44 = vld [vmem:[%s14882_s2 + $0x380] sm:$0xff] }
 0x1f3   : > { %v10971_v33 = vadd.f32 %v1632_v53, %v10491_v45  ;;  %v1634_v26 = vpop.f32.mrb[105].mxu1  ;;  %v995_v18 = vpop.f32.mrb[26].mxu0  ;;  %v10981_v45 = vadd.f32 %v1787_v52, %v10871_v51  ;;  %v8823_v53 = vld [vmem:[%s14883_s3 + $0x380] sm:$0xff] }
 0x1f4   : > { %1756 = vst [vmem:[#allocation3 + $0x69] sm:$0xff] %v995_v18  ;;  %v1635_v50 = vpop.f32.mrb[106].mxu1  ;;  %v997_v15 = vpop.f32.mrb[27].mxu0  ;;  %v1947_v18 = vadd.f32 %v1946_v39, %v10965_v58  ;;  %v10991_v26 = vadd.f32 %v1788_v10, %v10887_v40  ;;  %v1790_v39 = vld [vmem:[#allocation3 + $0x40] sm:$0xff] }
 0x1f5   : > { %v10978_v3 = vadd.f32 %v1635_v50, %v10499_v61  ;;  %v1637_v2 = vpop.f32.mrb[107].mxu1  ;;  %v10993_v61 = vpop.permute.xlu1 %4431  ;;  %6830 = vperm.xlu1 %9282, %v8823_v53   ;;  %6549 = vperm.xlu0 %9281, %v8783_v44   ;;  %v8785_v50 = vld [vmem:[%s14882_s2 + $0x390] sm:$0xff]  ;;  %v8784_v53 = vld [vmem:[%s14882_s2 + $0x388] sm:$0xff] }
 0x1f6   : > { %15105 = vst [vmem:[#allocation131_spill] sm:$0xff] %v10993_v61  ;;  %v1789_v2 = vld [vmem:[#allocation3 + $0x38] sm:$0xff]  ;;  %v10995_v24 = vpop.permute.xlu0 %4426  ;;  %v1948_v15 = vadd.f32 %v1947_v18, %v10981_v45 }
 0x1f7   : > { %15106 = vst [vmem:[#allocation132_spill] sm:$0xff] %v10995_v24 }
 0x1f8   : > { %v1949_v24 = vadd.f32 %v1948_v15, %v10991_v26 }
 0x1f9   : > { %v1000_v51 = vpop.f32.mrb[28].mxu0  ;;  %6559 = vperm.xlu1 %9282, %v8785_v50   ;;  %6554 = vperm.xlu0 %9281, %v8784_v53   ;;  %v8825_v53 = vld [vmem:[%s14883_s3 + $0x390] sm:$0xff] }
 0x1fa   : > { %1757 = vst [vmem:[#allocation3 + $0x71] sm:$0xff] %v1000_v51  ;;  %v1640_v52 = vpop.f32.mrb[108].mxu1  ;;  %v1002_v12 = vpop.f32.mrb[29].mxu0  ;;  %v11008_v51 = vadd.f32 %v1789_v2, %v10893_v42  ;;  %v1791_v42 = vld [vmem:[#allocation3 + $0x48] sm:$0xff] }
 0x1fb   : > { %v11002_v40 = vadd.f32 %v1640_v52, %v10519_v1  ;;  %v1642_v10 = vpop.f32.mrb[109].mxu1  ;;  %v1003_v61 = vpop.f32.mrb[30].mxu0  ;;  %v11015_v1 = vadd.f32 %v1790_v39, %v10909_v9  ;;  %v8786_v52 = vld [vmem:[%s14882_s2 + $0x398] sm:$0xff]  ;;  %v11029_v9 = vadd.f32 %v1791_v42, %v10915_v43  ;;  %v8787_v43 = vld [vmem:[%s14882_s2 + $0x3a0] sm:$0xff] }
 0x1fc   : > { %1758 = vst [vmem:[#allocation3 + $0x79] sm:$0xff] %v1003_v61  ;;  %v1643_v44 = vpop.f32.mrb[110].mxu1  ;;  %v1005_v12 = vpop.f32.mrb[31].mxu0  ;;  %v8824_v61 = vld [vmem:[%s14883_s3 + $0x388] sm:$0xff] }
 0x1fd   : > { %v11012_v18 = vadd.f32 %v1643_v44, %v10527_v19  ;;  %v1645_v7 = vpop.f32.mrb[111].mxu1  ;;  %v11023_v2 = vpop.permute.xlu1 %4712  ;;  %v1950_v19 = vadd.f32 %v1949_v24, %v11008_v51  ;;  %6564 = vperm.xlu1 %9282, %v8786_v52   ;;  %6835 = vperm.xlu0 %9281, %v8824_v61  }
 0x1fe   : > { %15107 = vst [vmem:[#allocation133_spill] sm:$0xff] %v11023_v2  ;;  %v11026_v15 = vpop.permute.xlu0 %4707  ;;  %v1792_v7 = vld [vmem:[#allocation3 + $0x50] sm:$0xff] }
 0x1ff   : > { %15108 = vst [vmem:[#allocation134_spill] sm:$0xff] %v11026_v15  ;;  %v1951_v44 = vadd.f32 %v1950_v19, %v11015_v1  ;;  %v11042_v52 = vadd.f32 %v1792_v7, %v10934_v14  ;;  %v8826_v14 = vld [vmem:[%s14883_s3 + $0x398] sm:$0xff]  ;;  %v1795_v15 = vld [vmem:[#allocation3 + $0x68] sm:$0xff] }
 0x201   : > { %v1008_v50 = vpop.f32.mrb[32].mxu0  ;;  %6840 = vperm.xlu1 %9282, %v8825_v53   ;;  %6569 = vperm.xlu0 %9281, %v8787_v43  }
 0x202   : > { %1759 = vst [vmem:[#allocation3 + $0x81] sm:$0xff] %v1008_v50  ;;  %v1648_v39 = vpop.f32.mrb[112].mxu1  ;;  %v1010_v10 = vpop.f32.mrb[33].mxu0  ;;  %v1793_v50 = vld [vmem:[#allocation3 + $0x58] sm:$0xff] }
 0x203   : > { %v11036_v24 = vadd.f32 %v1648_v39, %v10547_v4  ;;  %v1650_v12 = vpop.f32.mrb[113].mxu1  ;;  %v1011_v2 = vpop.f32.mrb[34].mxu0  ;;  %v8827_v4 = vld [vmem:[%s14883_s3 + $0x3a0] sm:$0xff]  ;;  %v1952_v39 = vadd.f32 %v1951_v44, %v11029_v9  ;;  %v11057_v7 = vadd.f32 %v1793_v50, %v10946_v25 }
 0x204   : > { %1760 = vst [vmem:[#allocation3 + $0x89] sm:$0xff] %v1011_v2  ;;  %v1651_v42 = vpop.f32.mrb[114].mxu1  ;;  %v1013_v61 = vpop.f32.mrb[35].mxu0  ;;  %v1794_v12 = vld [vmem:[#allocation3 + $0x60] sm:$0xff] }
 0x205   : > { %v11045_v10 = vadd.f32 %v1651_v42, %v10555_v29  ;;  %v1653_v19 = vpop.f32.mrb[115].mxu1  ;;  %v11054_v2 = vpop.permute.xlu1 %4441  ;;  %v1953_v29 = vadd.f32 %v1952_v39, %v11042_v52  ;;  %6850 = vperm.xlu1 %9282, %v8827_v4   ;;  %v11063_v42 = vadd.f32 %v1794_v12, %v10971_v33  ;;  %6845 = vperm.xlu0 %9281, %v8826_v14   ;;  %v8788_v4 = vld [vmem:[%s14882_s2 + $0x3a8] sm:$0xff] }
 0x206   : > { %15109 = vst [vmem:[#allocation135_spill] sm:$0xff] %v11054_v2  ;;  %v11060_v53 = vpop.permute.xlu0 %4436  ;;  %v8789_v19 = vld [vmem:[%s14882_s2 + $0x3b0] sm:$0xff] }
 0x207   : > { %15110 = vst [vmem:[#allocation136_spill] sm:$0xff] %v11060_v53  ;;  %v11075_v53 = vadd.f32 %v1795_v15, %v10978_v3  ;;  %v1797_v3 = vld [vmem:[#allocation3 + $0x78] sm:$0xff] }
 0x209   : > { %v1016_v43 = vpop.f32.mrb[36].mxu0  ;;  %6579 = vperm.xlu1 %9282, %v8789_v19   ;;  %6574 = vperm.xlu0 %9281, %v8788_v4   ;;  %v8830_v4 = vld [vmem:[%s14883_s3 + $0x3b8] sm:$0x1] }
 0x20a   : > { %1761 = vst [vmem:[#allocation3 + $0x91] sm:$0xff] %v1016_v43  ;;  %v1656_v44 = vpop.f32.mrb[116].mxu1  ;;  %v1018_v61 = vpop.f32.mrb[37].mxu0  ;;  %v1954_v43 = vadd.f32 %v1953_v29, %v11057_v7  ;;  %v8790_v29 = vld [vmem:[%s14882_s2 + $0x3b8] sm:$0x1] }
 0x20b   : > { %v1657_v25 = vadd.f32 %v1656_v44, %v10575_v59  ;;  %v1658_v50 = vpop.f32.mrb[117].mxu1  ;;  %v1019_v39 = vpop.f32.mrb[38].mxu0  ;;  %v1796_v61 = vld [vmem:[#allocation3 + $0x70] sm:$0xff]  ;;  %v8828_v59 = vld [vmem:[%s14883_s3 + $0x3a8] sm:$0xff] }
 0x20c   : > { %1762 = vst [vmem:[#allocation3 + $0x99] sm:$0xff] %v1019_v39  ;;  %v1659_v33 = vpop.f32.mrb[118].mxu1  ;;  %v1021_v12 = vpop.f32.mrb[39].mxu0  ;;  %v1955_v44 = vadd.f32 %v1954_v43, %v11063_v42 }
 0x20d   : > { %v1660_v14 = vadd.f32 %v1659_v33, %v10583_v6  ;;  %v1661_v2 = vpop.f32.mrb[119].mxu1  ;;  %v11081_v50 = vpop.permute.xlu1 %4722  ;;  %v11089_v6 = vadd.f32 %v1796_v61, %v11002_v40  ;;  %6855 = vperm.xlu1 %9282, %v8828_v59   ;;  %v1798_v12 = vld [vmem:[#allocation3 + $0x80] sm:$0xff]  ;;  %v8829_v40 = vld [vmem:[%s14883_s3 + $0x3b0] sm:$0xff]  ;;  %v11100_v61 = vadd.f32 %v1797_v3, %v11012_v18 }
 0x20e   : > { %15111 = vst [vmem:[#allocation137_spill] sm:$0xff] %v11081_v50  ;;  %v11086_v39 = vpop.permute.xlu0 %4717  ;;  %6584 = vperm.xlu0 %9281, %v8790_v29   ;;  %v1956_v33 = vadd.f32 %v1955_v44, %v11075_v53 }
 0x20f   : > { %15112 = vst [vmem:[#allocation138_spill] sm:$0xff] %v11086_v39 }
 0x211   : > { %v1024_v15 = vpop.f32.mrb[40].mxu0 }
 0x212   : > { %1763 = vst [vmem:[#allocation3 + $0xa1] sm:$0xff] %v1024_v15  ;;  %v1664_v2 = vpop.f32.mrb[120].mxu1  ;;  %v1026_v19 = vpop.f32.mrb[41].mxu0  ;;  %v1957_v15 = vadd.f32 %v1956_v33, %v11089_v6 }
 0x213   : > { %v1665_v43 = vadd.f32 %v1664_v2, %v10599_v21  ;;  %v1666_v50 = vpop.f32.mrb[121].mxu1  ;;  %v1027_v39 = vpop.f32.mrb[42].mxu0  ;;  %v1799_v2 = vld [vmem:[#allocation3 + $0x88] sm:$0xff] }
 0x214   : > { %1764 = vst [vmem:[#allocation3 + $0xa9] sm:$0xff] %v1027_v39  ;;  %v1667_v59 = vpop.f32.mrb[122].mxu1  ;;  %v1029_v29 = vpop.f32.mrb[43].mxu0  ;;  %v11109_v50 = vadd.f32 %v1798_v12, %v11036_v24  ;;  %v1958_v18 = vadd.f32 %v1957_v15, %v11100_v61  ;;  %v1800_v39 = vld [vmem:[#allocation3 + $0x90] sm:$0xff]  ;;  %v1801_v15 = vld [vmem:[#allocation3 + $0x98] sm:$0xff] }
 0x215   : > { %v11103_v19 = vpop.permute.xlu1 %4451  ;;  %v1668_v44 = vadd.f32 %v1667_v59, %v10611_v32  ;;  %v1669_v37 = vpop.f32.mrb[123].mxu1  ;;  %6865 = vperm.xlu1 %9282, %v8830_v4   ;;  %v11113_v29 = vadd.f32 %v1799_v2, %v11045_v10  ;;  %v11117_v24 = vadd.f32 %v1800_v39, %v1657_v25 }
 0x216   : > { %15113 = vst [vmem:[#allocation139_spill] sm:$0xff] %v11103_v19  ;;  %v11106_v21 = vpop.permute.xlu0 %4446  ;;  %6860 = vperm.xlu0 %9281, %v8829_v40   ;;  %v1959_v37 = vadd.f32 %v1958_v18, %v11109_v50 }
 0x217   : > { %15114 = vst [vmem:[#allocation140_spill] sm:$0xff] %v11106_v21 }
 0x218   : > { %v1960_v10 = vadd.f32 %v1959_v37, %v11113_v29 }
 0x219   : > { %v1032_v3 = vpop.f32.mrb[44].mxu0  ;;  %v1802_v2 = vld [vmem:[#allocation3 + $0xa0] sm:$0xff] }
 0x21a   : > { %1765 = vst [vmem:[#allocation3 + $0xb1] sm:$0xff] %v1032_v3  ;;  %v1672_v33 = vpop.f32.mrb[124].mxu1  ;;  %v1034_v19 = vpop.f32.mrb[45].mxu0  ;;  %v11121_v3 = vadd.f32 %v1801_v15, %v1660_v14 }
 0x21b   : > { %v1673_v32 = vadd.f32 %v1672_v33, %v10626_v48  ;;  %v1674_v4 = vpop.f32.mrb[125].mxu1  ;;  %v1035_v59 = vpop.f32.mrb[46].mxu0  ;;  %v1961_v19 = vadd.f32 %v1960_v10, %v11117_v24  ;;  %v11124_v48 = vadd.f32 %v1802_v2, %v1665_v43  ;;  %v1803_v33 = vld [vmem:[#allocation3 + $0xa8] sm:$0xff] }
 0x21c   : > { %1766 = vst [vmem:[#allocation3 + $0xb9] sm:$0xff] %v1035_v59  ;;  %v1675_v12 = vpop.f32.mrb[126].mxu1  ;;  %v1037_v40 = vpop.f32.mrb[47].mxu0  ;;  %v11129_v10 = vadd.f32 %v1803_v33, %v1668_v44 }
 0x21d   : > { %v1676_v21 = vadd.f32 %v1675_v12, %v10634_v49  ;;  %v1677_v41 = vpop.f32.mrb[127].mxu1  ;;  %v1962_v37 = vadd.f32 %v1961_v19, %v11121_v3 }
 0x21f   : > { %v1963_v43 = vadd.f32 %v1962_v37, %v11124_v48 }
 0x221   : > { %v1040_v18 = vpop.f32.mrb[48].mxu0  ;;  %v1804_v14 = vld [vmem:[#allocation3 + $0xb0] sm:$0xff] }
 0x222   : > { %1767 = vst [vmem:[#allocation3 + $0xc1] sm:$0xff] %v1040_v18  ;;  %v1680_v25 = vpop.f32.mrb[128].mxu1  ;;  %v1042_v39 = vpop.f32.mrb[49].mxu0  ;;  %v11132_v2 = vadd.f32 %v1804_v14, %v1673_v32 }
 0x223   : > { %v1681_v4 = vadd.f32 %v1680_v25, %v10647_v11  ;;  %v1682_v59 = vpop.f32.mrb[129].mxu1  ;;  %v1043_v40 = vpop.f32.mrb[50].mxu0  ;;  %v1805_v18 = vld [vmem:[#allocation3 + $0xb8] sm:$0xff] }
 0x224   : > { %1768 = vst [vmem:[#allocation3 + $0xc9] sm:$0xff] %v1043_v40  ;;  %v1683_v41 = vpop.f32.mrb[130].mxu1  ;;  %v1045_v49 = vpop.f32.mrb[51].mxu0  ;;  %v1964_v59 = vadd.f32 %v1963_v43, %v11129_v10 }
 0x225   : > { %v1684_v12 = vadd.f32 %v1683_v41, %v10655_v30  ;;  %v1685_v15 = vpop.f32.mrb[131].mxu1  ;;  %v11136_v30 = vadd.f32 %v1805_v18, %v1676_v21 }
 0x226   : > { %v1965_v32 = vadd.f32 %v1964_v59, %v11132_v2 }
 0x228   : > { %v1966_v43 = vadd.f32 %v1965_v32, %v11136_v30 }
 0x229   : > { %v1048_v39 = vpop.f32.mrb[52].mxu0  ;;  %v1806_v40 = vld [vmem:[#allocation3 + $0xc0] sm:$0xff] }
 0x22a   : > { %1769 = vst [vmem:[#allocation3 + $0xd1] sm:$0xff] %v1048_v39  ;;  %v1688_v11 = vpop.f32.mrb[132].mxu1  ;;  %v1050_v25 = vpop.f32.mrb[53].mxu0  ;;  %v11140_v14 = vadd.f32 %v1806_v40, %v1681_v4 }
 0x22b   : > { %v1689_v19 = vadd.f32 %v1688_v11, %v10667_v20  ;;  %v1690_v49 = vpop.f32.mrb[133].mxu1  ;;  %v1051_v31 = vpop.f32.mrb[54].mxu0  ;;  %v1807_v15 = vld [vmem:[#allocation3 + $0xc8] sm:$0xff] }
 0x22c   : > { %1770 = vst [vmem:[#allocation3 + $0xd9] sm:$0xff] %v1051_v31  ;;  %v1691_v44 = vpop.f32.mrb[134].mxu1  ;;  %v1053_v33 = vpop.f32.mrb[55].mxu0  ;;  %v11143_v20 = vadd.f32 %v1807_v15, %v1684_v12  ;;  %v1967_v31 = vadd.f32 %v1966_v43, %v11140_v14 }
 0x22d   : > { %v1692_v41 = vadd.f32 %v1691_v44, %v10679_v5  ;;  %v1693_v37 = vpop.f32.mrb[135].mxu1 }
 0x22e   : > { %v1968_v12 = vadd.f32 %v1967_v31, %v11143_v20 }
 0x231   : > { %v1808_v39 = vld [vmem:[#allocation3 + $0xd0] sm:$0xff]  ;;  %v1056_v25 = vpop.f32.mrb[56].mxu0 }
 0x232   : > { %1771 = vst [vmem:[#allocation3 + $0xe1] sm:$0xff] %v1056_v25  ;;  %v1696_v21 = vpop.f32.mrb[136].mxu1  ;;  %v1058_v18 = vpop.f32.mrb[57].mxu0  ;;  %v11147_v5 = vadd.f32 %v1808_v39, %v1689_v19 }
 0x233   : > { %v1697_v11 = vadd.f32 %v1696_v21, %v10691_v36  ;;  %v1698_v59 = vpop.f32.mrb[137].mxu1  ;;  %v1059_v49 = vpop.f32.mrb[58].mxu0  ;;  %v1809_v44 = vld [vmem:[#allocation3 + $0xd8] sm:$0xff] }
 0x234   : > { %1772 = vst [vmem:[#allocation3 + $0xe9] sm:$0xff] %v1059_v49  ;;  %v1699_v4 = vpop.f32.mrb[138].mxu1  ;;  %v1061_v40 = vpop.f32.mrb[59].mxu0  ;;  %v11151_v37 = vadd.f32 %v1809_v44, %v1692_v41  ;;  %v1969_v15 = vadd.f32 %v1968_v12, %v11147_v5 }
 0x235   : > { %v1700_v33 = vadd.f32 %v1699_v4, %v10699_v23  ;;  %v1701_v32 = vpop.f32.mrb[139].mxu1 }
 0x236   : > { %v1970_v4 = vadd.f32 %v1969_v15, %v11151_v37 }
 0x239   : > { %v1810_v43 = vld [vmem:[#allocation3 + $0xe0] sm:$0xff]  ;;  %v1064_v25 = vpop.f32.mrb[60].mxu0 }
 0x23a   : > { %v11154_v36 = vadd.f32 %v1810_v43, %v1697_v11  ;;  %1773 = vst [vmem:[#allocation3 + $0xf1] sm:$0xff] %v1064_v25  ;;  %v1704_v19 = vpop.f32.mrb[140].mxu1  ;;  %v1066_v18 = vpop.f32.mrb[61].mxu0 }
 0x23b   : > { %v1811_v39 = vld [vmem:[#allocation3 + $0xe8] sm:$0xff]  ;;  %v1705_v21 = vadd.f32 %v1704_v19, %v10711_v62  ;;  %v1706_v59 = vpop.f32.mrb[141].mxu1  ;;  %v1067_v49 = vpop.f32.mrb[62].mxu0 }
 0x23c   : > { %v1707_v23 = vpop.f32.mrb[142].mxu1  ;;  %1774 = vst [vmem:[#allocation3 + $0xf9] sm:$0xff] %v1067_v49  ;;  %v1069_v31 = vpop.f32.mrb[63].mxu0  ;;  %v11159_v40 = vadd.f32 %v1811_v39, %v1700_v33  ;;  %v1971_v11 = vadd.f32 %v1970_v4, %v11154_v36 }
 0x23d   : > { %v1708_v41 = vadd.f32 %v1707_v23, %v10719_v54  ;;  %v1709_v44 = vpop.f32.mrb[143].mxu1 }
 0x23e   : > { %v1972_v25 = vadd.f32 %v1971_v11, %v11159_v40 }
 0x241   : > { %v1812_v32 = vld [vmem:[#allocation3 + $0xf0] sm:$0xff]  ;;  %v1072_v12 = vpop.f32.mrb[64].mxu0 }
 0x242   : > { %v11162_v43 = vadd.f32 %v1812_v32, %v1705_v21  ;;  %1775 = vst [vmem:[#allocation3 + $0x101] sm:$0xff] %v1072_v12  ;;  %v1712_v62 = vpop.f32.mrb[144].mxu1  ;;  %v1074_v15 = vpop.f32.mrb[65].mxu0 }
 0x243   : > { %v1713_v19 = vadd.f32 %v1712_v62, %v10731_v55  ;;  %v1714_v18 = vpop.f32.mrb[145].mxu1  ;;  %v1813_v59 = vld [vmem:[#allocation3 + $0xf8] sm:$0xff]  ;;  %v1075_v54 = vpop.f32.mrb[66].mxu0 }
 0x244   : > { %v1715_v49 = vpop.f32.mrb[146].mxu1  ;;  %v1973_v33 = vadd.f32 %v1972_v25, %v11162_v43  ;;  %v11167_v39 = vadd.f32 %v1813_v59, %v1708_v41  ;;  %1776 = vst [vmem:[#allocation3 + $0x109] sm:$0xff] %v1075_v54  ;;  %v1077_v21 = vpop.f32.mrb[67].mxu0 }
 0x245   : > { %v1716_v23 = vadd.f32 %v1715_v49, %v10743_v22  ;;  %v1717_v4 = vpop.f32.mrb[147].mxu1 }
 0x246   : > { %v1974_v31 = vadd.f32 %v1973_v33, %v11167_v39 }
 0x249   : > { %v1814_v44 = vld [vmem:[#allocation3 + $0x100] sm:$0xff]  ;;  %v1080_v11 = vpop.f32.mrb[68].mxu0 }
 0x24a   : > { %v11171_v32 = vadd.f32 %v1814_v44, %v1713_v19  ;;  %1777 = vst [vmem:[#allocation3 + $0x111] sm:$0xff] %v1080_v11  ;;  %v1720_v55 = vpop.f32.mrb[148].mxu1  ;;  %v1082_v62 = vpop.f32.mrb[69].mxu0 }
 0x24b   : > { %v1721_v12 = vadd.f32 %v1720_v55, %v10755_v63  ;;  %v1722_v15 = vpop.f32.mrb[149].mxu1  ;;  %v1815_v25 = vld [vmem:[#allocation3 + $0x108] sm:$0xff]  ;;  %v1083_v41 = vpop.f32.mrb[70].mxu0 }
 0x24c   : > { %v1723_v18 = vpop.f32.mrb[150].mxu1  ;;  %v1975_v59 = vadd.f32 %v1974_v31, %v11171_v32  ;;  %v11175_v22 = vadd.f32 %v1815_v25, %v1716_v23  ;;  %1778 = vst [vmem:[#allocation3 + $0x119] sm:$0xff] %v1083_v41  ;;  %v1085_v49 = vpop.f32.mrb[71].mxu0 }
 0x24d   : > { %v1724_v54 = vadd.f32 %v1723_v18, %v10763_v38  ;;  %v1725_v33 = vpop.f32.mrb[151].mxu1 }
 0x24e   : > { %v1976_v19 = vadd.f32 %v1975_v59, %v11175_v22 }
 0x251   : > { %v1816_v21 = vld [vmem:[#allocation3 + $0x110] sm:$0xff]  ;;  %v1088_v4 = vpop.f32.mrb[72].mxu0 }
 0x252   : > { %v1936_v44 = vadd.f32 %v1816_v21, %v1721_v12  ;;  %1779 = vst [vmem:[#allocation3 + $0x121] sm:$0xff] %v1088_v4  ;;  %v1728_v63 = vpop.f32.mrb[152].mxu1  ;;  %v1090_v55 = vpop.f32.mrb[73].mxu0 }
 0x253   : > { %v1729_v11 = vadd.f32 %v1728_v63, %v10775_v28  ;;  %v1730_v62 = vpop.f32.mrb[153].mxu1  ;;  %v1817_v15 = vld [vmem:[#allocation3 + $0x118] sm:$0xff]  ;;  %v1091_v31 = vpop.f32.mrb[74].mxu0 }
 0x254   : > { %v1731_v23 = vpop.f32.mrb[154].mxu1  ;;  %v1977_v25 = vadd.f32 %v1976_v19, %v1936_v44  ;;  %v1937_v41 = vadd.f32 %v1817_v15, %v1724_v54  ;;  %1780 = vst [vmem:[#allocation3 + $0x129] sm:$0xff] %v1091_v31  ;;  %v1093_v18 = vpop.f32.mrb[75].mxu0 }
 0x255   : > { %v1732_v38 = vadd.f32 %v1731_v23, %v10783_v47  ;;  %v1733_v49 = vpop.f32.mrb[155].mxu1 }
 0x256   : > { %v1978_v59 = vadd.f32 %v1977_v25, %v1937_v41  ;;  %v15115_v25 = vmov 0.0  }
 0x259   : > { %v1818_v33 = vld [vmem:[#allocation3 + $0x120] sm:$0xff]  ;;  %v1096_v27 = vpop.f32.mrb[76].mxu0 }
 0x25a   : > { %v1938_v12 = vadd.f32 %v1818_v33, %v1729_v11  ;;  %1781 = vst [vmem:[#allocation3 + $0x131] sm:$0xff] %v1096_v27  ;;  %v1736_v21 = vpop.f32.mrb[156].mxu1  ;;  %v1098_v4 = vpop.f32.mrb[77].mxu0 }
 0x25b   : > { %v1737_v28 = vadd.f32 %v1736_v21, %v10795_v8  ;;  %v1738_v63 = vpop.f32.mrb[157].mxu1  ;;  %v1819_v55 = vld [vmem:[#allocation3 + $0x128] sm:$0xff]  ;;  %v1099_v34 = vpop.f32.mrb[78].mxu0 }
 0x25c   : > { %v1979_v62 = vadd.f32 %v1978_v59, %v1938_v12  ;;  %v1739_v19 = vpop.f32.mrb[158].mxu1  ;;  %v1939_v54 = vadd.f32 %v1819_v55, %v1732_v38  ;;  %v1100_v15 = vpop.f32.mrb[79].mxu0 }
 0x25d   : > { %v1740_v31 = vpop.f32.mrb[159].mxu1 }
 0x25e   : > { %v1980_v47 = vadd.f32 %v1979_v62, %v1939_v54  ;;  %v9347_v62 = vld [vmem:[%s14884_s4] sm:$0xff]   ;;  %v15116_v31 = vmov 0  }
 0x25f   : > { %3652 = vmatpush1.bf16.msra.mxu0 %v9347_v62  ;;  %9173 = vmatpush1.bf16.msra.mxu1 %v9347_v62 }
 0x260   : > { %3653 = vmatprep.subr.bf16.mxu0 %v15116_v31  ;;  %9158 = vmatprep.subr.bf16.mxu1 %v15116_v31 }
 0x261   : > { %v1821_v23 = vld [vmem:[#allocation3 + $0x138] sm:$0x1]  ;;  %v1820_v18 = vld [vmem:[#allocation3 + $0x130] sm:$0xff] }
 0x262   : > { %1861 = vst [vmem:[#allocation3 + $0x138] sm:$0x1] %v15115_v25  ;;  %v1940_v49 = vadd.f32 %v1820_v18, %v1737_v28 }
 0x264   : > { %v1981_v11 = vadd.f32 %v1980_v47, %v1940_v49 }
 0x269   : > { %v1901_v27 = vld [vmem:[#allocation3 + $0x138] sm:$0x1] }
 0x26a   : > { %v1941_v33 = vadd.f32 %v1901_v27, %v1821_v23 }
 0x26c   : > { %v1983_v8 = vsel %vm1982_vm0, %v1941_v33, 0.0 }
 0x26d   : > { %v1984_v21 = vadd.f32 %v1983_v8, %v1981_v11  ;;  %v9350_v11 = vld [vmem:[%s14884_s4 + $0x18] sm:$0xff]  }
 0x26f   : > { %v1985_v4 = vrot.slane %v1984_v21, 4 }
 0x271   : > { %v1986_v59 = vadd.f32 %v1985_v4, %v1984_v21  ;;  %v9351_v21 = vld [vmem:[%s14884_s4 + $0x20] sm:$0xff]  }
 0x273   : > { %v1987_v34 = vrot.slane %v1986_v59, 2 }
 0x275   : > { %v1988_v63 = vadd.f32 %v1987_v34, %v1986_v59 }
 0x277   : > { %v1989_v38 = vrot.slane %v1988_v63, 1 }
 0x279   : > { %v1990_v55 = vadd.f32 %v1989_v38, %v1988_v63 }
 0x27b   : > { %v11184_v19 = vmul.f32 0.0031948881, %v1990_v55 }
 0x27d   : > { %v11191_v28 = vsub.f32 %v11162_v43, %v11184_v19  ;;  %v11195_v15 = vsub.f32 %v11167_v39, %v11184_v19  ;;  %v11200_v47 = vsub.f32 %v11171_v32, %v11184_v19  ;;  %v11204_v23 = vsub.f32 %v11175_v22, %v11184_v19  ;;  %v9348_v39 = vld [vmem:[%s14884_s4 + $0x8] sm:$0xff]  }
 0x27e   : > { %v11207_v18 = vsub.f32 %v1936_v44, %v11184_v19  ;;  %v11210_v43 = vsub.f32 %v1937_v41, %v11184_v19  ;;  %v11216_v25 = vsub.f32 %v1938_v12, %v11184_v19  ;;  %v11219_v32 = vsub.f32 %v1939_v54, %v11184_v19  ;;  %3654 = vmatpush1.bf16.msra.mxu0 %v9348_v39  ;;  %v9349_v54 = vld [vmem:[%s14884_s4 + $0x10] sm:$0xff]  }
 0x27f   : > { %v11222_v22 = vsub.f32 %v1940_v49, %v11184_v19  ;;  %v11225_v44 = vsub.f32 %v1941_v33, %v11184_v19  ;;  %3655 = vmatprep.subr.bf16.mxu0 %v15116_v31  ;;  %v11231_v41 = vsub.f32 %v10943_v16, %v11184_v19  ;;  %v11235_v12 = vsub.f32 %v10928_v13, %v11184_v19 }
 0x280   : > { %9174 = vmatpush1.bf16.msra.mxu1 %v9348_v39  ;;  %v11244_v49 = vsub.f32 %v10940_v0, %v11184_v19  ;;  %v11256_v27 = vsub.f32 %v10957_v46, %v11184_v19  ;;  %v11261_v0 = vsub.f32 %v10965_v58, %v11184_v19  ;;  %v11271_v46 = vsub.f32 %v10981_v45, %v11184_v19  ;;  %v9352_v45 = vld [vmem:[%s14884_s4 + $0x28] sm:$0xff]  }
 0x281   : > { %9159 = vmatprep.subr.bf16.mxu1 %v15116_v31  ;;  %v2033_v16 = vmul.f32 %v11231_v41, %v11231_v41  ;;  %v2034_v13 = vmul.f32 %v11235_v12, %v11235_v12  ;;  %v11278_v59 = vsub.f32 %v10991_v26, %v11184_v19  ;;  %v11288_v38 = vsub.f32 %v11008_v51, %v11184_v19  ;;  %v9353_v51 = vld [vmem:[%s14884_s4 + $0x30] sm:$0xff]  }
 0x282   : > { %3656 = vmatpush1.bf16.msra.mxu0 %v9349_v54  ;;  %v2035_v33 = vmul.f32 %v11244_v49, %v11244_v49  ;;  %v2036_v4 = vmul.f32 %v11256_v27, %v11256_v27  ;;  %v2037_v34 = vmul.f32 %v11261_v0, %v11261_v0  ;;  %v2038_v55 = vmul.f32 %v11271_v46, %v11271_v46 }
 0x283   : > { %3657 = vmatprep.subr.bf16.mxu0 %v15116_v31  ;;  %v2073_v8 = vadd.f32 %v2034_v13, %v2033_v16  ;;  %15117 = vst [vmem:[#allocation141_spill] sm:$0xff] %v11278_v59  ;;  %15118 = vst [vmem:[#allocation142_spill] sm:$0xff] %v11288_v38  ;;  %v11295_v62 = vsub.f32 %v11015_v1, %v11184_v19  ;;  %v2039_v39 = vmul.f32 %v11278_v59, %v11278_v59 }
 0x284   : > { %9175 = vmatpush1.bf16.msra.mxu1 %v9349_v54  ;;  %v11305_v16 = vsub.f32 %v11029_v9, %v11184_v19  ;;  %v2040_v13 = vmul.f32 %v11288_v38, %v11288_v38  ;;  %v9354_v9 = vld [vmem:[%s14884_s4 + $0x38] sm:$0xff]  }
 0x285   : > { %9160 = vmatprep.subr.bf16.mxu1 %v15116_v31  ;;  %v2074_v58 = vadd.f32 %v2073_v8, %v2035_v33  ;;  %15119 = vst [vmem:[#allocation143_spill] sm:$0xff] %v11295_v62  ;;  %v2041_v33 = vmul.f32 %v11295_v62, %v11295_v62 }
 0x286   : > { %3658 = vmatpush1.bf16.msra.mxu0 %v9350_v11  ;;  %15120 = vst [vmem:[#allocation144_spill] sm:$0xff] %v11305_v16 }
 0x287   : > { %3659 = vmatprep.subr.bf16.mxu0 %v15116_v31  ;;  %v2075_v63 = vadd.f32 %v2074_v58, %v2036_v4  ;;  %v2042_v4 = vmul.f32 %v11305_v16, %v11305_v16  ;;  %v11329_v58 = vsub.f32 %v11063_v42, %v11184_v19 }
 0x288   : > { %9176 = vmatpush1.bf16.msra.mxu1 %v9350_v11  ;;  %v11312_v11 = vsub.f32 %v11042_v52, %v11184_v19 }
 0x289   : > { %9161 = vmatprep.subr.bf16.mxu1 %v15116_v31  ;;  %v2076_v26 = vadd.f32 %v2075_v63, %v2037_v34 }
 0x28a   : > { %3660 = vmatpush1.bf16.msra.mxu0 %v9351_v21  ;;  %15121 = vst [vmem:[#allocation145_spill] sm:$0xff] %v11312_v11  ;;  %v2043_v34 = vmul.f32 %v11312_v11, %v11312_v11 }
 0x28b   : > { %3661 = vmatprep.subr.bf16.mxu0 %v15116_v31  ;;  %v2077_v54 = vadd.f32 %v2076_v26, %v2038_v55  ;;  %v11346_v26 = vsub.f32 %v11089_v6, %v11184_v19 }
 0x28c   : > { %9177 = vmatpush1.bf16.msra.mxu1 %v9351_v21  ;;  %v11322_v21 = vsub.f32 %v11057_v7, %v11184_v19  ;;  %v9355_v7 = vld [vmem:[%s14884_s4 + $0x40] sm:$0xff]  }
 0x28d   : > { %9162 = vmatprep.subr.bf16.mxu1 %v15116_v31  ;;  %v2078_v1 = vadd.f32 %v2077_v54, %v2039_v39  ;;  %v2045_v39 = vmul.f32 %v11329_v58, %v11329_v58 }
 0x28e   : > { %3662 = vmatpush1.bf16.msra.mxu0 %v9352_v45  ;;  %v2044_v55 = vmul.f32 %v11322_v21, %v11322_v21 }
 0x28f   : > { %3663 = vmatprep.subr.bf16.mxu0 %v15116_v31  ;;  %v2079_v8 = vadd.f32 %v2078_v1, %v2040_v13  ;;  %v11363_v1 = vsub.f32 %v11109_v50, %v11184_v19 }
 0x290   : > { %9178 = vmatpush1.bf16.msra.mxu1 %v9352_v45  ;;  %v11339_v45 = vsub.f32 %v11075_v53, %v11184_v19  ;;  %v9356_v53 = vld [vmem:[%s14884_s4 + $0x48] sm:$0xff]  }
 0x291   : > { %9163 = vmatprep.subr.bf16.mxu1 %v15116_v31  ;;  %v2080_v52 = vadd.f32 %v2079_v8, %v2041_v33  ;;  %v2047_v33 = vmul.f32 %v11346_v26, %v11346_v26 }
 0x292   : > { %3664 = vmatpush1.bf16.msra.mxu0 %v9353_v51  ;;  %v2046_v13 = vmul.f32 %v11339_v45, %v11339_v45 }
 0x293   : > { %3665 = vmatprep.subr.bf16.mxu0 %v15116_v31  ;;  %v2081_v63 = vadd.f32 %v2080_v52, %v2042_v4  ;;  %v11380_v52 = vsub.f32 %v11117_v24, %v11184_v19 }
 0x294   : > { %9179 = vmatpush1.bf16.msra.mxu1 %v9353_v51  ;;  %v11356_v51 = vsub.f32 %v11100_v61, %v11184_v19  ;;  %v9357_v61 = vld [vmem:[%s14884_s4 + $0x50] sm:$0xff]  }
 0x295   : > { %9164 = vmatprep.subr.bf16.mxu1 %v15116_v31  ;;  %v2082_v42 = vadd.f32 %v2081_v63, %v2043_v34  ;;  %v2049_v34 = vmul.f32 %v11363_v1, %v11363_v1 }
 0x296   : > { %3666 = vmatpush1.bf16.msra.mxu0 %v9354_v9  ;;  %v2048_v4 = vmul.f32 %v11356_v51, %v11356_v51 }
 0x297   : > { %3667 = vmatprep.subr.bf16.mxu0 %v15116_v31  ;;  %v2083_v54 = vadd.f32 %v2082_v42, %v2044_v55  ;;  %v11397_v42 = vsub.f32 %v11124_v48, %v11184_v19 }
 0x298   : > { %9180 = vmatpush1.bf16.msra.mxu1 %v9354_v9  ;;  %v11373_v9 = vsub.f32 %v11113_v29, %v11184_v19  ;;  %v9358_v29 = vld [vmem:[%s14884_s4 + $0x58] sm:$0xff]  }
 0x299   : > { %9165 = vmatprep.subr.bf16.mxu1 %v15116_v31  ;;  %v2084_v6 = vadd.f32 %v2083_v54, %v2045_v39  ;;  %v2051_v39 = vmul.f32 %v11380_v52, %v11380_v52 }
 0x29a   : > { %3668 = vmatpush1.bf16.msra.mxu0 %v9355_v7  ;;  %v2050_v55 = vmul.f32 %v11373_v9, %v11373_v9 }
 0x29b   : > { %3669 = vmatprep.subr.bf16.mxu0 %v15116_v31  ;;  %v2085_v8 = vadd.f32 %v2084_v6, %v2046_v13  ;;  %v11414_v6 = vsub.f32 %v11132_v2, %v11184_v19 }
 0x29c   : > { %9181 = vmatpush1.bf16.msra.mxu1 %v9355_v7  ;;  %v11390_v7 = vsub.f32 %v11121_v3, %v11184_v19  ;;  %v9359_v3 = vld [vmem:[%s14884_s4 + $0x60] sm:$0xff]  }
 0x29d   : > { %9166 = vmatprep.subr.bf16.mxu1 %v15116_v31  ;;  %v2086_v50 = vadd.f32 %v2085_v8, %v2047_v33  ;;  %v2053_v33 = vmul.f32 %v11397_v42, %v11397_v42 }
 0x29e   : > { %3670 = vmatpush1.bf16.msra.mxu0 %v9356_v53  ;;  %v2052_v13 = vmul.f32 %v11390_v7, %v11390_v7 }
 0x29f   : > { %3671 = vmatprep.subr.bf16.mxu0 %v15116_v31  ;;  %v2087_v63 = vadd.f32 %v2086_v50, %v2048_v4  ;;  %v11431_v50 = vsub.f32 %v11140_v14, %v11184_v19 }
 0x2a0   : > { %9182 = vmatpush1.bf16.msra.mxu1 %v9356_v53  ;;  %v11407_v53 = vsub.f32 %v11129_v10, %v11184_v19  ;;  %v9360_v10 = vld [vmem:[%s14884_s4 + $0x68] sm:$0xff]  }
 0x2a1   : > { %9167 = vmatprep.subr.bf16.mxu1 %v15116_v31  ;;  %v2088_v24 = vadd.f32 %v2087_v63, %v2049_v34  ;;  %v2055_v34 = vmul.f32 %v11414_v6, %v11414_v6 }
 0x2a2   : > { %3672 = vmatpush1.bf16.msra.mxu0 %v9357_v61  ;;  %v2054_v4 = vmul.f32 %v11407_v53, %v11407_v53 }
 0x2a3   : > { %3673 = vmatprep.subr.bf16.mxu0 %v15116_v31  ;;  %v2089_v54 = vadd.f32 %v2088_v24, %v2050_v55  ;;  %v11448_v24 = vsub.f32 %v11147_v5, %v11184_v19 }
 0x2a4   : > { %9183 = vmatpush1.bf16.msra.mxu1 %v9357_v61  ;;  %v11424_v61 = vsub.f32 %v11136_v30, %v11184_v19  ;;  %v9361_v30 = vld [vmem:[%s14884_s4 + $0x70] sm:$0xff]  }
 0x2a5   : > { %9168 = vmatprep.subr.bf16.mxu1 %v15116_v31  ;;  %v2090_v48 = vadd.f32 %v2089_v54, %v2051_v39  ;;  %v2057_v39 = vmul.f32 %v11431_v50, %v11431_v50 }
 0x2a6   : > { %3674 = vmatpush1.bf16.msra.mxu0 %v9358_v29  ;;  %v2056_v55 = vmul.f32 %v11424_v61, %v11424_v61 }
 0x2a7   : > { %3675 = vmatprep.subr.bf16.mxu0 %v15116_v31  ;;  %v2091_v8 = vadd.f32 %v2090_v48, %v2052_v13  ;;  %v11464_v48 = vsub.f32 %v11154_v36, %v11184_v19 }
 0x2a8   : > { %9184 = vmatpush1.bf16.msra.mxu1 %v9358_v29  ;;  %v11441_v29 = vsub.f32 %v11143_v20, %v11184_v19  ;;  %v9362_v20 = vld [vmem:[%s14884_s4 + $0x78] sm:$0xff]  }
 0x2a9   : > { %9169 = vmatprep.subr.bf16.mxu1 %v15116_v31  ;;  %v2092_v2 = vadd.f32 %v2091_v8, %v2053_v33  ;;  %v2059_v33 = vmul.f32 %v11448_v24, %v11448_v24 }
 0x2aa   : > { %3676 = vmatpush1.bf16.msra.mxu0 %v9359_v3  ;;  %v2058_v13 = vmul.f32 %v11441_v29, %v11441_v29 }
 0x2ab   : > { %3677 = vmatprep.subr.bf16.mxu0 %v15116_v31  ;;  %v2093_v63 = vadd.f32 %v2092_v2, %v2054_v4  ;;  %v2061_v2 = vmul.f32 %v11464_v48, %v11464_v48 }
 0x2ac   : > { %9185 = vmatpush1.bf16.msra.mxu1 %v9359_v3  ;;  %v11458_v3 = vsub.f32 %v11151_v37, %v11184_v19 }
 0x2ad   : > { %9170 = vmatprep.subr.bf16.mxu1 %v15116_v31  ;;  %v2094_v14 = vadd.f32 %v2093_v63, %v2055_v34 }
 0x2ae   : > { %3678 = vmatpush1.bf16.msra.mxu0 %v9360_v10  ;;  %v2060_v37 = vmul.f32 %v11458_v3, %v11458_v3 }
 0x2af   : > { %3679 = vmatprep.subr.bf16.mxu0 %v15116_v31  ;;  %v2095_v54 = vadd.f32 %v2094_v14, %v2056_v55  ;;  %v11485_v14 = vld [vmem:[%s14884_s4 + $0x80] sm:$0xff]  }
 0x2b0   : > { %9186 = vmatpush1.bf16.msra.mxu1 %v9360_v10  ;;  %v11470_v10 = vsub.f32 %v11159_v40, %v11184_v19  ;;  %v2064_v40 = vmul.f32 %v11195_v15, %v11195_v15  ;;  %15122 = vst [vmem:[#allocation146_spill] sm:$0xff] %v11485_v14 }
 0x2b1   : > { %9171 = vmatprep.subr.bf16.mxu1 %v15116_v31  ;;  %v2096_v5 = vadd.f32 %v2095_v54, %v2057_v39  ;;  %v2065_v39 = vmul.f32 %v11200_v47, %v11200_v47 }
 0x2b2   : > { %3680 = vmatpush1.bf16.msra.mxu0 %v9361_v30  ;;  %v2062_v36 = vmul.f32 %v11470_v10, %v11470_v10 }
 0x2b3   : > { %3681 = vmatprep.subr.bf16.mxu0 %v15116_v31  ;;  %v2097_v8 = vadd.f32 %v2096_v5, %v2058_v13  ;;  %v2067_v5 = vmul.f32 %v11207_v18, %v11207_v18 }
 0x2b4   : > { %9187 = vmatpush1.bf16.msra.mxu1 %v9361_v30  ;;  %v2063_v30 = vmul.f32 %v11191_v28, %v11191_v28 }
 0x2b5   : > { %9172 = vmatprep.subr.bf16.mxu1 %v15116_v31  ;;  %v2098_v4 = vadd.f32 %v2097_v8, %v2059_v33  ;;  %v2068_v8 = vmul.f32 %v11210_v43, %v11210_v43 }
 0x2b6   : > { %3682 = vmatpush1.bf16.msra.mxu0 %v9362_v20 }
 0x2b7   : > { %v2099_v34 = vadd.f32 %v2098_v4, %v2060_v37  ;;  %v2069_v4 = vmul.f32 %v11216_v25, %v11216_v25 }
 0x2b8   : > { %9188 = vmatpush1.bf16.msra.mxu1 %v9362_v20  ;;  %v2066_v20 = vmul.f32 %v11204_v23, %v11204_v23 }
 0x2b9   : > { %v2100_v63 = vadd.f32 %v2099_v34, %v2061_v2  ;;  %8989 = vmatprep.subr.bf16.mxu1 %v11485_v14  ;;  %v2070_v34 = vmul.f32 %v11219_v32, %v11219_v32 }
 0x2bb   : > { %v2101_v55 = vadd.f32 %v2100_v63, %v2062_v36  ;;  %v2072_v63 = vmul.f32 %v11225_v44, %v11225_v44 }
 0x2bd   : > { %v2102_v19 = vadd.f32 %v2101_v55, %v2063_v30  ;;  %v2071_v30 = vmul.f32 %v11222_v22, %v11222_v22 }
 0x2bf   : > { %v2103_v54 = vadd.f32 %v2102_v19, %v2064_v40  ;;  %v2111_v19 = vsel %vm1982_vm0, %v2072_v63, 0.0 }
 0x2c1   : > { %v2104_v13 = vadd.f32 %v2103_v54, %v2065_v39 }
 0x2c3   : > { %v2105_v33 = vadd.f32 %v2104_v13, %v2066_v20 }
 0x2c5   : > { %v2106_v37 = vadd.f32 %v2105_v33, %v2067_v5 }
 0x2c7   : > { %v2107_v2 = vadd.f32 %v2106_v37, %v2068_v8 }
 0x2c9   : > { %v2108_v36 = vadd.f32 %v2107_v2, %v2069_v4 }
 0x2cb   : > { %v2109_v55 = vadd.f32 %v2108_v36, %v2070_v34 }
 0x2cd   : > { %v2110_v40 = vadd.f32 %v2109_v55, %v2071_v30 }
 0x2cf   : > { %v2112_v39 = vadd.f32 %v2111_v19, %v2110_v40  ;;  %v15124_v19 = vld [vmem:[#allocation46_spill] sm:$0xff] }
 0x2d1   : > { %v2113_v54 = vrot.slane %v2112_v39, 4 }
 0x2d3   : > { %v2114_v20 = vadd.f32 %v2113_v54, %v2112_v39 }
 0x2d5   : > { %v2115_v13 = vrot.slane %v2114_v20, 2 }
 0x2d7   : > { %v2116_v5 = vadd.f32 %v2115_v13, %v2114_v20 }
 0x2d9   : > { %v2117_v33 = vrot.slane %v2116_v5, 1 }
 0x2db   : > { %v2118_v8 = vadd.f32 %v2117_v33, %v2116_v5 }
 0x2dd   : > { %v2119_v37 = vmul.f32 0.0031948881, %v2118_v8 }
 0x2df   : > { %v2120_v31 = vadd.f32 1e-05, %v2119_v37 }
 0x2e1   : > { %9419 = vrsqrt.f32 %v2120_v31 }
 0x2eb   : > { %v11505_v4 = vpop.eup %9419 }
 0x2ec   : > { %15123 = vst [vmem:[#allocation147_spill] sm:$0xff] %v11505_v4  ;;  %v2159_v2 = vmul.f32 %v11505_v4, %v11219_v32  ;;  %v2160_v34 = vmul.f32 %v11505_v4, %v11222_v22  ;;  %v2161_v36 = vmul.f32 %v11505_v4, %v11225_v44  ;;  %v2123_v33 = vmul.f32 %v11505_v4, %v11235_v12 }
 0x2ed   : > { %v2124_v8 = vmul.f32 %v11505_v4, %v11244_v49  ;;  %v2125_v37 = vmul.f32 %v11505_v4, %v11256_v27  ;;  %v2134_v12 = vmul.f32 %v11505_v4, %v11329_v58  ;;  %v2135_v49 = vmul.f32 %v11505_v4, %v11339_v45 }
 0x2ee   : > { %v2439_v63 = vmul.f32 %v10205_v57, %v2159_v2  ;;  %v2440_v30 = vmul.f32 %v10255_v60, %v2160_v34  ;;  %v2441_v55 = vmul.f32 %v10253_v56, %v2161_v36  ;;  %v11537_v2 = vmul.f32 %v11505_v4, %v11261_v0 }
 0x2ef   : > { %v11541_v34 = vmul.f32 %v11505_v4, %v11271_v46  ;;  %v2136_v27 = vmul.f32 %v11505_v4, %v11346_v26  ;;  %v2137_v0 = vmul.f32 %v11505_v4, %v11356_v51  ;;  %v2138_v36 = vmul.f32 %v11505_v4, %v11363_v1 }
 0x2f0   : > { %v2719_v40 = vadd.f32 %v10229_v17, %v2439_v63  ;;  %v2720_v31 = vadd.f32 %v10279_v35, %v2440_v30  ;;  %v2721_v39 = vadd.f32 %v15124_v19, %v2441_v55  ;;  %v2122_v35 = vmul.f32 %v11505_v4, %v11231_v41  ;;  %v15126_v63 = vld [vmem:[#allocation5_spill] sm:$0xff]  ;;  %v15127_v30 = vld [vmem:[#allocation7_spill] sm:$0xff] }
 0x2f1   : > { %v2133_v41 = vmul.f32 %v11505_v4, %v11322_v21  ;;  %v2139_v46 = vmul.f32 %v11505_v4, %v11373_v9  ;;  %v2140_v21 = vmul.f32 %v11505_v4, %v11380_v52  ;;  %v2141_v58 = vmul.f32 %v11505_v4, %v11390_v7 }
 0x2f2   : > { %v2759_v54 = vmul.f32 0.2, %v2719_v40  ;;  %v2760_v32 = vmul.f32 0.2, %v2720_v31  ;;  %v2761_v20 = vmul.f32 0.2, %v2721_v39  ;;  %v2142_v45 = vmul.f32 %v11505_v4, %v11397_v42 }
 0x2f3   : > { %v2143_v26 = vmul.f32 %v11505_v4, %v11407_v53  ;;  %v2144_v51 = vmul.f32 %v11505_v4, %v11414_v6  ;;  %v2145_v1 = vmul.f32 %v11505_v4, %v11424_v61  ;;  %v2146_v9 = vmul.f32 %v11505_v4, %v11431_v50 }
 0x2f4   : > { %v11519_v13 = vmax.f32 %v2719_v40, %v2759_v54  ;;  %v2800_v22 = vmax.f32 %v2720_v31, %v2760_v32  ;;  %v2801_v5 = vmax.f32 %v2721_v39, %v2761_v20  ;;  %v2147_v52 = vmul.f32 %v11505_v4, %v11441_v29  ;;  %v15132_v54 = vld [vmem:[#allocation44_spill] sm:$0xff]  ;;  %v15133_v32 = vld [vmem:[#allocation50_spill] sm:$0xff] }
 0x2f5   : > { %v2148_v7 = vmul.f32 %v11505_v4, %v11448_v24  ;;  %v2149_v42 = vmul.f32 %v11505_v4, %v11458_v3  ;;  %v2150_v53 = vmul.f32 %v11505_v4, %v11464_v48  ;;  %v2151_v6 = vmul.f32 %v11505_v4, %v11470_v10 }
 0x2f6   : > { %15125 = vst [vmem:[#allocation46_spill] sm:$0xff] %v11519_v13  ;;  %2840 = vst [vmem:[#allocation2 + $0x398] sm:$0xff] %v2800_v22  ;;  %v14890_v57 = vrot.slane %v11519_v13, 7  ;;  %v2957_v44 = vrot.slane %v2800_v22, 7  ;;  %v2959_v60 = vrot.slane %v2801_v5, 7  ;;  %v2152_v61 = vmul.f32 %v11505_v4, %v11191_v28 }
 0x2f7   : > { %2839 = vst [vmem:[#allocation2 + $0x380] sm:$0xff] %v11519_v13  ;;  %2841 = vst [vmem:[#allocation2 + $0x3b0] sm:$0x1] %v2801_v5  ;;  %v2153_v50 = vmul.f32 %v11505_v4, %v11195_v15  ;;  %v2154_v29 = vmul.f32 %v11505_v4, %v11200_v47  ;;  %v2155_v24 = vmul.f32 %v11505_v4, %v11204_v23  ;;  %v15128_v15 = vld [vmem:[#allocation9_spill] sm:$0xff]  ;;  %v15129_v47 = vld [vmem:[#allocation8_spill] sm:$0xff] }
 0x2f8   : > { %v2958_v17 = vsel %vm1982_vm0, %v14890_v57, %v2957_v44  ;;  %v2960_v56 = vsel %vm1982_vm0, %v2957_v44, %v2959_v60  ;;  %v2156_v3 = vmul.f32 %v11505_v4, %v11207_v18  ;;  %v2157_v48 = vmul.f32 %v11505_v4, %v11210_v43  ;;  %v15130_v23 = vld [vmem:[#allocation39_spill] sm:$0xff]  ;;  %v15131_v18 = vld [vmem:[#allocation45_spill] sm:$0xff]  ;;  %v15135_v5 = vld [vmem:[#allocation54_spill] sm:$0xff] }
 0x2f9   : > { %3039 = vst [vmem:[#allocation2 + $0x390] sm:$0xff] %v2958_v17  ;;  %3040 = vst [vmem:[#allocation2 + $0x3a8] sm:$0x3] %v2960_v56  ;;  %v2158_v10 = vmul.f32 %v11505_v4, %v11216_v25  ;;  %v2402_v28 = vmul.f32 %v15126_v63, %v2122_v35  ;;  %v2403_v55 = vmul.f32 %v15127_v30, %v2123_v33  ;;  %v15134_v25 = vld [vmem:[#allocation49_spill] sm:$0xff]  ;;  %v15137_v56 = vld [vmem:[#allocation58_spill] sm:$0xff] }
 0x2fa   : > { %v11598_v40 = vmul.f32 %v15128_v15, %v2124_v8  ;;  %v11601_v31 = vmul.f32 %v15129_v47, %v2125_v37  ;;  %v11604_v19 = vmul.f32 %v15130_v23, %v2133_v41  ;;  %v2414_v39 = vmul.f32 %v15131_v18, %v2134_v12  ;;  %v15136_v60 = vld [vmem:[#allocation53_spill] sm:$0xff]  ;;  %v15139_v37 = vld [vmem:[#allocation62_spill] sm:$0xff]  ;;  %v15143_v23 = vld [vmem:[#allocation68_spill] sm:$0xff] }
 0x2fb   : > { %v2415_v43 = vmul.f32 %v15132_v54, %v2135_v49  ;;  %v2416_v20 = vmul.f32 %v15133_v32, %v2136_v27  ;;  %v2417_v22 = vmul.f32 %v15134_v25, %v2137_v0  ;;  %v2418_v44 = vmul.f32 %v15135_v5, %v2138_v36  ;;  %v15138_v33 = vld [vmem:[#allocation57_spill] sm:$0xff]  ;;  %v15141_v15 = vld [vmem:[#allocation66_spill] sm:$0xff]  ;;  %v15144_v18 = vld [vmem:[#allocation72_spill] sm:$0xff] }
 0x2fc   : > { %v2419_v17 = vmul.f32 %v15136_v60, %v2139_v46  ;;  %v2420_v35 = vmul.f32 %v15137_v56, %v2140_v21  ;;  %v2421_v8 = vmul.f32 %v15138_v33, %v2141_v58  ;;  %v2422_v63 = vmul.f32 %v15139_v37, %v2142_v45  ;;  %v15140_v41 = vld [vmem:[#allocation61_spill] sm:$0xff]  ;;  %v15145_v54 = vld [vmem:[#allocation71_spill] sm:$0xff]  ;;  %v15146_v32 = vld [vmem:[#allocation74_spill] sm:$0xff] }
 0x2fd   : > { %v2423_v30 = vmul.f32 %v15140_v41, %v2143_v26  ;;  %v2424_v12 = vmul.f32 %v15141_v15, %v2144_v51  ;;  %v15142_v47 = vld [vmem:[#allocation65_spill] sm:$0xff]  ;;  %v2426_v27 = vmul.f32 %v15143_v23, %v2146_v9  ;;  %v2427_v0 = vmul.f32 %v15144_v18, %v2147_v52  ;;  %v15147_v25 = vld [vmem:[#allocation4_spill] sm:$0xff]  ;;  %v15151_v33 = vld [vmem:[#allocation15_spill] sm:$0xff] }
 0x2fe   : > { %v2425_v49 = vmul.f32 %v15142_v47, %v2145_v1  ;;  %v2428_v36 = vmul.f32 %v15145_v54, %v2148_v7  ;;  %v2429_v46 = vmul.f32 %v15146_v32, %v2149_v42  ;;  %v2682_v21 = vadd.f32 %v15147_v25, %v2402_v28  ;;  %v15148_v5 = vld [vmem:[#allocation73_spill] sm:$0xff]  ;;  %v15150_v56 = vld [vmem:[#allocation12_spill] sm:$0xff]  ;;  %v15152_v37 = vld [vmem:[#allocation23_spill] sm:$0xff] }
 0x2ff   : > { %v2430_v58 = vmul.f32 %v15148_v5, %v2150_v53  ;;  %v15149_v60 = vld [vmem:[#allocation13_spill] sm:$0xff]  ;;  %v2432_v26 = vmul.f32 %v15150_v56, %v2152_v61  ;;  %v2433_v51 = vmul.f32 %v15151_v33, %v2153_v50  ;;  %v2434_v1 = vmul.f32 %v15152_v37, %v2154_v29  ;;  %v15153_v41 = vld [vmem:[#allocation22_spill] sm:$0xff]  ;;  %v15154_v15 = vld [vmem:[#allocation31_spill] sm:$0xff] }
 0x300   : > { %v2431_v45 = vmul.f32 %v15149_v60, %v2151_v6  ;;  %v2435_v9 = vmul.f32 %v15153_v41, %v2155_v24  ;;  %v2436_v52 = vmul.f32 %v15154_v15, %v2156_v3  ;;  %v15155_v47 = vld [vmem:[#allocation30_spill] sm:$0xff]  ;;  %v15158_v53 = vld [vmem:[#allocation48_spill] sm:$0xff]  ;;  %v15160_v6 = vld [vmem:[#allocation47_spill] sm:$0xff]  ;;  %v2722_v60 = vmul.f32 0.2, %v2682_v21 }
 0x301   : > { %v2437_v7 = vmul.f32 %v15155_v47, %v2157_v48  ;;  %v15156_v23 = vld [vmem:[#allocation38_spill] sm:$0xff]  ;;  %v11636_v54 = vadd.f32 %v15158_v53, %v2414_v39  ;;  %v2695_v61 = vadd.f32 %v15160_v6, %v2415_v43  ;;  %v15161_v32 = vld [vmem:[#allocation52_spill] sm:$0xff]  ;;  %v15162_v25 = vld [vmem:[#allocation51_spill] sm:$0xff] }
 0x302   : > { %v2438_v42 = vmul.f32 %v15156_v23, %v2158_v10  ;;  %v15157_v18 = vld [vmem:[#allocation6_spill] sm:$0xff]  ;;  %v2696_v50 = vadd.f32 %v15161_v32, %v2416_v20  ;;  %v2697_v29 = vadd.f32 %v15162_v25, %v2417_v22  ;;  %v15163_v5 = vld [vmem:[#allocation56_spill] sm:$0xff]  ;;  %v15164_v3 = vld [vmem:[#allocation55_spill] sm:$0xff]  ;;  %v11649_v20 = vmax.f32 %v2682_v21, %v2722_v60 }
 0x303   : > { %v11633_v28 = vadd.f32 %v15157_v18, %v2403_v55  ;;  %15159 = vst [vmem:[#allocation5_spill] sm:$0xff] %v11636_v54  ;;  %v2698_v24 = vadd.f32 %v15163_v5, %v2418_v44  ;;  %v2699_v56 = vadd.f32 %v15164_v3, %v2419_v17  ;;  %v15165_v48 = vld [vmem:[#allocation60_spill] sm:$0xff]  ;;  %v15166_v10 = vld [vmem:[#allocation59_spill] sm:$0xff]  ;;  %v15170_v43 = vld [vmem:[#allocation70_spill] sm:$0xff] }
 0x304   : > { %v2700_v33 = vadd.f32 %v15165_v48, %v2420_v35  ;;  %v2701_v37 = vadd.f32 %v15166_v10, %v2421_v8  ;;  %v15167_v55 = vld [vmem:[#allocation64_spill] sm:$0xff]  ;;  %v15168_v15 = vld [vmem:[#allocation63_spill] sm:$0xff]  ;;  %v2705_v18 = vadd.f32 %v15170_v43, %v2425_v49  ;;  %v15171_v22 = vld [vmem:[#allocation69_spill] sm:$0xff]  ;;  %2802 = vst [vmem:[#allocation2 + $0x8] sm:$0xff] %v11649_v20  ;;  %v2737_v60 = vmul.f32 0.2, %v2697_v29 }
 0x305   : > { %v2702_v41 = vadd.f32 %v15167_v55, %v2422_v63  ;;  %v2703_v39 = vadd.f32 %v15168_v15, %v2423_v30  ;;  %v15169_v47 = vld [vmem:[#allocation67_spill] sm:$0xff]  ;;  %v2706_v53 = vadd.f32 %v15171_v22, %v2426_v27  ;;  %v15172_v44 = vld [vmem:[#allocation76_spill] sm:$0xff]  ;;  %v15174_v25 = vld [vmem:[#allocation78_spill] sm:$0xff]  ;;  %v11666_v27 = vmul.f32 0.2, %v11633_v28 }
 0x306   : > { %v2704_v23 = vadd.f32 %v15169_v47, %v2424_v12  ;;  %v2707_v6 = vadd.f32 %v15172_v44, %v2427_v0  ;;  %v15173_v32 = vld [vmem:[#allocation75_spill] sm:$0xff]  ;;  %v2709_v35 = vadd.f32 %v15174_v25, %v2429_v46  ;;  %v15175_v5 = vld [vmem:[#allocation77_spill] sm:$0xff]  ;;  %v15176_v3 = vld [vmem:[#allocation16_spill] sm:$0xff]  ;;  %v11669_v0 = vmul.f32 0.2, %v11636_v54 }
 0x307   : > { %v2708_v17 = vadd.f32 %v15173_v32, %v2428_v36  ;;  %v2710_v8 = vadd.f32 %v15175_v5, %v2430_v58  ;;  %v2711_v63 = vadd.f32 %v15176_v3, %v2431_v45  ;;  %v15177_v48 = vld [vmem:[#allocation19_spill] sm:$0xff]  ;;  %v15178_v10 = vld [vmem:[#allocation18_spill] sm:$0xff]  ;;  %v2735_v36 = vmul.f32 0.2, %v2695_v61  ;;  %v15184_v5 = vld [vmem:[#allocation41_spill] sm:$0xff] }
 0x308   : > { %v2712_v30 = vadd.f32 %v15177_v48, %v2432_v26  ;;  %v11659_v12 = vadd.f32 %v15178_v10, %v2433_v51  ;;  %v15179_v49 = vld [vmem:[#allocation27_spill] sm:$0xff]  ;;  %15180 = vst [vmem:[#allocation7_spill] sm:$0xff] %v11669_v0  ;;  %v15181_v46 = vld [vmem:[#allocation26_spill] sm:$0xff]  ;;  %v2736_v45 = vmul.f32 0.2, %v2696_v50  ;;  %v2718_v3 = vadd.f32 %v15184_v5, %v2438_v42 }
 0x309   : > { %v11663_v21 = vadd.f32 %v15179_v49, %v2434_v1  ;;  %v2715_v58 = vadd.f32 %v15181_v46, %v2435_v9  ;;  %v2738_v26 = vmul.f32 0.2, %v2698_v24  ;;  %v15182_v55 = vld [vmem:[#allocation35_spill] sm:$0xff]  ;;  %v2739_v15 = vmul.f32 0.2, %v2699_v56  ;;  %v15183_v22 = vld [vmem:[#allocation34_spill] sm:$0xff] }
 0x30a   : > { %v2716_v51 = vadd.f32 %v15182_v55, %v2436_v52  ;;  %v2740_v47 = vmul.f32 0.2, %v2700_v33  ;;  %v2741_v43 = vmul.f32 0.2, %v2701_v37  ;;  %v2717_v1 = vadd.f32 %v15183_v22, %v2437_v7  ;;  %v15185_v9 = vld [vmem:[#allocation11_spill] sm:$0xff]  ;;  %v15186_v55 = vld [vmem:[#allocation10_spill] sm:$0xff] }
 0x30b   : > { %v2742_v44 = vmul.f32 0.2, %v2702_v41  ;;  %v2743_v32 = vmul.f32 0.2, %v2703_v39  ;;  %v2744_v25 = vmul.f32 0.2, %v2704_v23  ;;  %v11677_v46 = vadd.f32 %v15185_v9, %v11598_v40 }
 0x30c   : > { %v2745_v48 = vmul.f32 0.2, %v2705_v18  ;;  %v2746_v10 = vmul.f32 0.2, %v2706_v53  ;;  %v2747_v49 = vmul.f32 0.2, %v2707_v6  ;;  %v11681_v14 = vadd.f32 %v15186_v55, %v11601_v31 }
 0x30d   : > { %v2748_v57 = vmul.f32 0.2, %v2708_v17  ;;  %v2749_v11 = vmul.f32 0.2, %v2709_v35  ;;  %v2750_v52 = vmul.f32 0.2, %v2710_v8  ;;  %v11689_v4 = vmax.f32 %v2695_v61, %v2735_v36 }
 0x30e   : > { %15187 = vst [vmem:[#allocation9_spill] sm:$0xff] %v11681_v14  ;;  %v2751_v7 = vmul.f32 0.2, %v2711_v63  ;;  %v2752_v22 = vmul.f32 0.2, %v2712_v30  ;;  %v15188_v42 = vld [vmem:[#allocation42_spill] sm:$0xff]  ;;  %v11691_v59 = vmax.f32 %v2696_v50, %v2736_v45  ;;  %v11693_v31 = vmax.f32 %v2697_v29, %v2737_v60 }
 0x30f   : > { %v2753_v16 = vmul.f32 0.2, %v11659_v12  ;;  %v11686_v5 = vadd.f32 %v15188_v42, %v11604_v19  ;;  %v2754_v62 = vmul.f32 0.2, %v11663_v21  ;;  %v2755_v13 = vmul.f32 0.2, %v2715_v58 }
 0x310   : > { %v2756_v40 = vmul.f32 0.2, %v2716_v51  ;;  %v2757_v9 = vmul.f32 0.2, %v2717_v1  ;;  %v2758_v38 = vmul.f32 0.2, %v2718_v3  ;;  %v11695_v55 = vmax.f32 %v2698_v24, %v2738_v26 }
 0x311   : > { %15189 = vst [vmem:[#allocation8_spill] sm:$0xff] %v11686_v5  ;;  %v11697_v54 = vmax.f32 %v2699_v56, %v2739_v15  ;;  %v11699_v0 = vmax.f32 %v2700_v33, %v2740_v47  ;;  %v11701_v19 = vmax.f32 %v2701_v37, %v2741_v43  ;;  %v11703_v42 = vmax.f32 %v2702_v41, %v2742_v44  ;;  %v15197_v36 = vld [vmem:[#allocation147_spill] sm:$0xff]  ;;  %v15198_v45 = vld [vmem:[#allocation142_spill] sm:$0xff]  ;;  %v15199_v60 = vld [vmem:[#allocation21_spill] sm:$0xff] }
 0x312   : > { %v11705_v5 = vmax.f32 %v2703_v39, %v2743_v32  ;;  %v11707_v14 = vmax.f32 %v2704_v23, %v2744_v25  ;;  %2815 = vst [vmem:[#allocation2 + $0x140] sm:$0xff] %v11689_v4  ;;  %2816 = vst [vmem:[#allocation2 + $0x158] sm:$0xff] %v11691_v59  ;;  %v11711_v61 = vmax.f32 %v2705_v18, %v2745_v48  ;;  %v15200_v15 = vld [vmem:[#allocation20_spill] sm:$0xff]  ;;  %v2907_v25 = vrot.slane %v11689_v4, 7 }
 0x313   : > { %v11713_v50 = vmax.f32 %v2706_v53, %v2746_v10  ;;  %v11715_v29 = vmax.f32 %v2707_v6, %v2747_v49  ;;  %v11717_v24 = vmax.f32 %v2708_v17, %v2748_v57  ;;  %2817 = vst [vmem:[#allocation2 + $0x170] sm:$0xff] %v11693_v31  ;;  %2818 = vst [vmem:[#allocation2 + $0x188] sm:$0xff] %v11695_v55  ;;  %v2911_v48 = vrot.slane %v11693_v31, 7 }
 0x314   : > { %2819 = vst [vmem:[#allocation2 + $0x1a0] sm:$0xff] %v11697_v54  ;;  %2820 = vst [vmem:[#allocation2 + $0x1b8] sm:$0xff] %v11699_v0  ;;  %v11723_v56 = vmax.f32 %v2709_v35, %v2749_v11  ;;  %v11725_v33 = vmax.f32 %v2710_v8, %v2750_v52  ;;  %v11727_v37 = vmax.f32 %v2711_v63, %v2751_v7  ;;  %v2724_v35 = vmul.f32 0.2, %v11677_v46 }
 0x315   : > { %v11729_v41 = vmax.f32 %v2712_v30, %v2752_v22  ;;  %2821 = vst [vmem:[#allocation2 + $0x1d0] sm:$0xff] %v11701_v19  ;;  %2822 = vst [vmem:[#allocation2 + $0x1e8] sm:$0xff] %v11703_v42  ;;  %v11736_v57 = vmax.f32 %v11659_v12, %v2753_v16  ;;  %v11739_v11 = vmax.f32 %v11663_v21, %v2754_v62  ;;  %v2882_v62 = vrot.slane %v11649_v20, 7  ;;  %v15190_v16 = vld [vmem:[#allocation14_spill] sm:$0xff]  ;;  %v15192_v8 = vld [vmem:[#allocation9_spill] sm:$0xff] }
 0x316   : > { %2823 = vst [vmem:[#allocation2 + $0x200] sm:$0xff] %v11705_v5  ;;  %2824 = vst [vmem:[#allocation2 + $0x218] sm:$0xff] %v11707_v14  ;;  %v11741_v39 = vmax.f32 %v2715_v58, %v2755_v13  ;;  %v11743_v23 = vmax.f32 %v2716_v51, %v2756_v40  ;;  %v11749_v18 = vmax.f32 %v2717_v1, %v2757_v9  ;;  %v2725_v63 = vmul.f32 0.2, %v15192_v8  ;;  %v15195_v12 = vld [vmem:[#allocation5_spill] sm:$0xff] }
 0x317   : > { %2825 = vst [vmem:[#allocation2 + $0x230] sm:$0xff] %v11711_v61  ;;  %2826 = vst [vmem:[#allocation2 + $0x248] sm:$0xff] %v11713_v50  ;;  %v11751_v53 = vmax.f32 %v2718_v3, %v2758_v38  ;;  %v2406_v13 = vmul.f32 %v15190_v16, %v11537_v2  ;;  %v11762_v6 = vmax.f32 %v11633_v28, %v11666_v27  ;;  %v15191_v38 = vld [vmem:[#allocation17_spill] sm:$0xff]  ;;  %v15194_v28 = vld [vmem:[#allocation7_spill] sm:$0xff]  ;;  %v2909_v3 = vrot.slane %v11691_v59, 7 }
 0x318   : > { %2827 = vst [vmem:[#allocation2 + $0x260] sm:$0xff] %v11715_v29  ;;  %2828 = vst [vmem:[#allocation2 + $0x278] sm:$0xff] %v11717_v24  ;;  %v2407_v17 = vmul.f32 %v15191_v38, %v11541_v34  ;;  %v15193_v2 = vld [vmem:[#allocation8_spill] sm:$0xff]  ;;  %v11777_v21 = vmax.f32 %v15195_v12, %v15194_v28  ;;  %v15196_v27 = vld [vmem:[#allocation141_spill] sm:$0xff]  ;;  %v2129_v34 = vmul.f32 %v15197_v36, %v15198_v45  ;;  %v2913_v10 = vrot.slane %v11695_v55, 7 }
 0x319   : > { %2829 = vst [vmem:[#allocation2 + $0x290] sm:$0xff] %v11723_v56  ;;  %2830 = vst [vmem:[#allocation2 + $0x2a8] sm:$0xff] %v11725_v33  ;;  %v2733_v30 = vmul.f32 0.2, %v15193_v2  ;;  %v2128_v58 = vmul.f32 %v15197_v36, %v15196_v27  ;;  %v11784_v26 = vadd.f32 %v15199_v60, %v2406_v13  ;;  %v2883_v51 = vrot.slane %v11762_v6, 7 }
 0x31a   : > { %2831 = vst [vmem:[#allocation2 + $0x2c0] sm:$0xff] %v11727_v37  ;;  %2832 = vst [vmem:[#allocation2 + $0x2d8] sm:$0xff] %v11729_v41  ;;  %v11788_v47 = vadd.f32 %v15200_v15, %v2407_v17  ;;  %v11791_v43 = vmax.f32 %v11677_v46, %v2724_v35  ;;  %v11794_v1 = vmax.f32 %v15192_v8, %v2725_v63  ;;  %v2905_v32 = vrot.slane %v11777_v21, 7 }
 0x31b   : > { %2833 = vst [vmem:[#allocation2 + $0x2f0] sm:$0xff] %v11736_v57  ;;  %2834 = vst [vmem:[#allocation2 + $0x308] sm:$0xff] %v11739_v11  ;;  %v11797_v44 = vmax.f32 %v15193_v2, %v2733_v30  ;;  %v2915_v49 = vrot.slane %v11697_v54, 7  ;;  %v2917_v46 = vrot.slane %v11699_v0, 7  ;;  %v2919_v52 = vrot.slane %v11701_v19, 7 }
 0x31c   : > { %2835 = vst [vmem:[#allocation2 + $0x320] sm:$0xff] %v11741_v39  ;;  %2836 = vst [vmem:[#allocation2 + $0x338] sm:$0xff] %v11743_v23  ;;  %v2921_v7 = vrot.slane %v11703_v42, 7  ;;  %v2923_v22 = vrot.slane %v11705_v5, 7  ;;  %v2925_v40 = vrot.slane %v11707_v14, 7  ;;  %v2884_v9 = vsel %vm1982_vm0, %v2882_v62, %v2883_v51 }
 0x31d   : > { %2837 = vst [vmem:[#allocation2 + $0x350] sm:$0xff] %v11749_v18  ;;  %2838 = vst [vmem:[#allocation2 + $0x368] sm:$0xff] %v11751_v53  ;;  %v2927_v16 = vrot.slane %v11711_v61, 7  ;;  %v2929_v13 = vrot.slane %v11713_v50, 7  ;;  %v2931_v38 = vrot.slane %v11715_v29, 7  ;;  %v2933_v0 = vrot.slane %v11717_v24, 7 }
 0x31e   : > { %3001 = vst [vmem:[#allocation2] sm:$0xfe] %v2882_v62  ;;  %v2935_v19 = vrot.slane %v11723_v56, 7  ;;  %v2937_v42 = vrot.slane %v11725_v33, 7  ;;  %v2939_v5 = vrot.slane %v11727_v37, 7  ;;  %v2941_v14 = vrot.slane %v11729_v41, 7 }
 0x31f   : > { %v2943_v17 = vrot.slane %v11736_v57, 7  ;;  %v2951_v62 = vrot.slane %v11749_v18, 7  ;;  %v2953_v61 = vrot.slane %v11751_v53, 7  ;;  %v11827_v50 = vsel %vm1982_vm0, %v2905_v32, %v2907_v25 }
 0x320   : > { %v11830_v29 = vsel %vm1982_vm0, %v2907_v25, %v2909_v3  ;;  %v11833_v24 = vsel %vm1982_vm0, %v2909_v3, %v2911_v48  ;;  %v11836_v56 = vsel %vm1982_vm0, %v2911_v48, %v2913_v10  ;;  %v11839_v33 = vsel %vm1982_vm0, %v2913_v10, %v2915_v49  ;;  %v15201_v3 = vld [vmem:[#allocation25_spill] sm:$0xff] }
 0x321   : > { %v11842_v37 = vsel %vm1982_vm0, %v2915_v49, %v2917_v46  ;;  %v11845_v35 = vsel %vm1982_vm0, %v2917_v46, %v2919_v52  ;;  %v11848_v8 = vsel %vm1982_vm0, %v2919_v52, %v2921_v7  ;;  %v11851_v63 = vsel %vm1982_vm0, %v2921_v7, %v2923_v22  ;;  %v15202_v46 = vld [vmem:[#allocation24_spill] sm:$0xff] }
 0x322   : > { %v11854_v2 = vsel %vm1982_vm0, %v2923_v22, %v2925_v40  ;;  %v11857_v30 = vsel %vm1982_vm0, %v2925_v40, %v2927_v16  ;;  %v2930_v28 = vsel %vm1982_vm0, %v2927_v16, %v2929_v13  ;;  %v2932_v12 = vsel %vm1982_vm0, %v2929_v13, %v2931_v38  ;;  %v15203_v40 = vld [vmem:[#allocation46_spill] sm:$0xff] }
 0x323   : > { %v2934_v27 = vsel %vm1982_vm0, %v2931_v38, %v2933_v0  ;;  %v2936_v45 = vsel %vm1982_vm0, %v2933_v0, %v2935_v19  ;;  %v2938_v60 = vsel %vm1982_vm0, %v2935_v19, %v2937_v42  ;;  %v2940_v15 = vsel %vm1982_vm0, %v2937_v42, %v2939_v5  ;;  %3025 = vst [vmem:[#allocation2 + $0x240] sm:$0xff] %v2930_v28 }
 0x324   : > { %3026 = vst [vmem:[#allocation2 + $0x258] sm:$0xff] %v2932_v12  ;;  %v2408_v48 = vmul.f32 %v15201_v3, %v2128_v58  ;;  %v2942_v10 = vsel %vm1982_vm0, %v2939_v5, %v2941_v14  ;;  %v2944_v49 = vsel %vm1982_vm0, %v2941_v14, %v2943_v17  ;;  %3027 = vst [vmem:[#allocation2 + $0x270] sm:$0xff] %v2934_v27  ;;  %v2726_v7 = vmul.f32 0.2, %v11784_v26  ;;  %v9364_v12 = vld [vmem:[%s14884_s4 + $0x88] sm:$0xff]   ;;  %v15205_v27 = vld [vmem:[#allocation143_spill] sm:$0xff] }
 0x325   : > { %v3279_v25 = vld [vmem:[#allocation2] sm:$0xff]  ;;  %3028 = vst [vmem:[#allocation2 + $0x288] sm:$0xff] %v2936_v45  ;;  %3029 = vst [vmem:[#allocation2 + $0x2a0] sm:$0xff] %v2938_v60  ;;  %v2409_v52 = vmul.f32 %v15202_v46, %v2129_v34  ;;  %v2727_v22 = vmul.f32 0.2, %v11788_v47  ;;  %v15204_v16 = vrot.slane %v15203_v40, 7  ;;  %v3400_v13 = vpack.c.bf16 %v11762_v6, %v11649_v20 }
 0x326   : > { %3030 = vst [vmem:[#allocation2 + $0x2b8] sm:$0xff] %v2940_v15  ;;  %v3445_v38 = vpack.c.bf16 %v11736_v57, %v11729_v41  ;;  %v3399_v0 = vpack.c.bf16 %v2884_v9, %v3279_v25  ;;  %v3444_v19 = vpack.c.bf16 %v2944_v49, %v2942_v10  ;;  %v2885_v42 = vrot.slane %v11791_v43, 7  ;;  %v15206_v45 = vld [vmem:[#allocation144_spill] sm:$0xff]  ;;  %v15207_v15 = vld [vmem:[#allocation29_spill] sm:$0xff] }
 0x327   : > { %v11876_v58 = vsel %vm1982_vm0, %v2953_v61, %v15204_v16  ;;  %v2887_v34 = vrot.slane %v11794_v1, 7  ;;  %v2903_v5 = vrot.slane %v11797_v44, 7  ;;  %v11888_v14 = vsel %vm1982_vm0, %v2951_v62, %v2953_v61  ;;  %3683 = vmatprep.mubr.bf16.mxu0 %v3400_v13  ;;  %v15208_v3 = vld [vmem:[#allocation28_spill] sm:$0xff] }
 0x328   : > { %v2945_v28 = vrot.slane %v11739_v11, 7  ;;  %v2947_v20 = vrot.slane %v11741_v39, 7  ;;  %3803 = vmatprep.mubr.bf16.mxu1 %v3445_v38  ;;  %v3403_v41 = vpack.c.bf16 %v11794_v1, %v11791_v43  ;;  %v3448_v9 = vpack.c.bf16 %v11741_v39, %v11739_v11  ;;  %3684 = vmatmul.mubr.bf16.vlgmr.msra.gmra.mrb[80].mxu0 %v3399_v0  ;;  %v15211_v13 = vld [vmem:[#allocation32_spill] sm:$0xff] }
 0x329   : > { %v2130_v61 = vmul.f32 %v15197_v36, %v15205_v27  ;;  %v2131_v60 = vmul.f32 %v15197_v36, %v15206_v45  ;;  %3804 = vmatmul.mubr.bf16.vlgmr.msra.gmra.mrb[160].mxu1 %v3444_v19  ;;  %v2688_v25 = vadd.f32 %v15207_v15, %v2408_v48  ;;  %v2689_v10 = vadd.f32 %v15208_v3, %v2409_v52  ;;  %v15209_v48 = vld [vmem:[#allocation146_spill] sm:$0xff]  ;;  %v15213_v3 = vld [vmem:[#allocation37_spill] sm:$0xff] }
 0x32a   : > { %3691 = vmatprep.mubr.bf16.mxu0 %v3403_v41  ;;  %3811 = vmatprep.mubr.bf16.mxu1 %v3448_v9  ;;  %v3453_v11 = vpack.c.bf16 %v11876_v58, %v11888_v14  ;;  %v11908_v39 = vmax.f32 %v11784_v26, %v2726_v7  ;;  %v11911_v49 = vmax.f32 %v11788_v47, %v2727_v22  ;;  %v15210_v7 = vld [vmem:[#allocation33_spill] sm:$0xff]  ;;  %v2949_v41 = vrot.slane %v11743_v23, 7 }
 0x32b   : > { %v11918_v46 = vsel %vm1982_vm0, %v2903_v5, %v2905_v32  ;;  %8990 = vmatpush3.bf16.msra.mxu1 %v15209_v48  ;;  %v2886_v52 = vsel %vm1982_vm0, %v2883_v51, %v2885_v42  ;;  %v2888_v40 = vsel %vm1982_vm0, %v2885_v42, %v2887_v34  ;;  %v2946_v26 = vsel %vm1982_vm0, %v2943_v17, %v2945_v28  ;;  %v9365_v32 = vld [vmem:[%s14884_s4 + $0x90] sm:$0xff]  }
 0x32c   : > { %v2948_v47 = vsel %vm1982_vm0, %v2945_v28, %v2947_v20  ;;  %8991 = vmatprep.subr.bf16.mxu1 %v9364_v12  ;;  %v2410_v22 = vmul.f32 %v15210_v7, %v2130_v61  ;;  %v3418_v16 = vpack.c.bf16 %v11689_v4, %v11777_v21  ;;  %v2411_v51 = vmul.f32 %v15211_v13, %v2131_v60  ;;  %v9366_v61 = vld [vmem:[%s14884_s4 + $0x98] sm:$0xff]   ;;  %v15212_v60 = vld [vmem:[#allocation145_spill] sm:$0xff] }
 0x32d   : > { %v2728_v38 = vmul.f32 0.2, %v2688_v25  ;;  %v2729_v0 = vmul.f32 0.2, %v2689_v10  ;;  %v3417_v57 = vpack.c.bf16 %v11827_v50, %v11918_v46  ;;  %v2889_v17 = vrot.slane %v11908_v39, 7  ;;  %v3334_v50 = vld [vmem:[#allocation2 + $0x1b8] sm:$0xff] }
 0x32e   : > { %v2891_v19 = vrot.slane %v11911_v49, 7  ;;  %v3402_v42 = vpack.c.bf16 %v2888_v40, %v2886_v52  ;;  %v3447_v28 = vpack.c.bf16 %v2948_v47, %v2946_v26  ;;  %v3406_v9 = vpack.c.bf16 %v11911_v49, %v11908_v39  ;;  %v15214_v52 = vld [vmem:[#allocation36_spill] sm:$0xff] }
 0x32f   : > { %8992 = vmatpush3.bf16.msra.mxu1 %v9364_v12  ;;  %v3451_v27 = vpack.c.bf16 %v11749_v18, %v11743_v23  ;;  %v3421_v45 = vpack.c.bf16 %v11693_v31, %v11691_v59  ;;  %v3420_v12 = vpack.c.bf16 %v11833_v24, %v11830_v29  ;;  %v2132_v15 = vmul.f32 %v15197_v36, %v15212_v60  ;;  %v3058_v46 = vld [vmem:[#allocation2 + $0x1a0] sm:$0xff]  ;;  %v3063_v24 = vld [vmem:[#allocation2 + $0x218] sm:$0xff] }
 0x330   : > { %8993 = vmatprep.subr.bf16.mxu1 %v9365_v32  ;;  %3692 = vmatmul.mubr.bf16.gmra.mrb[84].mxu0 %v3402_v42  ;;  %v2690_v48 = vadd.f32 %v15213_v3, %v2410_v22  ;;  %v3424_v23 = vpack.c.bf16 %v11697_v54, %v11695_v55  ;;  %v2691_v40 = vadd.f32 %v15214_v52, %v2411_v51  ;;  %v9367_v51 = vld [vmem:[%s14884_s4 + $0xa0] sm:$0xff]   ;;  %v3155_v59 = vrot.slane %v3058_v46, 1 }
 0x331   : > { %3812 = vmatmul.mubr.bf16.gmra.mrb[164].mxu1 %v3447_v28  ;;  %3699 = vmatprep.mubr.bf16.mxu0 %v3406_v9  ;;  %v11958_v26 = vmax.f32 %v2688_v25, %v2728_v38  ;;  %v11960_v47 = vmax.f32 %v2689_v10, %v2729_v0  ;;  %v2890_v7 = vsel %vm1982_vm0, %v2887_v34, %v2889_v17  ;;  %v11973_v10 = vld [vmem:[#allocation2 + $0x380] sm:$0xff]  ;;  %v9368_v9 = vld [vmem:[%s14884_s4 + $0xa8] sm:$0xff]   ;;  %v3157_v31 = vrot.slane %v3334_v50, 1 }
 0x332   : > { %3819 = vmatprep.mubr.bf16.mxu1 %v3451_v27  ;;  %v2892_v13 = vsel %vm1982_vm0, %v2889_v17, %v2891_v19  ;;  %v2950_v36 = vsel %vm1982_vm0, %v2947_v20, %v2949_v41  ;;  %v2952_v22 = vsel %vm1982_vm0, %v2949_v41, %v2951_v62  ;;  %v3423_v25 = vpack.c.bf16 %v11839_v33, %v11836_v56  ;;  %v15215_v34 = vld [vmem:[#allocation40_spill] sm:$0xff] }
 0x333   : > { %8994 = vmatpush3.bf16.msra.mxu1 %v9365_v32  ;;  %v2412_v32 = vmul.f32 %v15215_v34, %v2132_v15  ;;  %v2730_v38 = vmul.f32 0.2, %v2690_v48  ;;  %v2731_v0 = vmul.f32 0.2, %v2691_v40  ;;  %v3405_v17 = vpack.c.bf16 %v2892_v13, %v2890_v7  ;;  %v9369_v7 = vld [vmem:[%s14884_s4 + $0xb0] sm:$0xff]   ;;  %v11999_v13 = vld [vmem:[#allocation2 + $0x398] sm:$0xff] }
 0x334   : > { %8995 = vmatprep.subr.bf16.mxu1 %v9366_v61  ;;  %v3450_v20 = vpack.c.bf16 %v2952_v22, %v2950_v36  ;;  %v3426_v18 = vpack.c.bf16 %v11845_v35, %v11842_v37  ;;  %v2893_v62 = vrot.slane %v11958_v26, 7  ;;  %v2895_v42 = vrot.slane %v11960_v47, 7  ;;  %v3397_v36 = vld [vmem:[#allocation2 + $0x3b0] sm:$0x1]  ;;  %v3343_v29 = vld [vmem:[#allocation2 + $0x200] sm:$0xff]  ;;  %v3071_v37 = vld [vmem:[#allocation2 + $0x2d8] sm:$0xff] }
 0x335   : > { %v3409_v28 = vpack.c.bf16 %v11960_v47, %v11958_v26  ;;  %v3454_v41 = vpack.c.bf16 %v11973_v10, %v11751_v53  ;;  %v3429_v27 = vpack.c.bf16 %v11851_v63, %v11848_v8  ;;  %v11990_v15 = vmax.f32 %v2690_v48, %v2730_v38 }
 0x336   : > { %v11992_v3 = vmax.f32 %v2691_v40, %v2731_v0  ;;  %v2894_v53 = vsel %vm1982_vm0, %v2891_v19, %v2893_v62  ;;  %v2896_v52 = vsel %vm1982_vm0, %v2893_v62, %v2895_v42  ;;  %v3432_v22 = vpack.c.bf16 %v11857_v30, %v11854_v2  ;;  %v9370_v0 = vld [vmem:[%s14884_s4 + $0xb8] sm:$0xff]  }
 0x337   : > { %8996 = vmatpush3.bf16.msra.mxu1 %v9366_v61  ;;  %v15216_v61 = vld [vmem:[#allocation43_spill] sm:$0xff]  ;;  %v3408_v34 = vpack.c.bf16 %v2896_v52, %v2894_v53  ;;  %v2897_v40 = vrot.slane %v11990_v15, 7  ;;  %v3457_v38 = vpack.c.bf16 %v3397_v36, %v11999_v13  ;;  %v3123_v62 = vrot.slane %v11762_v6, 1  ;;  %v3396_v53 = vld [vmem:[#allocation2 + $0x3a8] sm:$0x1] }
 0x338   : > { %8997 = vmatprep.subr.bf16.mxu1 %v9367_v51  ;;  %3700 = vmatmul.mubr.bf16.gmra.mrb[88].mxu0 %v3405_v17  ;;  %v2692_v60 = vadd.f32 %v15216_v61, %v2412_v32  ;;  %v2899_v19 = vrot.slane %v11992_v3, 7  ;;  %v3412_v32 = vpack.c.bf16 %v11992_v3, %v11990_v15  ;;  %v3393_v61 = vld [vmem:[#allocation2 + $0x390] sm:$0xff]  ;;  %v15217_v36 = vmov 0  }
 0x339   : > { %3820 = vmatmul.mubr.bf16.gmra.mrb[168].mxu1 %v3450_v20  ;;  %3707 = vmatprep.mubr.bf16.mxu0 %v3409_v28  ;;  %v3125_v28 = vrot.slane %v11791_v43, 1  ;;  %v3456_v52 = vpack.c.bf16 %v3396_v53, %v3393_v61  ;;  %v3127_v43 = vrot.slane %v11794_v1, 1  ;;  %v3054_v61 = vld [vmem:[#allocation2 + $0x140] sm:$0xff]  ;;  %v3163_v54 = vrot.slane %v3343_v29, 1 }
 0x33a   : > { %3827 = vmatprep.mubr.bf16.mxu1 %v3454_v41  ;;  %v2732_v48 = vmul.f32 0.2, %v2692_v60  ;;  %v2898_v41 = vsel %vm1982_vm0, %v2895_v42, %v2897_v40  ;;  %v3129_v42 = vrot.slane %v11908_v39, 1  ;;  %v3147_v4 = vrot.slane %v3054_v61, 1 }
 0x33b   : > { %8998 = vmatpush3.bf16.msra.mxu1 %v9367_v51  ;;  %v3041_v51 = vld [vmem:[#allocation2 + $0x8] sm:$0xfe]  ;;  %v3128_v1 = vsel %vm3121_vm1, %v3125_v28, %v3127_v43  ;;  %v3165_v55 = vrot.slane %v3063_v24, 1 }
 0x33c   : > { %8999 = vmatprep.subr.bf16.mxu1 %v9368_v9  ;;  %v3122_v17 = vrot.slane %v3041_v51, 1  ;;  %v2772_v20 = vmax.f32 %v2692_v60, %v2732_v48  ;;  %v3126_v60 = vsel %vm3121_vm1, %v3123_v62, %v3125_v28  ;;  %v3131_v51 = vrot.slane %v11911_v49, 1 }
 0x33d   : > { %v3133_v48 = vrot.slane %v11958_v26, 1  ;;  %v3130_v39 = vsel %vm3121_vm1, %v3127_v43, %v3129_v42  ;;  %v3135_v26 = vrot.slane %v11960_v47, 1 }
 0x33e   : > { %v3124_v58 = vsel %vm3121_vm1, %v3122_v17, %v3123_v62  ;;  %v2901_v14 = vrot.slane %v2772_v20, 7  ;;  %v3415_v6 = vpack.c.bf16 %v11797_v44, %v2772_v20  ;;  %v3404_v49 = vpack.c.bf16 %v3130_v39, %v3128_v1 }
 0x33f   : > { %9000 = vmatpush3.bf16.msra.mxu1 %v9368_v9  ;;  %v2900_v9 = vsel %vm1982_vm0, %v2897_v40, %v2899_v19  ;;  %v3137_v62 = vrot.slane %v11990_v15, 1  ;;  %v3136_v28 = vsel %vm3121_vm1, %v3133_v48, %v3135_v26  ;;  %v3055_v15 = vld [vmem:[#allocation2 + $0x158] sm:$0xff] }
 0x340   : > { %9001 = vmatprep.subr.bf16.mxu1 %v9369_v7  ;;  %3708 = vmatmul.mubr.bf16.gmra.mrb[92].mxu0 %v3408_v34  ;;  %v2902_v34 = vsel %vm1982_vm0, %v2899_v19, %v2901_v14  ;;  %v2904_v40 = vsel %vm1982_vm0, %v2901_v14, %v2903_v5  ;;  %v3139_v19 = vrot.slane %v11992_v3, 1  ;;  %v3141_v5 = vrot.slane %v2772_v20, 1 }
 0x341   : > { %3828 = vmatmul.mubr.bf16.gmra.mrb[172].mxu1 %v3453_v11  ;;  %3715 = vmatprep.mubr.bf16.mxu0 %v3412_v32  ;;  %v3411_v11 = vpack.c.bf16 %v2900_v9, %v2898_v41  ;;  %v3132_v32 = vsel %vm3121_vm1, %v3129_v42, %v3131_v51  ;;  %v3138_v41 = vsel %vm3121_vm1, %v3135_v26, %v3137_v62  ;;  %v3143_v3 = vrot.slane %v11797_v44, 1  ;;  %v3064_v26 = vld [vmem:[#allocation2 + $0x230] sm:$0xff] }
 0x342   : > { %3835 = vmatprep.mubr.bf16.mxu1 %v3457_v38  ;;  %v3134_v38 = vsel %vm3121_vm1, %v3131_v51, %v3133_v48  ;;  %v3140_v9 = vsel %vm3121_vm1, %v3137_v62, %v3139_v19  ;;  %v3142_v47 = vsel %vm3121_vm1, %v3139_v19, %v3141_v5  ;;  %v3410_v53 = vpack.c.bf16 %v3138_v41, %v3136_v28  ;;  %v3337_v51 = vld [vmem:[#allocation2 + $0x1d0] sm:$0xff]  ;;  %v3065_v62 = vld [vmem:[#allocation2 + $0x248] sm:$0xff]  ;;  %v3066_v19 = vld [vmem:[#allocation2 + $0x260] sm:$0xff] }
 0x343   : > { %9002 = vmatpush3.bf16.msra.mxu1 %v9369_v7  ;;  %v3401_v7 = vpack.c.bf16 %v3126_v60, %v3124_v58  ;;  %v3407_v17 = vpack.c.bf16 %v3134_v38, %v3132_v32  ;;  %v3413_v58 = vpack.c.bf16 %v3142_v47, %v3140_v9  ;;  %v3145_v20 = vrot.slane %v11777_v21, 1  ;;  %v3057_v60 = vld [vmem:[#allocation2 + $0x188] sm:$0xff] }
 0x344   : > { %9003 = vmatprep.subr.bf16.mxu1 %v9370_v0  ;;  %v3144_v14 = vsel %vm3121_vm1, %v3141_v5, %v3143_v3  ;;  %v3153_v43 = vrot.slane %v3057_v60, 1  ;;  %v3427_v1 = vpack.c.bf16 %v3337_v51, %v3334_v50  ;;  %v3159_v32 = vrot.slane %v3337_v51, 1  ;;  %v12073_v5 = vld [vmem:[#allocation2 + $0x278] sm:$0xff]  ;;  %v3351_v51 = vld [vmem:[#allocation2 + $0x240] sm:$0xff] }
 0x345   : > { %v3148_v44 = vsel %vm3121_vm1, %v3145_v20, %v3147_v4  ;;  %v3167_v28 = vrot.slane %v3064_v26, 1  ;;  %v3169_v41 = vrot.slane %v3065_v62, 1  ;;  %v3171_v9 = vrot.slane %v3066_v19, 1 }
 0x346   : > { %v3156_v48 = vsel %vm3121_vm1, %v3153_v43, %v3155_v59  ;;  %v3173_v47 = vrot.slane %v12073_v5, 1  ;;  %v3436_v63 = vpack.c.bf16 %v3066_v19, %v3065_v62  ;;  %v3080_v19 = vld [vmem:[#allocation2 + $0x3b0] sm:$0x1] }
 0x347   : > { %9004 = vmatpush3.bf16.msra.mxu1 %v9370_v0  ;;  %v3414_v0 = vpack.c.bf16 %v2904_v40, %v2902_v34  ;;  %v3158_v34 = vsel %vm3121_vm1, %v3155_v59, %v3157_v31  ;;  %v3061_v40 = vld [vmem:[#allocation2 + $0x1e8] sm:$0xff]  ;;  %v3168_v61 = vsel %vm3121_vm1, %v3165_v55, %v3167_v28 }
 0x348   : > { %5744 = vmatprep.subr.bf16.mxu1 %v15217_v36  ;;  %3716 = vmatmul.mubr.bf16.gmra.mrb[96].mxu0 %v3411_v11  ;;  %v3146_v11 = vsel %vm3121_vm1, %v3143_v3, %v3145_v20  ;;  %v3425_v39 = vpack.c.bf16 %v3158_v34, %v3156_v48  ;;  %v3161_v38 = vrot.slane %v3061_v40, 1  ;;  %v3430_v33 = vpack.c.bf16 %v3343_v29, %v3061_v40  ;;  %v3068_v3 = vld [vmem:[#allocation2 + $0x290] sm:$0xff]  ;;  %v12083_v20 = vld [vmem:[#allocation2 + $0x2a8] sm:$0xff]  ;;  %v3354_v48 = vld [vmem:[#allocation2 + $0x258] sm:$0xff] }
 0x349   : > { %3836 = vmatmul.mubr.bf16.gmra.mrb[176].mxu1 %v3456_v52  ;;  %3723 = vmatprep.mubr.bf16.mxu0 %v3415_v6  ;;  %v3056_v52 = vld [vmem:[#allocation2 + $0x170] sm:$0xff]  ;;  %v3439_v30 = vpack.c.bf16 %v3068_v3, %v12073_v5 }
 0x34a   : > { %9005 = vmatprep.mubr.bf16.mxu1 %v3401_v7  ;;  %v3151_v7 = vrot.slane %v3056_v52, 1 }
 0x34c   : > { %v3154_v42 = vsel %vm3121_vm1, %v3151_v7, %v3153_v43  ;;  %v3075_v43 = vld [vmem:[#allocation2 + $0x338] sm:$0xff] }
 0x350   : > { %3724 = vmatmul.mubr.bf16.gmra.mrb[100].mxu0 %v3414_v0  ;;  %v3162_v0 = vsel %vm3121_vm1, %v3159_v32, %v3161_v38 }
 0x351   : > { %9006 = vmatmul.mubr.bf16.vlgmr.msra.gmra.mrb[180].mxu1 %v3404_v49  ;;  %3731 = vmatprep.mubr.bf16.mxu0 %v3418_v16  ;;  %v3149_v16 = vrot.slane %v3055_v15, 1  ;;  %v3164_v49 = vsel %vm3121_vm1, %v3161_v38, %v3163_v54  ;;  %v3170_v15 = vsel %vm3121_vm1, %v3167_v28, %v3169_v41  ;;  %v3366_v28 = vld [vmem:[#allocation2 + $0x2b8] sm:$0xff] }
 0x352   : > { %9009 = vmatprep.mubr.bf16.mxu1 %v3407_v17  ;;  %v3166_v17 = vsel %vm3121_vm1, %v3163_v54, %v3165_v55  ;;  %v3434_v35 = vpack.c.bf16 %v3170_v15, %v3168_v61  ;;  %v3195_v54 = vrot.slane %v11973_v10, 1  ;;  %v3197_v55 = vrot.slane %v11999_v13, 1 }
 0x353   : > { %v3150_v21 = vsel %vm3121_vm1, %v3147_v4, %v3149_v16  ;;  %v12085_v4 = vld [vmem:[#allocation2 + $0x2c0] sm:$0xff]  ;;  %v3199_v13 = vrot.slane %v3080_v19, 1 }
 0x354   : > { %v3419_v6 = vpack.c.bf16 %v3150_v21, %v3148_v44  ;;  %v3179_v44 = vrot.slane %v12085_v4, 1  ;;  %v3181_v21 = vrot.slane %v3071_v37, 1  ;;  %v3198_v62 = vsel %vm3121_vm1, %v3195_v54, %v3197_v55 }
 0x355   : > { %v3442_v10 = vpack.c.bf16 %v12085_v4, %v12083_v20 }
 0x356   : > { %v3182_v46 = vsel %vm3121_vm1, %v3179_v44, %v3181_v21 }
 0x358   : > { %3732 = vmatmul.mubr.bf16.gmra.mrb[104].mxu0 %v3417_v57  ;;  %v3416_v57 = vpack.c.bf16 %v3146_v11, %v3144_v14  ;;  %v3175_v14 = vrot.slane %v3068_v3, 1  ;;  %v3177_v11 = vrot.slane %v12083_v20, 1 }
 0x359   : > { %9010 = vmatmul.mubr.bf16.gmra.mrb[184].mxu1 %v3410_v53  ;;  %3739 = vmatprep.mubr.bf16.mxu0 %v3421_v45  ;;  %v3152_v45 = vsel %vm3121_vm1, %v3149_v16, %v3151_v7  ;;  %v3172_v53 = vsel %vm3121_vm1, %v3169_v41, %v3171_v9  ;;  %v3074_v7 = vld [vmem:[#allocation2 + $0x320] sm:$0xff]  ;;  %v3200_v41 = vsel %vm3121_vm1, %v3197_v55, %v3199_v13 }
 0x35a   : > { %9013 = vmatprep.mubr.bf16.mxu1 %v3413_v58  ;;  %v3174_v58 = vsel %vm3121_vm1, %v3171_v9, %v3173_v47  ;;  %v3176_v52 = vsel %vm3121_vm1, %v3173_v47, %v3175_v14  ;;  %v3178_v60 = vsel %vm3121_vm1, %v3175_v14, %v3177_v11  ;;  %v3180_v50 = vsel %vm3121_vm1, %v3177_v11, %v3179_v44  ;;  %v3398_v9 = vld [vmem:[#allocation2 + $0x3b8] sm:$0x1] }
 0x35b   : > { %v3437_v16 = vpack.c.bf16 %v3174_v58, %v3172_v53  ;;  %v3440_v8 = vpack.c.bf16 %v3178_v60, %v3176_v52  ;;  %v3458_v61 = vpack.c.bf16 %v3398_v9, %v3200_v41 }
 0x360   : > { %3740 = vmatmul.mubr.bf16.gmra.mrb[108].mxu0 %v3420_v12  ;;  %v3422_v12 = vpack.c.bf16 %v3154_v42, %v3152_v45  ;;  %v3187_v45 = vrot.slane %v3074_v7, 1  ;;  %v3189_v42 = vrot.slane %v3075_v43, 1 }
 0x361   : > { %9014 = vmatmul.mubr.bf16.gmra.mrb[188].mxu1 %v3416_v57  ;;  %3747 = vmatprep.mubr.bf16.mxu0 %v3424_v23  ;;  %v3160_v23 = vsel %vm3121_vm1, %v3157_v31, %v3159_v32  ;;  %v3072_v57 = vld [vmem:[#allocation2 + $0x2f0] sm:$0xff] }
 0x362   : > { %9017 = vmatprep.mubr.bf16.mxu1 %v3419_v6  ;;  %v3428_v56 = vpack.c.bf16 %v3162_v0, %v3160_v23  ;;  %v3073_v6 = vld [vmem:[#allocation2 + $0x308] sm:$0xff]  ;;  %v3183_v59 = vrot.slane %v3072_v57, 1  ;;  %v3357_v23 = vld [vmem:[#allocation2 + $0x270] sm:$0xff] }
 0x363   : > { %v3185_v31 = vrot.slane %v3073_v6, 1  ;;  %v3360_v0 = vld [vmem:[#allocation2 + $0x288] sm:$0xff] }
 0x364   : > { %v3184_v34 = vsel %vm3121_vm1, %v3181_v21, %v3183_v59  ;;  %v3438_v5 = vpack.c.bf16 %v3360_v0, %v3357_v23 }
 0x365   : > { %v3186_v40 = vsel %vm3121_vm1, %v3183_v59, %v3185_v31  ;;  %v3188_v29 = vsel %vm3121_vm1, %v3185_v31, %v3187_v45 }
 0x366   : > { %v3446_v2 = vpack.c.bf16 %v3186_v40, %v3184_v34 }
 0x368   : > { %3748 = vmatmul.mubr.bf16.gmra.mrb[112].mxu0 %v3423_v25  ;;  %v3431_v25 = vpack.c.bf16 %v3166_v17, %v3164_v49 }
 0x369   : > { %9018 = vmatmul.mubr.bf16.gmra.mrb[192].mxu1 %v3422_v12  ;;  %3755 = vmatprep.mubr.bf16.mxu0 %v3427_v1  ;;  %v3076_v12 = vld [vmem:[#allocation2 + $0x350] sm:$0xff]  ;;  %v3077_v1 = vld [vmem:[#allocation2 + $0x368] sm:$0xff] }
 0x36a   : > { %9021 = vmatprep.mubr.bf16.mxu1 %v3425_v39  ;;  %v3435_v39 = vpack.c.bf16 %v3354_v48, %v3351_v51  ;;  %v3191_v32 = vrot.slane %v3076_v12, 1  ;;  %v3193_v38 = vrot.slane %v3077_v1, 1 }
 0x36c   : > { %v3192_v49 = vsel %vm3121_vm1, %v3189_v42, %v3191_v32  ;;  %v3194_v17 = vsel %vm3121_vm1, %v3191_v32, %v3193_v38 }
 0x370   : > { %3756 = vmatmul.mubr.bf16.gmra.mrb[116].mxu0 %v3426_v18  ;;  %v3433_v18 = vpack.c.bf16 %v3064_v26, %v3063_v24  ;;  %v3190_v24 = vsel %vm3121_vm1, %v3187_v45, %v3189_v42  ;;  %v3196_v26 = vsel %vm3121_vm1, %v3193_v38, %v3195_v54 }
 0x371   : > { %9022 = vmatmul.mubr.bf16.gmra.mrb[196].mxu1 %v3428_v56  ;;  %3763 = vmatprep.mubr.bf16.mxu0 %v3430_v33  ;;  %v3452_v56 = vpack.c.bf16 %v3194_v17, %v3192_v49  ;;  %v3455_v33 = vpack.c.bf16 %v3198_v62, %v3196_v26 }
 0x372   : > { %9025 = vmatprep.mubr.bf16.mxu1 %v3431_v25  ;;  %v3363_v25 = vld [vmem:[#allocation2 + $0x2a0] sm:$0xff] }
 0x373   : > { %v3441_v47 = vpack.c.bf16 %v3366_v28, %v3363_v25 }
 0x378   : > { %3764 = vmatmul.mubr.bf16.gmra.mrb[120].mxu0 %v3429_v27  ;;  %v3443_v27 = vpack.c.bf16 %v3182_v46, %v3180_v50 }
 0x379   : > { %9026 = vmatmul.mubr.bf16.gmra.mrb[200].mxu1 %v3434_v35  ;;  %3771 = vmatprep.mubr.bf16.mxu0 %v3433_v18 }
 0x37a   : > { %9029 = vmatprep.mubr.bf16.mxu1 %v3437_v16 }
 0x380   : > { %3772 = vmatmul.mubr.bf16.gmra.mrb[124].mxu0 %v3432_v22  ;;  %v3449_v22 = vpack.c.bf16 %v3190_v24, %v3188_v29 }
 0x381   : > { %9030 = vmatmul.mubr.bf16.gmra.mrb[204].mxu1 %v3440_v8  ;;  %3779 = vmatprep.mubr.bf16.mxu0 %v3436_v63 }
 0x382   : > { %9033 = vmatprep.mubr.bf16.mxu1 %v3443_v27 }
 0x388   : > { %3780 = vmatmul.mubr.bf16.gmra.mrb[128].mxu0 %v3435_v39 }
 0x389   : > { %9034 = vmatmul.mubr.bf16.gmra.mrb[208].mxu1 %v3446_v2  ;;  %3787 = vmatprep.mubr.bf16.mxu0 %v3439_v30 }
 0x38a   : > { %9037 = vmatprep.mubr.bf16.mxu1 %v3449_v22 }
 0x390   : > { %3788 = vmatmul.mubr.bf16.gmra.mrb[132].mxu0 %v3438_v5 }
 0x391   : > { %9038 = vmatmul.mubr.bf16.gmra.mrb[212].mxu1 %v3452_v56  ;;  %3795 = vmatprep.mubr.bf16.mxu0 %v3442_v10 }
 0x392   : > { %9041 = vmatprep.mubr.bf16.mxu1 %v3455_v33 }
 0x398   : > { %3796 = vmatmul.mubr.bf16.gmra.mrb[136].mxu0 %v3441_v47 }
 0x399   : > { %9042 = vmatmul.mubr.bf16.gmra.mrb[216].mxu1 %v3458_v61 }
 0x3fb   : > { %v3685_v15 = vpop.f32.mrb[80].mxu0 }
 0x3fc   : > { %v12113_v53 = vpop.f32.mrb[160].mxu1  ;;  %v3687_v58 = vpop.f32.mrb[81].mxu0 }
 0x3fd   : > { %v3807_v3 = vpop.f32.mrb[161].mxu1  ;;  %v3688_v20 = vpop.f32.mrb[82].mxu0 }
 0x3fe   : > { %v12115_v4 = vpop.f32.mrb[162].mxu1  ;;  %v3690_v37 = vpop.f32.mrb[83].mxu0 }
 0x3ff   : > { %v3810_v35 = vpop.f32.mrb[163].mxu1 }
 0x403   : > { %v3693_v18 = vpop.f32.mrb[84].mxu0 }
 0x404   : > { %v12117_v16 = vpop.f32.mrb[164].mxu1  ;;  %v3695_v14 = vpop.f32.mrb[85].mxu0 }
 0x405   : > { %v3815_v11 = vpop.f32.mrb[165].mxu1  ;;  %v3696_v44 = vpop.f32.mrb[86].mxu0 }
 0x406   : > { %v12119_v21 = vpop.f32.mrb[166].mxu1  ;;  %v3698_v52 = vpop.f32.mrb[87].mxu0 }
 0x407   : > { %v3818_v60 = vpop.f32.mrb[167].mxu1 }
 0x40b   : > { %v3701_v50 = vpop.f32.mrb[88].mxu0 }
 0x40c   : > { %v12121_v46 = vpop.f32.mrb[168].mxu1  ;;  %v3703_v57 = vpop.f32.mrb[89].mxu0 }
 0x40d   : > { %v3823_v6 = vpop.f32.mrb[169].mxu1  ;;  %v3704_v7 = vpop.f32.mrb[90].mxu0 }
 0x40e   : > { %v12123_v43 = vpop.f32.mrb[170].mxu1  ;;  %v3706_v8 = vpop.f32.mrb[91].mxu0 }
 0x40f   : > { %v3826_v63 = vpop.f32.mrb[171].mxu1 }
 0x413   : > { %v3709_v27 = vpop.f32.mrb[92].mxu0 }
 0x414   : > { %v12125_v59 = vpop.f32.mrb[172].mxu1  ;;  %v3711_v31 = vpop.f32.mrb[93].mxu0 }
 0x415   : > { %v3831_v45 = vpop.f32.mrb[173].mxu1  ;;  %v3712_v42 = vpop.f32.mrb[94].mxu0 }
 0x416   : > { %v12127_v51 = vpop.f32.mrb[174].mxu1  ;;  %v3714_v48 = vpop.f32.mrb[95].mxu0 }
 0x417   : > { %v3834_v34 = vpop.f32.mrb[175].mxu1 }
 0x41b   : > { %v3717_v40 = vpop.f32.mrb[96].mxu0 }
 0x41c   : > { %v12129_v29 = vpop.f32.mrb[176].mxu1  ;;  %v3719_v24 = vpop.f32.mrb[97].mxu0 }
 0x41d   : > { %v3839_v12 = vpop.f32.mrb[177].mxu1  ;;  %v3720_v1 = vpop.f32.mrb[98].mxu0 }
 0x41e   : > { %v12131_v39 = vpop.f32.mrb[178].mxu1  ;;  %v3722_v2 = vpop.f32.mrb[99].mxu0 }
 0x41f   : > { %v3842_v30 = vpop.f32.mrb[179].mxu1 }
 0x423   : > { %v3725_v22 = vpop.f32.mrb[100].mxu0 }
 0x424   : > { %v9007_v32 = vpop.f32.mrb[180].mxu1  ;;  %v3727_v54 = vpop.f32.mrb[101].mxu0 }
 0x425   : > { %v12133_v38 = vadd.f32 %v9007_v32, %v3693_v18  ;;  %v3878_v55 = vpop.f32.mrb[181].mxu1  ;;  %v3728_v0 = vpop.f32.mrb[102].mxu0 }
 0x426   : > { %v12135_v23 = vadd.f32 %v3878_v55, %v3685_v15  ;;  %v9008_v49 = vpop.f32.mrb[182].mxu1  ;;  %v3730_v26 = vpop.f32.mrb[103].mxu0 }
 0x427   : > { %v12137_v17 = vadd.f32 %v9008_v49, %v3696_v44  ;;  %v3881_v62 = vpop.f32.mrb[183].mxu1 }
 0x428   : > { %v12139_v19 = vadd.f32 %v3881_v62, %v3688_v20 }
 0x42a   : > { %v4037_v5 = vadd.f32 %v12139_v19, %v12135_v23 }
 0x42b   : > { %v3733_v10 = vpop.f32.mrb[104].mxu0 }
 0x42c   : > { %v4038_v56 = vadd.f32 %v4037_v5, %v12133_v38  ;;  %v9011_v33 = vpop.f32.mrb[184].mxu1  ;;  %v3735_v25 = vpop.f32.mrb[105].mxu0 }
 0x42d   : > { %v12144_v13 = vadd.f32 %v9011_v33, %v3709_v27  ;;  %v3894_v28 = vpop.f32.mrb[185].mxu1  ;;  %v3736_v47 = vpop.f32.mrb[106].mxu0 }
 0x42e   : > { %v12146_v41 = vadd.f32 %v3894_v28, %v3701_v50  ;;  %v4039_v9 = vadd.f32 %v4038_v56, %v12137_v17  ;;  %v9012_v61 = vpop.f32.mrb[186].mxu1  ;;  %v3738_v58 = vpop.f32.mrb[107].mxu0 }
 0x42f   : > { %v12149_v15 = vadd.f32 %v9012_v61, %v3712_v42  ;;  %v3897_v3 = vpop.f32.mrb[187].mxu1 }
 0x430   : > { %v4040_v20 = vadd.f32 %v4039_v9, %v12146_v41  ;;  %v12152_v37 = vadd.f32 %v3897_v3, %v3704_v7 }
 0x432   : > { %v4041_v35 = vadd.f32 %v4040_v20, %v12152_v37 }
 0x433   : > { %v3741_v14 = vpop.f32.mrb[108].mxu0 }
 0x434   : > { %v4042_v18 = vadd.f32 %v4041_v35, %v12144_v13  ;;  %v9015_v11 = vpop.f32.mrb[188].mxu1  ;;  %v3743_v52 = vpop.f32.mrb[109].mxu0 }
 0x435   : > { %v12156_v44 = vadd.f32 %v9015_v11, %v3725_v22  ;;  %v3910_v60 = vpop.f32.mrb[189].mxu1  ;;  %v3744_v6 = vpop.f32.mrb[110].mxu0 }
 0x436   : > { %v12158_v50 = vadd.f32 %v3910_v60, %v3717_v40  ;;  %v4043_v57 = vadd.f32 %v4042_v18, %v12149_v15  ;;  %v9016_v8 = vpop.f32.mrb[190].mxu1  ;;  %v3746_v7 = vpop.f32.mrb[111].mxu0 }
 0x437   : > { %v12161_v63 = vadd.f32 %v9016_v8, %v3728_v0  ;;  %v3913_v27 = vpop.f32.mrb[191].mxu1 }
 0x438   : > { %v4044_v31 = vadd.f32 %v4043_v57, %v12158_v50  ;;  %v12164_v45 = vadd.f32 %v3913_v27, %v3720_v1 }
 0x43a   : > { %v4045_v42 = vadd.f32 %v4044_v31, %v12164_v45 }
 0x43b   : > { %v3749_v34 = vpop.f32.mrb[112].mxu0 }
 0x43c   : > { %v4046_v48 = vadd.f32 %v4045_v42, %v12156_v44  ;;  %v9019_v24 = vpop.f32.mrb[192].mxu1  ;;  %v3751_v12 = vpop.f32.mrb[113].mxu0 }
 0x43d   : > { %v12168_v40 = vadd.f32 %v9019_v24, %v3741_v14  ;;  %v3926_v2 = vpop.f32.mrb[193].mxu1  ;;  %v3752_v32 = vpop.f32.mrb[114].mxu0 }
 0x43e   : > { %v12170_v30 = vadd.f32 %v3926_v2, %v3733_v10  ;;  %v4047_v22 = vadd.f32 %v4046_v48, %v12161_v63  ;;  %v9020_v54 = vpop.f32.mrb[194].mxu1  ;;  %v3754_v1 = vpop.f32.mrb[115].mxu0 }
 0x43f   : > { %v12173_v55 = vadd.f32 %v9020_v54, %v3744_v6  ;;  %v3929_v0 = vpop.f32.mrb[195].mxu1 }
 0x440   : > { %v4048_v49 = vadd.f32 %v4047_v22, %v12170_v30  ;;  %v12176_v26 = vadd.f32 %v3929_v0, %v3736_v47 }
 0x442   : > { %v4049_v62 = vadd.f32 %v4048_v49, %v12176_v26 }
 0x443   : > { %v3757_v56 = vpop.f32.mrb[116].mxu0 }
 0x444   : > { %v4050_v5 = vadd.f32 %v4049_v62, %v12168_v40  ;;  %v9023_v33 = vpop.f32.mrb[196].mxu1  ;;  %v3759_v25 = vpop.f32.mrb[117].mxu0 }
 0x445   : > { %v12180_v10 = vadd.f32 %v9023_v33, %v3757_v56  ;;  %v3942_v28 = vpop.f32.mrb[197].mxu1  ;;  %v3760_v58 = vpop.f32.mrb[118].mxu0 }
 0x446   : > { %v12182_v9 = vadd.f32 %v3942_v28, %v3749_v34  ;;  %v4051_v61 = vadd.f32 %v4050_v5, %v12173_v55  ;;  %v9024_v3 = vpop.f32.mrb[198].mxu1  ;;  %v3762_v47 = vpop.f32.mrb[119].mxu0 }
 0x447   : > { %v12185_v20 = vadd.f32 %v9024_v3, %v3760_v58  ;;  %v3945_v35 = vpop.f32.mrb[199].mxu1 }
 0x448   : > { %v4052_v18 = vadd.f32 %v4051_v61, %v12182_v9  ;;  %v12188_v14 = vadd.f32 %v3945_v35, %v3752_v32 }
 0x44a   : > { %v4053_v11 = vadd.f32 %v4052_v18, %v12188_v14 }
 0x44b   : > { %v3765_v52 = vpop.f32.mrb[120].mxu0 }
 0x44c   : > { %v9027_v60 = vpop.f32.mrb[200].mxu1  ;;  %v4054_v57 = vadd.f32 %v4053_v11, %v12180_v10  ;;  %v3767_v6 = vpop.f32.mrb[121].mxu0 }
 0x44d   : > { %v3958_v8 = vpop.f32.mrb[201].mxu1  ;;  %v3768_v27 = vpop.f32.mrb[122].mxu0 }
 0x44e   : > { %v12192_v7 = vadd.f32 %v3958_v8, %v3765_v52  ;;  %v9028_v31 = vpop.f32.mrb[202].mxu1  ;;  %v3770_v42 = vpop.f32.mrb[123].mxu0  ;;  %v4055_v24 = vadd.f32 %v4054_v57, %v12185_v20 }
 0x44f   : > { %v3961_v48 = vpop.f32.mrb[203].mxu1 }
 0x450   : > { %v12194_v34 = vadd.f32 %v3961_v48, %v3768_v27  ;;  %v4056_v12 = vadd.f32 %v4055_v24, %v12192_v7 }
 0x452   : > { %v4057_v62 = vadd.f32 %v4056_v12, %v12194_v34 }
 0x453   : > { %v3773_v2 = vpop.f32.mrb[124].mxu0 }
 0x454   : > { %v9031_v22 = vpop.f32.mrb[204].mxu1  ;;  %v12198_v32 = vadd.f32 %v9027_v60, %v3773_v2  ;;  %v3775_v54 = vpop.f32.mrb[125].mxu0 }
 0x455   : > { %v3974_v1 = vpop.f32.mrb[205].mxu1  ;;  %v3776_v0 = vpop.f32.mrb[126].mxu0 }
 0x456   : > { %v9032_v49 = vpop.f32.mrb[206].mxu1  ;;  %v12201_v5 = vadd.f32 %v9028_v31, %v3776_v0  ;;  %v3778_v56 = vpop.f32.mrb[127].mxu0  ;;  %v4058_v25 = vadd.f32 %v4057_v62, %v12198_v32 }
 0x457   : > { %v3977_v33 = vpop.f32.mrb[207].mxu1 }
 0x458   : > { %v4059_v58 = vadd.f32 %v4058_v25, %v12201_v5 }
 0x45b   : > { %v3781_v28 = vpop.f32.mrb[128].mxu0 }
 0x45c   : > { %v9035_v61 = vpop.f32.mrb[208].mxu1  ;;  %v3975_v3 = vadd.f32 %v3974_v1, %v3781_v28  ;;  %v3783_v35 = vpop.f32.mrb[129].mxu0 }
 0x45d   : > { %v12206_v47 = vadd.f32 %v9035_v61, %v12113_v53  ;;  %v3990_v18 = vpop.f32.mrb[209].mxu1  ;;  %v3784_v11 = vpop.f32.mrb[130].mxu0 }
 0x45e   : > { %v9036_v52 = vpop.f32.mrb[210].mxu1  ;;  %v4060_v60 = vadd.f32 %v4059_v58, %v3975_v3  ;;  %v3978_v57 = vadd.f32 %v3977_v33, %v3784_v11  ;;  %v3786_v8 = vpop.f32.mrb[131].mxu0 }
 0x45f   : > { %v4002_v6 = vadd.f32 %v9036_v52, %v12115_v4  ;;  %v3993_v27 = vpop.f32.mrb[211].mxu1 }
 0x460   : > { %v4061_v31 = vadd.f32 %v4060_v60, %v3978_v57 }
 0x463   : > { %v3789_v42 = vpop.f32.mrb[132].mxu0 }
 0x464   : > { %v9039_v48 = vpop.f32.mrb[212].mxu1  ;;  %v3983_v24 = vadd.f32 %v9031_v22, %v3789_v42  ;;  %v3791_v2 = vpop.f32.mrb[133].mxu0 }
 0x465   : > { %v4015_v12 = vadd.f32 %v9039_v48, %v12121_v46  ;;  %v4006_v54 = vpop.f32.mrb[213].mxu1  ;;  %v3792_v1 = vpop.f32.mrb[134].mxu0 }
 0x466   : > { %v4007_v53 = vadd.f32 %v4006_v54, %v12117_v16  ;;  %v9040_v0 = vpop.f32.mrb[214].mxu1  ;;  %v4062_v62 = vadd.f32 %v4061_v31, %v3983_v24  ;;  %v3986_v56 = vadd.f32 %v9032_v49, %v3792_v1  ;;  %v3794_v25 = vpop.f32.mrb[135].mxu0 }
 0x467   : > { %v4018_v33 = vadd.f32 %v9040_v0, %v12123_v43  ;;  %v4009_v4 = vpop.f32.mrb[215].mxu1 }
 0x468   : > { %v4010_v28 = vadd.f32 %v4009_v4, %v12119_v21  ;;  %v4063_v61 = vadd.f32 %v4062_v62, %v3986_v56 }
 0x46b   : > { %v3797_v58 = vpop.f32.mrb[136].mxu0 }
 0x46c   : > { %v9043_v35 = vpop.f32.mrb[216].mxu1  ;;  %v3991_v22 = vadd.f32 %v3990_v18, %v3797_v58  ;;  %v3799_v11 = vpop.f32.mrb[137].mxu0 }
 0x46d   : > { %v4031_v46 = vadd.f32 %v9043_v35, %v12129_v29  ;;  %v4022_v52 = vpop.f32.mrb[217].mxu1  ;;  %v3800_v60 = vpop.f32.mrb[138].mxu0 }
 0x46e   : > { %v4023_v16 = vadd.f32 %v4022_v52, %v12125_v59  ;;  %v9044_v8 = vpop.f32.mrb[218].mxu1  ;;  %v4064_v31 = vadd.f32 %v4063_v61, %v3991_v22  ;;  %v3994_v49 = vadd.f32 %v3993_v27, %v3800_v60  ;;  %v3802_v42 = vpop.f32.mrb[139].mxu0 }
 0x46f   : > { %v4034_v43 = vadd.f32 %v9044_v8, %v12131_v39  ;;  %v4025_v48 = vpop.f32.mrb[219].mxu1 }
 0x470   : > { %v4026_v21 = vadd.f32 %v4025_v48, %v12127_v51  ;;  %v4065_v2 = vadd.f32 %v4064_v31, %v3994_v49 }
 0x471   : > { %v4075_v61 = vsel %vm1982_vm0, %v4034_v43, 0.0 }
 0x472   : > { %v4066_v54 = vadd.f32 %v4065_v2, %v12206_v47 }
 0x474   : > { %v4067_v18 = vadd.f32 %v4066_v54, %v4002_v6 }
 0x476   : > { %v4068_v1 = vadd.f32 %v4067_v18, %v4007_v53 }
 0x478   : > { %v4069_v29 = vadd.f32 %v4068_v1, %v4010_v28 }
 0x47a   : > { %v4070_v0 = vadd.f32 %v4069_v29, %v4015_v12  ;;  %v9373_v29 = vld [vmem:[%s14884_s4 + $0xd0] sm:$0xff]  }
 0x47c   : > { %v4071_v62 = vadd.f32 %v4070_v0, %v4018_v33 }
 0x47e   : > { %v4072_v25 = vadd.f32 %v4071_v62, %v4023_v16 }
 0x480   : > { %v4073_v59 = vadd.f32 %v4072_v25, %v4026_v21 }
 0x482   : > { %v4074_v4 = vadd.f32 %v4073_v59, %v4031_v46 }
 0x484   : > { %v4076_v27 = vadd.f32 %v4075_v61, %v4074_v4 }
 0x486   : > { %v4077_v58 = vrot.slane %v4076_v27, 4 }
 0x488   : > { %v4078_v39 = vadd.f32 %v4077_v58, %v4076_v27 }
 0x48a   : > { %v4079_v35 = vrot.slane %v4078_v39, 2 }
 0x48c   : > { %v4080_v11 = vadd.f32 %v4079_v35, %v4078_v39 }
 0x48e   : > { %v4081_v52 = vrot.slane %v4080_v11, 1 }
 0x490   : > { %v4082_v51 = vadd.f32 %v4081_v52, %v4080_v11 }
 0x492   : > { %v12219_v60 = vmul.f32 0.0031948881, %v4082_v51 }
 0x494   : > { %v12222_v8 = vsub.f32 %v3975_v3, %v12219_v60  ;;  %v12225_v31 = vsub.f32 %v3978_v57, %v12219_v60  ;;  %v12228_v42 = vsub.f32 %v3983_v24, %v12219_v60  ;;  %v12231_v48 = vsub.f32 %v3986_v56, %v12219_v60 }
 0x495   : > { %v12234_v2 = vsub.f32 %v3991_v22, %v12219_v60  ;;  %v12237_v54 = vsub.f32 %v3994_v49, %v12219_v60  ;;  %v12241_v18 = vsub.f32 %v12206_v47, %v12219_v60  ;;  %v12244_v3 = vsub.f32 %v4002_v6, %v12219_v60 }
 0x496   : > { %v12247_v57 = vsub.f32 %v4007_v53, %v12219_v60  ;;  %v12250_v24 = vsub.f32 %v4010_v28, %v12219_v60  ;;  %v12253_v56 = vsub.f32 %v4015_v12, %v12219_v60  ;;  %v12256_v22 = vsub.f32 %v4018_v33, %v12219_v60  ;;  %v9371_v33 = vld [vmem:[%s14884_s4 + $0xc0] sm:$0xff]  }
 0x497   : > { %v12259_v49 = vsub.f32 %v4023_v16, %v12219_v60  ;;  %v12262_v47 = vsub.f32 %v4026_v21, %v12219_v60  ;;  %v12265_v6 = vsub.f32 %v4031_v46, %v12219_v60  ;;  %v12268_v53 = vsub.f32 %v4034_v43, %v12219_v60  ;;  %5745 = vmatpush1.bf16.msra.mxu1 %v9371_v33 }
 0x498   : > { %v12272_v28 = vsub.f32 %v12135_v23, %v12219_v60  ;;  %v12276_v12 = vsub.f32 %v12139_v19, %v12219_v60  ;;  %v12283_v46 = vsub.f32 %v12133_v38, %v12219_v60  ;;  %5746 = vmatprep.subr.bf16.mxu1 %v15217_v36  ;;  %v9372_v19 = vld [vmem:[%s14884_s4 + $0xc8] sm:$0xff]   ;;  %v12295_v43 = vsub.f32 %v12137_v17, %v12219_v60 }
 0x499   : > { %v12299_v38 = vsub.f32 %v12146_v41, %v12219_v60  ;;  %v12309_v0 = vsub.f32 %v12152_v37, %v12219_v60  ;;  %v12315_v41 = vsub.f32 %v12144_v13, %v12219_v60  ;;  %v9374_v37 = vld [vmem:[%s14884_s4 + $0xd8] sm:$0xff]   ;;  %v12325_v4 = vsub.f32 %v12149_v15, %v12219_v60  ;;  %v9375_v15 = vld [vmem:[%s14884_s4 + $0xe0] sm:$0xff]  }
 0x49a   : > { %v4124_v16 = vmul.f32 %v12272_v28, %v12272_v28  ;;  %v4125_v23 = vmul.f32 %v12276_v12, %v12276_v12  ;;  %v4126_v21 = vmul.f32 %v12283_v46, %v12283_v46  ;;  %v4127_v17 = vmul.f32 %v12295_v43, %v12295_v43 }
 0x49b   : > { %5747 = vmatpush1.bf16.msra.mxu1 %v9372_v19  ;;  %v4128_v25 = vmul.f32 %v12299_v38, %v12299_v38  ;;  %v4129_v61 = vmul.f32 %v12309_v0, %v12309_v0  ;;  %v12331_v13 = vsub.f32 %v12158_v50, %v12219_v60  ;;  %v4130_v58 = vmul.f32 %v12315_v41, %v12315_v41 }
 0x49c   : > { %v4164_v1 = vadd.f32 %v4125_v23, %v4124_v16  ;;  %5748 = vmatprep.subr.bf16.mxu1 %v15217_v36  ;;  %v12341_v35 = vsub.f32 %v12164_v45, %v12219_v60  ;;  %v4131_v11 = vmul.f32 %v12325_v4, %v12325_v4  ;;  %v12347_v50 = vsub.f32 %v12156_v44, %v12219_v60  ;;  %v9376_v45 = vld [vmem:[%s14884_s4 + $0xe8] sm:$0xff]  }
 0x49d   : > { %v4132_v51 = vmul.f32 %v12331_v13, %v12331_v13  ;;  %v12357_v16 = vsub.f32 %v12161_v63, %v12219_v60  ;;  %v12363_v44 = vsub.f32 %v12170_v30, %v12219_v60  ;;  %v9377_v63 = vld [vmem:[%s14884_s4 + $0xf0] sm:$0xff]   ;;  %v12379_v30 = vsub.f32 %v12168_v40, %v12219_v60 }
 0x49e   : > { %v4165_v62 = vadd.f32 %v4164_v1, %v4126_v21  ;;  %v4133_v23 = vmul.f32 %v12341_v35, %v12341_v35  ;;  %v4134_v21 = vmul.f32 %v12347_v50, %v12347_v50  ;;  %v12395_v40 = vsub.f32 %v12182_v9, %v12219_v60  ;;  %v9379_v9 = vld [vmem:[%s14884_s4 + $0x140] sm:$0xff]  }
 0x49f   : > { %5749 = vmatpush1.bf16.msra.mxu1 %v9373_v29  ;;  %v12373_v29 = vsub.f32 %v12176_v26, %v12219_v60  ;;  %v9378_v26 = vld [vmem:[%s14884_s4 + $0xf8] sm:$0xff]   ;;  %9045 = vmatprep.subr.bf16.mxu0 %v9379_v9 }
 0x4a0   : > { %v4166_v59 = vadd.f32 %v4165_v62, %v4127_v17  ;;  %5750 = vmatprep.subr.bf16.mxu1 %v15217_v36  ;;  %v4135_v17 = vmul.f32 %v12357_v16, %v12357_v16  ;;  %9046 = vmatpush3.bf16.msra.mxu0 %v9379_v9 }
 0x4a2   : > { %v4167_v27 = vadd.f32 %v4166_v59, %v4128_v25  ;;  %v4136_v25 = vmul.f32 %v12363_v44, %v12363_v44 }
 0x4a3   : > { %5751 = vmatpush1.bf16.msra.mxu1 %v9374_v37  ;;  %v12389_v37 = vsub.f32 %v12173_v55, %v12219_v60  ;;  %v9380_v55 = vld [vmem:[%s14884_s4 + $0x100] sm:$0xff]  }
 0x4a4   : > { %v4168_v39 = vadd.f32 %v4167_v27, %v4129_v61  ;;  %5752 = vmatprep.subr.bf16.mxu1 %v15217_v36  ;;  %v4137_v61 = vmul.f32 %v12373_v29, %v12373_v29 }
 0x4a6   : > { %v4169_v52 = vadd.f32 %v4168_v39, %v4130_v58  ;;  %v4138_v58 = vmul.f32 %v12379_v30, %v12379_v30 }
 0x4a7   : > { %5753 = vmatpush1.bf16.msra.mxu1 %v9375_v15  ;;  %v12405_v15 = vsub.f32 %v12188_v14, %v12219_v60  ;;  %v9381_v14 = vld [vmem:[%s14884_s4 + $0x108] sm:$0xff]  }
 0x4a8   : > { %v4170_v33 = vadd.f32 %v4169_v52, %v4131_v11  ;;  %5754 = vmatprep.subr.bf16.mxu1 %v15217_v36  ;;  %v4139_v11 = vmul.f32 %v12389_v37, %v12389_v37 }
 0x4aa   : > { %v4171_v19 = vadd.f32 %v4170_v33, %v4132_v51  ;;  %v12414_v51 = vsub.f32 %v12180_v10, %v12219_v60  ;;  %v4140_v33 = vmul.f32 %v12395_v40, %v12395_v40  ;;  %v4141_v10 = vmul.f32 %v12405_v15, %v12405_v15 }
 0x4ab   : > { %5755 = vmatpush1.bf16.msra.mxu1 %v9376_v45 }
 0x4ac   : > { %v4172_v1 = vadd.f32 %v4171_v19, %v4133_v23  ;;  %5756 = vmatprep.subr.bf16.mxu1 %v15217_v36  ;;  %v12424_v23 = vsub.f32 %v12185_v20, %v12219_v60  ;;  %v9382_v20 = vld [vmem:[%s14884_s4 + $0x110] sm:$0xff]  }
 0x4ae   : > { %v4173_v62 = vadd.f32 %v4172_v1, %v4134_v21  ;;  %v9383_v21 = vld [vmem:[%s14884_s4 + $0x148] sm:$0xff]   ;;  %v12433_v1 = vsub.f32 %v12192_v7, %v12219_v60  ;;  %v4143_v7 = vmul.f32 %v12424_v23, %v12424_v23 }
 0x4af   : > { %5757 = vmatpush1.bf16.msra.mxu1 %v9377_v63  ;;  %v4142_v63 = vmul.f32 %v12414_v51, %v12414_v51  ;;  %9047 = vmatprep.subr.bf16.mxu0 %v9383_v21 }
 0x4b0   : > { %v4174_v59 = vadd.f32 %v4173_v62, %v4135_v17  ;;  %5758 = vmatprep.subr.bf16.mxu1 %v15217_v36  ;;  %9048 = vmatpush3.bf16.msra.mxu0 %v9383_v21  ;;  %v12443_v62 = vsub.f32 %v12194_v34, %v12219_v60  ;;  %v9384_v34 = vld [vmem:[%s14884_s4 + $0x118] sm:$0xff]  }
 0x4b2   : > { %v4175_v27 = vadd.f32 %v4174_v59, %v4136_v25  ;;  %v9386_v59 = vld [vmem:[%s14884_s4 + $0x150] sm:$0xff]  }
 0x4b3   : > { %5759 = vmatpush1.bf16.msra.mxu1 %v9378_v26  ;;  %v12452_v26 = vsub.f32 %v12198_v32, %v12219_v60  ;;  %9049 = vmatprep.subr.bf16.mxu0 %v9386_v59  ;;  %v4145_v32 = vmul.f32 %v12443_v62, %v12443_v62 }
 0x4b4   : > { %v4176_v39 = vadd.f32 %v4175_v27, %v4137_v61  ;;  %5760 = vmatprep.subr.bf16.mxu1 %v15217_v36  ;;  %v4144_v61 = vmul.f32 %v12433_v1, %v12433_v1  ;;  %9050 = vmatpush3.bf16.msra.mxu0 %v9386_v59 }
 0x4b6   : > { %v4177_v52 = vadd.f32 %v4176_v39, %v4138_v58  ;;  %v12462_v58 = vsub.f32 %v12201_v5, %v12219_v60  ;;  %v9385_v5 = vld [vmem:[%s14884_s4 + $0x120] sm:$0xff]  }
 0x4b7   : > { %5761 = vmatpush1.bf16.msra.mxu1 %v9380_v55  ;;  %v9388_v55 = vld [vmem:[%s14884_s4 + $0x158] sm:$0xff]  }
 0x4b8   : > { %v4178_v45 = vadd.f32 %v4177_v52, %v4139_v11  ;;  %5762 = vmatprep.subr.bf16.mxu1 %v15217_v36  ;;  %v4146_v11 = vmul.f32 %v12452_v26, %v12452_v26  ;;  %9051 = vmatprep.subr.bf16.mxu0 %v9388_v55  ;;  %v4147_v60 = vmul.f32 %v12462_v58, %v12462_v58 }
 0x4b9   : > { %9052 = vmatpush3.bf16.msra.mxu0 %v9388_v55  ;;  %v4153_v55 = vmul.f32 %v12237_v54, %v12237_v54 }
 0x4ba   : > { %v4179_v19 = vadd.f32 %v4178_v45, %v4140_v33  ;;  %v9390_v33 = vld [vmem:[%s14884_s4 + $0x160] sm:$0xff]   ;;  %v4148_v45 = vmul.f32 %v12222_v8, %v12222_v8 }
 0x4bb   : > { %5763 = vmatpush1.bf16.msra.mxu1 %v9381_v14  ;;  %9053 = vmatprep.subr.bf16.mxu0 %v9390_v33 }
 0x4bc   : > { %v4180_v17 = vadd.f32 %v4179_v19, %v4141_v10  ;;  %5764 = vmatprep.subr.bf16.mxu1 %v15217_v36  ;;  %v9387_v10 = vld [vmem:[%s14884_s4 + $0x128] sm:$0xff]   ;;  %v4149_v19 = vmul.f32 %v12225_v31, %v12225_v31 }
 0x4bd   : > { %9054 = vmatpush3.bf16.msra.mxu0 %v9390_v33  ;;  %v12518_v33 = vpop.permute.xlu0 %4727 }
 0x4be   : > { %v4181_v25 = vadd.f32 %v4180_v17, %v4142_v63  ;;  %v9392_v63 = vld [vmem:[%s14884_s4 + $0x168] sm:$0xff]   ;;  %v4150_v17 = vmul.f32 %v12228_v42, %v12228_v42  ;;  %15218 = vst [vmem:[#allocation39_spill] sm:$0xff] %v12518_v33 }
 0x4bf   : > { %5765 = vmatpush1.bf16.msra.mxu1 %v9382_v20  ;;  %9055 = vmatprep.subr.bf16.mxu0 %v9392_v63 }
 0x4c0   : > { %v4182_v27 = vadd.f32 %v4181_v25, %v4143_v7  ;;  %5766 = vmatprep.subr.bf16.mxu1 %v15217_v36  ;;  %v9389_v7 = vld [vmem:[%s14884_s4 + $0x130] sm:$0xff]   ;;  %v4151_v25 = vmul.f32 %v12231_v48, %v12231_v48 }
 0x4c1   : > { %9056 = vmatpush3.bf16.msra.mxu0 %v9392_v63 }
 0x4c2   : > { %v4183_v39 = vadd.f32 %v4182_v27, %v4144_v61  ;;  %v9393_v61 = vld [vmem:[%s14884_s4 + $0x170] sm:$0xff]   ;;  %v9394_v27 = vld [vmem:[%s14884_s4 + $0x178] sm:$0xff]  }
 0x4c3   : > { %5767 = vmatpush1.bf16.msra.mxu1 %v9384_v34  ;;  %v9391_v34 = vld [vmem:[%s14884_s4 + $0x138] sm:$0xff]   ;;  %9057 = vmatprep.subr.bf16.mxu0 %v9393_v61 }
 0x4c4   : > { %v4184_v52 = vadd.f32 %v4183_v39, %v4145_v32  ;;  %5768 = vmatprep.subr.bf16.mxu1 %v15217_v36  ;;  %v4152_v32 = vmul.f32 %v12234_v2, %v12234_v2 }
 0x4c5   : > { %9058 = vmatpush3.bf16.msra.mxu0 %v9393_v61 }
 0x4c6   : > { %v4185_v9 = vadd.f32 %v4184_v52, %v4146_v11  ;;  %9059 = vmatprep.subr.bf16.mxu0 %v9394_v27  ;;  %v4154_v52 = vmul.f32 %v12241_v18, %v12241_v18 }
 0x4c7   : > { %5769 = vmatpush1.bf16.msra.mxu1 %v9385_v5 }
 0x4c8   : > { %v4186_v14 = vadd.f32 %v4185_v9, %v4147_v60  ;;  %5770 = vmatprep.subr.bf16.mxu1 %v15217_v36  ;;  %v4155_v60 = vmul.f32 %v12244_v3, %v12244_v3 }
 0x4c9   : > { %9060 = vmatpush3.bf16.msra.mxu0 %v9394_v27  ;;  %v4161_v27 = vmul.f32 %v12262_v47, %v12262_v47 }
 0x4ca   : > { %v4187_v21 = vadd.f32 %v4186_v14, %v4148_v45  ;;  %7837 = vmatprep.subr.bf16.mxu0 %v15217_v36  ;;  %v4156_v45 = vmul.f32 %v12247_v57, %v12247_v57 }
 0x4cb   : > { %5771 = vmatpush1.bf16.msra.mxu1 %v9387_v10  ;;  %v4157_v10 = vmul.f32 %v12250_v24, %v12250_v24 }
 0x4cc   : > { %v4188_v20 = vadd.f32 %v4187_v21, %v4149_v19  ;;  %5772 = vmatprep.subr.bf16.mxu1 %v15217_v36  ;;  %v4158_v21 = vmul.f32 %v12253_v56, %v12253_v56 }
 0x4ce   : > { %v4189_v59 = vadd.f32 %v4188_v20, %v4150_v17  ;;  %v12526_v17 = vpop.permute.xlu1 %4732  ;;  %v12528_v20 = vpop.permute.xlu0 %4456 }
 0x4cf   : > { %5773 = vmatpush1.bf16.msra.mxu1 %v9389_v7  ;;  %15219 = vst [vmem:[#allocation45_spill] sm:$0xff] %v12526_v17  ;;  %v4159_v7 = vmul.f32 %v12256_v22, %v12256_v22 }
 0x4d0   : > { %v4190_v39 = vadd.f32 %v4189_v59, %v4151_v25  ;;  %5774 = vmatprep.subr.bf16.mxu1 %v15217_v36  ;;  %v4160_v59 = vmul.f32 %v12259_v49, %v12259_v49 }
 0x4d2   : > { %v4191_v11 = vadd.f32 %v4190_v39, %v4152_v32  ;;  %v4163_v32 = vmul.f32 %v12268_v53, %v12268_v53  ;;  %v12538_v39 = vpop.permute.xlu1 %4737 }
 0x4d3   : > { %5775 = vmatpush1.bf16.msra.mxu1 %v9391_v34 }
 0x4d4   : > { %v4192_v5 = vadd.f32 %v4191_v11, %v4153_v55  ;;  %v12540_v55 = vpop.permute.xlu0 %4461  ;;  %v4162_v11 = vmul.f32 %v12265_v6, %v12265_v6 }
 0x4d6   : > { %v4193_v9 = vadd.f32 %v4192_v5, %v4154_v52 }
 0x4d8   : > { %v4194_v14 = vadd.f32 %v4193_v9, %v4155_v60  ;;  %v4202_v60 = vsel %vm1982_vm0, %v4163_v32, 0.0 }
 0x4da   : > { %v4195_v19 = vadd.f32 %v4194_v14, %v4156_v45  ;;  %v12545_v45 = vpop.permute.xlu1 %4742  ;;  %v12547_v14 = vpop.permute.xlu0 %4466 }
 0x4db   : > { %15220 = vst [vmem:[#allocation44_spill] sm:$0xff] %v12545_v45  ;;  %15221 = vst [vmem:[#allocation50_spill] sm:$0xff] %v12547_v14 }
 0x4dc   : > { %v4196_v63 = vadd.f32 %v4195_v19, %v4157_v10 }
 0x4de   : > { %v4197_v25 = vadd.f32 %v4196_v63, %v4158_v21  ;;  %v12549_v63 = vpop.permute.xlu1 %4471 }
 0x4df   : > { %15222 = vst [vmem:[#allocation49_spill] sm:$0xff] %v12549_v63 }
 0x4e0   : > { %v4198_v61 = vadd.f32 %v4197_v25, %v4159_v7  ;;  %v4477_v7 = vpop.permute.xlu0 %4476 }
 0x4e2   : > { %v4199_v34 = vadd.f32 %v4198_v61, %v4160_v59  ;;  %v12551_v36 = vpop.permute.xlu1 %4747 }
 0x4e3   : > { %15223 = vst [vmem:[#allocation54_spill] sm:$0xff] %v12551_v36 }
 0x4e4   : > { %v4200_v52 = vadd.f32 %v4199_v34, %v4161_v27  ;;  %v12553_v27 = vpop.permute.xlu0 %4752 }
 0x4e5   : > { %15224 = vst [vmem:[#allocation53_spill] sm:$0xff] %v12553_v27 }
 0x4e6   : > { %v4201_v5 = vadd.f32 %v4200_v52, %v4162_v11  ;;  %v4758_v11 = vpop.permute.xlu1 %4757 }
 0x4e8   : > { %v4203_v9 = vadd.f32 %v4202_v60, %v4201_v5  ;;  %v4482_v52 = vpop.permute.xlu0 %4481 }
 0x4ea   : > { %v4204_v10 = vrot.slane %v4203_v9, 4  ;;  %v4487_v5 = vpop.permute.xlu1 %4486 }
 0x4ec   : > { %v4205_v19 = vadd.f32 %v4204_v10, %v4203_v9  ;;  %v12555_v60 = vpop.permute.xlu0 %4491 }
 0x4ed   : > { %15225 = vst [vmem:[#allocation58_spill] sm:$0xff] %v12555_v60 }
 0x4ee   : > { %v4206_v21 = vrot.slane %v4205_v19, 2 }
 0x4f0   : > { %v4207_v25 = vadd.f32 %v4206_v21, %v4205_v19 }
 0x4f2   : > { %v4208_v59 = vrot.slane %v4207_v25, 1 }
 0x4f4   : > { %v4209_v61 = vadd.f32 %v4208_v59, %v4207_v25 }
 0x4f6   : > { %v4210_v34 = vmul.f32 0.0031948881, %v4209_v61 }
 0x4f8   : > { %v4211_v32 = vadd.f32 1e-05, %v4210_v34  ;;  %v4763_v34 = vpop.permute.xlu1 %4762 }
 0x4fa   : > { %9421 = vrsqrt.f32 %v4211_v32  ;;  %v4768_v32 = vpop.permute.xlu0 %4767 }
 0x504   : > { %v12557_v9 = vpop.eup %9421 }
 0x505   : > { %v4249_v10 = vmul.f32 %v12557_v9, %v12259_v49  ;;  %v4250_v19 = vmul.f32 %v12557_v9, %v12262_v47  ;;  %v4251_v21 = vmul.f32 %v12557_v9, %v12265_v6 }
 0x507   : > { %v4530_v25 = vmul.f32 %v4477_v7, %v4249_v10  ;;  %v4531_v59 = vmul.f32 %v4482_v52, %v4250_v19  ;;  %v4532_v61 = vmul.f32 %v4487_v5, %v4251_v21  ;;  %v4217_v52 = vmul.f32 %v12557_v9, %v12299_v38  ;;  %v15228_v10 = vld [vmem:[#allocation80_spill] sm:$0xff]  ;;  %v15229_v19 = vld [vmem:[#allocation79_spill] sm:$0xff] }
 0x508   : > { %v4218_v5 = vmul.f32 %v12557_v9, %v12309_v0  ;;  %v4223_v38 = vmul.f32 %v12557_v9, %v12347_v50  ;;  %v4224_v0 = vmul.f32 %v12557_v9, %v12357_v16  ;;  %v4230_v50 = vmul.f32 %v12557_v9, %v12405_v15 }
 0x509   : > { %v4811_v27 = vadd.f32 %v4758_v11, %v4530_v25  ;;  %v4812_v36 = vadd.f32 %v4763_v34, %v4531_v59  ;;  %v4813_v45 = vadd.f32 %v4768_v32, %v4532_v61  ;;  %v4231_v16 = vmul.f32 %v12557_v9, %v12414_v51  ;;  %v15231_v59 = vld [vmem:[#allocation83_spill] sm:$0xff]  ;;  %v15232_v61 = vld [vmem:[#allocation88_spill] sm:$0xff] }
 0x50a   : > { %v4237_v15 = vmul.f32 %v12557_v9, %v12222_v8  ;;  %v4242_v8 = vmul.f32 %v12557_v9, %v12237_v54  ;;  %v15230_v54 = vld [vmem:[#allocation84_spill] sm:$0xff]  ;;  %v4498_v34 = vmul.f32 %v15232_v61, %v4217_v52  ;;  %v15233_v32 = vld [vmem:[#allocation87_spill] sm:$0xff] }
 0x50b   : > { %v4851_v17 = vmul.f32 0.2, %v4811_v27  ;;  %v4852_v33 = vmul.f32 0.2, %v4812_v36  ;;  %v4853_v60 = vmul.f32 0.2, %v4813_v45 }
 0x50c   : > { %v15241_v52 = vld [vmem:[#allocation104_spill] sm:$0xff] }
 0x50d   : > { %v12565_v63 = vmax.f32 %v4811_v27, %v4851_v17  ;;  %v4892_v49 = vmax.f32 %v4812_v36, %v4852_v33  ;;  %v12567_v14 = vmax.f32 %v4813_v45, %v4853_v60  ;;  %v4213_v33 = vmul.f32 %v12557_v9, %v12272_v28 }
 0x50e   : > { %v4214_v17 = vmul.f32 %v12557_v9, %v12276_v12  ;;  %v4215_v45 = vmul.f32 %v12557_v9, %v12283_v46  ;;  %v4216_v27 = vmul.f32 %v12557_v9, %v12295_v43  ;;  %v4219_v60 = vmul.f32 %v12557_v9, %v12315_v41 }
 0x50f   : > { %15226 = vst [vmem:[#allocation57_spill] sm:$0xff] %v12565_v63  ;;  %15227 = vst [vmem:[#allocation62_spill] sm:$0xff] %v12567_v14  ;;  %v14905_v47 = vrot.slane %v12565_v63, 7  ;;  %v5048_v6 = vrot.slane %v4892_v49, 7  ;;  %v14904_v7 = vrot.slane %v12567_v14, 7  ;;  %v4220_v28 = vmul.f32 %v12557_v9, %v12325_v4 }
 0x510   : > { %4932 = vst [vmem:[#allocation2 + $0x380] sm:$0xff] %v4892_v49  ;;  %4931 = vst [vmem:[#allocation2 + $0x368] sm:$0xff] %v12565_v63  ;;  %v4221_v12 = vmul.f32 %v12557_v9, %v12331_v13  ;;  %v4222_v46 = vmul.f32 %v12557_v9, %v12341_v35  ;;  %v4246_v43 = vmul.f32 %v12557_v9, %v12250_v24 }
 0x511   : > { %4933 = vst [vmem:[#allocation2 + $0x398] sm:$0xff] %v12567_v14  ;;  %v5049_v11 = vsel %vm1982_vm0, %v14905_v47, %v5048_v6  ;;  %v5051_v36 = vsel %vm1982_vm0, %v5048_v6, %v14904_v7  ;;  %v4225_v41 = vmul.f32 %v12557_v9, %v12363_v44  ;;  %v4226_v4 = vmul.f32 %v12557_v9, %v12373_v29 }
 0x512   : > { %5131 = vst [vmem:[#allocation2 + $0x378] sm:$0xff] %v5049_v11  ;;  %5132 = vst [vmem:[#allocation2 + $0x390] sm:$0xff] %v5051_v36  ;;  %v4227_v13 = vmul.f32 %v12557_v9, %v12379_v30  ;;  %v4228_v35 = vmul.f32 %v12557_v9, %v12389_v37  ;;  %v4229_v24 = vmul.f32 %v12557_v9, %v12395_v40  ;;  %v15235_v11 = vld [vmem:[#allocation91_spill] sm:$0xff] }
 0x513   : > { %v4232_v44 = vmul.f32 %v12557_v9, %v12424_v23  ;;  %v4233_v29 = vmul.f32 %v12557_v9, %v12433_v1  ;;  %v4234_v30 = vmul.f32 %v12557_v9, %v12443_v62  ;;  %v4235_v37 = vmul.f32 %v12557_v9, %v12452_v26 }
 0x514   : > { %v4236_v40 = vmul.f32 %v12557_v9, %v12462_v58  ;;  %v12632_v51 = vmul.f32 %v12540_v55, %v4246_v43  ;;  %v4238_v23 = vmul.f32 %v12557_v9, %v12225_v31  ;;  %v4239_v1 = vmul.f32 %v12557_v9, %v12228_v42  ;;  %v15237_v43 = vld [vmem:[#allocation95_spill] sm:$0xff] }
 0x515   : > { %v4240_v62 = vmul.f32 %v12557_v9, %v12231_v48  ;;  %v4245_v26 = vmul.f32 %v12557_v9, %v12247_v57  ;;  %v4241_v58 = vmul.f32 %v12557_v9, %v12234_v2  ;;  %v4243_v55 = vmul.f32 %v12557_v9, %v12241_v18 }
 0x516   : > { %v4494_v31 = vmul.f32 %v15228_v10, %v4213_v33  ;;  %v4244_v42 = vmul.f32 %v12557_v9, %v12244_v3  ;;  %v4247_v48 = vmul.f32 %v12557_v9, %v12253_v56  ;;  %v4248_v57 = vmul.f32 %v12557_v9, %v12256_v22  ;;  %v15234_v3 = vld [vmem:[#allocation92_spill] sm:$0xff] }
 0x517   : > { %v4252_v2 = vmul.f32 %v12557_v9, %v12268_v53  ;;  %v4495_v21 = vmul.f32 %v15229_v19, %v4214_v17  ;;  %v4496_v25 = vmul.f32 %v15230_v54, %v4215_v45  ;;  %v4497_v18 = vmul.f32 %v15231_v59, %v4216_v27  ;;  %v15236_v22 = vld [vmem:[#allocation96_spill] sm:$0xff]  ;;  %v15239_v45 = vld [vmem:[#allocation82_spill] sm:$0xff]  ;;  %v15240_v27 = vld [vmem:[#allocation99_spill] sm:$0xff] }
 0x518   : > { %v4499_v49 = vmul.f32 %v15233_v32, %v4218_v5  ;;  %v4500_v6 = vmul.f32 %v15234_v3, %v4219_v60  ;;  %v4501_v56 = vmul.f32 %v15235_v11, %v4220_v28  ;;  %v4526_v36 = vmul.f32 %v12528_v20, %v4245_v26  ;;  %v15238_v9 = vld [vmem:[#allocation100_spill] sm:$0xff]  ;;  %v15242_v60 = vld [vmem:[#allocation103_spill] sm:$0xff] }
 0x519   : > { %v4502_v33 = vmul.f32 %v15236_v22, %v4221_v12  ;;  %v4503_v53 = vmul.f32 %v15237_v43, %v4222_v46  ;;  %v12668_v17 = vmul.f32 %v15238_v9, %v4223_v38  ;;  %v4775_v10 = vadd.f32 %v15239_v45, %v4494_v31  ;;  %v15243_v28 = vld [vmem:[#allocation108_spill] sm:$0xff]  ;;  %v15244_v12 = vld [vmem:[#allocation107_spill] sm:$0xff] }
 0x51a   : > { %v12672_v19 = vmul.f32 %v15240_v27, %v4224_v0  ;;  %v12675_v5 = vmul.f32 %v15241_v52, %v4225_v41  ;;  %v12678_v54 = vmul.f32 %v15242_v60, %v4226_v4  ;;  %v12681_v20 = vmul.f32 %v15243_v28, %v4227_v13  ;;  %v15245_v46 = vld [vmem:[#allocation112_spill] sm:$0xff]  ;;  %v15246_v59 = vld [vmem:[#allocation111_spill] sm:$0xff] }
 0x51b   : > { %v12684_v26 = vmul.f32 %v15244_v12, %v4228_v35  ;;  %v12687_v38 = vmul.f32 %v15245_v46, %v4229_v24  ;;  %v12690_v31 = vmul.f32 %v15246_v59, %v4230_v50  ;;  %v15247_v0 = vld [vmem:[#allocation116_spill] sm:$0xff]  ;;  %v15248_v41 = vld [vmem:[#allocation115_spill] sm:$0xff]  ;;  %v12699_v13 = vadd.f32 %v12538_v39, %v4526_v36 }
 0x51c   : > { %v12693_v61 = vmul.f32 %v15247_v0, %v4231_v16  ;;  %v4513_v32 = vmul.f32 %v15248_v41, %v4232_v44  ;;  %v15249_v3 = vld [vmem:[#allocation120_spill] sm:$0xff]  ;;  %v15250_v11 = vld [vmem:[#allocation119_spill] sm:$0xff]  ;;  %v4815_v50 = vmul.f32 0.2, %v4775_v10 }
 0x51d   : > { %v4514_v4 = vmul.f32 %v15249_v3, %v4233_v29  ;;  %v4515_v22 = vmul.f32 %v15250_v11, %v4234_v30  ;;  %v15251_v35 = vld [vmem:[#allocation124_spill] sm:$0xff]  ;;  %v15252_v9 = vld [vmem:[#allocation123_spill] sm:$0xff] }
 0x51e   : > { %v4516_v43 = vmul.f32 %v15251_v35, %v4235_v37  ;;  %v4517_v24 = vmul.f32 %v15252_v9, %v4236_v40  ;;  %v15253_v45 = vld [vmem:[#allocation128_spill] sm:$0xff]  ;;  %v15254_v52 = vld [vmem:[#allocation127_spill] sm:$0xff]  ;;  %v12711_v37 = vmax.f32 %v4775_v10, %v4815_v50  ;;  %v15261_v40 = vld [vmem:[#allocation50_spill] sm:$0xff] }
 0x51f   : > { %v4518_v27 = vmul.f32 %v15253_v45, %v4237_v15  ;;  %v4519_v60 = vmul.f32 %v15254_v52, %v4238_v23  ;;  %v15255_v16 = vld [vmem:[#allocation132_spill] sm:$0xff]  ;;  %v15256_v12 = vld [vmem:[#allocation131_spill] sm:$0xff]  ;;  %v4528_v3 = vmul.f32 %v15261_v40, %v4247_v48  ;;  %v15262_v15 = vld [vmem:[#allocation49_spill] sm:$0xff] }
 0x520   : > { %v4520_v28 = vmul.f32 %v15255_v16, %v4239_v1  ;;  %v4521_v44 = vmul.f32 %v15256_v12, %v4240_v62  ;;  %v15257_v46 = vld [vmem:[#allocation136_spill] sm:$0xff]  ;;  %v15258_v59 = vld [vmem:[#allocation135_spill] sm:$0xff]  ;;  %v4529_v11 = vmul.f32 %v15262_v15, %v4248_v57  ;;  %v15263_v35 = vld [vmem:[#allocation58_spill] sm:$0xff]  ;;  %4895 = vst [vmem:[#allocation2 + $0x8] sm:$0xff] %v12711_v37 }
 0x521   : > { %v4522_v29 = vmul.f32 %v15257_v46, %v4241_v58  ;;  %v4523_v30 = vmul.f32 %v15258_v59, %v4242_v8  ;;  %v15259_v0 = vld [vmem:[#allocation140_spill] sm:$0xff]  ;;  %v15260_v36 = vld [vmem:[#allocation139_spill] sm:$0xff]  ;;  %v4533_v23 = vmul.f32 %v15263_v35, %v4252_v2  ;;  %v15264_v9 = vld [vmem:[#allocation81_spill] sm:$0xff] }
 0x522   : > { %v4524_v39 = vmul.f32 %v15259_v0, %v4243_v55  ;;  %v4525_v41 = vmul.f32 %v15260_v36, %v4244_v42  ;;  %v4776_v1 = vadd.f32 %v15264_v9, %v4495_v21  ;;  %v15265_v45 = vld [vmem:[#allocation86_spill] sm:$0xff]  ;;  %v15266_v58 = vld [vmem:[#allocation85_spill] sm:$0xff] }
 0x523   : > { %v12718_v62 = vadd.f32 %v15265_v45, %v4496_v25  ;;  %v12721_v52 = vadd.f32 %v15266_v58, %v4497_v18  ;;  %v15267_v8 = vld [vmem:[#allocation90_spill] sm:$0xff]  ;;  %v15268_v42 = vld [vmem:[#allocation89_spill] sm:$0xff] }
 0x524   : > { %v12724_v55 = vadd.f32 %v15267_v8, %v4498_v34  ;;  %v12727_v10 = vadd.f32 %v15268_v42, %v4499_v49  ;;  %v15269_v48 = vld [vmem:[#allocation94_spill] sm:$0xff]  ;;  %v15270_v2 = vld [vmem:[#allocation93_spill] sm:$0xff] }
 0x525   : > { %v12731_v57 = vadd.f32 %v15269_v48, %v4500_v6  ;;  %v12734_v50 = vadd.f32 %v15270_v2, %v4501_v56  ;;  %v15271_v21 = vld [vmem:[#allocation98_spill] sm:$0xff]  ;;  %v15273_v12 = vld [vmem:[#allocation97_spill] sm:$0xff] }
 0x526   : > { %v12737_v25 = vadd.f32 %v15271_v21, %v4502_v33  ;;  %v15272_v16 = vld [vmem:[#allocation122_spill] sm:$0xff]  ;;  %v12741_v46 = vadd.f32 %v15273_v12, %v4503_v53  ;;  %v15274_v34 = vld [vmem:[#allocation121_spill] sm:$0xff]  ;;  %v15283_v53 = vld [vmem:[#allocation39_spill] sm:$0xff] }
 0x527   : > { %v4795_v18 = vadd.f32 %v15272_v16, %v4514_v4  ;;  %v4796_v59 = vadd.f32 %v15274_v34, %v4515_v22  ;;  %v15275_v49 = vld [vmem:[#allocation126_spill] sm:$0xff]  ;;  %v15276_v36 = vld [vmem:[#allocation125_spill] sm:$0xff]  ;;  %v4805_v2 = vadd.f32 %v15283_v53, %v4524_v39 }
 0x528   : > { %v4797_v0 = vadd.f32 %v15275_v49, %v4516_v43  ;;  %v4798_v40 = vadd.f32 %v15276_v36, %v4517_v24  ;;  %v15277_v15 = vld [vmem:[#allocation130_spill] sm:$0xff]  ;;  %v15278_v35 = vld [vmem:[#allocation129_spill] sm:$0xff]  ;;  %v15285_v43 = vld [vmem:[#allocation44_spill] sm:$0xff] }
 0x529   : > { %v4799_v6 = vadd.f32 %v15277_v15, %v4518_v27  ;;  %v4800_v9 = vadd.f32 %v15278_v35, %v4519_v60  ;;  %v15279_v56 = vld [vmem:[#allocation134_spill] sm:$0xff]  ;;  %v15280_v58 = vld [vmem:[#allocation133_spill] sm:$0xff]  ;;  %v4808_v16 = vadd.f32 %v15285_v43, %v12632_v51  ;;  %v4816_v27 = vmul.f32 0.2, %v4776_v1  ;;  %v4773_v60 = vpop.permute.xlu1 %4772 }
 0x52a   : > { %v4801_v45 = vadd.f32 %v15279_v56, %v4520_v28  ;;  %v4802_v33 = vadd.f32 %v15280_v58, %v4521_v44  ;;  %v15281_v8 = vld [vmem:[#allocation138_spill] sm:$0xff]  ;;  %v15282_v4 = vld [vmem:[#allocation137_spill] sm:$0xff]  ;;  %v4835_v34 = vmul.f32 0.2, %v4795_v18  ;;  %v4836_v36 = vmul.f32 0.2, %v4796_v59 }
 0x52b   : > { %v4803_v42 = vadd.f32 %v15281_v8, %v4522_v29  ;;  %v4804_v48 = vadd.f32 %v15282_v4, %v4523_v30  ;;  %v15284_v21 = vld [vmem:[#allocation45_spill] sm:$0xff]  ;;  %v15286_v24 = vld [vmem:[#allocation54_spill] sm:$0xff]  ;;  %v4837_v44 = vmul.f32 0.2, %v4797_v0  ;;  %v4838_v15 = vmul.f32 0.2, %v4798_v40 }
 0x52c   : > { %v4806_v22 = vadd.f32 %v15284_v21, %v4525_v41  ;;  %v4809_v12 = vadd.f32 %v15286_v24, %v4528_v3  ;;  %v15287_v49 = vld [vmem:[#allocation53_spill] sm:$0xff]  ;;  %v4814_v29 = vadd.f32 %v4773_v60, %v4533_v23  ;;  %v4839_v35 = vmul.f32 0.2, %v4799_v6  ;;  %v15288_v39 = vld [vmem:[#allocation102_spill] sm:$0xff] }
 0x52d   : > { %v4810_v28 = vadd.f32 %v15287_v49, %v4529_v11  ;;  %v4840_v30 = vmul.f32 0.2, %v4800_v9  ;;  %v4841_v56 = vmul.f32 0.2, %v4801_v45  ;;  %v12760_v41 = vadd.f32 %v15288_v39, %v12668_v17  ;;  %v15290_v3 = vld [vmem:[#allocation117_spill] sm:$0xff] }
 0x52e   : > { %v4842_v58 = vmul.f32 0.2, %v4802_v33  ;;  %v4843_v51 = vmul.f32 0.2, %v4803_v42  ;;  %v4844_v8 = vmul.f32 0.2, %v4804_v48  ;;  %v12763_v4 = vadd.f32 %v15290_v3, %v4513_v32 }
 0x52f   : > { %15289 = vst [vmem:[#allocation61_spill] sm:$0xff] %v12760_v41  ;;  %v4845_v53 = vmul.f32 0.2, %v4805_v2  ;;  %v4846_v21 = vmul.f32 0.2, %v4806_v22  ;;  %v12766_v60 = vmax.f32 %v4776_v1, %v4816_v27  ;;  %v12768_v7 = vmax.f32 %v4795_v18, %v4835_v34 }
 0x530   : > { %v4847_v11 = vmul.f32 0.2, %v12699_v13  ;;  %v4848_v43 = vmul.f32 0.2, %v4808_v16  ;;  %v4849_v24 = vmul.f32 0.2, %v4809_v12  ;;  %v12770_v17 = vmax.f32 %v4796_v59, %v4836_v36 }
 0x531   : > { %v4850_v23 = vmul.f32 0.2, %v4810_v28  ;;  %v4854_v49 = vmul.f32 0.2, %v4814_v29  ;;  %v12772_v39 = vmax.f32 %v4797_v0, %v4837_v44  ;;  %v12774_v47 = vmax.f32 %v4798_v40, %v4838_v15  ;;  %4915 = vst [vmem:[#allocation2 + $0x1e8] sm:$0xff] %v12768_v7  ;;  %v15297_v44 = vld [vmem:[#allocation114_spill] sm:$0xff] }
 0x532   : > { %15291 = vst [vmem:[#allocation66_spill] sm:$0xff] %v12770_v17  ;;  %v12776_v32 = vmax.f32 %v4799_v6, %v4839_v35  ;;  %v12778_v3 = vmax.f32 %v4800_v9, %v4840_v30  ;;  %v12780_v14 = vmax.f32 %v4801_v45, %v4841_v56  ;;  %v12782_v63 = vmax.f32 %v4802_v33, %v4842_v58  ;;  %v15298_v15 = vld [vmem:[#allocation113_spill] sm:$0xff]  ;;  %v15299_v30 = vld [vmem:[#allocation118_spill] sm:$0xff] }
 0x533   : > { %v12784_v41 = vmax.f32 %v4803_v42, %v4843_v51  ;;  %v12786_v1 = vmax.f32 %v4804_v48, %v4844_v8  ;;  %v12788_v18 = vmax.f32 %v4805_v2, %v4845_v53  ;;  %4916 = vst [vmem:[#allocation2 + $0x200] sm:$0xff] %v12770_v17  ;;  %4917 = vst [vmem:[#allocation2 + $0x218] sm:$0xff] %v12772_v39  ;;  %v14910_v33 = vrot.slane %v12766_v60, 7  ;;  %v15292_v42 = vld [vmem:[#allocation101_spill] sm:$0xff]  ;;  %v15293_v2 = vld [vmem:[#allocation106_spill] sm:$0xff] }
 0x534   : > { %v12793_v59 = vmax.f32 %v4806_v22, %v4846_v21  ;;  %v12796_v0 = vmax.f32 %v12699_v13, %v4847_v11  ;;  %v12798_v40 = vmax.f32 %v4808_v16, %v4848_v43  ;;  %v12800_v6 = vmax.f32 %v4809_v12, %v4849_v24  ;;  %4918 = vst [vmem:[#allocation2 + $0x230] sm:$0xff] %v12774_v47  ;;  %v15294_v16 = vld [vmem:[#allocation105_spill] sm:$0xff] }
 0x535   : > { %4919 = vst [vmem:[#allocation2 + $0x248] sm:$0xff] %v12776_v32  ;;  %4920 = vst [vmem:[#allocation2 + $0x260] sm:$0xff] %v12778_v3  ;;  %v12806_v9 = vmax.f32 %v4810_v28, %v4850_v23  ;;  %v12808_v45 = vmax.f32 %v4814_v29, %v4854_v49  ;;  %v4975_v13 = vrot.slane %v12711_v37, 7  ;;  %v12818_v48 = vadd.f32 %v15292_v42, %v12672_v19  ;;  %v15295_v19 = vld [vmem:[#allocation110_spill] sm:$0xff] }
 0x536   : > { %4921 = vst [vmem:[#allocation2 + $0x278] sm:$0xff] %v12780_v14  ;;  %4922 = vst [vmem:[#allocation2 + $0x290] sm:$0xff] %v12782_v63  ;;  %v12822_v22 = vadd.f32 %v15293_v2, %v12675_v5  ;;  %v12826_v12 = vadd.f32 %v15294_v16, %v12678_v54  ;;  %v4834_v27 = vmul.f32 0.2, %v12763_v4  ;;  %v12835_v34 = vadd.f32 %v15295_v19, %v12681_v20  ;;  %v15296_v5 = vld [vmem:[#allocation109_spill] sm:$0xff] }
 0x537   : > { %4923 = vst [vmem:[#allocation2 + $0x2a8] sm:$0xff] %v12784_v41  ;;  %4924 = vst [vmem:[#allocation2 + $0x2c0] sm:$0xff] %v12786_v1  ;;  %v12839_v28 = vadd.f32 %v15296_v5, %v12684_v26  ;;  %v4817_v54 = vmul.f32 0.2, %v12718_v62  ;;  %v12847_v36 = vsel %vm1982_vm0, %v4975_v13, %v14910_v33  ;;  %v12851_v20 = vadd.f32 %v15297_v44, %v12687_v38 }
 0x538   : > { %4925 = vst [vmem:[#allocation2 + $0x2d8] sm:$0xff] %v12788_v18  ;;  %4926 = vst [vmem:[#allocation2 + $0x2f0] sm:$0xff] %v12793_v59  ;;  %v12855_v26 = vadd.f32 %v15298_v15, %v12690_v31  ;;  %v4818_v29 = vmul.f32 0.2, %v12721_v52  ;;  %v4819_v35 = vmul.f32 0.2, %v12724_v55  ;;  %v12861_v56 = vadd.f32 %v15299_v30, %v12693_v61 }
 0x539   : > { %4927 = vst [vmem:[#allocation2 + $0x308] sm:$0xff] %v12796_v0  ;;  %4928 = vst [vmem:[#allocation2 + $0x320] sm:$0xff] %v12798_v40  ;;  %v4820_v58 = vmul.f32 0.2, %v12727_v10  ;;  %v4821_v51 = vmul.f32 0.2, %v12731_v57  ;;  %v12872_v11 = vmax.f32 %v12763_v4, %v4834_v27  ;;  %v12884_v23 = vmax.f32 %v12718_v62, %v4817_v54 }
 0x53a   : > { %4929 = vst [vmem:[#allocation2 + $0x338] sm:$0xff] %v12800_v6  ;;  %4930 = vst [vmem:[#allocation2 + $0x350] sm:$0xff] %v12806_v9  ;;  %v4822_v8 = vmul.f32 0.2, %v12734_v50  ;;  %v4823_v38 = vmul.f32 0.2, %v12737_v25  ;;  %v12896_v42 = vmax.f32 %v12721_v52, %v4818_v29  ;;  %v12902_v16 = vmax.f32 %v12724_v55, %v4819_v35 }
 0x53b   : > { %4934 = vst [vmem:[#allocation2 + $0x3b0] sm:$0x1] %v12808_v45  ;;  %5094 = vst [vmem:[#allocation2] sm:$0xfe] %v4975_v13  ;;  %v4824_v53 = vmul.f32 0.2, %v12741_v46  ;;  %v12905_v62 = vmax.f32 %v12727_v10, %v4820_v58  ;;  %v12908_v27 = vmax.f32 %v12731_v57, %v4821_v51 }
 0x53c   : > { %v15300_v31 = vld [vmem:[#allocation61_spill] sm:$0xff]  ;;  %v12875_v43 = vmul.f32 0.2, %v12818_v48  ;;  %v12878_v61 = vmul.f32 0.2, %v12822_v22  ;;  %v12911_v19 = vmax.f32 %v12734_v50, %v4822_v8  ;;  %v14909_v5 = vrot.slane %v12872_v11, 7 }
 0x53d   : > { %v12869_v21 = vmul.f32 0.2, %v15300_v31  ;;  %v12881_v24 = vmul.f32 0.2, %v12826_v12  ;;  %v12887_v49 = vmul.f32 0.2, %v12835_v34  ;;  %v12917_v44 = vmax.f32 %v12737_v25, %v4823_v38 }
 0x53e   : > { %v12890_v13 = vmul.f32 0.2, %v12839_v28  ;;  %v12893_v4 = vmul.f32 0.2, %v12851_v20  ;;  %v12899_v2 = vmul.f32 0.2, %v12861_v56  ;;  %v12923_v57 = vmax.f32 %v12741_v46, %v4824_v53 }
 0x53f   : > { %v5014_v52 = vrot.slane %v12768_v7, 7  ;;  %v5016_v54 = vrot.slane %v12770_v17, 7  ;;  %v5018_v55 = vrot.slane %v12772_v39, 7  ;;  %v5020_v10 = vrot.slane %v12774_v47, 7 }
 0x540   : > { %v5022_v15 = vrot.slane %v12776_v32, 7  ;;  %v4978_v50 = vrot.slane %v12884_v23, 7  ;;  %v5024_v46 = vrot.slane %v12778_v3, 7  ;;  %v5026_v51 = vrot.slane %v12780_v14, 7 }
 0x541   : > { %v12929_v29 = vsel %vm1982_vm0, %v14909_v5, %v5014_v52  ;;  %v12932_v35 = vsel %vm1982_vm0, %v5014_v52, %v5016_v54  ;;  %v12935_v25 = vsel %vm1982_vm0, %v5016_v54, %v5018_v55  ;;  %v12938_v30 = vsel %vm1982_vm0, %v5018_v55, %v5020_v10 }
 0x542   : > { %15301 = vst [vmem:[#allocation65_spill] sm:$0xff] %v12932_v35  ;;  %15302 = vst [vmem:[#allocation68_spill] sm:$0xff] %v12935_v25  ;;  %v12941_v58 = vsel %vm1982_vm0, %v5020_v10, %v5022_v15  ;;  %v5028_v8 = vrot.slane %v12782_v63, 7  ;;  %v5030_v38 = vrot.slane %v12784_v41, 7  ;;  %v5032_v53 = vrot.slane %v12786_v1, 7 }
 0x543   : > { %15303 = vst [vmem:[#allocation72_spill] sm:$0xff] %v12938_v30  ;;  %15304 = vst [vmem:[#allocation71_spill] sm:$0xff] %v12941_v58  ;;  %v12949_v52 = vsel %vm1982_vm0, %v5022_v15, %v5024_v46  ;;  %v5034_v54 = vrot.slane %v12788_v18, 7  ;;  %v5036_v55 = vrot.slane %v12793_v59, 7  ;;  %v5038_v10 = vrot.slane %v12796_v0, 7  ;;  %v5371_v15 = vld [vmem:[#allocation2] sm:$0xff] }
 0x544   : > { %15305 = vst [vmem:[#allocation74_spill] sm:$0xff] %v12949_v52  ;;  %v12955_v5 = vsel %vm1982_vm0, %v5024_v46, %v5026_v51  ;;  %v12958_v33 = vsel %vm1982_vm0, %v5026_v51, %v5028_v8  ;;  %v12961_v17 = vsel %vm1982_vm0, %v5028_v8, %v5030_v38  ;;  %v12964_v58 = vsel %vm1982_vm0, %v5030_v38, %v5032_v53 }
 0x545   : > { %15306 = vst [vmem:[#allocation4_spill] sm:$0xff] %v12955_v5  ;;  %15307 = vst [vmem:[#allocation73_spill] sm:$0xff] %v12958_v33  ;;  %v12967_v52 = vsel %vm1982_vm0, %v5032_v53, %v5034_v54  ;;  %v12970_v30 = vsel %vm1982_vm0, %v5034_v54, %v5036_v55  ;;  %v12973_v25 = vsel %vm1982_vm0, %v5036_v55, %v5038_v10  ;;  %v5040_v46 = vrot.slane %v12798_v40, 7 }
 0x546   : > { %15308 = vst [vmem:[#allocation13_spill] sm:$0xff] %v12961_v17  ;;  %15309 = vst [vmem:[#allocation12_spill] sm:$0xff] %v12964_v58  ;;  %v5042_v51 = vrot.slane %v12800_v6, 7  ;;  %v5044_v8 = vrot.slane %v12806_v9, 7  ;;  %v5052_v17 = vrot.slane %v12808_v45, 7  ;;  %v5219_v38 = vrot.slane %v12896_v42, 1 }
 0x547   : > { %15310 = vst [vmem:[#allocation15_spill] sm:$0xff] %v12967_v52  ;;  %15311 = vst [vmem:[#allocation23_spill] sm:$0xff] %v12970_v30  ;;  %v5134_v58 = vld [vmem:[#allocation2 + $0x8] sm:$0xfe]  ;;  %v12981_v53 = vsel %vm1982_vm0, %v5038_v10, %v5040_v46  ;;  %v5221_v54 = vrot.slane %v12902_v16, 1  ;;  %v5492_v55 = vpack.c.bf16 %v12766_v60, %v12711_v37  ;;  %v15316_v10 = vld [vmem:[#allocation62_spill] sm:$0xff]  ;;  %v5495_v37 = vpack.c.bf16 %v12896_v42, %v12884_v23 }
 0x548   : > { %15312 = vst [vmem:[#allocation22_spill] sm:$0xff] %v12973_v25  ;;  %15313 = vst [vmem:[#allocation31_spill] sm:$0xff] %v12981_v53  ;;  %v5491_v25 = vpack.c.bf16 %v12847_v36, %v5371_v15  ;;  %v12988_v30 = vsel %vm1982_vm0, %v5040_v46, %v5042_v51  ;;  %v12991_v9 = vsel %vm1982_vm0, %v5042_v51, %v5044_v8  ;;  %v15314_v45 = vld [vmem:[#allocation57_spill] sm:$0xff]  ;;  %v15317_v53 = vrot.slane %v15316_v10, 7 }
 0x549   : > { %v15315_v52 = vrot.slane %v15314_v45, 7  ;;  %v4980_v35 = vrot.slane %v12896_v42, 7  ;;  %5776 = vmatprep.mubr.bf16.mxu1 %v5492_v55  ;;  %v5214_v36 = vrot.slane %v5134_v58, 1  ;;  %v5215_v15 = vrot.slane %v12766_v60, 1 }
 0x54a   : > { %v5053_v5 = vsel %vm1982_vm0, %v15317_v53, %v5052_v17  ;;  %v13007_v46 = vmax.f32 %v15300_v31, %v12869_v21  ;;  %5777 = vmatmul.mubr.bf16.vlgmr.msra.gmra.mrb[220].mxu1 %v5491_v25  ;;  %v5217_v17 = vrot.slane %v12884_v23, 1  ;;  %v4982_v51 = vrot.slane %v12902_v16, 7 }
 0x54b   : > { %v12996_v33 = vsel %vm1982_vm0, %v5044_v8, %v15315_v52  ;;  %5133 = vst [vmem:[#allocation2 + $0x3a8] sm:$0x3] %v5053_v5  ;;  %v13011_v52 = vmax.f32 %v12818_v48, %v12875_v43  ;;  %v5223_v5 = vrot.slane %v12905_v62, 1  ;;  %5784 = vmatprep.mubr.bf16.mxu1 %v5495_v37  ;;  %v5216_v42 = vsel %vm3121_vm1, %v5214_v36, %v5215_v15 }
 0x54c   : > { %v5222_v58 = vsel %vm3121_vm1, %v5219_v38, %v5221_v54  ;;  %v5225_v8 = vrot.slane %v12908_v27, 1  ;;  %v4984_v31 = vrot.slane %v12905_v62, 7  ;;  %v5218_v21 = vsel %vm3121_vm1, %v5215_v15, %v5217_v17 }
 0x54d   : > { %v5220_v48 = vsel %vm3121_vm1, %v5217_v17, %v5219_v38  ;;  %v5224_v43 = vsel %vm3121_vm1, %v5221_v54, %v5223_v5  ;;  %v15318_v23 = vrot.slane %v12766_v60, 7  ;;  %v4981_v53 = vsel %vm1982_vm0, %v4978_v50, %v4980_v35 }
 0x54e   : > { %v5493_v55 = vpack.c.bf16 %v5218_v21, %v5216_v42  ;;  %v5226_v45 = vsel %vm3121_vm1, %v5223_v5, %v5225_v8  ;;  %v13030_v10 = vmax.f32 %v12822_v22, %v12878_v61  ;;  %v5496_v37 = vpack.c.bf16 %v5222_v58, %v5220_v48 }
 0x54f   : > { %v4979_v25 = vsel %vm1982_vm0, %v15318_v23, %v4978_v50  ;;  %v5227_v36 = vrot.slane %v12911_v19, 1  ;;  %v5229_v38 = vrot.slane %v12917_v44, 1  ;;  %v4832_v54 = vmul.f32 0.2, %v12855_v26 }
 0x550   : > { %v13037_v60 = vmax.f32 %v12826_v12, %v12881_v24  ;;  %v13041_v50 = vmax.f32 %v12861_v56, %v12899_v2  ;;  %9061 = vmatprep.mubr.bf16.mxu0 %v5493_v55  ;;  %v5499_v15 = vpack.c.bf16 %v5226_v45, %v5224_v43  ;;  %v4986_v22 = vrot.slane %v12908_v27, 7 }
 0x551   : > { %v5494_v61 = vpack.c.bf16 %v4981_v53, %v4979_v25  ;;  %9062 = vmatmul.mubr.bf16.vlgmr.msra.gmra.mrb[140].mxu0 %v5496_v37  ;;  %v5231_v17 = vrot.slane %v12923_v57, 1  ;;  %v5233_v5 = vrot.slane %v13007_v46, 1  ;;  %v4983_v42 = vsel %vm1982_vm0, %v4980_v35, %v4982_v51 }
 0x552   : > { %v4985_v58 = vsel %vm1982_vm0, %v4982_v51, %v4984_v31  ;;  %v4988_v12 = vrot.slane %v12911_v19, 7  ;;  %v5498_v56 = vpack.c.bf16 %v12905_v62, %v12902_v16  ;;  %9065 = vmatprep.mubr.bf16.mxu0 %v5499_v15  ;;  %v5228_v24 = vsel %vm3121_vm1, %v5225_v8, %v5227_v36 }
 0x553   : > { %5785 = vmatmul.mubr.bf16.gmra.mrb[224].mxu1 %v5494_v61  ;;  %v5230_v2 = vsel %vm3121_vm1, %v5227_v36, %v5229_v38  ;;  %v5235_v21 = vrot.slane %v13011_v52, 1  ;;  %v5237_v48 = vrot.slane %v13030_v10, 1  ;;  %v13057_v35 = vmax.f32 %v12835_v34, %v12887_v49 }
 0x554   : > { %v13061_v51 = vmax.f32 %v12839_v28, %v12890_v13  ;;  %v13065_v16 = vmax.f32 %v12851_v20, %v12893_v4  ;;  %v13068_v62 = vmax.f32 %v12855_v26, %v4832_v54  ;;  %5792 = vmatprep.mubr.bf16.mxu1 %v5498_v56  ;;  %v13071_v8 = vsel %vm1982_vm0, %v4984_v31, %v4986_v22 }
 0x555   : > { %v5232_v43 = vsel %vm3121_vm1, %v5229_v38, %v5231_v17  ;;  %v5234_v34 = vsel %vm3121_vm1, %v5231_v17, %v5233_v5  ;;  %v5249_v49 = vrot.slane %v13041_v50, 1  ;;  %v4989_v28 = vsel %vm1982_vm0, %v4986_v22, %v4988_v12 }
 0x556   : > { %v5497_v13 = vpack.c.bf16 %v4985_v58, %v4983_v42  ;;  %v5502_v20 = vpack.c.bf16 %v5230_v2, %v5228_v24  ;;  %v5251_v4 = vrot.slane %v12872_v11, 1  ;;  %v5236_v26 = vsel %vm3121_vm1, %v5233_v5, %v5235_v21 }
 0x557   : > { %v5238_v23 = vsel %vm3121_vm1, %v5235_v21, %v5237_v48  ;;  %v5239_v31 = vrot.slane %v13037_v60, 1  ;;  %v5253_v25 = vrot.slane %v12768_v7, 1  ;;  %v5505_v53 = vpack.c.bf16 %v5234_v34, %v5232_v43 }
 0x558   : > { %v5241_v55 = vrot.slane %v13057_v35, 1  ;;  %v13088_v45 = vsel %vm3121_vm1, %v5249_v49, %v5251_v4  ;;  %v5257_v37 = vrot.slane %v12772_v39, 1  ;;  %v5501_v36 = vpack.c.bf16 %v12911_v19, %v12908_v27  ;;  %v15326_v19 = vld [vmem:[#allocation66_spill] sm:$0xff] }
 0x559   : > { %9066 = vmatmul.mubr.bf16.gmra.mrb[144].mxu0 %v5502_v20  ;;  %v5500_v38 = vpack.c.bf16 %v4989_v28, %v13071_v8  ;;  %v13097_v54 = vsel %vm3121_vm1, %v5251_v4, %v5253_v25  ;;  %v5259_v15 = vrot.slane %v12774_v47, 1  ;;  %v5508_v22 = vpack.c.bf16 %v5238_v23, %v5236_v26 }
 0x55a   : > { %9069 = vmatprep.mubr.bf16.mxu0 %v5505_v53  ;;  %v5243_v61 = vrot.slane %v13061_v51, 1  ;;  %v5520_v17 = vpack.c.bf16 %v13097_v54, %v13088_v45  ;;  %v5261_v5 = vrot.slane %v12776_v32, 1  ;;  %v5240_v27 = vsel %vm3121_vm1, %v5237_v48, %v5239_v31 }
 0x55b   : > { %5793 = vmatmul.mubr.bf16.gmra.mrb[228].mxu1 %v5497_v13  ;;  %v13108_v42 = vsel %vm3121_vm1, %v5257_v37, %v5259_v15  ;;  %v5263_v58 = vrot.slane %v12778_v3, 1  ;;  %v5265_v47 = vrot.slane %v12780_v14, 1  ;;  %v5242_v56 = vsel %vm3121_vm1, %v5239_v31, %v5241_v55 }
 0x55c   : > { %5800 = vmatprep.mubr.bf16.mxu1 %v5501_v36  ;;  %v5245_v24 = vrot.slane %v13065_v16, 1  ;;  %v13115_v2 = vsel %vm3121_vm1, %v5259_v15, %v5261_v5  ;;  %v5267_v32 = vrot.slane %v12782_v63, 1  ;;  %v5269_v14 = vrot.slane %v12784_v41, 1  ;;  %v15330_v41 = vld [vmem:[#allocation23_spill] sm:$0xff] }
 0x55d   : > { %v5526_v21 = vpack.c.bf16 %v13115_v2, %v13108_v42  ;;  %v13121_v48 = vsel %vm3121_vm1, %v5261_v5, %v5263_v58  ;;  %v13124_v3 = vsel %vm3121_vm1, %v5263_v58, %v5265_v47  ;;  %v5271_v34 = vrot.slane %v12786_v1, 1 }
 0x55e   : > { %v5529_v8 = vpack.c.bf16 %v13124_v3, %v13121_v48  ;;  %v13130_v43 = vsel %vm3121_vm1, %v5265_v47, %v5267_v32  ;;  %v5273_v63 = vrot.slane %v12788_v18, 1  ;;  %v5511_v28 = vpack.c.bf16 %v5242_v56, %v5240_v27  ;;  %v15319_v56 = vld [vmem:[#allocation65_spill] sm:$0xff]  ;;  %v15329_v18 = vld [vmem:[#allocation15_spill] sm:$0xff]  ;;  %v13244_v48 = vld [vmem:[#allocation2 + $0x350] sm:$0xff] }
 0x55f   : > { %v5247_v13 = vrot.slane %v13068_v62, 1  ;;  %v13136_v20 = vsel %vm3121_vm1, %v5267_v32, %v5269_v14  ;;  %v5275_v4 = vrot.slane %v12793_v59, 1  ;;  %v13142_v26 = vsel %vm3121_vm1, %v5269_v14, %v5271_v34  ;;  %v13246_v3 = vld [vmem:[#allocation2 + $0x368] sm:$0xff] }
 0x560   : > { %v13145_v23 = vsel %vm3121_vm1, %v5271_v34, %v5273_v63  ;;  %v5277_v1 = vrot.slane %v12796_v0, 1  ;;  %v5279_v59 = vrot.slane %v12798_v40, 1  ;;  %v14925_v53 = vrot.slane %v12800_v6, 1  ;;  %v15320_v34 = vld [vmem:[#allocation68_spill] sm:$0xff] }
 0x561   : > { %9070 = vmatmul.mubr.bf16.gmra.mrb[148].mxu0 %v5508_v22  ;;  %v13151_v31 = vsel %vm3121_vm1, %v5273_v63, %v5275_v4  ;;  %v4990_v36 = vrot.slane %v12917_v44, 7  ;;  %v4992_v15 = vrot.slane %v12923_v57, 7  ;;  %v5504_v5 = vpack.c.bf16 %v12923_v57, %v12917_v44  ;;  %v15328_v22 = vld [vmem:[#allocation12_spill] sm:$0xff] }
 0x562   : > { %9073 = vmatprep.mubr.bf16.mxu0 %v5511_v28  ;;  %v13160_v0 = vsel %vm3121_vm1, %v5275_v4, %v5277_v1  ;;  %v13165_v27 = vsel %vm3121_vm1, %v5277_v1, %v5279_v59  ;;  %v13170_v40 = vsel %vm3121_vm1, %v5279_v59, %v14925_v53  ;;  %v5244_v58 = vsel %vm3121_vm1, %v5241_v55, %v5243_v61  ;;  %v15322_v4 = vld [vmem:[#allocation71_spill] sm:$0xff]  ;;  %v15323_v1 = vld [vmem:[#allocation74_spill] sm:$0xff] }
 0x563   : > { %5801 = vmatmul.mubr.bf16.gmra.mrb[232].mxu1 %v5500_v38  ;;  %v5246_v44 = vsel %vm3121_vm1, %v5243_v61, %v5245_v24  ;;  %v5248_v38 = vsel %vm3121_vm1, %v5245_v24, %v5247_v13  ;;  %v5250_v47 = vsel %vm3121_vm1, %v5247_v13, %v5249_v49  ;;  %v4991_v14 = vsel %vm1982_vm0, %v4988_v12, %v4990_v36  ;;  %v15321_v61 = vld [vmem:[#allocation72_spill] sm:$0xff]  ;;  %v15325_v13 = vld [vmem:[#allocation73_spill] sm:$0xff] }
 0x564   : > { %5808 = vmatprep.mubr.bf16.mxu1 %v5504_v5  ;;  %v4993_v55 = vsel %vm1982_vm0, %v4990_v36, %v4992_v15  ;;  %v5514_v28 = vpack.c.bf16 %v5246_v44, %v5244_v58  ;;  %v4994_v59 = vrot.slane %v13007_v46, 7  ;;  %v5517_v5 = vpack.c.bf16 %v5250_v47, %v5248_v38  ;;  %v15324_v49 = vld [vmem:[#allocation4_spill] sm:$0xff]  ;;  %v15327_v12 = vld [vmem:[#allocation13_spill] sm:$0xff]  ;;  %v15331_v38 = vld [vmem:[#allocation22_spill] sm:$0xff] }
 0x565   : > { %v5530_v53 = vpack.c.bf16 %v15325_v13, %v15324_v49  ;;  %v5503_v32 = vpack.c.bf16 %v4993_v55, %v4991_v14  ;;  %v5255_v57 = vrot.slane %v15326_v19, 1  ;;  %v5533_v36 = vpack.c.bf16 %v15328_v22, %v15327_v12  ;;  %v15332_v47 = vld [vmem:[#allocation31_spill] sm:$0xff]  ;;  %v5485_v13 = vld [vmem:[#allocation2 + $0x390] sm:$0xff]  ;;  %v5488_v12 = vld [vmem:[#allocation2 + $0x3a8] sm:$0x1] }
 0x566   : > { %v5536_v63 = vpack.c.bf16 %v15330_v41, %v15329_v18  ;;  %v4996_v58 = vrot.slane %v13011_v52, 7  ;;  %v5507_v44 = vpack.c.bf16 %v13011_v52, %v13007_v46  ;;  %v5539_v24 = vpack.c.bf16 %v15332_v47, %v15331_v38  ;;  %v5482_v49 = vld [vmem:[#allocation2 + $0x378] sm:$0xff]  ;;  %v5489_v41 = vld [vmem:[#allocation2 + $0x3b0] sm:$0x1] }
 0x567   : > { %v5542_v14 = vpack.c.bf16 %v12991_v9, %v12988_v30  ;;  %v5256_v55 = vsel %vm3121_vm1, %v5253_v25, %v5255_v57  ;;  %v4995_v19 = vsel %vm1982_vm0, %v4992_v15, %v4994_v59  ;;  %v5000_v7 = vrot.slane %v13037_v60, 7 }
 0x568   : > { %v4997_v46 = vsel %vm1982_vm0, %v4994_v59, %v4996_v58  ;;  %v5510_v25 = vpack.c.bf16 %v13037_v60, %v13030_v10  ;;  %v5002_v45 = vrot.slane %v13057_v35, 7  ;;  %v5004_v54 = vrot.slane %v13061_v51, 7  ;;  %v13252_v59 = vld [vmem:[#allocation2 + $0x398] sm:$0xff] }
 0x569   : > { %9074 = vmatmul.mubr.bf16.gmra.mrb[152].mxu0 %v5514_v28  ;;  %v5258_v28 = vsel %vm3121_vm1, %v5255_v57, %v5257_v37  ;;  %v15333_v42 = vpack.c.bf16 %v13136_v20, %v13130_v43  ;;  %v5006_v2 = vrot.slane %v13065_v16, 7  ;;  %v13250_v20 = vld [vmem:[#allocation2 + $0x380] sm:$0xff]  ;;  %v5545_v18 = vpack.c.bf16 %v5482_v49, %v12996_v33 }
 0x56a   : > { %9077 = vmatprep.mubr.bf16.mxu0 %v5517_v5  ;;  %v5523_v52 = vpack.c.bf16 %v5258_v28, %v5256_v55  ;;  %v5506_v5 = vpack.c.bf16 %v4997_v46, %v4995_v19  ;;  %v5005_v60 = vsel %vm1982_vm0, %v5002_v45, %v5004_v54  ;;  %v5010_v55 = vrot.slane %v13041_v50, 7 }
 0x56b   : > { %5809 = vmatmul.mubr.bf16.gmra.mrb[236].mxu1 %v5503_v32  ;;  %v4998_v32 = vrot.slane %v13030_v10, 7  ;;  %v5003_v10 = vsel %vm1982_vm0, %v5000_v7, %v5002_v45  ;;  %v5519_v28 = vpack.c.bf16 %v12872_v11, %v13041_v50  ;;  %v15336_v19 = vpack.c.bf16 %v13170_v40, %v13165_v27  ;;  %v5432_v40 = vld [vmem:[#allocation2 + $0x1e8] sm:$0xff] }
 0x56c   : > { %5816 = vmatprep.mubr.bf16.mxu1 %v5507_v44  ;;  %v5512_v57 = vpack.c.bf16 %v5005_v60, %v5003_v10  ;;  %v5289_v44 = vrot.slane %v13252_v59, 1  ;;  %v15337_v46 = vrot.slane %v12800_v6, 1  ;;  %v15338_v50 = vrot.slane %v12872_v11, 7  ;;  %v5438_v10 = vld [vmem:[#allocation2 + $0x218] sm:$0xff]  ;;  %v5441_v60 = vld [vmem:[#allocation2 + $0x230] sm:$0xff] }
 0x56d   : > { %v4999_v39 = vsel %vm1982_vm0, %v4996_v58, %v4998_v32  ;;  %v5001_v37 = vsel %vm1982_vm0, %v4998_v32, %v5000_v7  ;;  %v5287_v58 = vrot.slane %v13250_v20, 1  ;;  %v5173_v32 = vld [vmem:[#allocation2 + $0x3b0] sm:$0x1]  ;;  %v5525_v11 = vpack.c.bf16 %v5441_v60, %v5438_v10 }
 0x56e   : > { %v5509_v15 = vpack.c.bf16 %v5001_v37, %v4999_v39  ;;  %v5013_v27 = vsel %vm1982_vm0, %v5010_v55, %v15338_v50  ;;  %v5291_v6 = vrot.slane %v5173_v32, 1  ;;  %v5546_v22 = vpack.c.bf16 %v13250_v20, %v13246_v3 }
 0x571   : > { %9078 = vmatmul.mubr.bf16.gmra.mrb[156].mxu0 %v5520_v17  ;;  %v5513_v17 = vpack.c.bf16 %v13061_v51, %v13057_v35  ;;  %v5516_v35 = vpack.c.bf16 %v13068_v62, %v13065_v16  ;;  %v15334_v51 = vpack.c.bf16 %v13145_v23, %v13142_v26  ;;  %v5283_v16 = vrot.slane %v13244_v48, 1 }
 0x572   : > { %9081 = vmatprep.mubr.bf16.mxu0 %v5523_v52  ;;  %v15335_v23 = vpack.c.bf16 %v13160_v0, %v13151_v31 }
 0x573   : > { %5817 = vmatmul.mubr.bf16.gmra.mrb[240].mxu1 %v5506_v5  ;;  %v5284_v31 = vsel %vm3121_vm1, %v15337_v46, %v5283_v16  ;;  %v5290_v5 = vsel %vm3121_vm1, %v5287_v58, %v5289_v44 }
 0x574   : > { %5824 = vmatprep.mubr.bf16.mxu1 %v5510_v25  ;;  %v5435_v25 = vld [vmem:[#allocation2 + $0x200] sm:$0xff] }
 0x575   : > { %v5522_v45 = vpack.c.bf16 %v5435_v25, %v5432_v40 }
 0x579   : > { %9082 = vmatmul.mubr.bf16.gmra.mrb[160].mxu0 %v5526_v21  ;;  %v5008_v21 = vrot.slane %v13068_v62, 7  ;;  %v5285_v62 = vrot.slane %v13246_v3, 1 }
 0x57a   : > { %9085 = vmatprep.mubr.bf16.mxu0 %v5529_v8  ;;  %v5007_v8 = vsel %vm1982_vm0, %v5004_v54, %v5006_v2  ;;  %v5292_v54 = vsel %vm3121_vm1, %v5289_v44, %v5291_v6  ;;  %v5474_v44 = vld [vmem:[#allocation2 + $0x338] sm:$0xff] }
 0x57b   : > { %5825 = vmatmul.mubr.bf16.gmra.mrb[244].mxu1 %v5509_v15  ;;  %v5009_v43 = vsel %vm1982_vm0, %v5006_v2, %v5008_v21  ;;  %v5286_v0 = vsel %vm3121_vm1, %v5283_v16, %v5285_v62  ;;  %v5288_v52 = vsel %vm3121_vm1, %v5285_v62, %v5287_v58  ;;  %v5011_v7 = vsel %vm1982_vm0, %v5008_v21, %v5010_v55  ;;  %v5444_v2 = vld [vmem:[#allocation2 + $0x248] sm:$0xff]  ;;  %v5447_v21 = vld [vmem:[#allocation2 + $0x260] sm:$0xff] }
 0x57c   : > { %5832 = vmatprep.mubr.bf16.mxu1 %v5513_v17  ;;  %v5515_v26 = vpack.c.bf16 %v5009_v43, %v5007_v8  ;;  %v5544_v39 = vpack.c.bf16 %v5286_v0, %v5284_v31  ;;  %v5547_v37 = vpack.c.bf16 %v5290_v5, %v5288_v52  ;;  %v5518_v15 = vpack.c.bf16 %v5013_v27, %v5011_v7  ;;  %v5490_v17 = vld [vmem:[#allocation2 + $0x3b8] sm:$0x1]  ;;  %v5453_v43 = vld [vmem:[#allocation2 + $0x290] sm:$0xff]  ;;  %v5468_v58 = vld [vmem:[#allocation2 + $0x308] sm:$0xff] }
 0x57d   : > { %v5450_v8 = vld [vmem:[#allocation2 + $0x278] sm:$0xff]  ;;  %v15341_v62 = vpack.c.bf16 %v15323_v1, %v15322_v4  ;;  %v5471_v4 = vld [vmem:[#allocation2 + $0x320] sm:$0xff] }
 0x57e   : > { %v5531_v16 = vpack.c.bf16 %v5453_v43, %v5450_v8  ;;  %v5540_v1 = vpack.c.bf16 %v5471_v4, %v5468_v58 }
 0x581   : > { %9086 = vmatmul.mubr.bf16.gmra.mrb[164].mxu0 %v15333_v42  ;;  %v15339_v42 = vpack.c.bf16 %v15319_v56, %v12929_v29  ;;  %v5459_v29 = vld [vmem:[#allocation2 + $0x2c0] sm:$0xff] }
 0x582   : > { %9089 = vmatprep.mubr.bf16.mxu0 %v15334_v51  ;;  %v15340_v51 = vpack.c.bf16 %v15321_v61, %v15320_v34  ;;  %v5465_v34 = vld [vmem:[#allocation2 + $0x2f0] sm:$0xff] }
 0x583   : > { %5833 = vmatmul.mubr.bf16.gmra.mrb[248].mxu1 %v5512_v57  ;;  %v5550_v57 = vpack.c.bf16 %v5490_v17, %v5292_v54 }
 0x584   : > { %5840 = vmatprep.mubr.bf16.mxu1 %v5516_v35  ;;  %v5528_v35 = vpack.c.bf16 %v5447_v21, %v5444_v2 }
 0x589   : > { %9090 = vmatmul.mubr.bf16.gmra.mrb[168].mxu0 %v15335_v23  ;;  %v5462_v23 = vld [vmem:[#allocation2 + $0x2d8] sm:$0xff] }
 0x58a   : > { %9093 = vmatprep.mubr.bf16.mxu0 %v15336_v19  ;;  %v5537_v61 = vpack.c.bf16 %v5465_v34, %v5462_v23 }
 0x58b   : > { %5841 = vmatmul.mubr.bf16.gmra.mrb[252].mxu1 %v5515_v26  ;;  %v5456_v26 = vld [vmem:[#allocation2 + $0x2a8] sm:$0xff] }
 0x58c   : > { %5848 = vmatprep.mubr.bf16.mxu1 %v5519_v28  ;;  %v5534_v56 = vpack.c.bf16 %v5459_v29, %v5456_v26 }
 0x591   : > { %9094 = vmatmul.mubr.bf16.gmra.mrb[172].mxu0 %v5544_v39 }
 0x592   : > { %9097 = vmatprep.mubr.bf16.mxu0 %v5547_v37 }
 0x593   : > { %5849 = vmatmul.mubr.bf16.gmra.mrb[0].mxu1 %v5518_v15 }
 0x594   : > { %5856 = vmatprep.mubr.bf16.mxu1 %v5522_v45 }
 0x599   : > { %9098 = vmatmul.mubr.bf16.gmra.mrb[176].mxu0 %v5550_v57 }
 0x59b   : > { %5857 = vmatmul.mubr.bf16.gmra.mrb[4].mxu1 %v15339_v42 }
 0x59c   : > { %5864 = vmatprep.mubr.bf16.mxu1 %v5525_v11 }
 0x5a3   : > { %5865 = vmatmul.mubr.bf16.gmra.mrb[8].mxu1 %v15340_v51 }
 0x5a4   : > { %5872 = vmatprep.mubr.bf16.mxu1 %v5528_v35 }
 0x5ab   : > { %5873 = vmatmul.mubr.bf16.gmra.mrb[12].mxu1 %v15341_v62 }
 0x5ac   : > { %5880 = vmatprep.mubr.bf16.mxu1 %v5531_v16 }
 0x5b3   : > { %5881 = vmatmul.mubr.bf16.gmra.mrb[16].mxu1 %v5530_v53  ;;  %v5543_v53 = vpack.c.bf16 %v13244_v48, %v5474_v44 }
 0x5b4   : > { %5888 = vmatprep.mubr.bf16.mxu1 %v5534_v56 }
 0x5bb   : > { %5889 = vmatmul.mubr.bf16.gmra.mrb[20].mxu1 %v5533_v36 }
 0x5bc   : > { %5896 = vmatprep.mubr.bf16.mxu1 %v5537_v61 }
 0x5c3   : > { %5897 = vmatmul.mubr.bf16.gmra.mrb[24].mxu1 %v5536_v63  ;;  %v5549_v63 = vpack.c.bf16 %v5489_v41, %v13252_v59 }
 0x5c4   : > { %5904 = vmatprep.mubr.bf16.mxu1 %v5540_v1 }
 0x5cb   : > { %5905 = vmatmul.mubr.bf16.gmra.mrb[28].mxu1 %v5539_v24  ;;  %v5548_v24 = vpack.c.bf16 %v5488_v12, %v5485_v13 }
 0x5cc   : > { %5912 = vmatprep.mubr.bf16.mxu1 %v5543_v53 }
 0x5d3   : > { %5913 = vmatmul.mubr.bf16.gmra.mrb[32].mxu1 %v5542_v14 }
 0x5d4   : > { %5920 = vmatprep.mubr.bf16.mxu1 %v5546_v22 }
 0x5db   : > { %5921 = vmatmul.mubr.bf16.gmra.mrb[36].mxu1 %v5545_v18 }
 0x5dc   : > { %5928 = vmatprep.mubr.bf16.mxu1 %v5549_v63 }
 0x5e3   : > { %5929 = vmatmul.mubr.bf16.gmra.mrb[40].mxu1 %v5548_v24 }
 0x61d   : > { %v5778_v36 = vpop.f32.mrb[220].mxu1 }
 0x61e   : > { %v5780_v38 = vpop.f32.mrb[221].mxu1 }
 0x61f   : > { %v5781_v47 = vpop.f32.mrb[222].mxu1 }
 0x620   : > { %v5783_v48 = vpop.f32.mrb[223].mxu1 }
 0x624   : > { %v9063_v3 = vpop.f32.mrb[140].mxu0 }
 0x625   : > { %v5971_v30 = vpop.f32.mrb[141].mxu0 }
 0x626   : > { %v5786_v9 = vpop.f32.mrb[224].mxu1  ;;  %v13307_v14 = vadd.f32 %v5971_v30, %v5778_v36  ;;  %v9064_v20 = vpop.f32.mrb[142].mxu0 }
 0x627   : > { %v5788_v55 = vpop.f32.mrb[225].mxu1  ;;  %v13309_v33 = vadd.f32 %v9063_v3, %v5786_v9  ;;  %v5974_v59 = vpop.f32.mrb[143].mxu0 }
 0x628   : > { %v5789_v28 = vpop.f32.mrb[226].mxu1  ;;  %v13311_v19 = vadd.f32 %v5974_v59, %v5781_v47 }
 0x629   : > { %v5791_v46 = vpop.f32.mrb[227].mxu1  ;;  %v13313_v31 = vadd.f32 %v9064_v20, %v5789_v28 }
 0x62a   : > { %v6130_v62 = vadd.f32 %v13311_v19, %v13307_v14 }
 0x62c   : > { %v9067_v0 = vpop.f32.mrb[144].mxu0  ;;  %v6131_v23 = vadd.f32 %v6130_v62, %v13309_v33 }
 0x62d   : > { %v5987_v52 = vpop.f32.mrb[145].mxu0 }
 0x62e   : > { %v5794_v5 = vpop.f32.mrb[228].mxu1  ;;  %v9068_v32 = vpop.f32.mrb[146].mxu0  ;;  %v6132_v22 = vadd.f32 %v6131_v23, %v13313_v31 }
 0x62f   : > { %v5796_v7 = vpop.f32.mrb[229].mxu1  ;;  %v13315_v50 = vadd.f32 %v5987_v52, %v5794_v5  ;;  %v5990_v27 = vpop.f32.mrb[147].mxu0 }
 0x630   : > { %v5797_v40 = vpop.f32.mrb[230].mxu1 }
 0x631   : > { %v5799_v25 = vpop.f32.mrb[231].mxu1  ;;  %v13317_v39 = vadd.f32 %v5990_v27, %v5797_v40  ;;  %v6133_v18 = vadd.f32 %v6132_v22, %v13315_v50 }
 0x633   : > { %v6134_v36 = vadd.f32 %v6133_v18, %v13317_v39 }
 0x634   : > { %v9071_v37 = vpop.f32.mrb[148].mxu0 }
 0x635   : > { %v6003_v6 = vpop.f32.mrb[149].mxu0 }
 0x636   : > { %v5802_v15 = vpop.f32.mrb[232].mxu1  ;;  %v9072_v45 = vpop.f32.mrb[150].mxu0 }
 0x637   : > { %v13319_v54 = vadd.f32 %v9067_v0, %v5802_v15  ;;  %v5804_v17 = vpop.f32.mrb[233].mxu1  ;;  %v6006_v10 = vpop.f32.mrb[151].mxu0 }
 0x638   : > { %v5805_v60 = vpop.f32.mrb[234].mxu1 }
 0x639   : > { %v13321_v57 = vadd.f32 %v9068_v32, %v5805_v60  ;;  %v5807_v11 = vpop.f32.mrb[235].mxu1  ;;  %v6135_v30 = vadd.f32 %v6134_v36, %v13319_v54 }
 0x63b   : > { %v6136_v59 = vadd.f32 %v6135_v30, %v13321_v57 }
 0x63c   : > { %v9075_v42 = vpop.f32.mrb[152].mxu0 }
 0x63d   : > { %v6019_v2 = vpop.f32.mrb[153].mxu0 }
 0x63e   : > { %v5810_v21 = vpop.f32.mrb[236].mxu1  ;;  %v9076_v35 = vpop.f32.mrb[154].mxu0 }
 0x63f   : > { %v13323_v51 = vadd.f32 %v6003_v6, %v5810_v21  ;;  %v5812_v8 = vpop.f32.mrb[237].mxu1  ;;  %v6022_v43 = vpop.f32.mrb[155].mxu0 }
 0x640   : > { %v5813_v16 = vpop.f32.mrb[238].mxu1  ;;  %v13361_v6 = vpop.permute.xlu1 %6394 }
 0x641   : > { %v13327_v26 = vadd.f32 %v6006_v10, %v5813_v16  ;;  %v5815_v29 = vpop.f32.mrb[239].mxu1  ;;  %v6137_v52 = vadd.f32 %v6136_v59, %v13323_v51 }
 0x644   : > { %v9079_v56 = vpop.f32.mrb[156].mxu0  ;;  %v13380_v29 = vpop.permute.xlu1 %6675 }
 0x645   : > { %v6035_v34 = vpop.f32.mrb[157].mxu0  ;;  %15342 = vst [vmem:[#allocation30_spill] sm:$0xff] %v13380_v29 }
 0x646   : > { %v5818_v61 = vpop.f32.mrb[240].mxu1  ;;  %v9080_v58 = vpop.f32.mrb[158].mxu0 }
 0x647   : > { %v13330_v4 = vadd.f32 %v9071_v37, %v5818_v61  ;;  %v5820_v1 = vpop.f32.mrb[241].mxu1  ;;  %v6038_v44 = vpop.f32.mrb[159].mxu0  ;;  %v6138_v37 = vadd.f32 %v6137_v52, %v13327_v26 }
 0x648   : > { %v5821_v53 = vpop.f32.mrb[242].mxu1  ;;  %v13398_v30 = vpop.permute.xlu1 %6404 }
 0x649   : > { %v13333_v49 = vadd.f32 %v9072_v45, %v5821_v53  ;;  %v5823_v41 = vpop.f32.mrb[243].mxu1  ;;  %v13365_v45 = vpop.permute.xlu0 %6389  ;;  %v6139_v17 = vadd.f32 %v6138_v37, %v13330_v4 }
 0x64b   : > { %v6140_v8 = vadd.f32 %v6139_v17, %v13333_v49 }
 0x64c   : > { %v13336_v63 = vpop.f32.mrb[160].mxu0 }
 0x64d   : > { %v6051_v13 = vpop.f32.mrb[161].mxu0  ;;  %v13384_v61 = vpop.permute.xlu0 %6670 }
 0x64e   : > { %v5826_v12 = vpop.f32.mrb[244].mxu1  ;;  %v13338_v24 = vpop.f32.mrb[162].mxu0  ;;  %15343 = vst [vmem:[#allocation38_spill] sm:$0xff] %v13384_v61 }
 0x64f   : > { %v13341_v38 = vadd.f32 %v6019_v2, %v5826_v12  ;;  %v5828_v47 = vpop.f32.mrb[245].mxu1  ;;  %v6054_v48 = vpop.f32.mrb[163].mxu0 }
 0x650   : > { %v5829_v3 = vpop.f32.mrb[246].mxu1 }
 0x651   : > { %v13344_v9 = vadd.f32 %v6022_v43, %v5829_v3  ;;  %v5831_v20 = vpop.f32.mrb[247].mxu1  ;;  %v6141_v62 = vadd.f32 %v6140_v8, %v13341_v38  ;;  %v13402_v59 = vpop.permute.xlu0 %6399 }
 0x653   : > { %v6142_v22 = vadd.f32 %v6141_v62, %v13344_v9 }
 0x654   : > { %v13346_v55 = vpop.f32.mrb[164].mxu0 }
 0x655   : > { %v13349_v28 = vpop.f32.mrb[165].mxu0 }
 0x656   : > { %v5834_v46 = vpop.f32.mrb[248].mxu1  ;;  %v13351_v0 = vpop.f32.mrb[166].mxu0 }
 0x657   : > { %v13354_v5 = vadd.f32 %v9075_v42, %v5834_v46  ;;  %v5836_v32 = vpop.f32.mrb[249].mxu1  ;;  %v13356_v7 = vpop.f32.mrb[167].mxu0 }
 0x658   : > { %v5837_v27 = vpop.f32.mrb[250].mxu1 }
 0x659   : > { %v13358_v40 = vadd.f32 %v9076_v35, %v5837_v27  ;;  %v5839_v25 = vpop.f32.mrb[251].mxu1  ;;  %v6143_v36 = vadd.f32 %v6142_v22, %v13354_v5 }
 0x65b   : > { %v6144_v46 = vadd.f32 %v6143_v36, %v13358_v40 }
 0x65c   : > { %v13363_v15 = vpop.f32.mrb[168].mxu0 }
 0x65d   : > { %v13368_v10 = vpop.f32.mrb[169].mxu0 }
 0x65e   : > { %v5842_v60 = vpop.f32.mrb[252].mxu1  ;;  %v13370_v11 = vpop.f32.mrb[170].mxu0 }
 0x65f   : > { %v13372_v42 = vadd.f32 %v6035_v34, %v5842_v60  ;;  %v5844_v2 = vpop.f32.mrb[253].mxu1  ;;  %v13374_v21 = vpop.f32.mrb[171].mxu0 }
 0x660   : > { %v5845_v35 = vpop.f32.mrb[254].mxu1 }
 0x661   : > { %v13377_v43 = vadd.f32 %v6038_v44, %v5845_v35  ;;  %v5847_v16 = vpop.f32.mrb[255].mxu1  ;;  %v6145_v27 = vadd.f32 %v6144_v46, %v13372_v42  ;;  %v13416_v35 = vpop.permute.xlu1 %6685 }
 0x662   : > { %15344 = vst [vmem:[#allocation6_spill] sm:$0xff] %v13416_v35  ;;  %v13419_v16 = vpop.permute.xlu0 %6680 }
 0x663   : > { %v6146_v8 = vadd.f32 %v6145_v27, %v13377_v43  ;;  %15345 = vst [vmem:[#allocation48_spill] sm:$0xff] %v13419_v16 }
 0x664   : > { %v13382_v23 = vpop.f32.mrb[172].mxu0 }
 0x665   : > { %v13386_v1 = vpop.f32.mrb[173].mxu0 }
 0x666   : > { %v5850_v34 = vpop.f32.mrb[0].mxu1  ;;  %v13388_v53 = vpop.f32.mrb[174].mxu0 }
 0x667   : > { %v13391_v41 = vadd.f32 %v9079_v56, %v5850_v34  ;;  %v5852_v44 = vpop.f32.mrb[1].mxu1  ;;  %v13393_v18 = vpop.f32.mrb[175].mxu0 }
 0x668   : > { %v5853_v12 = vpop.f32.mrb[2].mxu1  ;;  %v13431_v46 = vpop.permute.xlu0 %6409 }
 0x669   : > { %v13396_v47 = vadd.f32 %v9080_v58, %v5853_v12  ;;  %v5855_v3 = vpop.f32.mrb[3].mxu1  ;;  %v6147_v62 = vadd.f32 %v6146_v8, %v13391_v41  ;;  %v13425_v12 = vpop.permute.xlu1 %6414 }
 0x66a   : > { %15346 = vst [vmem:[#allocation47_spill] sm:$0xff] %v13425_v12 }
 0x66c   : > { %v13400_v20 = vpop.f32.mrb[176].mxu0  ;;  %v13440_v8 = vpop.permute.xlu0 %6690 }
 0x66d   : > { %v13405_v52 = vpop.f32.mrb[177].mxu0  ;;  %15348 = vst [vmem:[#allocation51_spill] sm:$0xff] %v13440_v8 }
 0x66e   : > { %v5858_v56 = vpop.f32.mrb[4].mxu1  ;;  %v13407_v32 = vpop.f32.mrb[178].mxu0 }
 0x66f   : > { %v13410_v25 = vadd.f32 %v6051_v13, %v5858_v56  ;;  %v5860_v58 = vpop.f32.mrb[5].mxu1  ;;  %v13412_v37 = vpop.f32.mrb[179].mxu0 }
 0x670   : > { %v5861_v17 = vpop.f32.mrb[6].mxu1  ;;  %v13434_v58 = vpop.permute.xlu1 %6695 }
 0x671   : > { %v13414_v60 = vadd.f32 %v6054_v48, %v5861_v17  ;;  %v5863_v2 = vpop.f32.mrb[7].mxu1  ;;  %v6148_v48 = vadd.f32 %v6147_v62, %v13396_v47  ;;  %15347 = vst [vmem:[#allocation52_spill] sm:$0xff] %v13434_v58 }
 0x673   : > { %v6149_v56 = vadd.f32 %v6148_v48, %v13410_v25 }
 0x676   : > { %v5866_v34 = vpop.f32.mrb[8].mxu1 }
 0x677   : > { %v13423_v22 = vadd.f32 %v13336_v63, %v5866_v34  ;;  %v5868_v13 = vpop.f32.mrb[9].mxu1  ;;  %v6150_v63 = vadd.f32 %v6149_v56, %v13414_v60 }
 0x678   : > { %v5869_v44 = vpop.f32.mrb[10].mxu1 }
 0x679   : > { %v13429_v36 = vadd.f32 %v13338_v24, %v5869_v44  ;;  %v5871_v3 = vpop.f32.mrb[11].mxu1  ;;  %v6151_v24 = vadd.f32 %v6150_v63, %v13423_v22  ;;  %v13446_v44 = vpop.permute.xlu1 %6424 }
 0x67a   : > { %15349 = vst [vmem:[#allocation56_spill] sm:$0xff] %v13446_v44  ;;  %v13449_v3 = vpop.permute.xlu0 %6419 }
 0x67b   : > { %v6152_v48 = vadd.f32 %v6151_v24, %v13429_v36  ;;  %15350 = vst [vmem:[#allocation55_spill] sm:$0xff] %v13449_v3 }
 0x67e   : > { %v5874_v27 = vpop.f32.mrb[12].mxu1  ;;  %v13461_v8 = vpop.permute.xlu0 %6700 }
 0x67f   : > { %v13438_v17 = vadd.f32 %v13349_v28, %v5874_v27  ;;  %v5876_v2 = vpop.f32.mrb[13].mxu1  ;;  %15352 = vst [vmem:[#allocation59_spill] sm:$0xff] %v13461_v8 }
 0x680   : > { %v5877_v62 = vpop.f32.mrb[14].mxu1 }
 0x681   : > { %v13444_v34 = vadd.f32 %v13356_v7, %v5877_v62  ;;  %v5879_v13 = vpop.f32.mrb[15].mxu1  ;;  %v6153_v28 = vadd.f32 %v6152_v48, %v13438_v17  ;;  %v13458_v62 = vpop.permute.xlu1 %6705 }
 0x682   : > { %15351 = vst [vmem:[#allocation60_spill] sm:$0xff] %v13458_v62  ;;  %v13473_v62 = vpop.permute.xlu0 %6429 }
 0x683   : > { %v6154_v13 = vadd.f32 %v6153_v28, %v13444_v34  ;;  %15354 = vst [vmem:[#allocation63_spill] sm:$0xff] %v13473_v62 }
 0x686   : > { %v5882_v56 = vpop.f32.mrb[16].mxu1  ;;  %v13482_v16 = vpop.permute.xlu0 %6710 }
 0x687   : > { %v13453_v27 = vadd.f32 %v13346_v55, %v5882_v56  ;;  %v5884_v2 = vpop.f32.mrb[17].mxu1  ;;  %15356 = vst [vmem:[#allocation70_spill] sm:$0xff] %v13482_v16 }
 0x688   : > { %v5885_v58 = vpop.f32.mrb[18].mxu1  ;;  %v13467_v2 = vpop.permute.xlu1 %6434 }
 0x689   : > { %v13456_v63 = vadd.f32 %v13351_v0, %v5885_v58  ;;  %v5887_v7 = vpop.f32.mrb[19].mxu1  ;;  %v6155_v24 = vadd.f32 %v6154_v13, %v13453_v27  ;;  %15353 = vst [vmem:[#allocation64_spill] sm:$0xff] %v13467_v2 }
 0x68b   : > { %v6156_v0 = vadd.f32 %v6155_v24, %v13456_v63 }
 0x68c   : > { %v13476_v13 = vpop.permute.xlu1 %6715 }
 0x68d   : > { %15355 = vst [vmem:[#allocation67_spill] sm:$0xff] %v13476_v13  ;;  %v13491_v13 = vpop.permute.xlu0 %6439 }
 0x68e   : > { %v5890_v35 = vpop.f32.mrb[20].mxu1  ;;  %15358 = vst [vmem:[#allocation76_spill] sm:$0xff] %v13491_v13 }
 0x68f   : > { %v13465_v48 = vadd.f32 %v13368_v10, %v5890_v35  ;;  %v5892_v55 = vpop.f32.mrb[21].mxu1 }
 0x690   : > { %v5893_v56 = vpop.f32.mrb[22].mxu1  ;;  %v13489_v29 = vpop.permute.xlu1 %6444 }
 0x691   : > { %v13471_v58 = vadd.f32 %v13374_v21, %v5893_v56  ;;  %v5895_v7 = vpop.f32.mrb[23].mxu1  ;;  %v6157_v28 = vadd.f32 %v6156_v0, %v13465_v48  ;;  %15357 = vst [vmem:[#allocation69_spill] sm:$0xff] %v13489_v29 }
 0x693   : > { %v6158_v10 = vadd.f32 %v6157_v28, %v13471_v58 }
 0x696   : > { %v5898_v8 = vpop.f32.mrb[24].mxu1 }
 0x697   : > { %v13480_v35 = vadd.f32 %v13363_v15, %v5898_v8  ;;  %v5900_v55 = vpop.f32.mrb[25].mxu1 }
 0x698   : > { %v5901_v24 = vpop.f32.mrb[26].mxu1 }
 0x699   : > { %v6159_v21 = vadd.f32 %v6158_v10, %v13480_v35  ;;  %v13486_v56 = vadd.f32 %v13370_v11, %v5901_v24  ;;  %v5903_v7 = vpop.f32.mrb[27].mxu1  ;;  %v13495_v10 = vpop.permute.xlu1 %6725 }
 0x69a   : > { %15359 = vst [vmem:[#allocation75_spill] sm:$0xff] %v13495_v10  ;;  %v13497_v24 = vpop.permute.xlu0 %6720 }
 0x69b   : > { %v6160_v0 = vadd.f32 %v6159_v21, %v13486_v56  ;;  %15360 = vst [vmem:[#allocation78_spill] sm:$0xff] %v13497_v24 }
 0x69d   : > { %v13500_v13 = vpop.permute.xlu1 %6454 }
 0x69e   : > { %v5906_v28 = vpop.f32.mrb[28].mxu1  ;;  %15361 = vst [vmem:[#allocation77_spill] sm:$0xff] %v13500_v13 }
 0x69f   : > { %v6100_v15 = vadd.f32 %v13386_v1, %v5906_v28  ;;  %v5908_v8 = vpop.f32.mrb[29].mxu1 }
 0x6a0   : > { %v5909_v55 = vpop.f32.mrb[30].mxu1 }
 0x6a1   : > { %v6161_v61 = vadd.f32 %v6160_v0, %v6100_v15  ;;  %v6103_v16 = vadd.f32 %v13393_v18, %v5909_v55  ;;  %v5911_v2 = vpop.f32.mrb[31].mxu1  ;;  %v13503_v0 = vpop.permute.xlu0 %6449 }
 0x6a2   : > { %15362 = vst [vmem:[#allocation16_spill] sm:$0xff] %v13503_v0  ;;  %v13505_v8 = vpop.permute.xlu1 %6735 }
 0x6a3   : > { %v6162_v11 = vadd.f32 %v6161_v61, %v6103_v16  ;;  %15363 = vst [vmem:[#allocation19_spill] sm:$0xff] %v13505_v8 }
 0x6a5   : > { %v13508_v10 = vpop.permute.xlu0 %6730 }
 0x6a6   : > { %v5914_v7 = vpop.f32.mrb[32].mxu1  ;;  %15364 = vst [vmem:[#allocation18_spill] sm:$0xff] %v13508_v10  ;;  %v13511_v13 = vpop.permute.xlu1 %6464 }
 0x6a7   : > { %v6108_v21 = vadd.f32 %v13382_v23, %v5914_v7  ;;  %v5916_v29 = vpop.f32.mrb[33].mxu1  ;;  %15365 = vst [vmem:[#allocation27_spill] sm:$0xff] %v13511_v13 }
 0x6a8   : > { %v5917_v62 = vpop.f32.mrb[34].mxu1 }
 0x6a9   : > { %v6163_v44 = vadd.f32 %v6162_v11, %v6108_v21  ;;  %v6111_v1 = vadd.f32 %v13388_v53, %v5917_v62  ;;  %v5919_v28 = vpop.f32.mrb[35].mxu1  ;;  %v13513_v53 = vpop.permute.xlu0 %6459 }
 0x6aa   : > { %15366 = vst [vmem:[#allocation26_spill] sm:$0xff] %v13513_v53 }
 0x6ab   : > { %v6164_v18 = vadd.f32 %v6163_v44, %v6111_v1 }
 0x6ae   : > { %v5922_v2 = vpop.f32.mrb[36].mxu1 }
 0x6af   : > { %v6116_v61 = vadd.f32 %v13405_v52, %v5922_v2  ;;  %v5924_v55 = vpop.f32.mrb[37].mxu1 }
 0x6b0   : > { %v5925_v23 = vpop.f32.mrb[38].mxu1 }
 0x6b1   : > { %v6165_v29 = vadd.f32 %v6164_v18, %v6116_v61  ;;  %v6119_v7 = vadd.f32 %v13412_v37, %v5925_v23  ;;  %v5927_v24 = vpop.f32.mrb[39].mxu1  ;;  %v13518_v18 = vpop.permute.xlu1 %6745 }
 0x6b2   : > { %15367 = vst [vmem:[#allocation35_spill] sm:$0xff] %v13518_v18  ;;  %v13520_v37 = vpop.permute.xlu0 %6740 }
 0x6b3   : > { %v6166_v11 = vadd.f32 %v6165_v29, %v6119_v7  ;;  %15368 = vst [vmem:[#allocation34_spill] sm:$0xff] %v13520_v37 }
 0x6b5   : > { %v13522_v10 = vpop.permute.xlu1 %6474 }
 0x6b6   : > { %v5930_v62 = vpop.f32.mrb[40].mxu1  ;;  %15369 = vst [vmem:[#allocation41_spill] sm:$0xff] %v13522_v10  ;;  %v13524_v13 = vpop.permute.xlu0 %6469 }
 0x6b7   : > { %v6124_v44 = vadd.f32 %v13400_v20, %v5930_v62  ;;  %v5932_v28 = vpop.f32.mrb[41].mxu1  ;;  %15370 = vst [vmem:[#allocation11_spill] sm:$0xff] %v13524_v13 }
 0x6b8   : > { %v5933_v8 = vpop.f32.mrb[42].mxu1 }
 0x6b9   : > { %v6167_v0 = vadd.f32 %v6166_v11, %v6124_v44  ;;  %v6127_v52 = vadd.f32 %v13407_v32, %v5933_v8  ;;  %v5935_v2 = vpop.f32.mrb[43].mxu1  ;;  %v13526_v11 = vpop.permute.xlu1 %6755 }
 0x6ba   : > { %15371 = vst [vmem:[#allocation10_spill] sm:$0xff] %v13526_v11  ;;  %v13528_v32 = vpop.permute.xlu0 %6750 }
 0x6bb   : > { %v6168_v55 = vsel %vm1982_vm0, %v6127_v52, 0.0  ;;  %15372 = vst [vmem:[#allocation42_spill] sm:$0xff] %v13528_v32 }
 0x6bc   : > { %v6169_v24 = vadd.f32 %v6168_v55, %v6167_v0 }
 0x6bd   : > { %v13530_v2 = vpop.permute.xlu1 %6484 }
 0x6be   : > { %v6170_v23 = vrot.slane %v6169_v24, 4  ;;  %15373 = vst [vmem:[#allocation14_spill] sm:$0xff] %v13530_v2  ;;  %v13532_v18 = vpop.permute.xlu0 %6479 }
 0x6bf   : > { %15374 = vst [vmem:[#allocation17_spill] sm:$0xff] %v13532_v18 }
 0x6c0   : > { %v6171_v29 = vadd.f32 %v6170_v23, %v6169_v24 }
 0x6c1   : > { %v13548_v23 = vpop.permute.xlu1 %6765 }
 0x6c2   : > { %v6172_v20 = vrot.slane %v6171_v29, 2  ;;  %15375 = vst [vmem:[#allocation9_spill] sm:$0xff] %v13548_v23  ;;  %v9396_v23 = vld [vmem:[%s14884_s4 + $0x180] sm:$0xff]  }
 0x6c3   : > { %7838 = vmatpush1.bf16.msra.mxu0 %v9396_v23 }
 0x6c4   : > { %v6173_v62 = vadd.f32 %v6172_v20, %v6171_v29  ;;  %v13550_v29 = vpop.permute.xlu0 %6760 }
 0x6c5   : > { %15376 = vst [vmem:[#allocation8_spill] sm:$0xff] %v13550_v29 }
 0x6c6   : > { %v6174_v28 = vrot.slane %v6173_v62, 1 }
 0x6c8   : > { %v6175_v8 = vadd.f32 %v6174_v28, %v6173_v62 }
 0x6ca   : > { %v13534_v37 = vmul.f32 0.0031948881, %v6175_v8 }
 0x6cc   : > { %v13538_v0 = vsub.f32 %v13471_v58, %v13534_v37  ;;  %v13542_v55 = vsub.f32 %v13480_v35, %v13534_v37  ;;  %v13546_v24 = vsub.f32 %v13486_v56, %v13534_v37  ;;  %v13553_v20 = vsub.f32 %v6100_v15, %v13534_v37 }
 0x6cd   : > { %v13556_v62 = vsub.f32 %v6103_v16, %v13534_v37  ;;  %v13559_v58 = vsub.f32 %v6108_v21, %v13534_v37  ;;  %v13562_v35 = vsub.f32 %v6111_v1, %v13534_v37  ;;  %v13565_v28 = vsub.f32 %v6116_v61, %v13534_v37  ;;  %v9395_v16 = vld [vmem:[%s14884_s4 + $0x200] sm:$0xff]   ;;  %v13587_v61 = vpop.permute.xlu1 %6494 }
 0x6ce   : > { %v13568_v56 = vsub.f32 %v6119_v7, %v13534_v37  ;;  %v13571_v8 = vsub.f32 %v6124_v44, %v13534_v37  ;;  %v13574_v15 = vsub.f32 %v6127_v52, %v13534_v37  ;;  %v13581_v21 = vsub.f32 %v13307_v14, %v13534_v37  ;;  %9101 = vmatprep.subr.bf16.mxu1 %v9395_v16  ;;  %v13589_v7 = vpop.permute.xlu0 %6489 }
 0x6cf   : > { %v13585_v1 = vsub.f32 %v13311_v19, %v13534_v37  ;;  %15377 = vst [vmem:[#allocation7_spill] sm:$0xff] %v13587_v61  ;;  %15378 = vst [vmem:[#allocation5_spill] sm:$0xff] %v13589_v7  ;;  %9102 = vmatpush3.bf16.msra.mxu1 %v9395_v16  ;;  %v13593_v44 = vsub.f32 %v13309_v33, %v13534_v37  ;;  %v13601_v19 = vsub.f32 %v13313_v31, %v13534_v37 }
 0x6d0   : > { %v6217_v52 = vmul.f32 %v13581_v21, %v13581_v21  ;;  %v13612_v33 = vsub.f32 %v13315_v50, %v13534_v37  ;;  %v13618_v31 = vsub.f32 %v13317_v39, %v13534_v37  ;;  %v9398_v50 = vld [vmem:[%s14884_s4 + $0x188] sm:$0xff]  }
 0x6d1   : > { %v6218_v14 = vmul.f32 %v13585_v1, %v13585_v1  ;;  %v13606_v29 = vpop.permute.xlu1 %6775  ;;  %v6219_v11 = vmul.f32 %v13593_v44, %v13593_v44  ;;  %v6220_v61 = vmul.f32 %v13601_v19, %v13601_v19 }
 0x6d2   : > { %15379 = vst [vmem:[#allocation141_spill] sm:$0xff] %v13606_v29  ;;  %v13608_v16 = vpop.permute.xlu0 %6770  ;;  %v15381_v29 = vmov 0   ;;  %v6221_v23 = vmul.f32 %v13612_v33, %v13612_v33 }
 0x6d3   : > { %15380 = vst [vmem:[#allocation147_spill] sm:$0xff] %v13608_v16  ;;  %v6257_v32 = vadd.f32 %v6218_v14, %v6217_v52  ;;  %7839 = vmatprep.subr.bf16.mxu0 %v15381_v29  ;;  %v13628_v16 = vsub.f32 %v13319_v54, %v13534_v37  ;;  %v9399_v54 = vld [vmem:[%s14884_s4 + $0x190] sm:$0xff]  }
 0x6d4   : > { %7840 = vmatpush1.bf16.msra.mxu0 %v9398_v50 }
 0x6d5   : > { %v6258_v7 = vadd.f32 %v6257_v32, %v6219_v11  ;;  %v13632_v39 = vpop.permute.xlu1 %6504  ;;  %v13638_v11 = vsub.f32 %v13321_v57, %v13534_v37  ;;  %v6222_v32 = vmul.f32 %v13618_v31, %v13618_v31  ;;  %7841 = vmatprep.subr.bf16.mxu0 %v15381_v29  ;;  %v13654_v57 = vsub.f32 %v13327_v26, %v13534_v37 }
 0x6d6   : > { %15382 = vst [vmem:[#allocation142_spill] sm:$0xff] %v13632_v39  ;;  %v13634_v14 = vpop.permute.xlu0 %6499 }
 0x6d7   : > { %v6259_v52 = vadd.f32 %v6258_v7, %v6220_v61  ;;  %15383 = vst [vmem:[#allocation21_spill] sm:$0xff] %v13634_v14  ;;  %v13648_v61 = vsub.f32 %v13323_v51, %v13534_v37  ;;  %v6223_v7 = vmul.f32 %v13628_v16, %v13628_v16  ;;  %v9400_v51 = vld [vmem:[%s14884_s4 + $0x198] sm:$0xff]  }
 0x6d8   : > { %7842 = vmatpush1.bf16.msra.mxu0 %v9399_v54  ;;  %v13674_v54 = vsub.f32 %v13333_v49, %v13534_v37 }
 0x6d9   : > { %v6260_v2 = vadd.f32 %v6259_v52, %v6221_v23  ;;  %v6224_v23 = vmul.f32 %v13638_v11, %v13638_v11  ;;  %7843 = vmatprep.subr.bf16.mxu0 %v15381_v29  ;;  %v13662_v39 = vpop.permute.xlu1 %6785  ;;  %v6225_v26 = vmul.f32 %v13648_v61, %v13648_v61 }
 0x6da   : > { %15384 = vst [vmem:[#allocation20_spill] sm:$0xff] %v13662_v39  ;;  %v13664_v14 = vpop.permute.xlu0 %6780  ;;  %v13684_v39 = vsub.f32 %v13341_v38, %v13534_v37  ;;  %v9403_v38 = vld [vmem:[%s14884_s4 + $0x1a8] sm:$0xff]  }
 0x6db   : > { %v6261_v50 = vadd.f32 %v6260_v2, %v6222_v32  ;;  %15385 = vst [vmem:[#allocation25_spill] sm:$0xff] %v13664_v14  ;;  %v13668_v2 = vsub.f32 %v13330_v4, %v13534_v37  ;;  %v9401_v4 = vld [vmem:[%s14884_s4 + $0x1a0] sm:$0xff]  }
 0x6dc   : > { %7844 = vmatpush1.bf16.msra.mxu0 %v9400_v51 }
 0x6dd   : > { %v6262_v52 = vadd.f32 %v6261_v50, %v6223_v7  ;;  %v6226_v7 = vmul.f32 %v13654_v57, %v13654_v57  ;;  %7845 = vmatprep.subr.bf16.mxu0 %v15381_v29  ;;  %v13688_v49 = vpop.permute.xlu1 %6514 }
 0x6de   : > { %15386 = vst [vmem:[#allocation24_spill] sm:$0xff] %v13688_v49  ;;  %v13690_v51 = vpop.permute.xlu0 %6509 }
 0x6df   : > { %v6263_v32 = vadd.f32 %v6262_v52, %v6224_v23  ;;  %v6227_v23 = vmul.f32 %v13668_v2, %v13668_v2  ;;  %15387 = vst [vmem:[#allocation46_spill] sm:$0xff] %v13690_v51 }
 0x6e0   : > { %7846 = vmatpush1.bf16.msra.mxu0 %v9401_v4 }
 0x6e1   : > { %v6264_v50 = vadd.f32 %v6263_v32, %v6225_v26  ;;  %v13694_v26 = vsub.f32 %v13344_v9, %v13534_v37  ;;  %v6228_v32 = vmul.f32 %v13674_v54, %v13674_v54  ;;  %7847 = vmatprep.subr.bf16.mxu0 %v15381_v29  ;;  %v13710_v9 = vsub.f32 %v13358_v40, %v13534_v37  ;;  %v13718_v49 = vpop.permute.xlu1 %6795 }
 0x6e2   : > { %15388 = vst [vmem:[#allocation143_spill] sm:$0xff] %v13718_v49  ;;  %v13720_v51 = vpop.permute.xlu0 %6790  ;;  %v13740_v49 = vsub.f32 %v13391_v41, %v13534_v37  ;;  %v9406_v41 = vld [vmem:[%s14884_s4 + $0x1c0] sm:$0xff]  }
 0x6e3   : > { %v6265_v52 = vadd.f32 %v6264_v50, %v6226_v7  ;;  %v13704_v7 = vsub.f32 %v13354_v5, %v13534_v37  ;;  %v6229_v50 = vmul.f32 %v13684_v39, %v13684_v39  ;;  %v9404_v5 = vld [vmem:[%s14884_s4 + $0x1b0] sm:$0xff]   ;;  %15389 = vst [vmem:[#allocation144_spill] sm:$0xff] %v13720_v51 }
 0x6e4   : > { %7848 = vmatpush1.bf16.msra.mxu0 %v9403_v38  ;;  %v13730_v38 = vsub.f32 %v13377_v43, %v13534_v37 }
 0x6e5   : > { %v6266_v14 = vadd.f32 %v6265_v52, %v6227_v23  ;;  %v6230_v23 = vmul.f32 %v13694_v26, %v13694_v26  ;;  %7849 = vmatprep.subr.bf16.mxu0 %v15381_v29  ;;  %v6231_v40 = vmul.f32 %v13704_v7, %v13704_v7  ;;  %v13744_v43 = vpop.permute.xlu1 %6524 }
 0x6e6   : > { %15390 = vst [vmem:[#allocation29_spill] sm:$0xff] %v13744_v43 }
 0x6e7   : > { %v6267_v4 = vadd.f32 %v6266_v14, %v6228_v32  ;;  %v13724_v14 = vsub.f32 %v13372_v42, %v13534_v37  ;;  %v9405_v42 = vld [vmem:[%s14884_s4 + $0x1b8] sm:$0xff]  }
 0x6e8   : > { %7850 = vmatpush1.bf16.msra.mxu0 %v9404_v5  ;;  %v13746_v5 = vpop.permute.xlu0 %6519 }
 0x6e9   : > { %v6268_v52 = vadd.f32 %v6267_v4, %v6229_v50  ;;  %v6232_v50 = vmul.f32 %v13710_v9, %v13710_v9  ;;  %7851 = vmatprep.subr.bf16.mxu0 %v15381_v29  ;;  %15391 = vst [vmem:[#allocation28_spill] sm:$0xff] %v13746_v5  ;;  %v13774_v43 = vpop.permute.xlu1 %6805 }
 0x6ea   : > { %15392 = vst [vmem:[#allocation146_spill] sm:$0xff] %v13774_v43 }
 0x6eb   : > { %v6269_v32 = vadd.f32 %v6268_v52, %v6230_v23  ;;  %v6233_v23 = vmul.f32 %v13724_v14, %v13724_v14 }
 0x6ec   : > { %7852 = vmatpush1.bf16.msra.mxu0 %v9405_v42  ;;  %v13776_v5 = vpop.permute.xlu0 %6800 }
 0x6ed   : > { %v6270_v4 = vadd.f32 %v6269_v32, %v6231_v40  ;;  %v13750_v40 = vsub.f32 %v13396_v47, %v13534_v37  ;;  %v6234_v32 = vmul.f32 %v13730_v38, %v13730_v38  ;;  %7853 = vmatprep.subr.bf16.mxu0 %v15381_v29  ;;  %v13766_v47 = vsub.f32 %v13414_v60, %v13534_v37 }
 0x6ee   : > { %15393 = vst [vmem:[#allocation33_spill] sm:$0xff] %v13776_v5 }
 0x6ef   : > { %v6271_v52 = vadd.f32 %v6270_v4, %v6232_v50  ;;  %v13760_v50 = vsub.f32 %v13410_v25, %v13534_v37  ;;  %v6235_v4 = vmul.f32 %v13740_v49, %v13740_v49  ;;  %v9408_v25 = vld [vmem:[%s14884_s4 + $0x1c8] sm:$0xff]  }
 0x6f0   : > { %7854 = vmatpush1.bf16.msra.mxu0 %v9406_v41  ;;  %v9397_v41 = vld [vmem:[%s14884_s4 + $0x208] sm:$0xff]  }
 0x6f1   : > { %v6272_v51 = vadd.f32 %v6271_v52, %v6233_v23  ;;  %v6236_v23 = vmul.f32 %v13750_v40, %v13750_v40  ;;  %7855 = vmatprep.subr.bf16.mxu0 %v15381_v29  ;;  %v6237_v60 = vmul.f32 %v13760_v50, %v13760_v50  ;;  %9103 = vmatprep.subr.bf16.mxu1 %v9397_v41 }
 0x6f2   : > { %9104 = vmatpush3.bf16.msra.mxu1 %v9397_v41  ;;  %v13812_v41 = vsub.f32 %v13444_v34, %v13534_v37 }
 0x6f3   : > { %v6273_v42 = vadd.f32 %v6272_v51, %v6234_v32  ;;  %v13780_v51 = vsub.f32 %v13423_v22, %v13534_v37  ;;  %v9409_v22 = vld [vmem:[%s14884_s4 + $0x1d0] sm:$0xff]  }
 0x6f4   : > { %7856 = vmatpush1.bf16.msra.mxu0 %v9408_v25  ;;  %v9402_v25 = vld [vmem:[%s14884_s4 + $0x210] sm:$0xff]  }
 0x6f5   : > { %v6274_v52 = vadd.f32 %v6273_v42, %v6235_v4  ;;  %v13789_v4 = vsub.f32 %v13429_v36, %v13534_v37  ;;  %v6238_v42 = vmul.f32 %v13766_v47, %v13766_v47  ;;  %7857 = vmatprep.subr.bf16.mxu0 %v15381_v29  ;;  %v6239_v36 = vmul.f32 %v13780_v51, %v13780_v51 }
 0x6f6   : > { %9105 = vmatprep.subr.bf16.mxu1 %v9402_v25 }
 0x6f7   : > { %v6275_v32 = vadd.f32 %v6274_v52, %v6236_v23  ;;  %v13799_v23 = vsub.f32 %v13438_v17, %v13534_v37  ;;  %v6240_v17 = vmul.f32 %v13789_v4, %v13789_v4  ;;  %9106 = vmatpush3.bf16.msra.mxu1 %v9402_v25  ;;  %v6242_v25 = vmul.f32 %v13812_v41, %v13812_v41 }
 0x6f8   : > { %7858 = vmatpush1.bf16.msra.mxu0 %v9409_v22 }
 0x6f9   : > { %v6276_v43 = vadd.f32 %v6275_v32, %v6237_v60  ;;  %v13806_v60 = vpop.permute.xlu1 %6534  ;;  %v13808_v32 = vpop.permute.xlu0 %6529  ;;  %7859 = vmatprep.subr.bf16.mxu0 %v15381_v29  ;;  %v6241_v34 = vmul.f32 %v13799_v23, %v13799_v23 }
 0x6fa   : > { %15394 = vst [vmem:[#allocation32_spill] sm:$0xff] %v13806_v60  ;;  %15395 = vst [vmem:[#allocation145_spill] sm:$0xff] %v13808_v32 }
 0x6fb   : > { %v6277_v52 = vadd.f32 %v6276_v43, %v6238_v42  ;;  %v9410_v43 = vld [vmem:[%s14884_s4 + $0x1d8] sm:$0xff]   ;;  %v13822_v42 = vsub.f32 %v13453_v27, %v13534_v37  ;;  %v9411_v27 = vld [vmem:[%s14884_s4 + $0x1e0] sm:$0xff]  }
 0x6fc   : > { %7860 = vmatpush1.bf16.msra.mxu0 %v9410_v43 }
 0x6fd   : > { %v6278_v5 = vadd.f32 %v6277_v52, %v6239_v36  ;;  %v9407_v36 = vld [vmem:[%s14884_s4 + $0x218] sm:$0xff]   ;;  %v13831_v52 = vsub.f32 %v13456_v63, %v13534_v37  ;;  %7861 = vmatprep.subr.bf16.mxu0 %v15381_v29  ;;  %v13845_v63 = vsub.f32 %v13465_v48, %v13534_v37  ;;  %v6243_v43 = vmul.f32 %v13822_v42, %v13822_v42  ;;  %v9413_v48 = vld [vmem:[%s14884_s4 + $0x1e8] sm:$0xff]  }
 0x6fe   : > { %9107 = vmatprep.subr.bf16.mxu1 %v9407_v36 }
 0x6ff   : > { %v6279_v22 = vadd.f32 %v6278_v5, %v6240_v17  ;;  %9108 = vmatpush3.bf16.msra.mxu1 %v9407_v36  ;;  %v13839_v5 = vpop.permute.xlu1 %6815  ;;  %v13841_v17 = vpop.permute.xlu0 %6810  ;;  %v6244_v36 = vmul.f32 %v13831_v52, %v13831_v52  ;;  %v6245_v37 = vmul.f32 %v13845_v63, %v13845_v63 }
 0x700   : > { %15396 = vst [vmem:[#allocation37_spill] sm:$0xff] %v13839_v5  ;;  %15397 = vst [vmem:[#allocation36_spill] sm:$0xff] %v13841_v17  ;;  %7862 = vmatpush1.bf16.msra.mxu0 %v9411_v27  ;;  %v9414_v5 = vld [vmem:[%s14884_s4 + $0x1f0] sm:$0xff]   ;;  %v6248_v17 = vmul.f32 %v13546_v24, %v13546_v24 }
 0x701   : > { %v6280_v60 = vadd.f32 %v6279_v22, %v6241_v34  ;;  %v9412_v22 = vld [vmem:[%s14884_s4 + $0x220] sm:$0xff]   ;;  %7863 = vmatprep.subr.bf16.mxu0 %v15381_v29 }
 0x702   : > { %9109 = vmatprep.subr.bf16.mxu1 %v9412_v22 }
 0x703   : > { %v6281_v34 = vadd.f32 %v6280_v60, %v6242_v25  ;;  %9110 = vmatpush3.bf16.msra.mxu1 %v9412_v22  ;;  %v9416_v25 = vld [vmem:[%s14884_s4 + $0x228] sm:$0xff]   ;;  %v13863_v27 = vpop.permute.xlu1 %6544 }
 0x704   : > { %7864 = vmatpush1.bf16.msra.mxu0 %v9413_v48  ;;  %15398 = vst [vmem:[#allocation40_spill] sm:$0xff] %v13863_v27  ;;  %9111 = vmatprep.subr.bf16.mxu1 %v9416_v25  ;;  %v9415_v48 = vld [vmem:[%s14884_s4 + $0x1f8] sm:$0xff]  }
 0x705   : > { %v6282_v32 = vadd.f32 %v6281_v34, %v6243_v43  ;;  %v13865_v43 = vpop.permute.xlu0 %6539  ;;  %v6246_v34 = vmul.f32 %v13538_v0, %v13538_v0  ;;  %7865 = vmatprep.subr.bf16.mxu0 %v15381_v29 }
 0x706   : > { %15399 = vst [vmem:[#allocation43_spill] sm:$0xff] %v13865_v43  ;;  %v6250_v43 = vmul.f32 %v13556_v62, %v13556_v62 }
 0x707   : > { %v6283_v60 = vadd.f32 %v6282_v32, %v6244_v36  ;;  %v6247_v32 = vmul.f32 %v13542_v55, %v13542_v55  ;;  %9112 = vmatpush3.bf16.msra.mxu1 %v9416_v25 }
 0x708   : > { %7866 = vmatpush1.bf16.msra.mxu0 %v9414_v5  ;;  %v13887_v5 = vpop.permute.xlu1 %6825 }
 0x709   : > { %v6284_v22 = vadd.f32 %v6283_v60, %v6245_v37  ;;  %v9417_v37 = vld [vmem:[%s14884_s4 + $0x230] sm:$0xff]   ;;  %v9418_v60 = vld [vmem:[%s14884_s4 + $0x238] sm:$0xff]   ;;  %7867 = vmatprep.subr.bf16.mxu0 %v15381_v29  ;;  %15400 = vst [vmem:[#allocation80_spill] sm:$0xff] %v13887_v5  ;;  %v13889_v25 = vpop.permute.xlu0 %6820 }
 0x70a   : > { %9113 = vmatprep.subr.bf16.mxu1 %v9417_v37  ;;  %15401 = vst [vmem:[#allocation79_spill] sm:$0xff] %v13889_v25  ;;  %v6252_v25 = vmul.f32 %v13562_v35, %v13562_v35 }
 0x70b   : > { %v6285_v36 = vadd.f32 %v6284_v22, %v6246_v34  ;;  %v6249_v34 = vmul.f32 %v13553_v20, %v13553_v20  ;;  %9114 = vmatpush3.bf16.msra.mxu1 %v9417_v37  ;;  %v6254_v37 = vmul.f32 %v13568_v56, %v13568_v56 }
 0x70c   : > { %7868 = vmatpush1.bf16.msra.mxu0 %v9415_v48  ;;  %9115 = vmatprep.subr.bf16.mxu1 %v9418_v60 }
 0x70d   : > { %v6286_v27 = vadd.f32 %v6285_v36, %v6247_v32  ;;  %v6251_v32 = vmul.f32 %v13559_v58, %v13559_v58  ;;  %v13897_v36 = vpop.permute.xlu1 %6830  ;;  %v13899_v5 = vpop.permute.xlu0 %6549 }
 0x70e   : > { %15402 = vst [vmem:[#allocation84_spill] sm:$0xff] %v13897_v36  ;;  %15403 = vst [vmem:[#allocation83_spill] sm:$0xff] %v13899_v5 }
 0x70f   : > { %v6287_v22 = vadd.f32 %v6286_v27, %v6248_v17  ;;  %9116 = vmatpush3.bf16.msra.mxu1 %v9418_v60  ;;  %v6253_v27 = vmul.f32 %v13565_v28, %v13565_v28 }
 0x711   : > { %v6288_v18 = vadd.f32 %v6287_v22, %v6249_v34  ;;  %v13911_v60 = vpop.permute.xlu0 %6554  ;;  %v6255_v22 = vmul.f32 %v13571_v8, %v13571_v8 }
 0x712   : > { %15405 = vst [vmem:[#allocation87_spill] sm:$0xff] %v13911_v60 }
 0x713   : > { %v6289_v29 = vadd.f32 %v6288_v18, %v6250_v43  ;;  %v6256_v18 = vmul.f32 %v13574_v15, %v13574_v15  ;;  %v13909_v43 = vpop.permute.xlu1 %6559 }
 0x714   : > { %15404 = vst [vmem:[#allocation88_spill] sm:$0xff] %v13909_v43 }
 0x715   : > { %v6290_v17 = vadd.f32 %v6289_v29, %v6251_v32  ;;  %v6295_v29 = vsel %vm1982_vm0, %v6256_v18, 0.0 }
 0x717   : > { %v6291_v48 = vadd.f32 %v6290_v17, %v6252_v25  ;;  %v13916_v25 = vpop.permute.xlu1 %6564  ;;  %v13918_v17 = vpop.permute.xlu0 %6835 }
 0x718   : > { %15406 = vst [vmem:[#allocation92_spill] sm:$0xff] %v13918_v17 }
 0x719   : > { %v6292_v34 = vadd.f32 %v6291_v48, %v6253_v27 }
 0x71b   : > { %v6293_v36 = vadd.f32 %v6292_v34, %v6254_v37  ;;  %v13920_v13 = vpop.permute.xlu1 %6840  ;;  %v13922_v43 = vpop.permute.xlu0 %6569 }
 0x71c   : > { %15407 = vst [vmem:[#allocation91_spill] sm:$0xff] %v13920_v13 }
 0x71d   : > { %v6294_v32 = vadd.f32 %v6293_v36, %v6255_v22 }
 0x71f   : > { %v6296_v5 = vadd.f32 %v6295_v29, %v6294_v32  ;;  %v13924_v12 = vpop.permute.xlu1 %6850  ;;  %v13926_v36 = vpop.permute.xlu0 %6845 }
 0x720   : > { %15408 = vst [vmem:[#allocation96_spill] sm:$0xff] %v13924_v12  ;;  %15409 = vst [vmem:[#allocation95_spill] sm:$0xff] %v13926_v36 }
 0x721   : > { %v6297_v27 = vrot.slane %v6296_v5, 4 }
 0x723   : > { %v6298_v48 = vadd.f32 %v6297_v27, %v6296_v5  ;;  %v6580_v18 = vpop.permute.xlu1 %6579  ;;  %v13928_v22 = vpop.permute.xlu0 %6574 }
 0x725   : > { %v6299_v10 = vrot.slane %v6298_v48, 2 }
 0x727   : > { %v6300_v60 = vadd.f32 %v6299_v10, %v6298_v48  ;;  %v13930_v32 = vpop.permute.xlu1 %6855  ;;  %v6585_v5 = vpop.permute.xlu0 %6584 }
 0x728   : > { %15410 = vst [vmem:[#allocation100_spill] sm:$0xff] %v13930_v32 }
 0x729   : > { %v6301_v53 = vrot.slane %v6300_v60, 1 }
 0x72b   : > { %v6302_v3 = vadd.f32 %v6301_v53, %v6300_v60  ;;  %v6866_v13 = vpop.permute.xlu1 %6865 }
 0x72d   : > { %v6303_v37 = vmul.f32 0.0031948881, %v6302_v3 }
 0x72f   : > { %v6304_v34 = vadd.f32 1e-05, %v6303_v37 }
 0x731   : > { %9423 = vrsqrt.f32 %v6304_v34 }
 0x73b   : > { %v9424_v29 = vpop.eup %9423 }
 0x73c   : > { %v6344_v27 = vmul.f32 %v9424_v29, %v13571_v8  ;;  %v6345_v10 = vmul.f32 %v9424_v29, %v13574_v15  ;;  %v6306_v53 = vmul.f32 %v9424_v29, %v13581_v21  ;;  %v6307_v60 = vmul.f32 %v9424_v29, %v13585_v1  ;;  %v6861_v8 = vpop.permute.xlu0 %6860 }
 0x73d   : > { %v6308_v48 = vmul.f32 %v9424_v29, %v13593_v44  ;;  %v6309_v3 = vmul.f32 %v9424_v29, %v13601_v19  ;;  %v6310_v37 = vmul.f32 %v9424_v29, %v13612_v33  ;;  %v6311_v32 = vmul.f32 %v9424_v29, %v13618_v31 }
 0x73e   : > { %v6625_v34 = vmul.f32 %v6580_v18, %v6344_v27  ;;  %v6626_v12 = vmul.f32 %v6585_v5, %v6345_v10  ;;  %v6312_v36 = vmul.f32 %v9424_v29, %v13628_v16  ;;  %v6313_v15 = vmul.f32 %v9424_v29, %v13638_v11 }
 0x73f   : > { %v6314_v21 = vmul.f32 %v9424_v29, %v13648_v61  ;;  %v6315_v1 = vmul.f32 %v9424_v29, %v13654_v57  ;;  %v6316_v44 = vmul.f32 %v9424_v29, %v13668_v2  ;;  %v6317_v33 = vmul.f32 %v9424_v29, %v13674_v54 }
 0x740   : > { %v6906_v17 = vadd.f32 %v6861_v8, %v6625_v34  ;;  %v6907_v19 = vadd.f32 %v6866_v13, %v6626_v12  ;;  %v6318_v18 = vmul.f32 %v9424_v29, %v13684_v39  ;;  %v6319_v31 = vmul.f32 %v9424_v29, %v13694_v26  ;;  %v15412_v8 = vld [vmem:[#allocation47_spill] sm:$0xff] }
 0x741   : > { %v6320_v16 = vmul.f32 %v9424_v29, %v13704_v7  ;;  %v6321_v5 = vmul.f32 %v9424_v29, %v13710_v9  ;;  %v6322_v11 = vmul.f32 %v9424_v29, %v13724_v14  ;;  %v6323_v57 = vmul.f32 %v9424_v29, %v13730_v38 }
 0x742   : > { %v6946_v27 = vmul.f32 0.2, %v6906_v17  ;;  %v6947_v61 = vmul.f32 0.2, %v6907_v19  ;;  %v6324_v2 = vmul.f32 %v9424_v29, %v13740_v49  ;;  %v6325_v12 = vmul.f32 %v9424_v29, %v13750_v40 }
 0x743   : > { %v6326_v13 = vmul.f32 %v9424_v29, %v13760_v50  ;;  %v6327_v39 = vmul.f32 %v9424_v29, %v13766_v47  ;;  %v6328_v54 = vmul.f32 %v9424_v29, %v13780_v51  ;;  %v6329_v9 = vmul.f32 %v9424_v29, %v13789_v4 }
 0x744   : > { %v13957_v26 = vmax.f32 %v6906_v17, %v6946_v27  ;;  %v6987_v7 = vmax.f32 %v6907_v19, %v6947_v61  ;;  %v6330_v14 = vmul.f32 %v9424_v29, %v13799_v23  ;;  %v6331_v10 = vmul.f32 %v9424_v29, %v13812_v41  ;;  %v15413_v27 = vld [vmem:[#allocation55_spill] sm:$0xff] }
 0x745   : > { %v6332_v38 = vmul.f32 %v9424_v29, %v13822_v42  ;;  %v6333_v49 = vmul.f32 %v9424_v29, %v13831_v52  ;;  %v6334_v40 = vmul.f32 %v9424_v29, %v13845_v63  ;;  %v6335_v51 = vmul.f32 %v9424_v29, %v13538_v0 }
 0x746   : > { %15411 = vst [vmem:[#allocation82_spill] sm:$0xff] %v13957_v26  ;;  %7027 = vst [vmem:[#allocation2 + $0x3b0] sm:$0x1] %v6987_v7  ;;  %v14926_v50 = vrot.slane %v13957_v26, 7  ;;  %v7145_v47 = vrot.slane %v6987_v7, 7  ;;  %v6336_v17 = vmul.f32 %v9424_v29, %v13542_v55  ;;  %v6337_v4 = vmul.f32 %v9424_v29, %v13546_v24 }
 0x747   : > { %7026 = vst [vmem:[#allocation2 + $0x398] sm:$0xff] %v13957_v26  ;;  %v6338_v23 = vmul.f32 %v9424_v29, %v13553_v20  ;;  %v6339_v41 = vmul.f32 %v9424_v29, %v13556_v62  ;;  %v6340_v42 = vmul.f32 %v9424_v29, %v13559_v58  ;;  %v6341_v63 = vmul.f32 %v9424_v29, %v13562_v35  ;;  %v15414_v35 = vld [vmem:[#allocation56_spill] sm:$0xff] }
 0x748   : > { %v7146_v52 = vsel %vm1982_vm0, %v14926_v50, %v7145_v47  ;;  %v6342_v0 = vmul.f32 %v9424_v29, %v13565_v28  ;;  %v6343_v55 = vmul.f32 %v9424_v29, %v13568_v56  ;;  %v6587_v34 = vmul.f32 %v13365_v45, %v6306_v53  ;;  %v15415_v28 = vld [vmem:[#allocation63_spill] sm:$0xff]  ;;  %v15416_v56 = vld [vmem:[#allocation64_spill] sm:$0xff]  ;;  %v15418_v53 = vld [vmem:[#allocation69_spill] sm:$0xff] }
 0x749   : > { %7226 = vst [vmem:[#allocation2 + $0x3a8] sm:$0x3] %v7146_v52  ;;  %v6588_v24 = vmul.f32 %v13361_v6, %v6307_v60  ;;  %v6589_v20 = vmul.f32 %v13402_v59, %v6308_v48  ;;  %v6590_v62 = vmul.f32 %v13398_v30, %v6309_v3  ;;  %v6591_v58 = vmul.f32 %v13431_v46, %v6310_v37  ;;  %v15417_v52 = vld [vmem:[#allocation76_spill] sm:$0xff]  ;;  %v15420_v48 = vld [vmem:[#allocation77_spill] sm:$0xff]  ;;  %v15421_v3 = vld [vmem:[#allocation26_spill] sm:$0xff] }
 0x74a   : > { %v6592_v19 = vmul.f32 %v15412_v8, %v6311_v32  ;;  %v6593_v61 = vmul.f32 %v15413_v27, %v6312_v36  ;;  %v6594_v7 = vmul.f32 %v15414_v35, %v6313_v15  ;;  %v6595_v47 = vmul.f32 %v15415_v28, %v6314_v21  ;;  %v15419_v60 = vld [vmem:[#allocation16_spill] sm:$0xff]  ;;  %v15422_v37 = vld [vmem:[#allocation27_spill] sm:$0xff]  ;;  %v15424_v27 = vld [vmem:[#allocation41_spill] sm:$0xff] }
 0x74b   : > { %v6596_v29 = vmul.f32 %v15416_v56, %v6315_v1  ;;  %v6597_v45 = vmul.f32 %v15417_v52, %v6316_v44  ;;  %v6598_v6 = vmul.f32 %v15418_v53, %v6317_v33  ;;  %v6599_v59 = vmul.f32 %v15419_v60, %v6318_v18  ;;  %v15423_v8 = vld [vmem:[#allocation11_spill] sm:$0xff]  ;;  %v15425_v35 = vld [vmem:[#allocation17_spill] sm:$0xff]  ;;  %v15426_v28 = vld [vmem:[#allocation14_spill] sm:$0xff] }
 0x74c   : > { %v6600_v30 = vmul.f32 %v15420_v48, %v6319_v31  ;;  %v6601_v46 = vmul.f32 %v15421_v3, %v6320_v16  ;;  %v6602_v32 = vmul.f32 %v15422_v37, %v6321_v5  ;;  %v6603_v36 = vmul.f32 %v15423_v8, %v6322_v11  ;;  %v15427_v56 = vld [vmem:[#allocation5_spill] sm:$0xff]  ;;  %v15428_v52 = vld [vmem:[#allocation7_spill] sm:$0xff]  ;;  %v15430_v60 = vld [vmem:[#allocation142_spill] sm:$0xff] }
 0x74d   : > { %v6604_v15 = vmul.f32 %v15424_v27, %v6323_v57  ;;  %v6605_v21 = vmul.f32 %v15425_v35, %v6324_v2  ;;  %v6606_v1 = vmul.f32 %v15426_v28, %v6325_v12  ;;  %v6607_v44 = vmul.f32 %v15427_v56, %v6326_v13  ;;  %v15429_v53 = vld [vmem:[#allocation21_spill] sm:$0xff]  ;;  %v15431_v48 = vld [vmem:[#allocation46_spill] sm:$0xff]  ;;  %v15432_v3 = vld [vmem:[#allocation24_spill] sm:$0xff] }
 0x74e   : > { %v6608_v33 = vmul.f32 %v15428_v52, %v6327_v39  ;;  %v6609_v18 = vmul.f32 %v15429_v53, %v6328_v54  ;;  %v6610_v31 = vmul.f32 %v15430_v60, %v6329_v9  ;;  %v6611_v16 = vmul.f32 %v15431_v48, %v6330_v14  ;;  %v15433_v37 = vld [vmem:[#allocation28_spill] sm:$0xff]  ;;  %v15434_v8 = vld [vmem:[#allocation29_spill] sm:$0xff]  ;;  %v15437_v28 = vld [vmem:[#allocation43_spill] sm:$0xff] }
 0x74f   : > { %v6612_v5 = vmul.f32 %v15432_v3, %v6331_v10  ;;  %v6613_v11 = vmul.f32 %v15433_v37, %v6332_v38  ;;  %v6614_v57 = vmul.f32 %v15434_v8, %v6333_v49  ;;  %v15435_v27 = vld [vmem:[#allocation145_spill] sm:$0xff]  ;;  %v15436_v35 = vld [vmem:[#allocation32_spill] sm:$0xff]  ;;  %v6617_v13 = vmul.f32 %v15437_v28, %v6336_v17  ;;  %v15438_v56 = vld [vmem:[#allocation83_spill] sm:$0xff] }
 0x750   : > { %v6615_v2 = vmul.f32 %v15435_v27, %v6334_v40  ;;  %v6616_v12 = vmul.f32 %v15436_v35, %v6335_v51  ;;  %v6619_v39 = vmul.f32 %v15438_v56, %v6338_v23  ;;  %v15439_v52 = vld [vmem:[#allocation40_spill] sm:$0xff]  ;;  %v15440_v53 = vld [vmem:[#allocation87_spill] sm:$0xff]  ;;  %v6622_v10 = vmul.f32 %v13916_v25, %v6341_v63  ;;  %v15442_v48 = vld [vmem:[#allocation38_spill] sm:$0xff] }
 0x751   : > { %v6618_v54 = vmul.f32 %v15439_v52, %v6337_v4  ;;  %v6620_v9 = vmul.f32 %v15440_v53, %v6339_v41  ;;  %v15441_v60 = vld [vmem:[#allocation88_spill] sm:$0xff]  ;;  %v6623_v38 = vmul.f32 %v13922_v43, %v6342_v0  ;;  %v6624_v49 = vmul.f32 %v13928_v22, %v6343_v55  ;;  %v15443_v3 = vld [vmem:[#allocation30_spill] sm:$0xff]  ;;  %v15446_v27 = vld [vmem:[#allocation51_spill] sm:$0xff] }
 0x752   : > { %v6621_v14 = vmul.f32 %v15441_v60, %v6340_v42  ;;  %v6868_v40 = vadd.f32 %v15442_v48, %v6587_v34  ;;  %v6869_v51 = vadd.f32 %v15443_v3, %v6588_v24  ;;  %v15444_v37 = vld [vmem:[#allocation48_spill] sm:$0xff]  ;;  %v15445_v8 = vld [vmem:[#allocation6_spill] sm:$0xff]  ;;  %v6872_v4 = vadd.f32 %v15446_v27, %v6591_v58  ;;  %v15448_v28 = vld [vmem:[#allocation59_spill] sm:$0xff] }
 0x753   : > { %v6870_v17 = vadd.f32 %v15444_v37, %v6589_v20  ;;  %v6871_v23 = vadd.f32 %v15445_v8, %v6590_v62  ;;  %v15447_v35 = vld [vmem:[#allocation52_spill] sm:$0xff]  ;;  %v14024_v42 = vadd.f32 %v15448_v28, %v6593_v61  ;;  %v15450_v43 = vld [vmem:[#allocation70_spill] sm:$0xff]  ;;  %v15451_v0 = vld [vmem:[#allocation67_spill] sm:$0xff] }
 0x754   : > { %v6873_v41 = vadd.f32 %v15447_v35, %v6592_v19  ;;  %v15449_v25 = vld [vmem:[#allocation60_spill] sm:$0xff]  ;;  %v14030_v22 = vadd.f32 %v15450_v43, %v6595_v47  ;;  %v14033_v55 = vadd.f32 %v15451_v0, %v6596_v29  ;;  %v15452_v34 = vld [vmem:[#allocation78_spill] sm:$0xff]  ;;  %v15453_v20 = vld [vmem:[#allocation75_spill] sm:$0xff] }
 0x755   : > { %v14027_v63 = vadd.f32 %v15449_v25, %v6594_v7  ;;  %v14036_v24 = vadd.f32 %v15452_v34, %v6597_v45  ;;  %v14039_v62 = vadd.f32 %v15453_v20, %v6598_v6  ;;  %v15454_v58 = vld [vmem:[#allocation18_spill] sm:$0xff]  ;;  %v15455_v61 = vld [vmem:[#allocation19_spill] sm:$0xff]  ;;  %v15460_v6 = vld [vmem:[#allocation8_spill] sm:$0xff] }
 0x756   : > { %v14042_v19 = vadd.f32 %v15454_v58, %v6599_v59  ;;  %v14045_v56 = vadd.f32 %v15455_v61, %v6600_v30  ;;  %v15456_v7 = vld [vmem:[#allocation34_spill] sm:$0xff]  ;;  %v15457_v47 = vld [vmem:[#allocation35_spill] sm:$0xff]  ;;  %v14060_v3 = vadd.f32 %v15460_v6, %v6605_v21  ;;  %v15461_v59 = vld [vmem:[#allocation9_spill] sm:$0xff] }
 0x757   : > { %v14048_v52 = vadd.f32 %v15456_v7, %v6601_v46  ;;  %v14051_v53 = vadd.f32 %v15457_v47, %v6602_v32  ;;  %v15458_v29 = vld [vmem:[#allocation42_spill] sm:$0xff]  ;;  %v14063_v37 = vadd.f32 %v15461_v59, %v6606_v1  ;;  %v15462_v30 = vld [vmem:[#allocation147_spill] sm:$0xff]  ;;  %v15463_v46 = vld [vmem:[#allocation141_spill] sm:$0xff] }
 0x758   : > { %v14054_v60 = vadd.f32 %v15458_v29, %v6603_v36  ;;  %v15459_v45 = vld [vmem:[#allocation10_spill] sm:$0xff]  ;;  %v14066_v8 = vadd.f32 %v15462_v30, %v6607_v44  ;;  %v14069_v27 = vadd.f32 %v15463_v46, %v6608_v33  ;;  %v15464_v32 = vld [vmem:[#allocation25_spill] sm:$0xff]  ;;  %v15465_v36 = vld [vmem:[#allocation20_spill] sm:$0xff] }
 0x759   : > { %v14057_v48 = vadd.f32 %v15459_v45, %v6604_v15  ;;  %v14072_v35 = vadd.f32 %v15464_v32, %v6609_v18  ;;  %v14075_v28 = vadd.f32 %v15465_v36, %v6610_v31  ;;  %v15466_v15 = vld [vmem:[#allocation144_spill] sm:$0xff]  ;;  %v15467_v21 = vld [vmem:[#allocation143_spill] sm:$0xff]  ;;  %v15468_v1 = vld [vmem:[#allocation33_spill] sm:$0xff]  ;;  %v6910_v32 = vmul.f32 0.2, %v6870_v17 }
 0x75a   : > { %v14078_v25 = vadd.f32 %v15466_v15, %v6611_v16  ;;  %v14081_v43 = vadd.f32 %v15467_v21, %v6612_v5  ;;  %v14084_v0 = vadd.f32 %v15468_v1, %v6613_v11  ;;  %v15469_v44 = vld [vmem:[#allocation146_spill] sm:$0xff]  ;;  %v15470_v33 = vld [vmem:[#allocation36_spill] sm:$0xff]  ;;  %v15471_v18 = vld [vmem:[#allocation37_spill] sm:$0xff]  ;;  %v6912_v36 = vmul.f32 0.2, %v6872_v4 }
 0x75b   : > { %v14087_v34 = vadd.f32 %v15469_v44, %v6614_v57  ;;  %v14090_v20 = vadd.f32 %v15470_v33, %v6615_v2  ;;  %v14093_v58 = vadd.f32 %v15471_v18, %v6616_v12  ;;  %v15472_v31 = vld [vmem:[#allocation79_spill] sm:$0xff]  ;;  %v15473_v16 = vld [vmem:[#allocation80_spill] sm:$0xff]  ;;  %v6913_v15 = vmul.f32 0.2, %v6873_v41 }
 0x75c   : > { %v14096_v61 = vadd.f32 %v15472_v31, %v6617_v13  ;;  %v14099_v7 = vadd.f32 %v15473_v16, %v6618_v54  ;;  %v15474_v5 = vld [vmem:[#allocation84_spill] sm:$0xff]  ;;  %v15476_v57 = vld [vmem:[#allocation91_spill] sm:$0xff]  ;;  %v6908_v13 = vmul.f32 0.2, %v6868_v40  ;;  %v6909_v54 = vmul.f32 0.2, %v6869_v51 }
 0x75d   : > { %v14102_v47 = vadd.f32 %v15474_v5, %v6619_v39  ;;  %v15475_v11 = vld [vmem:[#allocation92_spill] sm:$0xff]  ;;  %v14108_v45 = vadd.f32 %v15476_v57, %v6621_v14  ;;  %v15477_v2 = vld [vmem:[#allocation95_spill] sm:$0xff]  ;;  %v6911_v39 = vmul.f32 0.2, %v6871_v23  ;;  %v6915_v14 = vmul.f32 0.2, %v14027_v63 }
 0x75e   : > { %v14105_v29 = vadd.f32 %v15475_v11, %v6620_v9  ;;  %v14111_v6 = vadd.f32 %v15477_v2, %v6622_v10  ;;  %v15478_v12 = vld [vmem:[#allocation96_spill] sm:$0xff]  ;;  %v6914_v9 = vmul.f32 0.2, %v14024_v42  ;;  %v14120_v21 = vmax.f32 %v6868_v40, %v6908_v13 }
 0x75f   : > { %v14114_v59 = vadd.f32 %v15478_v12, %v6623_v38  ;;  %v15479_v30 = vld [vmem:[#allocation100_spill] sm:$0xff]  ;;  %v6916_v10 = vmul.f32 0.2, %v14030_v22  ;;  %v6917_v38 = vmul.f32 0.2, %v14033_v55  ;;  %v14125_v1 = vmax.f32 %v6869_v51, %v6909_v54 }
 0x760   : > { %v14117_v46 = vadd.f32 %v15479_v30, %v6624_v49  ;;  %v6918_v49 = vmul.f32 0.2, %v14036_v24  ;;  %v6919_v44 = vmul.f32 0.2, %v14039_v62  ;;  %v6920_v33 = vmul.f32 0.2, %v14042_v19 }
 0x761   : > { %v14130_v18 = vmax.f32 %v6870_v17, %v6910_v32  ;;  %6988 = vst [vmem:[#allocation2 + $0x8] sm:$0xff] %v14120_v21  ;;  %v6921_v40 = vmul.f32 0.2, %v14045_v56  ;;  %v6922_v31 = vmul.f32 0.2, %v14048_v52  ;;  %v14136_v5 = vmax.f32 %v6871_v23, %v6911_v39 }
 0x762   : > { %v6923_v16 = vmul.f32 0.2, %v14051_v53  ;;  %v6924_v51 = vmul.f32 0.2, %v14054_v60  ;;  %v6925_v11 = vmul.f32 0.2, %v14057_v48  ;;  %v14141_v2 = vmax.f32 %v6872_v4, %v6912_v36 }
 0x763   : > { %15480 = vst [vmem:[#allocation99_spill] sm:$0xff] %v14130_v18  ;;  %15481 = vst [vmem:[#allocation104_spill] sm:$0xff] %v14136_v5  ;;  %v6926_v57 = vmul.f32 0.2, %v14060_v3  ;;  %v6927_v17 = vmul.f32 0.2, %v14063_v37  ;;  %v14146_v30 = vmax.f32 %v6873_v41, %v6913_v15  ;;  %v14152_v39 = vmax.f32 %v14024_v42, %v6914_v9 }
 0x764   : > { %15482 = vst [vmem:[#allocation103_spill] sm:$0xff] %v14141_v2  ;;  %v6928_v12 = vmul.f32 0.2, %v14066_v8  ;;  %v6929_v13 = vmul.f32 0.2, %v14069_v27  ;;  %v14158_v26 = vmax.f32 %v14027_v63, %v6915_v14  ;;  %v14164_v2 = vmax.f32 %v14030_v22, %v6916_v10 }
 0x765   : > { %15483 = vst [vmem:[#allocation108_spill] sm:$0xff] %v14146_v30  ;;  %v6930_v54 = vmul.f32 0.2, %v14072_v35  ;;  %v6931_v23 = vmul.f32 0.2, %v14075_v28  ;;  %15484 = vst [vmem:[#allocation107_spill] sm:$0xff] %v14152_v39  ;;  %v14170_v5 = vmax.f32 %v14033_v55, %v6917_v38  ;;  %v14176_v18 = vmax.f32 %v14036_v24, %v6918_v49 }
 0x766   : > { %v6932_v32 = vmul.f32 0.2, %v14078_v25  ;;  %v6933_v4 = vmul.f32 0.2, %v14081_v43  ;;  %v6934_v36 = vmul.f32 0.2, %v14084_v0  ;;  %v14180_v10 = vmax.f32 %v14039_v62, %v6919_v44 }
 0x767   : > { %v6935_v50 = vmul.f32 0.2, %v14087_v34  ;;  %15485 = vst [vmem:[#allocation112_spill] sm:$0xff] %v14158_v26  ;;  %v6936_v41 = vmul.f32 0.2, %v14090_v20  ;;  %15486 = vst [vmem:[#allocation111_spill] sm:$0xff] %v14164_v2  ;;  %v14183_v2 = vmax.f32 %v14042_v19, %v6920_v33  ;;  %v14186_v55 = vmax.f32 %v14045_v56, %v6921_v40 }
 0x768   : > { %v6937_v15 = vmul.f32 0.2, %v14093_v58  ;;  %v6938_v30 = vmul.f32 0.2, %v14096_v61  ;;  %v6939_v42 = vmul.f32 0.2, %v14099_v7  ;;  %v14189_v38 = vmax.f32 %v14048_v52, %v6922_v31 }
 0x769   : > { %v6940_v9 = vmul.f32 0.2, %v14102_v47  ;;  %v6941_v39 = vmul.f32 0.2, %v14105_v29  ;;  %15487 = vst [vmem:[#allocation116_spill] sm:$0xff] %v14170_v5  ;;  %v14192_v5 = vmax.f32 %v14051_v53, %v6923_v16  ;;  %v14195_v24 = vmax.f32 %v14054_v60, %v6924_v51  ;;  %7001 = vst [vmem:[#allocation2 + $0x140] sm:$0xff] %v14186_v55 }
 0x76a   : > { %v6942_v63 = vmul.f32 0.2, %v14108_v45  ;;  %v6943_v14 = vmul.f32 0.2, %v14111_v6  ;;  %v6944_v26 = vmul.f32 0.2, %v14114_v59  ;;  %v14198_v49 = vmax.f32 %v14057_v48, %v6925_v11 }
 0x76b   : > { %v6945_v22 = vmul.f32 0.2, %v14117_v46  ;;  %v14201_v62 = vmax.f32 %v14060_v3, %v6926_v57  ;;  %v14204_v19 = vmax.f32 %v14063_v37, %v6927_v17  ;;  %v14207_v56 = vmax.f32 %v14066_v8, %v6928_v12  ;;  %7002 = vst [vmem:[#allocation2 + $0x158] sm:$0xff] %v14189_v38  ;;  %7003 = vst [vmem:[#allocation2 + $0x170] sm:$0xff] %v14192_v5 }
 0x76c   : > { %v14210_v52 = vmax.f32 %v14069_v27, %v6929_v13  ;;  %v14214_v53 = vmax.f32 %v14072_v35, %v6930_v54  ;;  %v14217_v60 = vmax.f32 %v14075_v28, %v6931_v23  ;;  %v14220_v48 = vmax.f32 %v14078_v25, %v6932_v32  ;;  %7004 = vst [vmem:[#allocation2 + $0x188] sm:$0xff] %v14195_v24  ;;  %v15495_v33 = vld [vmem:[#allocation107_spill] sm:$0xff] }
 0x76d   : > { %v14223_v3 = vmax.f32 %v14081_v43, %v6933_v4  ;;  %7005 = vst [vmem:[#allocation2 + $0x1a0] sm:$0xff] %v14198_v49  ;;  %v14230_v37 = vmax.f32 %v14084_v0, %v6934_v36  ;;  %v14233_v8 = vmax.f32 %v14087_v34, %v6935_v50  ;;  %v14236_v27 = vmax.f32 %v14090_v20, %v6936_v41 }
 0x76e   : > { %v14239_v35 = vmax.f32 %v14093_v58, %v6937_v15  ;;  %7006 = vst [vmem:[#allocation2 + $0x1b8] sm:$0xff] %v14201_v62  ;;  %7007 = vst [vmem:[#allocation2 + $0x1d0] sm:$0xff] %v14204_v19  ;;  %v14246_v28 = vmax.f32 %v14096_v61, %v6938_v30  ;;  %v14249_v50 = vmax.f32 %v14099_v7, %v6939_v42  ;;  %v7069_v61 = vrot.slane %v14125_v1, 7  ;;  %v15491_v7 = vld [vmem:[#allocation99_spill] sm:$0xff]  ;;  %v15496_v31 = vld [vmem:[#allocation112_spill] sm:$0xff] }
 0x76f   : > { %7008 = vst [vmem:[#allocation2 + $0x1e8] sm:$0xff] %v14207_v56  ;;  %7009 = vst [vmem:[#allocation2 + $0x200] sm:$0xff] %v14210_v52  ;;  %v14252_v25 = vmax.f32 %v14102_v47, %v6940_v9  ;;  %v14255_v43 = vmax.f32 %v14105_v29, %v6941_v39  ;;  %v14262_v0 = vmax.f32 %v14108_v45, %v6942_v63  ;;  %v7071_v47 = vrot.slane %v15491_v7, 7  ;;  %v15492_v29 = vld [vmem:[#allocation104_spill] sm:$0xff]  ;;  %v15497_v17 = vld [vmem:[#allocation111_spill] sm:$0xff] }
 0x770   : > { %7010 = vst [vmem:[#allocation2 + $0x218] sm:$0xff] %v14214_v53  ;;  %7011 = vst [vmem:[#allocation2 + $0x230] sm:$0xff] %v14217_v60  ;;  %v14265_v34 = vmax.f32 %v14111_v6, %v6943_v14  ;;  %v14268_v20 = vmax.f32 %v14114_v59, %v6944_v26  ;;  %v14271_v58 = vmax.f32 %v14117_v46, %v6945_v22  ;;  %v7068_v26 = vrot.slane %v14120_v21, 7  ;;  %v15493_v6 = vld [vmem:[#allocation103_spill] sm:$0xff]  ;;  %v15494_v46 = vld [vmem:[#allocation108_spill] sm:$0xff] }
 0x771   : > { %15488 = vst [vmem:[#allocation115_spill] sm:$0xff] %v14255_v43  ;;  %7012 = vst [vmem:[#allocation2 + $0x248] sm:$0xff] %v14220_v48  ;;  %v7073_v45 = vrot.slane %v15492_v29, 7  ;;  %v7075_v59 = vrot.slane %v15493_v6, 7  ;;  %v7077_v44 = vrot.slane %v15494_v46, 7  ;;  %v7079_v40 = vrot.slane %v15495_v33, 7 }
 0x772   : > { %7013 = vst [vmem:[#allocation2 + $0x260] sm:$0xff] %v14223_v3  ;;  %15489 = vst [vmem:[#allocation120_spill] sm:$0xff] %v14262_v0  ;;  %v7081_v16 = vrot.slane %v15496_v31, 7  ;;  %v14294_v51 = vsel %vm1982_vm0, %v7068_v26, %v7069_v61  ;;  %v14297_v11 = vsel %vm1982_vm0, %v7069_v61, %v7071_v47  ;;  %v7083_v12 = vrot.slane %v15497_v17, 7  ;;  %v15501_v39 = vld [vmem:[#allocation116_spill] sm:$0xff] }
 0x773   : > { %15490 = vst [vmem:[#allocation119_spill] sm:$0xff] %v14268_v20  ;;  %7014 = vst [vmem:[#allocation2 + $0x278] sm:$0xff] %v14230_v37  ;;  %v14300_v57 = vsel %vm1982_vm0, %v7071_v47, %v7073_v45  ;;  %v14304_v13 = vsel %vm1982_vm0, %v7073_v45, %v7075_v59  ;;  %v14307_v30 = vsel %vm1982_vm0, %v7075_v59, %v7077_v44  ;;  %v7085_v4 = vrot.slane %v15501_v39, 7 }
 0x774   : > { %7015 = vst [vmem:[#allocation2 + $0x290] sm:$0xff] %v14233_v8  ;;  %7016 = vst [vmem:[#allocation2 + $0x2a8] sm:$0xff] %v14236_v27  ;;  %v14310_v54 = vsel %vm1982_vm0, %v7077_v44, %v7079_v40  ;;  %v14313_v23 = vsel %vm1982_vm0, %v7079_v40, %v7081_v16  ;;  %v14316_v32 = vsel %vm1982_vm0, %v7081_v16, %v7083_v12  ;;  %v7087_v36 = vrot.slane %v14176_v18, 7 }
 0x775   : > { %7017 = vst [vmem:[#allocation2 + $0x2c0] sm:$0xff] %v14239_v35  ;;  %7018 = vst [vmem:[#allocation2 + $0x2d8] sm:$0xff] %v14246_v28  ;;  %v7089_v41 = vrot.slane %v14180_v10, 7  ;;  %v7091_v15 = vrot.slane %v14183_v2, 7  ;;  %v7093_v42 = vrot.slane %v14186_v55, 7  ;;  %v7095_v9 = vrot.slane %v14189_v38, 7 }
 0x776   : > { %7019 = vst [vmem:[#allocation2 + $0x2f0] sm:$0xff] %v14249_v50  ;;  %7020 = vst [vmem:[#allocation2 + $0x308] sm:$0xff] %v14252_v25  ;;  %v7097_v63 = vrot.slane %v14192_v5, 7  ;;  %v14326_v14 = vsel %vm1982_vm0, %v7083_v12, %v7085_v4  ;;  %v14329_v22 = vsel %vm1982_vm0, %v7085_v4, %v7087_v36  ;;  %v7099_v61 = vrot.slane %v14195_v24, 7 }
 0x777   : > { %7021 = vst [vmem:[#allocation2 + $0x320] sm:$0xff] %v14255_v43  ;;  %7022 = vst [vmem:[#allocation2 + $0x338] sm:$0xff] %v14262_v0  ;;  %v14336_v47 = vsel %vm1982_vm0, %v7089_v41, %v7091_v15  ;;  %v14339_v45 = vsel %vm1982_vm0, %v7091_v15, %v7093_v42  ;;  %v14342_v59 = vsel %vm1982_vm0, %v7093_v42, %v7095_v9  ;;  %v7101_v16 = vrot.slane %v14198_v49, 7 }
 0x778   : > { %7023 = vst [vmem:[#allocation2 + $0x350] sm:$0xff] %v14265_v34  ;;  %7024 = vst [vmem:[#allocation2 + $0x368] sm:$0xff] %v14268_v20  ;;  %v14345_v44 = vsel %vm1982_vm0, %v7095_v9, %v7097_v63  ;;  %v14348_v40 = vsel %vm1982_vm0, %v7097_v63, %v7099_v61  ;;  %v7103_v12 = vrot.slane %v14201_v62, 7  ;;  %v7105_v4 = vrot.slane %v14204_v19, 7 }
 0x779   : > { %7025 = vst [vmem:[#allocation2 + $0x380] sm:$0xff] %v14271_v58  ;;  %7187 = vst [vmem:[#allocation2] sm:$0xfe] %v7068_v26  ;;  %v14332_v26 = vsel %vm1982_vm0, %v7087_v36, %v7089_v41  ;;  %v7107_v36 = vrot.slane %v14207_v56, 7  ;;  %v7109_v41 = vrot.slane %v14210_v52, 7  ;;  %v7111_v15 = vrot.slane %v14214_v53, 7 }
 0x77a   : > { %15498 = vst [vmem:[#allocation124_spill] sm:$0xff] %v14310_v54  ;;  %15499 = vst [vmem:[#allocation123_spill] sm:$0xff] %v14313_v23  ;;  %v7113_v42 = vrot.slane %v14217_v60, 7  ;;  %v14358_v9 = vsel %vm1982_vm0, %v7099_v61, %v7101_v16  ;;  %v14361_v63 = vsel %vm1982_vm0, %v7101_v16, %v7103_v12  ;;  %v7119_v54 = vrot.slane %v14230_v37, 7 }
 0x77b   : > { %15500 = vst [vmem:[#allocation128_spill] sm:$0xff] %v14316_v32  ;;  %15502 = vst [vmem:[#allocation127_spill] sm:$0xff] %v14326_v14  ;;  %v14368_v14 = vsel %vm1982_vm0, %v7105_v4, %v7107_v36  ;;  %v14371_v32 = vsel %vm1982_vm0, %v7107_v36, %v7109_v41  ;;  %v14374_v23 = vsel %vm1982_vm0, %v7109_v41, %v7111_v15  ;;  %v7125_v36 = vrot.slane %v14239_v35, 7 }
 0x77c   : > { %15503 = vst [vmem:[#allocation132_spill] sm:$0xff] %v14329_v22  ;;  %15504 = vst [vmem:[#allocation131_spill] sm:$0xff] %v14332_v26  ;;  %v14364_v26 = vsel %vm1982_vm0, %v7103_v12, %v7105_v4  ;;  %v7115_v22 = vrot.slane %v14220_v48, 7  ;;  %v14377_v61 = vsel %vm1982_vm0, %v7111_v15, %v7113_v42  ;;  %v7117_v12 = vrot.slane %v14223_v3, 7 }
 0x77d   : > { %15505 = vst [vmem:[#allocation136_spill] sm:$0xff] %v14348_v40  ;;  %15506 = vst [vmem:[#allocation135_spill] sm:$0xff] %v14358_v9  ;;  %v7123_v4 = vrot.slane %v14236_v27, 7  ;;  %v7129_v41 = vrot.slane %v14249_v50, 7  ;;  %v14975_v40 = vrot.slane %v14268_v20, 1 }
 0x77e   : > { %15507 = vst [vmem:[#allocation140_spill] sm:$0xff] %v14361_v63  ;;  %15508 = vst [vmem:[#allocation139_spill] sm:$0xff] %v14364_v26  ;;  %v14380_v16 = vsel %vm1982_vm0, %v7113_v42, %v7115_v22  ;;  %v7121_v26 = vrot.slane %v14233_v8, 7  ;;  %v14391_v15 = vsel %vm1982_vm0, %v7115_v22, %v7117_v12  ;;  %v14394_v42 = vsel %vm1982_vm0, %v7117_v12, %v7119_v54 }
 0x77f   : > { %15509 = vst [vmem:[#allocation50_spill] sm:$0xff] %v14368_v14  ;;  %15510 = vst [vmem:[#allocation49_spill] sm:$0xff] %v14371_v32  ;;  %v7127_v32 = vrot.slane %v14246_v28, 7  ;;  %v14404_v63 = vsel %vm1982_vm0, %v7123_v4, %v7125_v36  ;;  %v7135_v12 = vrot.slane %v14262_v0, 7  ;;  %v14973_v0 = vrot.slane %v14236_v27, 1 }
 0x780   : > { %15511 = vst [vmem:[#allocation58_spill] sm:$0xff] %v14374_v23  ;;  %15512 = vst [vmem:[#allocation81_spill] sm:$0xff] %v14377_v61  ;;  %v14397_v61 = vsel %vm1982_vm0, %v7119_v54, %v7121_v26  ;;  %v7131_v23 = vrot.slane %v14252_v25, 7  ;;  %v14401_v14 = vsel %vm1982_vm0, %v7121_v26, %v7123_v4  ;;  %v7133_v26 = vrot.slane %v14255_v43, 7 }
 0x781   : > { %15513 = vst [vmem:[#allocation86_spill] sm:$0xff] %v14380_v16  ;;  %7211 = vst [vmem:[#allocation2 + $0x240] sm:$0xff] %v14380_v16  ;;  %v14407_v9 = vsel %vm1982_vm0, %v7125_v36, %v7127_v32  ;;  %v14410_v22 = vsel %vm1982_vm0, %v7127_v32, %v7129_v41  ;;  %v7137_v4 = vrot.slane %v14265_v34, 7  ;;  %v7139_v32 = vrot.slane %v14268_v20, 7 }
 0x782   : > { %15514 = vst [vmem:[#allocation85_spill] sm:$0xff] %v14391_v15  ;;  %15515 = vst [vmem:[#allocation90_spill] sm:$0xff] %v14394_v42  ;;  %v14416_v54 = vsel %vm1982_vm0, %v7129_v41, %v7131_v23  ;;  %v7141_v36 = vrot.slane %v14271_v58, 7  ;;  %v14428_v41 = vsel %vm1982_vm0, %v7131_v23, %v7133_v26  ;;  %v15534_v43 = vrot.slane %v14217_v60, 1 }
 0x783   : > { %15516 = vst [vmem:[#allocation89_spill] sm:$0xff] %v14397_v61  ;;  %15517 = vst [vmem:[#allocation94_spill] sm:$0xff] %v14401_v14  ;;  %v7326_v20 = vrot.slane %v14176_v18, 1 }
 0x784   : > { %15518 = vst [vmem:[#allocation93_spill] sm:$0xff] %v14404_v63  ;;  %15519 = vst [vmem:[#allocation98_spill] sm:$0xff] %v14407_v9  ;;  %v7314_v9 = vrot.slane %v15493_v6, 1  ;;  %v14441_v58 = vsel %vm1982_vm0, %v7139_v32, %v7141_v36 }
 0x785   : > { %15520 = vst [vmem:[#allocation122_spill] sm:$0xff] %v14410_v22  ;;  %7212 = vst [vmem:[#allocation2 + $0x258] sm:$0xff] %v14391_v15  ;;  %v7312_v22 = vrot.slane %v15492_v29, 1 }
 0x786   : > { %7213 = vst [vmem:[#allocation2 + $0x270] sm:$0xff] %v14394_v42  ;;  %7214 = vst [vmem:[#allocation2 + $0x288] sm:$0xff] %v14397_v61  ;;  %v14434_v61 = vsel %vm1982_vm0, %v7135_v12, %v7137_v4  ;;  %v15527_v42 = vld [vmem:[#allocation82_spill] sm:$0xff] }
 0x787   : > { %15521 = vst [vmem:[#allocation97_spill] sm:$0xff] %v14416_v54  ;;  %7215 = vst [vmem:[#allocation2 + $0x2a0] sm:$0xff] %v14401_v14  ;;  %v14431_v54 = vsel %vm1982_vm0, %v7133_v26, %v7135_v12  ;;  %v7320_v14 = vrot.slane %v15496_v31, 1  ;;  %v15528_v15 = vrot.slane %v15527_v42, 7  ;;  %v7315_v23 = vsel %vm3121_vm1, %v7312_v22, %v7314_v9 }
 0x788   : > { %7216 = vst [vmem:[#allocation2 + $0x2b8] sm:$0xff] %v14404_v63  ;;  %15522 = vst [vmem:[#allocation121_spill] sm:$0xff] %v14428_v41  ;;  %v14438_v63 = vsel %vm1982_vm0, %v7137_v4, %v7139_v32  ;;  %v7322_v26 = vrot.slane %v15497_v17, 1  ;;  %v7328_v12 = vrot.slane %v14180_v10, 1  ;;  %v7330_v4 = vrot.slane %v14183_v2, 1  ;;  %v7464_v41 = vld [vmem:[#allocation2] sm:$0xff] }
 0x789   : > { %15523 = vst [vmem:[#allocation126_spill] sm:$0xff] %v14431_v54  ;;  %15524 = vst [vmem:[#allocation125_spill] sm:$0xff] %v14434_v61  ;;  %v14446_v16 = vsel %vm1982_vm0, %v7141_v36, %v15528_v15  ;;  %v7336_v32 = vrot.slane %v14192_v5, 1  ;;  %v14972_v42 = vrot.slane %v14204_v19, 1  ;;  %v14971_v15 = vrot.slane %v14207_v56, 1 }
 0x78a   : > { %15525 = vst [vmem:[#allocation130_spill] sm:$0xff] %v14438_v63  ;;  %15526 = vst [vmem:[#allocation129_spill] sm:$0xff] %v14441_v58  ;;  %v14969_v63 = vrot.slane %v14195_v24, 1  ;;  %v7227_v61 = vld [vmem:[#allocation2 + $0x8] sm:$0xfe]  ;;  %v15533_v54 = vrot.slane %v14220_v48, 1 }
 0x78b   : > { %15529 = vst [vmem:[#allocation134_spill] sm:$0xff] %v14446_v16  ;;  %7224 = vst [vmem:[#allocation2 + $0x378] sm:$0xff] %v14441_v58  ;;  %v14460_v58 = vsel %vm3121_vm1, %v7320_v14, %v7322_v26  ;;  %v14477_v36 = vsel %vm3121_vm1, %v14972_v42, %v14971_v15  ;;  %v15536_v15 = vrot.slane %v14233_v8, 1 }
 0x78c   : > { %7225 = vst [vmem:[#allocation2 + $0x390] sm:$0xff] %v14446_v16  ;;  %v14463_v16 = vsel %vm3121_vm1, %v7328_v12, %v7330_v4  ;;  %v14470_v17 = vsel %vm3121_vm1, %v7336_v32, %v14969_v63  ;;  %15532 = vst [vmem:[#allocation137_spill] sm:$0xff] %v14477_v36  ;;  %v14486_v31 = vsel %vm3121_vm1, %v15534_v43, %v15533_v54  ;;  %v14974_v63 = vrot.slane %v14252_v25, 1 }
 0x78d   : > { %15530 = vst [vmem:[#allocation133_spill] sm:$0xff] %v14463_v16  ;;  %15531 = vst [vmem:[#allocation138_spill] sm:$0xff] %v14470_v17  ;;  %v14976_v17 = vrot.slane %v14265_v34, 1  ;;  %v14496_v42 = vsel %vm3121_vm1, %v15536_v15, %v14973_v0  ;;  %v7585_v16 = vpack.c.bf16 %v14125_v1, %v14120_v21  ;;  %v7584_v36 = vpack.c.bf16 %v14294_v51, %v7464_v41 }
 0x78e   : > { %15535 = vst [vmem:[#allocation39_spill] sm:$0xff] %v14486_v31  ;;  %15537 = vst [vmem:[#allocation45_spill] sm:$0xff] %v14496_v42  ;;  %v15538_v43 = vrot.slane %v14249_v50, 1  ;;  %v7307_v15 = vrot.slane %v7227_v61, 1  ;;  %v7588_v21 = vpack.c.bf16 %v15492_v29, %v15491_v7  ;;  %v7308_v51 = vrot.slane %v14125_v1, 1 }
 0x78f   : > { %v14513_v31 = vsel %vm3121_vm1, %v14976_v17, %v14975_v40  ;;  %7869 = vmatprep.mubr.bf16.mxu0 %v7585_v16  ;;  %v7310_v41 = vrot.slane %v15491_v7, 1  ;;  %v7316_v0 = vrot.slane %v15494_v46, 1 }
 0x790   : > { %v14506_v54 = vsel %vm3121_vm1, %v15538_v43, %v14974_v63  ;;  %7870 = vmatmul.mubr.bf16.vlgmr.msra.gmra.mrb[180].mxu0 %v7584_v36  ;;  %v7318_v43 = vrot.slane %v15495_v33, 1  ;;  %v7324_v63 = vrot.slane %v15501_v39, 1  ;;  %v7309_v40 = vsel %vm3121_vm1, %v7307_v15, %v7308_v51 }
 0x791   : > { %7877 = vmatprep.mubr.bf16.mxu0 %v7588_v21  ;;  %v7311_v61 = vsel %vm3121_vm1, %v7308_v51, %v7310_v41  ;;  %v7313_v16 = vsel %vm3121_vm1, %v7310_v41, %v7312_v22  ;;  %v7317_v29 = vsel %vm3121_vm1, %v7314_v9, %v7316_v0  ;;  %v7332_v15 = vrot.slane %v14186_v55, 1 }
 0x792   : > { %v7586_v17 = vpack.c.bf16 %v7311_v61, %v7309_v40  ;;  %v7319_v1 = vsel %vm3121_vm1, %v7316_v0, %v7318_v43  ;;  %v7321_v7 = vsel %vm3121_vm1, %v7318_v43, %v7320_v14  ;;  %v7589_v42 = vpack.c.bf16 %v7315_v23, %v7313_v16  ;;  %v15576_v43 = vld [vmem:[#allocation126_spill] sm:$0xff] }
 0x793   : > { %v7325_v36 = vsel %vm3121_vm1, %v7322_v26, %v7324_v63  ;;  %v7592_v21 = vpack.c.bf16 %v7319_v1, %v7317_v29  ;;  %v7334_v51 = vrot.slane %v14189_v38, 1  ;;  %v7327_v22 = vsel %vm3121_vm1, %v7324_v63, %v7326_v20  ;;  %v15581_v1 = vld [vmem:[#allocation128_spill] sm:$0xff] }
 0x794   : > { %9117 = vmatprep.mubr.bf16.mxu1 %v7586_v17  ;;  %v14534_v40 = vsel %vm3121_vm1, %v7326_v20, %v7328_v12  ;;  %v7587_v14 = vpack.c.bf16 %v14300_v57, %v14297_v11  ;;  %v14541_v17 = vsel %vm3121_vm1, %v7330_v4, %v7332_v15  ;;  %v7591_v23 = vpack.c.bf16 %v15494_v46, %v15493_v6  ;;  %v15577_v11 = vld [vmem:[#allocation125_spill] sm:$0xff]  ;;  %v15580_v0 = vld [vmem:[#allocation138_spill] sm:$0xff] }
 0x795   : > { %9118 = vmatmul.mubr.bf16.vlgmr.msra.gmra.mrb[44].mxu1 %v7589_v42  ;;  %v14544_v9 = vsel %vm3121_vm1, %v7332_v15, %v7334_v51  ;;  %v14549_v63 = vsel %vm3121_vm1, %v7334_v51, %v7336_v32  ;;  %v7340_v20 = vrot.slane %v14198_v49, 1  ;;  %v7342_v26 = vrot.slane %v14201_v62, 1 }
 0x796   : > { %9121 = vmatprep.mubr.bf16.mxu1 %v7592_v21  ;;  %v7348_v57 = vrot.slane %v14210_v52, 1  ;;  %v15539_v12 = vrot.slane %v14195_v24, 1  ;;  %v15540_v46 = vrot.slane %v14204_v19, 1  ;;  %v7350_v62 = vrot.slane %v14214_v53, 1  ;;  %v15582_v53 = vld [vmem:[#allocation127_spill] sm:$0xff] }
 0x797   : > { %v14562_v6 = vsel %vm3121_vm1, %v7340_v20, %v7342_v26  ;;  %v7595_v42 = vpack.c.bf16 %v14460_v58, %v7321_v7  ;;  %v15541_v52 = vrot.slane %v14207_v56, 1  ;;  %v15542_v19 = vrot.slane %v14217_v60, 1  ;;  %v15571_v60 = vld [vmem:[#allocation93_spill] sm:$0xff] }
 0x798   : > { %7878 = vmatmul.mubr.bf16.gmra.mrb[184].mxu0 %v7587_v14  ;;  %v14559_v4 = vsel %vm3121_vm1, %v15539_v12, %v7340_v20  ;;  %v14567_v32 = vsel %vm3121_vm1, %v7342_v26, %v15540_v46  ;;  %v14579_v61 = vsel %vm3121_vm1, %v7348_v57, %v7350_v62  ;;  %v7356_v58 = vrot.slane %v14223_v3, 1  ;;  %v15546_v14 = vld [vmem:[#allocation135_spill] sm:$0xff]  ;;  %v14611_v20 = vld [vmem:[#allocation2 + $0x380] sm:$0xff] }
 0x799   : > { %7885 = vmatprep.mubr.bf16.mxu0 %v7591_v23  ;;  %v14574_v41 = vsel %vm3121_vm1, %v15541_v52, %v7348_v57  ;;  %v14584_v16 = vsel %vm3121_vm1, %v7350_v62, %v15542_v19  ;;  %v7598_v56 = vpack.c.bf16 %v7327_v22, %v7325_v36  ;;  %v7358_v29 = vrot.slane %v14230_v37, 1  ;;  %v15545_v22 = vld [vmem:[#allocation136_spill] sm:$0xff]  ;;  %v14619_v57 = vld [vmem:[#allocation2 + $0x398] sm:$0xff]  ;;  %v7266_v19 = vld [vmem:[#allocation2 + $0x3b0] sm:$0x1] }
 0x79a   : > { %v15543_v7 = vrot.slane %v14220_v48, 1  ;;  %v7364_v15 = vrot.slane %v14239_v35, 1  ;;  %v7366_v51 = vrot.slane %v14246_v28, 1  ;;  %v7590_v3 = vpack.c.bf16 %v14307_v30, %v14304_v13  ;;  %v15547_v35 = vld [vmem:[#allocation112_spill] sm:$0xff]  ;;  %v15550_v46 = vld [vmem:[#allocation115_spill] sm:$0xff] }
 0x79b   : > { %v7359_v37 = vsel %vm3121_vm1, %v7356_v58, %v7358_v29  ;;  %v15544_v36 = vrot.slane %v14233_v8, 1  ;;  %v7594_v26 = vpack.c.bf16 %v15547_v35, %v15495_v33  ;;  %v15548_v28 = vrot.slane %v14236_v27, 1  ;;  %v15552_v27 = vld [vmem:[#allocation133_spill] sm:$0xff] }
 0x79c   : > { %v14595_v21 = vsel %vm3121_vm1, %v15543_v7, %v7356_v58  ;;  %v7367_v30 = vsel %vm3121_vm1, %v7364_v15, %v7366_v51  ;;  %v15549_v8 = vrot.slane %v14249_v50, 1  ;;  %v7372_v62 = vrot.slane %v15550_v46, 1  ;;  %v15567_v7 = vld [vmem:[#allocation90_spill] sm:$0xff] }
 0x79d   : > { %9122 = vmatmul.mubr.bf16.gmra.mrb[48].mxu1 %v7595_v42  ;;  %v14607_v48 = vsel %vm3121_vm1, %v7358_v29, %v15544_v36  ;;  %v7365_v13 = vsel %vm3121_vm1, %v15548_v28, %v7364_v15  ;;  %v15551_v42 = vld [vmem:[#allocation120_spill] sm:$0xff]  ;;  %v7601_v33 = vpack.c.bf16 %v15552_v27, %v14534_v40  ;;  %v15554_v29 = vld [vmem:[#allocation139_spill] sm:$0xff]  ;;  %v7380_v50 = vrot.slane %v14611_v20, 1  ;;  %v15560_v27 = vld [vmem:[#allocation49_spill] sm:$0xff] }
 0x79e   : > { %9125 = vmatprep.mubr.bf16.mxu1 %v7598_v56  ;;  %v14624_v12 = vsel %vm3121_vm1, %v7366_v51, %v15549_v8  ;;  %v7374_v52 = vrot.slane %v15551_v42, 1  ;;  %v15553_v56 = vld [vmem:[#allocation140_spill] sm:$0xff]  ;;  %v15555_v15 = vrot.slane %v14252_v25, 1  ;;  %v15556_v36 = vrot.slane %v14265_v34, 1  ;;  %v15557_v28 = vld [vmem:[#allocation119_spill] sm:$0xff]  ;;  %v15570_v34 = vld [vmem:[#allocation94_spill] sm:$0xff] }
 0x79f   : > { %v7631_v58 = vpack.c.bf16 %v14506_v54, %v14624_v12  ;;  %v7382_v40 = vrot.slane %v14619_v57, 1  ;;  %v15558_v8 = vrot.slane %v15557_v28, 1  ;;  %v7384_v46 = vrot.slane %v7266_v19, 1  ;;  %v15565_v28 = vld [vmem:[#allocation124_spill] sm:$0xff] }
 0x7a0   : > { %7886 = vmatmul.mubr.bf16.gmra.mrb[188].mxu0 %v7590_v3  ;;  %v7373_v51 = vsel %vm3121_vm1, %v15555_v15, %v7372_v62  ;;  %v7375_v3 = vsel %vm3121_vm1, %v7372_v62, %v7374_v52  ;;  %v7377_v35 = vsel %vm3121_vm1, %v7374_v52, %v15556_v36  ;;  %v7604_v25 = vpack.c.bf16 %v14544_v9, %v14541_v17  ;;  %v15559_v62 = vld [vmem:[#allocation50_spill] sm:$0xff]  ;;  %v15562_v52 = vld [vmem:[#allocation81_spill] sm:$0xff] }
 0x7a1   : > { %7893 = vmatprep.mubr.bf16.mxu0 %v7594_v26  ;;  %v7634_v26 = vpack.c.bf16 %v7375_v3, %v7373_v51  ;;  %v7637_v54 = vpack.c.bf16 %v14513_v31, %v7377_v35  ;;  %v7381_v12 = vsel %vm3121_vm1, %v15558_v8, %v7380_v50  ;;  %v7383_v42 = vsel %vm3121_vm1, %v7380_v50, %v7382_v40  ;;  %v15561_v15 = vld [vmem:[#allocation58_spill] sm:$0xff]  ;;  %v15564_v3 = vld [vmem:[#allocation85_spill] sm:$0xff]  ;;  %v15566_v8 = vld [vmem:[#allocation123_spill] sm:$0xff] }
 0x7a2   : > { %v7385_v51 = vsel %vm3121_vm1, %v7382_v40, %v7384_v46  ;;  %v15563_v31 = vld [vmem:[#allocation86_spill] sm:$0xff]  ;;  %v7593_v19 = vpack.c.bf16 %v15566_v8, %v15565_v28  ;;  %v15568_v17 = vld [vmem:[#allocation89_spill] sm:$0xff]  ;;  %v15569_v50 = vld [vmem:[#allocation111_spill] sm:$0xff]  ;;  %v15583_v35 = vpack.c.bf16 %v14180_v10, %v14176_v18  ;;  %v7616_v9 = vpack.c.bf16 %v14579_v61, %v14574_v41 }
 0x7a3   : > { %v7597_v23 = vpack.c.bf16 %v15501_v39, %v15569_v50  ;;  %v15572_v36 = vld [vmem:[#allocation98_spill] sm:$0xff]  ;;  %v15574_v40 = vld [vmem:[#allocation97_spill] sm:$0xff]  ;;  %v7607_v39 = vpack.c.bf16 %v15580_v0, %v14549_v63  ;;  %v7610_v50 = vpack.c.bf16 %v14562_v6, %v14559_v4  ;;  %v15585_v0 = vld [vmem:[#allocation132_spill] sm:$0xff]  ;;  %v15587_v6 = vpack.c.bf16 %v14186_v55, %v14183_v2 }
 0x7a4   : > { %v15575_v46 = vld [vmem:[#allocation121_spill] sm:$0xff]  ;;  %v15586_v63 = vld [vmem:[#allocation131_spill] sm:$0xff]  ;;  %v7622_v10 = vpack.c.bf16 %v7359_v37, %v14595_v21  ;;  %v15590_v41 = vpack.c.bf16 %v14192_v5, %v14189_v38  ;;  %v7628_v2 = vpack.c.bf16 %v7367_v30, %v7365_v13  ;;  %v15592_v55 = vpack.c.bf16 %v14345_v44, %v14342_v59  ;;  %v7528_v37 = vld [vmem:[#allocation2 + $0x200] sm:$0xff] }
 0x7a5   : > { %9126 = vmatmul.mubr.bf16.gmra.mrb[52].mxu1 %v7601_v33  ;;  %v15573_v33 = vld [vmem:[#allocation122_spill] sm:$0xff]  ;;  %v15579_v8 = vld [vmem:[#allocation129_spill] sm:$0xff]  ;;  %v7599_v4 = vpack.c.bf16 %v15586_v63, %v15585_v0  ;;  %v15594_v38 = vpack.c.bf16 %v15546_v14, %v15545_v22  ;;  %v7531_v13 = vld [vmem:[#allocation2 + $0x218] sm:$0xff]  ;;  %v15596_v22 = vpack.c.bf16 %v15560_v27, %v15559_v62  ;;  %v15602_v0 = vpack.c.bf16 %v15575_v46, %v15574_v40 }
 0x7a6   : > { %9129 = vmatprep.mubr.bf16.mxu1 %v7604_v25  ;;  %v15578_v25 = vld [vmem:[#allocation130_spill] sm:$0xff]  ;;  %v15591_v61 = vld [vmem:[#allocation45_spill] sm:$0xff]  ;;  %v7552_v62 = vld [vmem:[#allocation2 + $0x2c0] sm:$0xff] }
 0x7a7   : > { %v7525_v21 = vld [vmem:[#allocation2 + $0x1e8] sm:$0xff]  ;;  %v7534_v30 = vld [vmem:[#allocation2 + $0x230] sm:$0xff] }
 0x7a8   : > { %7894 = vmatmul.mubr.bf16.gmra.mrb[192].mxu0 %v7593_v19  ;;  %v7596_v19 = vpack.c.bf16 %v15582_v53, %v15581_v1  ;;  %v15588_v53 = vld [vmem:[#allocation39_spill] sm:$0xff]  ;;  %v7625_v1 = vpack.c.bf16 %v15591_v61, %v14607_v48  ;;  %v7640_v48 = vpack.c.bf16 %v7383_v42, %v7381_v12  ;;  %v7615_v59 = vpack.c.bf16 %v7528_v37, %v7525_v21  ;;  %v7537_v14 = vld [vmem:[#allocation2 + $0x248] sm:$0xff]  ;;  %v15605_v40 = vld [vmem:[#allocation134_spill] sm:$0xff] }
 0x7a9   : > { %7901 = vmatprep.mubr.bf16.mxu0 %v7597_v23  ;;  %v15584_v23 = vld [vmem:[#allocation137_spill] sm:$0xff]  ;;  %v7619_v18 = vpack.c.bf16 %v15588_v53, %v14584_v16  ;;  %v15593_v16 = vpack.c.bf16 %v14198_v49, %v14195_v24  ;;  %v15595_v24 = vpack.c.bf16 %v15554_v29, %v15553_v56  ;;  %v7583_v49 = vld [vmem:[#allocation2 + $0x3b8] sm:$0x1]  ;;  %v15597_v12 = vpack.c.bf16 %v15562_v52, %v15561_v15  ;;  %v7546_v29 = vld [vmem:[#allocation2 + $0x290] sm:$0xff] }
 0x7aa   : > { %v7613_v28 = vpack.c.bf16 %v15584_v23, %v14567_v32  ;;  %v15589_v32 = vpack.c.bf16 %v14339_v45, %v14336_v47  ;;  %v7519_v47 = vld [vmem:[#allocation2 + $0x1b8] sm:$0xff]  ;;  %v7522_v45 = vld [vmem:[#allocation2 + $0x1d0] sm:$0xff]  ;;  %v7643_v44 = vpack.c.bf16 %v7583_v49, %v7385_v51  ;;  %v15598_v51 = vpack.c.bf16 %v15564_v3, %v15563_v31  ;;  %v7564_v31 = vld [vmem:[#allocation2 + $0x320] sm:$0xff] }
 0x7ab   : > { %v7612_v5 = vpack.c.bf16 %v7522_v45, %v7519_v47  ;;  %v7543_v56 = vld [vmem:[#allocation2 + $0x278] sm:$0xff]  ;;  %v7558_v15 = vld [vmem:[#allocation2 + $0x2f0] sm:$0xff]  ;;  %v7573_v63 = vld [vmem:[#allocation2 + $0x368] sm:$0xff] }
 0x7ac   : > { %v7624_v42 = vpack.c.bf16 %v7546_v29, %v7543_v56  ;;  %v7567_v23 = vld [vmem:[#allocation2 + $0x338] sm:$0xff] }
 0x7ad   : > { %9130 = vmatmul.mubr.bf16.gmra.mrb[56].mxu1 %v7607_v39  ;;  %v15600_v39 = vpack.c.bf16 %v15571_v60, %v15570_v34  ;;  %v7639_v60 = vpack.c.bf16 %v14611_v20, %v7573_v63  ;;  %v15603_v34 = vpack.c.bf16 %v15577_v11, %v15576_v43 }
 0x7ae   : > { %9133 = vmatprep.mubr.bf16.mxu1 %v7610_v50  ;;  %v7561_v50 = vld [vmem:[#allocation2 + $0x308] sm:$0xff] }
 0x7af   : > { %v7633_v3 = vpack.c.bf16 %v7564_v31, %v7561_v50 }
 0x7b0   : > { %7902 = vmatmul.mubr.bf16.gmra.mrb[196].mxu0 %v7596_v19  ;;  %v15601_v19 = vpack.c.bf16 %v15573_v33, %v15572_v36  ;;  %v15604_v33 = vpack.c.bf16 %v15579_v8, %v15578_v25 }
 0x7b1   : > { %7909 = vmatprep.mubr.bf16.mxu0 %v15583_v35  ;;  %v7549_v35 = vld [vmem:[#allocation2 + $0x2a8] sm:$0xff] }
 0x7b2   : > { %v7627_v27 = vpack.c.bf16 %v7552_v62, %v7549_v35 }
 0x7b5   : > { %9134 = vmatmul.mubr.bf16.gmra.mrb[60].mxu1 %v7613_v28  ;;  %v7555_v28 = vld [vmem:[#allocation2 + $0x2d8] sm:$0xff] }
 0x7b6   : > { %9137 = vmatprep.mubr.bf16.mxu1 %v7616_v9  ;;  %v15599_v9 = vpack.c.bf16 %v15568_v17, %v15567_v7  ;;  %v7630_v52 = vpack.c.bf16 %v7558_v15, %v7555_v28  ;;  %v7570_v7 = vld [vmem:[#allocation2 + $0x350] sm:$0xff] }
 0x7b7   : > { %v7636_v17 = vpack.c.bf16 %v7570_v7, %v7567_v23 }
 0x7b8   : > { %7910 = vmatmul.mubr.bf16.gmra.mrb[200].mxu0 %v7599_v4  ;;  %v7582_v4 = vld [vmem:[#allocation2 + $0x3b0] sm:$0x1] }
 0x7b9   : > { %7917 = vmatprep.mubr.bf16.mxu0 %v15587_v6  ;;  %v7642_v36 = vpack.c.bf16 %v7582_v4, %v14619_v57  ;;  %v7581_v6 = vld [vmem:[#allocation2 + $0x3a8] sm:$0x1] }
 0x7ba   : > { %v7641_v46 = vpack.c.bf16 %v7581_v6, %v15605_v40 }
 0x7bd   : > { %9138 = vmatmul.mubr.bf16.gmra.mrb[64].mxu1 %v7619_v18 }
 0x7be   : > { %9141 = vmatprep.mubr.bf16.mxu1 %v7622_v10 }
 0x7c0   : > { %7918 = vmatmul.mubr.bf16.gmra.mrb[204].mxu0 %v15589_v32 }
 0x7c1   : > { %7925 = vmatprep.mubr.bf16.mxu0 %v15590_v41 }
 0x7c5   : > { %9142 = vmatmul.mubr.bf16.gmra.mrb[68].mxu1 %v7625_v1 }
 0x7c6   : > { %9145 = vmatprep.mubr.bf16.mxu1 %v7628_v2 }
 0x7c8   : > { %7926 = vmatmul.mubr.bf16.gmra.mrb[208].mxu0 %v15592_v55 }
 0x7c9   : > { %7933 = vmatprep.mubr.bf16.mxu0 %v15593_v16 }
 0x7cd   : > { %9146 = vmatmul.mubr.bf16.gmra.mrb[72].mxu1 %v7631_v58  ;;  %v7618_v58 = vpack.c.bf16 %v7534_v30, %v7531_v13 }
 0x7ce   : > { %9149 = vmatprep.mubr.bf16.mxu1 %v7634_v26  ;;  %v7540_v26 = vld [vmem:[#allocation2 + $0x260] sm:$0xff] }
 0x7d0   : > { %7934 = vmatmul.mubr.bf16.gmra.mrb[212].mxu0 %v15594_v38 }
 0x7d1   : > { %7941 = vmatprep.mubr.bf16.mxu0 %v7612_v5 }
 0x7d5   : > { %9150 = vmatmul.mubr.bf16.gmra.mrb[76].mxu1 %v7637_v54  ;;  %v7621_v54 = vpack.c.bf16 %v7540_v26, %v7537_v14 }
 0x7d6   : > { %9153 = vmatprep.mubr.bf16.mxu1 %v7640_v48 }
 0x7d8   : > { %7942 = vmatmul.mubr.bf16.gmra.mrb[216].mxu0 %v15595_v24 }
 0x7d9   : > { %7949 = vmatprep.mubr.bf16.mxu0 %v7615_v59 }
 0x7dd   : > { %9154 = vmatmul.mubr.bf16.gmra.mrb[80].mxu1 %v7643_v44 }
 0x7e0   : > { %7950 = vmatmul.mubr.bf16.gmra.mrb[220].mxu0 %v15596_v22 }
 0x7e1   : > { %7957 = vmatprep.mubr.bf16.mxu0 %v7618_v58 }
 0x7e8   : > { %7958 = vmatmul.mubr.bf16.gmra.mrb[224].mxu0 %v15597_v12 }
 0x7e9   : > { %7965 = vmatprep.mubr.bf16.mxu0 %v7621_v54 }
 0x7f0   : > { %7966 = vmatmul.mubr.bf16.gmra.mrb[228].mxu0 %v15598_v51 }
 0x7f1   : > { %7973 = vmatprep.mubr.bf16.mxu0 %v7624_v42 }
 0x7f8   : > { %7974 = vmatmul.mubr.bf16.gmra.mrb[232].mxu0 %v15599_v9 }
 0x7f9   : > { %7981 = vmatprep.mubr.bf16.mxu0 %v7627_v27 }
 0x800   : > { %7982 = vmatmul.mubr.bf16.gmra.mrb[236].mxu0 %v15600_v39 }
 0x801   : > { %7989 = vmatprep.mubr.bf16.mxu0 %v7630_v52 }
 0x808   : > { %7990 = vmatmul.mubr.bf16.gmra.mrb[240].mxu0 %v15601_v19 }
 0x809   : > { %7997 = vmatprep.mubr.bf16.mxu0 %v7633_v3 }
 0x810   : > { %7998 = vmatmul.mubr.bf16.gmra.mrb[244].mxu0 %v15602_v0 }
 0x811   : > { %8005 = vmatprep.mubr.bf16.mxu0 %v7636_v17 }
 0x818   : > { %8006 = vmatmul.mubr.bf16.gmra.mrb[248].mxu0 %v15603_v34 }
 0x819   : > { %8013 = vmatprep.mubr.bf16.mxu0 %v7639_v60 }
 0x820   : > { %8014 = vmatmul.mubr.bf16.gmra.mrb[252].mxu0 %v15604_v33 }
 0x821   : > { %8021 = vmatprep.mubr.bf16.mxu0 %v7642_v36 }
 0x828   : > { %8022 = vmatmul.mubr.bf16.gmra.mrb[0].mxu0 %v7641_v46 }
 0x863   : > { %v7871_v53 = vpop.f32.mrb[180].mxu0 }
 0x864   : > { %v7873_v18 = vpop.f32.mrb[181].mxu0 }
 0x865   : > { %v7874_v20 = vpop.f32.mrb[182].mxu0 }
 0x866   : > { %v7876_v10 = vpop.f32.mrb[183].mxu0 }
 0x868   : > { %v9119_v32 = vpop.f32.mrb[44].mxu1 }
 0x869   : > { %v8064_v11 = vpop.f32.mrb[45].mxu1 }
 0x86a   : > { %v8065_v43 = vadd.f32 %v8064_v11, %v7871_v53  ;;  %v9120_v41 = vpop.f32.mrb[46].mxu1 }
 0x86b   : > { %v7879_v61 = vpop.f32.mrb[184].mxu0  ;;  %v8067_v1 = vpop.f32.mrb[47].mxu1 }
 0x86c   : > { %v7881_v57 = vpop.f32.mrb[185].mxu0  ;;  %v8073_v2 = vadd.f32 %v9119_v32, %v7879_v61  ;;  %8223 = vst [vmem:[#allocation3] sm:$0xff] %v8065_v43  ;;  %v8068_v25 = vadd.f32 %v8067_v1, %v7874_v20  ;;  %8304 = vxpose.xlu0.b32.start [1/16] %v8065_v43, 128 }
 0x86d   : > { %v7882_v8 = vpop.f32.mrb[186].mxu0 }
 0x86e   : > { %8225 = vst [vmem:[#allocation3 + $0x10] sm:$0xff] %v8073_v2  ;;  %v7884_v55 = vpop.f32.mrb[187].mxu0  ;;  %v8076_v16 = vadd.f32 %v9120_v41, %v7882_v8  ;;  %8224 = vst [vmem:[#allocation3 + $0x8] sm:$0xff] %v8068_v25 }
 0x870   : > { %8226 = vst [vmem:[#allocation3 + $0x18] sm:$0xff] %v8076_v16  ;;  %v9123_v47 = vpop.f32.mrb[48].mxu1  ;;  %8305 = vxpose.xlu0.b32.cont [2/16] %v8068_v25, 128 }
 0x871   : > { %v8080_v45 = vpop.f32.mrb[49].mxu1 }
 0x872   : > { %v9124_v5 = vpop.f32.mrb[50].mxu1 }
 0x873   : > { %v7887_v38 = vpop.f32.mrb[188].mxu0  ;;  %v8083_v21 = vpop.f32.mrb[51].mxu1 }
 0x874   : > { %v7889_v37 = vpop.f32.mrb[189].mxu0  ;;  %v8081_v48 = vadd.f32 %v8080_v45, %v7887_v38  ;;  %8306 = vxpose.xlu0.b32.cont [3/16] %v8073_v2, 128 }
 0x875   : > { %v7890_v59 = vpop.f32.mrb[190].mxu0 }
 0x876   : > { %8227 = vst [vmem:[#allocation3 + $0x20] sm:$0xff] %v8081_v48  ;;  %v7892_v24 = vpop.f32.mrb[191].mxu0  ;;  %v8084_v49 = vadd.f32 %v8083_v21, %v7890_v59 }
 0x878   : > { %8228 = vst [vmem:[#allocation3 + $0x28] sm:$0xff] %v8084_v49  ;;  %v9127_v44 = vpop.f32.mrb[52].mxu1  ;;  %8307 = vxpose.xlu0.b32.cont [4/16] %v8076_v16, 128 }
 0x879   : > { %v8096_v13 = vpop.f32.mrb[53].mxu1 }
 0x87a   : > { %v9128_v30 = vpop.f32.mrb[54].mxu1 }
 0x87b   : > { %v7895_v58 = vpop.f32.mrb[192].mxu0  ;;  %v8099_v22 = vpop.f32.mrb[55].mxu1 }
 0x87c   : > { %v8089_v14 = vadd.f32 %v9123_v47, %v7895_v58  ;;  %v7897_v26 = vpop.f32.mrb[193].mxu0  ;;  %8308 = vxpose.xlu0.b32.cont [5/16] %v8081_v48, 128 }
 0x87d   : > { %v7898_v54 = vpop.f32.mrb[194].mxu0 }
 0x87e   : > { %8229 = vst [vmem:[#allocation3 + $0x30] sm:$0xff] %v8089_v14  ;;  %v8092_v12 = vadd.f32 %v9124_v5, %v7898_v54  ;;  %v7900_v56 = vpop.f32.mrb[195].mxu0 }
 0x880   : > { %8230 = vst [vmem:[#allocation3 + $0x38] sm:$0xff] %v8092_v12  ;;  %v9131_v29 = vpop.f32.mrb[56].mxu1  ;;  %8309 = vxpose.xlu0.b32.cont [6/16] %v8084_v49, 128 }
 0x881   : > { %v8112_v42 = vpop.f32.mrb[57].mxu1 }
 0x882   : > { %v9132_v51 = vpop.f32.mrb[58].mxu1 }
 0x883   : > { %v7903_v35 = vpop.f32.mrb[196].mxu0  ;;  %v8115_v62 = vpop.f32.mrb[59].mxu1 }
 0x884   : > { %v8097_v27 = vadd.f32 %v8096_v13, %v7903_v35  ;;  %v7905_v9 = vpop.f32.mrb[197].mxu0  ;;  %8310 = vxpose.xlu0.b32.cont [7/16] %v8089_v14, 128 }
 0x885   : > { %v7906_v28 = vpop.f32.mrb[198].mxu0 }
 0x886   : > { %8231 = vst [vmem:[#allocation3 + $0x40] sm:$0xff] %v8097_v27  ;;  %v8100_v15 = vadd.f32 %v8099_v22, %v7906_v28  ;;  %v7908_v52 = vpop.f32.mrb[199].mxu0 }
 0x888   : > { %8232 = vst [vmem:[#allocation3 + $0x48] sm:$0xff] %v8100_v15  ;;  %v14744_v39 = vpop.f32.mrb[60].mxu1  ;;  %8311 = vxpose.xlu0.b32.cont [8/16] %v8092_v12, 128 }
 0x889   : > { %v8128_v50 = vpop.f32.mrb[61].mxu1 }
 0x88a   : > { %v14746_v31 = vpop.f32.mrb[62].mxu1 }
 0x88b   : > { %v7911_v3 = vpop.f32.mrb[200].mxu0  ;;  %v8131_v19 = vpop.f32.mrb[63].mxu1 }
 0x88c   : > { %v8105_v23 = vadd.f32 %v9127_v44, %v7911_v3  ;;  %v7913_v7 = vpop.f32.mrb[201].mxu0  ;;  %8312 = vxpose.xlu0.b32.cont [9/16] %v8097_v27, 128 }
 0x88d   : > { %v7914_v17 = vpop.f32.mrb[202].mxu0 }
 0x88e   : > { %8233 = vst [vmem:[#allocation3 + $0x50] sm:$0xff] %v8105_v23  ;;  %v8108_v0 = vadd.f32 %v9128_v30, %v7914_v17  ;;  %v7916_v63 = vpop.f32.mrb[203].mxu0 }
 0x890   : > { %8234 = vst [vmem:[#allocation3 + $0x58] sm:$0xff] %v8108_v0  ;;  %v14748_v60 = vpop.f32.mrb[64].mxu1  ;;  %8313 = vxpose.xlu0.b32.cont [10/16] %v8100_v15, 128 }
 0x891   : > { %v8144_v34 = vpop.f32.mrb[65].mxu1 }
 0x892   : > { %v14750_v4 = vpop.f32.mrb[66].mxu1 }
 0x893   : > { %v7919_v36 = vpop.f32.mrb[204].mxu0  ;;  %v14752_v33 = vpop.f32.mrb[67].mxu1 }
 0x894   : > { %v8113_v6 = vadd.f32 %v8112_v42, %v7919_v36  ;;  %v7921_v40 = vpop.f32.mrb[205].mxu0  ;;  %8314 = vxpose.xlu0.b32.cont [11/16] %v8105_v23, 128 }
 0x895   : > { %v7922_v46 = vpop.f32.mrb[206].mxu0 }
 0x896   : > { %8235 = vst [vmem:[#allocation3 + $0x60] sm:$0xff] %v8113_v6  ;;  %v8116_v53 = vadd.f32 %v8115_v62, %v7922_v46  ;;  %v7924_v18 = vpop.f32.mrb[207].mxu0 }
 0x898   : > { %8236 = vst [vmem:[#allocation3 + $0x68] sm:$0xff] %v8116_v53  ;;  %v14754_v20 = vpop.f32.mrb[68].mxu1  ;;  %8315 = vxpose.xlu0.b32.cont [12/16] %v8108_v0, 128 }
 0x899   : > { %v14756_v10 = vpop.f32.mrb[69].mxu1 }
 0x89a   : > { %v14758_v32 = vpop.f32.mrb[70].mxu1 }
 0x89b   : > { %v7927_v11 = vpop.f32.mrb[208].mxu0  ;;  %v14760_v43 = vpop.f32.mrb[71].mxu1 }
 0x89c   : > { %v8121_v41 = vadd.f32 %v9131_v29, %v7927_v11  ;;  %v7929_v61 = vpop.f32.mrb[209].mxu0  ;;  %8316 = vxpose.xlu0.b32.cont [13/16] %v8113_v6, 128 }
 0x89d   : > { %v7930_v1 = vpop.f32.mrb[210].mxu0 }
 0x89e   : > { %8237 = vst [vmem:[#allocation3 + $0x70] sm:$0xff] %v8121_v41  ;;  %v8124_v57 = vadd.f32 %v9132_v51, %v7930_v1  ;;  %v7932_v2 = vpop.f32.mrb[211].mxu0 }
 0x8a0   : > { %8238 = vst [vmem:[#allocation3 + $0x78] sm:$0xff] %v8124_v57  ;;  %v14762_v25 = vpop.f32.mrb[72].mxu1  ;;  %8317 = vxpose.xlu0.b32.cont [14/16] %v8116_v53, 128 }
 0x8a1   : > { %v14764_v8 = vpop.f32.mrb[73].mxu1 }
 0x8a2   : > { %v14766_v55 = vpop.f32.mrb[74].mxu1 }
 0x8a3   : > { %v7935_v16 = vpop.f32.mrb[212].mxu0  ;;  %v14768_v47 = vpop.f32.mrb[75].mxu1 }
 0x8a4   : > { %v8129_v45 = vadd.f32 %v8128_v50, %v7935_v16  ;;  %v7937_v5 = vpop.f32.mrb[213].mxu0  ;;  %8318 = vxpose.xlu0.b32.cont [15/16] %v8121_v41, 128 }
 0x8a5   : > { %v7938_v38 = vpop.f32.mrb[214].mxu0 }
 0x8a6   : > { %8239 = vst [vmem:[#allocation3 + $0x80] sm:$0xff] %v8129_v45  ;;  %v8132_v21 = vadd.f32 %v8131_v19, %v7938_v38  ;;  %v7940_v37 = vpop.f32.mrb[215].mxu0  ;;  %8336 = vxpose.xlu1.b32.start [1/16] %v8129_v45, 128 }
 0x8a8   : > { %8240 = vst [vmem:[#allocation3 + $0x88] sm:$0xff] %v8132_v21  ;;  %v14770_v48 = vpop.f32.mrb[76].mxu1  ;;  %8319 = vxpose.xlu0.b32.end [16/16] %v8124_v57, 128 }
 0x8a9   : > { %v14772_v59 = vpop.f32.mrb[77].mxu1 }
 0x8aa   : > { %v14774_v24 = vpop.f32.mrb[78].mxu1  ;;  %8337 = vxpose.xlu1.b32.cont [2/16] %v8132_v21, 128 }
 0x8ab   : > { %v7943_v49 = vpop.f32.mrb[216].mxu0  ;;  %v14776_v44 = vpop.f32.mrb[79].mxu1 }
 0x8ac   : > { %v8137_v13 = vadd.f32 %v14744_v39, %v7943_v49  ;;  %v7945_v30 = vpop.f32.mrb[217].mxu0 }
 0x8ad   : > { %v7946_v58 = vpop.f32.mrb[218].mxu0 }
 0x8ae   : > { %8241 = vst [vmem:[#allocation3 + $0x90] sm:$0xff] %v8137_v13  ;;  %v8140_v22 = vadd.f32 %v14746_v31, %v7946_v58  ;;  %v7948_v14 = vpop.f32.mrb[219].mxu0  ;;  %8338 = vxpose.xlu1.b32.cont [3/16] %v8137_v13, 128 }
 0x8b0   : > { %8242 = vst [vmem:[#allocation3 + $0x98] sm:$0xff] %v8140_v22  ;;  %v14780_v26 = vpop.f32.mrb[80].mxu1 }
 0x8b1   : > { %v14782_v54 = vpop.f32.mrb[81].mxu1 }
 0x8b2   : > { %v14784_v12 = vpop.f32.mrb[82].mxu1  ;;  %8339 = vxpose.xlu1.b32.cont [4/16] %v8140_v22, 128 }
 0x8b3   : > { %v7951_v56 = vpop.f32.mrb[220].mxu0  ;;  %v14786_v29 = vpop.f32.mrb[83].mxu1 }
 0x8b4   : > { %v8145_v42 = vadd.f32 %v8144_v34, %v7951_v56  ;;  %v7953_v51 = vpop.f32.mrb[221].mxu0 }
 0x8b5   : > { %v7954_v35 = vpop.f32.mrb[222].mxu0 }
 0x8b6   : > { %8243 = vst [vmem:[#allocation3 + $0xa0] sm:$0xff] %v8145_v42  ;;  %v8148_v62 = vadd.f32 %v14752_v33, %v7954_v35  ;;  %v7956_v27 = vpop.f32.mrb[223].mxu0  ;;  %8340 = vxpose.xlu1.b32.cont [5/16] %v8145_v42, 128 }
 0x8b8   : > { %8244 = vst [vmem:[#allocation3 + $0xa8] sm:$0xff] %v8148_v62 }
 0x8ba   : > { %8341 = vxpose.xlu1.b32.cont [6/16] %v8148_v62, 128 }
 0x8bb   : > { %v7959_v9 = vpop.f32.mrb[224].mxu0 }
 0x8bc   : > { %v8153_v28 = vadd.f32 %v14748_v60, %v7959_v9  ;;  %v7961_v15 = vpop.f32.mrb[225].mxu0 }
 0x8bd   : > { %v7962_v52 = vpop.f32.mrb[226].mxu0 }
 0x8be   : > { %8245 = vst [vmem:[#allocation3 + $0xb0] sm:$0xff] %v8153_v28  ;;  %v8156_v39 = vadd.f32 %v14750_v4, %v7962_v52  ;;  %v7964_v50 = vpop.f32.mrb[227].mxu0  ;;  %8342 = vxpose.xlu1.b32.cont [7/16] %v8153_v28, 128 }
 0x8c0   : > { %8246 = vst [vmem:[#allocation3 + $0xb8] sm:$0xff] %v8156_v39 }
 0x8c2   : > { %8343 = vxpose.xlu1.b32.cont [8/16] %v8156_v39, 128 }
 0x8c3   : > { %v7967_v31 = vpop.f32.mrb[228].mxu0 }
 0x8c4   : > { %v8161_v3 = vadd.f32 %v14756_v10, %v7967_v31  ;;  %v7969_v19 = vpop.f32.mrb[229].mxu0 }
 0x8c5   : > { %v7970_v23 = vpop.f32.mrb[230].mxu0 }
 0x8c6   : > { %8247 = vst [vmem:[#allocation3 + $0xc0] sm:$0xff] %v8161_v3  ;;  %v8164_v7 = vadd.f32 %v14760_v43, %v7970_v23  ;;  %v7972_v17 = vpop.f32.mrb[231].mxu0  ;;  %8344 = vxpose.xlu1.b32.cont [9/16] %v8161_v3, 128 }
 0x8c8   : > { %8248 = vst [vmem:[#allocation3 + $0xc8] sm:$0xff] %v8164_v7 }
 0x8ca   : > { %8345 = vxpose.xlu1.b32.cont [10/16] %v8164_v7, 128 }
 0x8cb   : > { %v7975_v0 = vpop.f32.mrb[232].mxu0 }
 0x8cc   : > { %v8169_v63 = vadd.f32 %v14754_v20, %v7975_v0  ;;  %v7977_v60 = vpop.f32.mrb[233].mxu0 }
 0x8cd   : > { %v7978_v34 = vpop.f32.mrb[234].mxu0 }
 0x8ce   : > { %8249 = vst [vmem:[#allocation3 + $0xd0] sm:$0xff] %v8169_v63  ;;  %v8172_v4 = vadd.f32 %v14758_v32, %v7978_v34  ;;  %v7980_v36 = vpop.f32.mrb[235].mxu0  ;;  %8346 = vxpose.xlu1.b32.cont [11/16] %v8169_v63, 128 }
 0x8d0   : > { %8250 = vst [vmem:[#allocation3 + $0xd8] sm:$0xff] %v8172_v4 }
 0x8d2   : > { %8347 = vxpose.xlu1.b32.cont [12/16] %v8172_v4, 128 }
 0x8d3   : > { %v7983_v33 = vpop.f32.mrb[236].mxu0 }
 0x8d4   : > { %v8177_v6 = vadd.f32 %v14764_v8, %v7983_v33  ;;  %v7985_v40 = vpop.f32.mrb[237].mxu0 }
 0x8d5   : > { %v7986_v46 = vpop.f32.mrb[238].mxu0 }
 0x8d6   : > { %8251 = vst [vmem:[#allocation3 + $0xe0] sm:$0xff] %v8177_v6  ;;  %v8180_v53 = vadd.f32 %v14768_v47, %v7986_v46  ;;  %v7988_v18 = vpop.f32.mrb[239].mxu0  ;;  %8348 = vxpose.xlu1.b32.cont [13/16] %v8177_v6, 128 }
 0x8d8   : > { %8252 = vst [vmem:[#allocation3 + $0xe8] sm:$0xff] %v8180_v53 }
 0x8da   : > { %8349 = vxpose.xlu1.b32.cont [14/16] %v8180_v53, 128 }
 0x8db   : > { %v7991_v20 = vpop.f32.mrb[240].mxu0 }
 0x8dc   : > { %v8185_v10 = vadd.f32 %v14762_v25, %v7991_v20  ;;  %v7993_v32 = vpop.f32.mrb[241].mxu0 }
 0x8dd   : > { %v7994_v11 = vpop.f32.mrb[242].mxu0 }
 0x8de   : > { %8253 = vst [vmem:[#allocation3 + $0xf0] sm:$0xff] %v8185_v10  ;;  %v8188_v43 = vadd.f32 %v14766_v55, %v7994_v11  ;;  %v7996_v41 = vpop.f32.mrb[243].mxu0  ;;  %8350 = vxpose.xlu1.b32.cont [15/16] %v8185_v10, 128 }
 0x8e0   : > { %8254 = vst [vmem:[#allocation3 + $0xf8] sm:$0xff] %v8188_v43 }
 0x8e2   : > { %8351 = vxpose.xlu1.b32.end [16/16] %v8188_v43, 128 }
 0x8e3   : > { %v7999_v61 = vpop.f32.mrb[244].mxu0 }
 0x8e4   : > { %v8193_v1 = vadd.f32 %v14772_v59, %v7999_v61  ;;  %v8001_v57 = vpop.f32.mrb[245].mxu0 }
 0x8e5   : > { %v8002_v2 = vpop.f32.mrb[246].mxu0 }
 0x8e6   : > { %8255 = vst [vmem:[#allocation3 + $0x100] sm:$0xff] %v8193_v1  ;;  %v8196_v8 = vadd.f32 %v14776_v44, %v8002_v2  ;;  %v8004_v16 = vpop.f32.mrb[247].mxu0  ;;  %8368 = vxpose.xlu0.b32.start [1/8] (short) %v8193_v1, 128 }
 0x8e8   : > { %8256 = vst [vmem:[#allocation3 + $0x108] sm:$0xff] %v8196_v8 }
 0x8ea   : > { %8369 = vxpose.xlu0.b32.cont [2/8] (short) %v8196_v8, 128 }
 0x8eb   : > { %v8007_v25 = vpop.f32.mrb[248].mxu0 }
 0x8ec   : > { %v8201_v55 = vadd.f32 %v14770_v48, %v8007_v25  ;;  %v8009_v47 = vpop.f32.mrb[249].mxu0  ;;  %v8320_v45 = vpop.trf.xlu0 }
 0x8ed   : > { %v8010_v5 = vpop.f32.mrb[250].mxu0  ;;  %8400 = vst [vmem:[%s14805_s14] sm:$0xff] %v8320_v45 }
 0x8ee   : > { %8257 = vst [vmem:[#allocation3 + $0x110] sm:$0xff] %v8201_v55  ;;  %v8204_v38 = vadd.f32 %v14774_v24, %v8010_v5  ;;  %v8012_v21 = vpop.f32.mrb[251].mxu0  ;;  %8370 = vxpose.xlu0.b32.cont [3/8] (short) %v8201_v55, 128 }
 0x8f0   : > { %8258 = vst [vmem:[#allocation3 + $0x118] sm:$0xff] %v8204_v38  ;;  %v8321_v37 = vpop.trf.xlu0 }
 0x8f1   : > { %8404 = vst [vmem:[%s14805_s14 + $0x18] sm:$0xff] %v8321_v37 }
 0x8f2   : > { %8371 = vxpose.xlu0.b32.cont [4/8] (short) %v8204_v38, 128 }
 0x8f3   : > { %v8015_v59 = vpop.f32.mrb[252].mxu0 }
 0x8f4   : > { %v8209_v49 = vadd.f32 %v14782_v54, %v8015_v59  ;;  %v8017_v44 = vpop.f32.mrb[253].mxu0  ;;  %v8322_v48 = vpop.trf.xlu0 }
 0x8f5   : > { %v8018_v13 = vpop.f32.mrb[254].mxu0  ;;  %8407 = vst [vmem:[%s14805_s14 + $0x30] sm:$0xff] %v8322_v48 }
 0x8f6   : > { %8259 = vst [vmem:[#allocation3 + $0x120] sm:$0xff] %v8209_v49  ;;  %v8212_v30 = vadd.f32 %v14786_v29, %v8018_v13  ;;  %v8020_v58 = vpop.f32.mrb[255].mxu0  ;;  %8372 = vxpose.xlu0.b32.cont [5/8] (short) %v8209_v49, 128 }
 0x8f8   : > { %8260 = vst [vmem:[#allocation3 + $0x128] sm:$0xff] %v8212_v30  ;;  %v8323_v24 = vpop.trf.xlu0 }
 0x8f9   : > { %8410 = vst [vmem:[%s14805_s14 + $0x48] sm:$0xff] %v8323_v24 }
 0x8fa   : > { %8373 = vxpose.xlu0.b32.cont [6/8] (short) %v8212_v30, 128 }
 0x8fb   : > { %v8023_v22 = vpop.f32.mrb[0].mxu0 }
 0x8fc   : > { %v8217_v14 = vadd.f32 %v14780_v26, %v8023_v22  ;;  %v8025_v54 = vpop.f32.mrb[1].mxu0  ;;  %v8324_v56 = vpop.trf.xlu0 }
 0x8fd   : > { %v8026_v42 = vpop.f32.mrb[2].mxu0  ;;  %8413 = vst [vmem:[%s14805_s14 + $0x60] sm:$0xff] %v8324_v56 }
 0x8fe   : > { %8261 = vst [vmem:[#allocation3 + $0x130] sm:$0xff] %v8217_v14  ;;  %v8220_v29 = vadd.f32 %v14784_v12, %v8026_v42  ;;  %v8028_v51 = vpop.f32.mrb[3].mxu0  ;;  %8374 = vxpose.xlu0.b32.cont [7/8] (short) %v8217_v14, 128 }
 0x900   : > { %8262 = vst [vmem:[#allocation3 + $0x138] sm:$0x1] %v8220_v29  ;;  %v8325_v35 = vpop.trf.xlu0 }
 0x901   : > { %8416 = vst [vmem:[%s14805_s14 + $0x78] sm:$0xff] %v8325_v35 }
 0x904   : > { %v8326_v62 = vpop.trf.xlu0 }
 0x905   : > { %8419 = vst [vmem:[%s14805_s14 + $0x90] sm:$0xff] %v8326_v62 }
 0x907   : > { %v8303_v26 = vld [vmem:[#allocation3 + $0x138] sm:$0xff] }
 0x908   : > { %8375 = vxpose.xlu0.b32.end [8/8] (short) %v8303_v26, 128  ;;  %v8327_v27 = vpop.trf.xlu0 }
 0x909   : > { %8422 = vst [vmem:[%s14805_s14 + $0xa8] sm:$0xff] %v8327_v27 }
 0x90c   : > { %v8328_v9 = vpop.trf.xlu0 }
 0x90d   : > { %8425 = vst [vmem:[%s14805_s14 + $0xc0] sm:$0xff] %v8328_v9 }
 0x910   : > { %v8329_v12 = vpop.trf.xlu0 }
 0x911   : > { %8428 = vst [vmem:[%s14805_s14 + $0xd8] sm:$0xff] %v8329_v12 }
 0x914   : > { %v8330_v28 = vpop.trf.xlu0 }
 0x915   : > { %8431 = vst [vmem:[%s14805_s14 + $0xf0] sm:$0xff] %v8330_v28 }
 0x918   : > { %v8331_v15 = vpop.trf.xlu0 }
 0x919   : > { %8434 = vst [vmem:[%s14805_s14 + $0x108] sm:$0xff] %v8331_v15 }
 0x91c   : > { %v8332_v52 = vpop.trf.xlu0 }
 0x91d   : > { %8437 = vst [vmem:[%s14805_s14 + $0x120] sm:$0xff] %v8332_v52 }
 0x920   : > { %v8333_v39 = vpop.trf.xlu0 }
 0x921   : > { %8440 = vst [vmem:[%s14805_s14 + $0x138] sm:$0xff] %v8333_v39 }
 0x924   : > { %v8334_v50 = vpop.trf.xlu0 }
 0x925   : > { %8443 = vst [vmem:[%s14805_s14 + $0x150] sm:$0xff] %v8334_v50 }
 0x926   : > { %v8352_v31 = vpop.trf.xlu1 }
 0x927   : > { %8401 = vst [vmem:[%s14805_s14 + $0x8] sm:$0xff] %v8352_v31 }
 0x928   : > { %v8335_v3 = vpop.trf.xlu0 }
 0x929   : > { %8446 = vst [vmem:[%s14805_s14 + $0x168] sm:$0xff] %v8335_v3 }
 0x92a   : > { %v8353_v19 = vpop.trf.xlu1 }
 0x92b   : > { %8405 = vst [vmem:[%s14805_s14 + $0x20] sm:$0xff] %v8353_v19 }
 0x92e   : > { %v8354_v23 = vpop.trf.xlu1 }
 0x92f   : > { %8408 = vst [vmem:[%s14805_s14 + $0x38] sm:$0xff] %v8354_v23 }
 0x932   : > { %v8355_v7 = vpop.trf.xlu1 }
 0x933   : > { %8411 = vst [vmem:[%s14805_s14 + $0x50] sm:$0xff] %v8355_v7 }
 0x936   : > { %v8356_v17 = vpop.trf.xlu1 }
 0x937   : > { %8414 = vst [vmem:[%s14805_s14 + $0x68] sm:$0xff] %v8356_v17 }
 0x93a   : > { %v8357_v0 = vpop.trf.xlu1 }
 0x93b   : > { %8417 = vst [vmem:[%s14805_s14 + $0x80] sm:$0xff] %v8357_v0 }
 0x93e   : > { %v8358_v63 = vpop.trf.xlu1 }
 0x93f   : > { %8420 = vst [vmem:[%s14805_s14 + $0x98] sm:$0xff] %v8358_v63 }
 0x942   : > { %v8359_v60 = vpop.trf.xlu1 }
 0x943   : > { %8423 = vst [vmem:[%s14805_s14 + $0xb0] sm:$0xff] %v8359_v60 }
 0x946   : > { %v8360_v34 = vpop.trf.xlu1 }
 0x947   : > { %8426 = vst [vmem:[%s14805_s14 + $0xc8] sm:$0xff] %v8360_v34 }
 0x94a   : > { %v8361_v4 = vpop.trf.xlu1 }
 0x94b   : > { %8429 = vst [vmem:[%s14805_s14 + $0xe0] sm:$0xff] %v8361_v4 }
 0x94e   : > { %v8362_v36 = vpop.trf.xlu1 }
 0x94f   : > { %8432 = vst [vmem:[%s14805_s14 + $0xf8] sm:$0xff] %v8362_v36 }
 0x952   : > { %v8363_v33 = vpop.trf.xlu1 }
 0x953   : > { %8435 = vst [vmem:[%s14805_s14 + $0x110] sm:$0xff] %v8363_v33 }
 0x956   : > { %v8364_v6 = vpop.trf.xlu1 }
 0x957   : > { %8438 = vst [vmem:[%s14805_s14 + $0x128] sm:$0xff] %v8364_v6 }
 0x95a   : > { %v8365_v40 = vpop.trf.xlu1 }
 0x95b   : > { %8441 = vst [vmem:[%s14805_s14 + $0x140] sm:$0xff] %v8365_v40 }
 0x95e   : > { %v8366_v46 = vpop.trf.xlu1 }
 0x95f   : > { %8444 = vst [vmem:[%s14805_s14 + $0x158] sm:$0xff] %v8366_v46 }
 0x962   : > { %v8367_v53 = vpop.trf.xlu1 }
 0x963   : > { %8447 = vst [vmem:[%s14805_s14 + $0x170] sm:$0xff] %v8367_v53 }
 0x96c   : > { %v8384_v18 = vpop.trf.xlu0 }
 0x96d   : > { %8403 = vst.msk [vmem:[%s14805_s14 + $0x10] sm:$0xff] %vm8402_vm2, %v8384_v18 }
 0x970   : > { %v8385_v20 = vpop.trf.xlu0 }
 0x971   : > { %8406 = vst.msk [vmem:[%s14805_s14 + $0x28] sm:$0xff] %vm8402_vm2, %v8385_v20 }
 0x974   : > { %v8386_v10 = vpop.trf.xlu0 }
 0x975   : > { %8409 = vst.msk [vmem:[%s14805_s14 + $0x40] sm:$0xff] %vm8402_vm2, %v8386_v10 }
 0x978   : > { %v8387_v32 = vpop.trf.xlu0 }
 0x979   : > { %8412 = vst.msk [vmem:[%s14805_s14 + $0x58] sm:$0xff] %vm8402_vm2, %v8387_v32 }
 0x97c   : > { %v8388_v11 = vpop.trf.xlu0 }
 0x97d   : > { %8415 = vst.msk [vmem:[%s14805_s14 + $0x70] sm:$0xff] %vm8402_vm2, %v8388_v11 }
 0x980   : > { %v8389_v43 = vpop.trf.xlu0 }
 0x981   : > { %8418 = vst.msk [vmem:[%s14805_s14 + $0x88] sm:$0xff] %vm8402_vm2, %v8389_v43 }
 0x984   : > { %v8390_v41 = vpop.trf.xlu0 }
 0x985   : > { %8421 = vst.msk [vmem:[%s14805_s14 + $0xa0] sm:$0xff] %vm8402_vm2, %v8390_v41 }
 0x988   : > { %v8391_v61 = vpop.trf.xlu0 }
 0x989   : > { %8424 = vst.msk [vmem:[%s14805_s14 + $0xb8] sm:$0xff] %vm8402_vm2, %v8391_v61 }
 0x98c   : > { %v8392_v1 = vpop.trf.xlu0 }
 0x98d   : > { %8427 = vst.msk [vmem:[%s14805_s14 + $0xd0] sm:$0xff] %vm8402_vm2, %v8392_v1 }
 0x990   : > { %v8393_v57 = vpop.trf.xlu0 }
 0x991   : > { %8430 = vst.msk [vmem:[%s14805_s14 + $0xe8] sm:$0xff] %vm8402_vm2, %v8393_v57 }
 0x994   : > { %v8394_v2 = vpop.trf.xlu0 }
 0x995   : > { %8433 = vst.msk [vmem:[%s14805_s14 + $0x100] sm:$0xff] %vm8402_vm2, %v8394_v2 }
 0x998   : > { %v8395_v8 = vpop.trf.xlu0 }
 0x999   : > { %8436 = vst.msk [vmem:[%s14805_s14 + $0x118] sm:$0xff] %vm8402_vm2, %v8395_v8 }
 0x99c   : > { %v8396_v16 = vpop.trf.xlu0 }
 0x99d   : > { %8439 = vst.msk [vmem:[%s14805_s14 + $0x130] sm:$0xff] %vm8402_vm2, %v8396_v16 }
 0x9a0   : > { %v8397_v25 = vpop.trf.xlu0 }
 0x9a1   : > { %8442 = vst.msk [vmem:[%s14805_s14 + $0x148] sm:$0xff] %vm8402_vm2, %v8397_v25 }
 0x9a4   : > { %v8398_v55 = vpop.trf.xlu0 }
 0x9a5   : > { %8445 = vst.msk [vmem:[%s14805_s14 + $0x160] sm:$0xff] %vm8402_vm2, %v8398_v55 }
 0x9a8   : > { %v8399_v47 = vpop.trf.xlu0 }
 0x9a9   : > { %8448 = vst.msk [vmem:[%s14805_s14 + $0x178] sm:$0xff] %vm8402_vm2, %v8399_v47 }
 0x9aa PF: > { %s15_s18 = sadd.s32 1, %s9431_s18  }
 0x9ab   : > { %p12_p4 = scmp.ge.s32.totalorder %s15_s18, 4  }
 0x9ad   :  { %14 = sbr.rel (!%p12_p4) target bundleno = 1 (0x1), region = 76 }

</bundles_post_ra>
